<compile_context>
chip_gen: v7x
topology: tpu7x:2x2x1
jax: 0.10.0
libtpu: 0.0.40
codegen_flags: <defaults>
</compile_context>

<pallas_src>
import numpy as np

import jax
import jax.numpy as jnp
from jax import lax
from jax.experimental import pallas as pl
from jax.experimental.pallas import tpu as pltpu


# ------------------------------ Pallas kernel ------------------------------


def _net_kernel(x_ref, w1_ref, b1_ref, w2_ref, b2_ref,
                fw1_ref, fb1_ref, fw2_ref, fb2_ref, fw3_ref, fb3_ref,
                o_ref,
                y1_ref, rp_ref, z_ref, y2_ref):
    """Whole Net forward for one image (one grid step along the batch)."""
    f32 = jnp.float32

    # ---- conv1 (5x5, 1->6, valid) + bias + relu --------------------------
    # Y[oh, c*96 + ow] = sum_kh x[oh+kh, :] @ W1[kh]   (block-Toeplitz W1)
    acc1 = jnp.dot(x_ref[0, 0:96, :], w1_ref[0], preferred_element_type=f32)
    for kh in range(1, 5):
        acc1 = acc1 + jnp.dot(x_ref[0, kh:kh + 96, :], w1_ref[kh],
                              preferred_element_type=f32)
    y1_ref[...] = jnp.maximum(acc1 + b1_ref[...], 0.0)          # (96, 576)

    # ---- 8x8 max-pool: 8-row bands (sublane) then 8-wide lane groups -----
    row_ids = lax.broadcasted_iota(jnp.int32, (12, 1), 0)
    rp = jnp.zeros((12, 6 * 96), f32)
    for i in range(12):
        band = jnp.max(y1_ref[8 * i:8 * i + 8, :], axis=0, keepdims=True)
        rp = rp + (row_ids == i).astype(f32) * band
    rp_ref[...] = rp                                            # (12, 576)

    col_ids = lax.broadcasted_iota(jnp.int32, (1, 72), 1)
    z = jnp.zeros((12, 72), f32)
    for c in range(6):
        for j in range(12):
            lo = c * 96 + 8 * j
            grp = jnp.max(rp_ref[:, lo:lo + 8], axis=1, keepdims=True)
            z = z + grp * (col_ids == c * 12 + j).astype(f32)
    z_ref[...] = z                                              # (12, 72): Z[oh, c*12+ow]

    # ---- conv2 (5x5, 6->16, valid) + bias + relu --------------------------
    # O[oh, ow*16 + oc] = sum_kh Z[oh+kh, :] @ W2[kh]
    acc2 = jnp.dot(z_ref[0:8, :], w2_ref[0], preferred_element_type=f32)
    for kh in range(1, 5):
        acc2 = acc2 + jnp.dot(z_ref[kh:kh + 8, :], w2_ref[kh],
                              preferred_element_type=f32)
    y2_ref[...] = jnp.maximum(acc2 + b2_ref[...], 0.0)          # (8, 128)

    # ---- global 8x8 max-pool -> feat[oc] ----------------------------------
    feat8 = y2_ref[:, 0:16]
    for ow in range(1, 8):
        feat8 = jnp.maximum(feat8, y2_ref[:, 16 * ow:16 * ow + 16])
    feat = jnp.max(feat8, axis=0, keepdims=True)                # (1, 16)

    # ---- fused FC tail (fc1+relu, fc2+relu, fc3) ---------------------------
    featb = jnp.broadcast_to(feat, (8, 16))                     # M=8 matmuls
    h = jnp.maximum(jnp.dot(featb, fw1_ref[...], preferred_element_type=f32)
                    + fb1_ref[...], 0.0)                        # (8, 100)
    h = jnp.maximum(jnp.dot(h, fw2_ref[...], preferred_element_type=f32)
                    + fb2_ref[...], 0.0)                        # (8, 50)
    out = jnp.dot(h, fw3_ref[...], preferred_element_type=f32) + fb3_ref[...]
    o_ref[0] = out                                              # (8, 128), lane-dense store


# ------------------------------ host wrapper --------------------------------


def net_forward(x_nchw, packed):
    """x_nchw: (N, 1, 100, 100) float32 -> logits (N, 3)."""
    (W1, B1, W2, B2, FW1, FB1, FW2, FB2, FW3, FB3) = packed
    N = x_nchw.shape[0]
    x = x_nchw.reshape(N, 100, 100).astype(jnp.float32)

    def const_spec(a):
        return pl.BlockSpec(a.shape, lambda i: (0,) * a.ndim)

    y = pl.pallas_call(
        _net_kernel,
        out_shape=jax.ShapeDtypeStruct((N, 8, 128), jnp.float32),
        grid=(N,),
        in_specs=[
            pl.BlockSpec((1, 100, 100), lambda i: (i, 0, 0)),
            const_spec(W1), const_spec(B1), const_spec(W2), const_spec(B2),
            const_spec(FW1), const_spec(FB1), const_spec(FW2),
            const_spec(FB2), const_spec(FW3), const_spec(FB3),
        ],
        out_specs=pl.BlockSpec((1, 8, 128), lambda i: (i, 0, 0)),
        scratch_shapes=[
            pltpu.VMEM((96, 6 * 96), jnp.float32),   # conv1 output
            pltpu.VMEM((12, 6 * 96), jnp.float32),   # row-pooled
            pltpu.VMEM((12, 72), jnp.float32),       # fully pooled stage-1
            pltpu.VMEM((8, 128), jnp.float32),       # conv2 output
        ],
        compiler_params=pltpu.CompilerParams(
            dimension_semantics=("parallel",)),
    )(x, W1, B1, W2, B2, FW1, FB1, FW2, FB2, FW3, FB3)
    return y[:, 0, :3]


def prepare_pallas_params(params):
    """One-time weight layout transform (host side, not jitted)."""
    w1, b1, w2, b2, fw1, fb1, fw2, fb2, fw3, fb3 = [
        np.asarray(jax.device_get(p), np.float32) for p in params]

    # conv1 -> block-Toeplitz: W1[kh, ow+kw, c*96+ow] = w1[c, 0, kh, kw]
    W1 = np.zeros((5, 100, 6 * 96), np.float32)
    ow = np.arange(96)
    for kh in range(5):
        for kw in range(5):
            for c in range(6):
                W1[kh, ow + kw, c * 96 + ow] = w1[c, 0, kh, kw]
    B1 = np.repeat(b1, 96)[None, :]                          # (1, 576)

    # conv2 -> block-Toeplitz on a 128-lane (ow, oc) output layout:
    #   W2[kh, c*12 + ow+kw, ow*16 + oc] = w2[oc, c, kh, kw]
    W2 = np.zeros((5, 72, 128), np.float32)
    ow2 = np.arange(8)
    for kh in range(5):
        for kw in range(5):
            for c in range(6):
                for oc in range(16):
                    W2[kh, c * 12 + ow2 + kw, ow2 * 16 + oc] = w2[oc, c, kh, kw]
    B2 = np.tile(b2, 8)[None, :]                             # (1, 128)

    # fc3 zero-padded to 128 output lanes (full-tile HBM store)
    FW3 = np.zeros((50, 128), np.float32)
    FW3[:, :3] = fw3
    FB3 = np.zeros((1, 128), np.float32)
    FB3[0, :3] = fb3

    j = lambda a: jnp.asarray(a, jnp.float32)
    return (j(W1), j(B1), j(W2), j(B2),
            j(fw1), j(fb1[None, :]), j(fw2), j(fb2[None, :]), j(FW3), j(FB3))


# ------------------------- deterministic parameters -------------------------


def init_params(key):
    def uniform(k, shape, fan_in):
        bound = 1.0 / jnp.sqrt(fan_in)
        return jax.random.uniform(k, shape, jnp.float32, -bound, bound)

    ks = jax.random.split(key, 10)
    w1 = uniform(ks[0], (6, 1, 5, 5), 1 * 25)
    b1 = uniform(ks[1], (6,), 1 * 25)
    w2 = uniform(ks[2], (16, 6, 5, 5), 6 * 25)
    b2 = uniform(ks[3], (16,), 6 * 25)
    fw1 = uniform(ks[4], (16, 100), 16)   # stored as (in, out)
    fb1 = uniform(ks[5], (100,), 16)
    fw2 = uniform(ks[6], (100, 50), 100)
    fb2 = uniform(ks[7], (50,), 100)
    fw3 = uniform(ks[8], (50, 3), 50)
    fb3 = uniform(ks[9], (3,), 50)
    return (w1, b1, w2, b2, fw1, fb1, fw2, fb2, fw3, fb3)


# ------------------------------ pure-JAX reference --------------------------


def net_reference(x_nchw, params):
    (w1, b1, w2, b2, fw1, fb1, fw2, fb2, fw3, fb3) = params

    def conv(x, w, b):
        y = lax.conv_general_dilated(
            x, w, window_strides=(1, 1), padding="VALID",
            dimension_numbers=("NCHW", "OIHW", "NCHW"))
        return y + b.reshape(1, -1, 1, 1)

    def pool(x, p):
        return lax.reduce_window(x, -jnp.inf, lax.max,
                                 (1, 1, p, p), (1, 1, p, p), "VALID")

    x = pool(jnp.maximum(conv(x_nchw, w1, b1), 0.0), 8)
    x = pool(jnp.maximum(conv(x, w2, b2), 0.0), 8)
    x = x.reshape(-1, 16)
    x = jnp.maximum(x @ fw1 + fb1, 0.0)
    x = jnp.maximum(x @ fw2 + fb2, 0.0)
    return x @ fw3 + fb3


# ----------------------------------- main ------------------------------------

if __name__ == "__main__":
    key = jax.random.PRNGKey(0)
    k_x, k_p = jax.random.split(key)
    # batch=2, 1 channel, 100x100 (required so torch's x.view(-1, 16) is valid)
    x = jax.random.normal(k_x, (2, 1, 100, 100), jnp.float32)
    params = init_params(k_p)
    packed = prepare_pallas_params(params)

    out = jax.jit(net_forward)(x, packed)
    out = jax.block_until_ready(out)
    assert out.shape == (2, 3), out.shape

    ref = jax.block_until_ready(net_reference(x, params))
    assert jnp.allclose(out, ref, rtol=1e-3, atol=1e-3), (out, ref)

    print("KERNEL_OK")
</pallas_src>

<mosaic_0001>
module attributes {stable_mosaic.version = 11 : i64} {
  func.func @_net_kernel(%arg0: i32, %arg1: memref<1x100x100xf32, #tpu.memory_space<vmem>>, %arg2: memref<5x100x576xf32, #tpu.memory_space<vmem>>, %arg3: memref<1x576xf32, #tpu.memory_space<vmem>>, %arg4: memref<5x72x128xf32, #tpu.memory_space<vmem>>, %arg5: memref<1x128xf32, #tpu.memory_space<vmem>>, %arg6: memref<16x100xf32, #tpu.memory_space<vmem>>, %arg7: memref<1x100xf32, #tpu.memory_space<vmem>>, %arg8: memref<100x50xf32, #tpu.memory_space<vmem>>, %arg9: memref<1x50xf32, #tpu.memory_space<vmem>>, %arg10: memref<50x128xf32, #tpu.memory_space<vmem>>, %arg11: memref<1x128xf32, #tpu.memory_space<vmem>>, %arg12: memref<1x8x128xf32, #tpu.memory_space<vmem>>, %arg13: memref<96x576xf32, #tpu.memory_space<vmem>>, %arg14: memref<12x576xf32, #tpu.memory_space<vmem>>, %arg15: memref<12x72xf32, #tpu.memory_space<vmem>>, %arg16: memref<8x128xf32, #tpu.memory_space<vmem>>) attributes {dimension_semantics = [#tpu.dimension_semantics<parallel>], iteration_bounds = array<i64: 2>, scalar_prefetch = 0 : i64, scratch_operands = 4 : i64, tpu.core_type = #tpu.core_type<tc>, window_params = [{transform_indices = @transform_0, window_bounds = array<i64: 1, 100, 100>}, {pipeline_mode = #tpu.pipeline_mode<synchronous>, transform_indices = @transform_1, window_bounds = array<i64: 5, 100, 576>}, {pipeline_mode = #tpu.pipeline_mode<synchronous>, transform_indices = @transform_2, window_bounds = array<i64: 1, 576>}, {pipeline_mode = #tpu.pipeline_mode<synchronous>, transform_indices = @transform_3, window_bounds = array<i64: 5, 72, 128>}, {pipeline_mode = #tpu.pipeline_mode<synchronous>, transform_indices = @transform_4, window_bounds = array<i64: 1, 128>}, {pipeline_mode = #tpu.pipeline_mode<synchronous>, transform_indices = @transform_5, window_bounds = array<i64: 16, 100>}, {pipeline_mode = #tpu.pipeline_mode<synchronous>, transform_indices = @transform_6, window_bounds = array<i64: 1, 100>}, {pipeline_mode = #tpu.pipeline_mode<synchronous>, transform_indices = @transform_7, window_bounds = array<i64: 100, 50>}, {pipeline_mode = #tpu.pipeline_mode<synchronous>, transform_indices = @transform_8, window_bounds = array<i64: 1, 50>}, {pipeline_mode = #tpu.pipeline_mode<synchronous>, transform_indices = @transform_9, window_bounds = array<i64: 50, 128>}, {pipeline_mode = #tpu.pipeline_mode<synchronous>, transform_indices = @transform_10, window_bounds = array<i64: 1, 128>}, {transform_indices = @transform_11, window_bounds = array<i64: 1, 8, 128>}]} {
    %c0 = arith.constant 0 : index
    %c0_0 = arith.constant 0 : index
    %c0_1 = arith.constant 0 : index
    %0 = vector.load %arg1[%c0, %c0_0, %c0_1] : memref<1x100x100xf32, #tpu.memory_space<vmem>>, vector<1x96x100xf32>
    %1 = vector.shape_cast %0 : vector<1x96x100xf32> to vector<96x100xf32>
    %c0_2 = arith.constant 0 : index
    %c0_3 = arith.constant 0 : index
    %c0_4 = arith.constant 0 : index
    %2 = vector.load %arg2[%c0_2, %c0_3, %c0_4] : memref<5x100x576xf32, #tpu.memory_space<vmem>>, vector<1x100x576xf32>
    %3 = vector.shape_cast %2 : vector<1x100x576xf32> to vector<100x576xf32>
    %cst = arith.constant dense<0.000000e+00> : vector<96x576xf32>
    %4 = tpu.matmul %1, %3, %cst {dimension_numbers = #tpu.dot_dimension_numbers<[1], [0], [0], [1], [0, 0, 1, 1], [], []>} : vector<96x100xf32>, vector<100x576xf32>, vector<96x576xf32> -> vector<96x576xf32>
    %c0_5 = arith.constant 0 : index
    %c1 = arith.constant 1 : index
    %c0_6 = arith.constant 0 : index
    %5 = vector.load %arg1[%c0_5, %c1, %c0_6] : memref<1x100x100xf32, #tpu.memory_space<vmem>>, vector<1x96x100xf32>
    %6 = vector.shape_cast %5 : vector<1x96x100xf32> to vector<96x100xf32>
    %c1_7 = arith.constant 1 : index
    %c0_8 = arith.constant 0 : index
    %c0_9 = arith.constant 0 : index
    %7 = vector.load %arg2[%c1_7, %c0_8, %c0_9] : memref<5x100x576xf32, #tpu.memory_space<vmem>>, vector<1x100x576xf32>
    %8 = vector.shape_cast %7 : vector<1x100x576xf32> to vector<100x576xf32>
    %cst_10 = arith.constant dense<0.000000e+00> : vector<96x576xf32>
    %9 = tpu.matmul %6, %8, %cst_10 {dimension_numbers = #tpu.dot_dimension_numbers<[1], [0], [0], [1], [0, 0, 1, 1], [], []>} : vector<96x100xf32>, vector<100x576xf32>, vector<96x576xf32> -> vector<96x576xf32>
    %10 = arith.addf %4, %9 : vector<96x576xf32>
    %c0_11 = arith.constant 0 : index
    %c2 = arith.constant 2 : index
    %c0_12 = arith.constant 0 : index
    %11 = vector.load %arg1[%c0_11, %c2, %c0_12] : memref<1x100x100xf32, #tpu.memory_space<vmem>>, vector<1x96x100xf32>
    %12 = vector.shape_cast %11 : vector<1x96x100xf32> to vector<96x100xf32>
    %c2_13 = arith.constant 2 : index
    %c0_14 = arith.constant 0 : index
    %c0_15 = arith.constant 0 : index
    %13 = vector.load %arg2[%c2_13, %c0_14, %c0_15] : memref<5x100x576xf32, #tpu.memory_space<vmem>>, vector<1x100x576xf32>
    %14 = vector.shape_cast %13 : vector<1x100x576xf32> to vector<100x576xf32>
    %cst_16 = arith.constant dense<0.000000e+00> : vector<96x576xf32>
    %15 = tpu.matmul %12, %14, %cst_16 {dimension_numbers = #tpu.dot_dimension_numbers<[1], [0], [0], [1], [0, 0, 1, 1], [], []>} : vector<96x100xf32>, vector<100x576xf32>, vector<96x576xf32> -> vector<96x576xf32>
    %16 = arith.addf %10, %15 : vector<96x576xf32>
    %c0_17 = arith.constant 0 : index
    %c3 = arith.constant 3 : index
    %c0_18 = arith.constant 0 : index
    %17 = vector.load %arg1[%c0_17, %c3, %c0_18] : memref<1x100x100xf32, #tpu.memory_space<vmem>>, vector<1x96x100xf32>
    %18 = vector.shape_cast %17 : vector<1x96x100xf32> to vector<96x100xf32>
    %c3_19 = arith.constant 3 : index
    %c0_20 = arith.constant 0 : index
    %c0_21 = arith.constant 0 : index
    %19 = vector.load %arg2[%c3_19, %c0_20, %c0_21] : memref<5x100x576xf32, #tpu.memory_space<vmem>>, vector<1x100x576xf32>
    %20 = vector.shape_cast %19 : vector<1x100x576xf32> to vector<100x576xf32>
    %cst_22 = arith.constant dense<0.000000e+00> : vector<96x576xf32>
    %21 = tpu.matmul %18, %20, %cst_22 {dimension_numbers = #tpu.dot_dimension_numbers<[1], [0], [0], [1], [0, 0, 1, 1], [], []>} : vector<96x100xf32>, vector<100x576xf32>, vector<96x576xf32> -> vector<96x576xf32>
    %22 = arith.addf %16, %21 : vector<96x576xf32>
    %c0_23 = arith.constant 0 : index
    %c4 = arith.constant 4 : index
    %c0_24 = arith.constant 0 : index
    %23 = vector.load %arg1[%c0_23, %c4, %c0_24] : memref<1x100x100xf32, #tpu.memory_space<vmem>>, vector<1x96x100xf32>
    %24 = vector.shape_cast %23 : vector<1x96x100xf32> to vector<96x100xf32>
    %c4_25 = arith.constant 4 : index
    %c0_26 = arith.constant 0 : index
    %c0_27 = arith.constant 0 : index
    %25 = vector.load %arg2[%c4_25, %c0_26, %c0_27] : memref<5x100x576xf32, #tpu.memory_space<vmem>>, vector<1x100x576xf32>
    %26 = vector.shape_cast %25 : vector<1x100x576xf32> to vector<100x576xf32>
    %cst_28 = arith.constant dense<0.000000e+00> : vector<96x576xf32>
    %27 = tpu.matmul %24, %26, %cst_28 {dimension_numbers = #tpu.dot_dimension_numbers<[1], [0], [0], [1], [0, 0, 1, 1], [], []>} : vector<96x100xf32>, vector<100x576xf32>, vector<96x576xf32> -> vector<96x576xf32>
    %28 = arith.addf %22, %27 : vector<96x576xf32>
    %c0_29 = arith.constant 0 : index
    %c0_30 = arith.constant 0 : index
    %29 = vector.load %arg3[%c0_29, %c0_30] : memref<1x576xf32, #tpu.memory_space<vmem>>, vector<1x576xf32>
    %30 = vector.broadcast %29 : vector<1x576xf32> to vector<96x576xf32>
    %31 = arith.addf %28, %30 : vector<96x576xf32>
    %cst_31 = arith.constant 0.000000e+00 : f32
    %32 = vector.broadcast %cst_31 : f32 to vector<96x576xf32>
    %33 = arith.maximumf %31, %32 : vector<96x576xf32>
    %c0_32 = arith.constant 0 : index
    %c0_33 = arith.constant 0 : index
    %34 = vector.load %arg13[%c0_32, %c0_33] : memref<96x576xf32, #tpu.memory_space<vmem>>, vector<96x576xf32>
    tpu.vector_store %arg13[%c0_32, %c0_33], %33 {strides = array<i32>} : memref<96x576xf32, #tpu.memory_space<vmem>>, vector<96x576xf32>,
    %35 = tpu.iota {dimensions = array<i32: 0>} : vector<12x1xi32>
    %cst_34 = arith.constant 0.000000e+00 : f32
    %36 = vector.broadcast %cst_34 : f32 to vector<12x576xf32>
    %c0_35 = arith.constant 0 : index
    %c0_36 = arith.constant 0 : index
    %37 = vector.load %arg13[%c0_35, %c0_36] : memref<96x576xf32, #tpu.memory_space<vmem>>, vector<8x576xf32>
    %cst_37 = arith.constant dense<0xFF800000> : vector<576xf32>
    %38 = vector.multi_reduction <maximumf>, %37, %cst_37 [0] : vector<8x576xf32> to vector<576xf32>
    %39 = vector.shape_cast %38 : vector<576xf32> to vector<1x576xf32>
    %c0_i32 = arith.constant 0 : i32
    %40 = vector.broadcast %c0_i32 : i32 to vector<12x1xi32>
    %41 = arith.cmpi eq, %35, %40 : vector<12x1xi32>
    %42 = arith.extui %41 : vector<12x1xi1> to vector<12x1xi32>
    %43 = arith.sitofp %42 : vector<12x1xi32> to vector<12x1xf32>
    %44 = vector.broadcast %43 : vector<12x1xf32> to vector<12x576xf32>
    %45 = vector.broadcast %39 : vector<1x576xf32> to vector<12x576xf32>
    %46 = arith.mulf %44, %45 : vector<12x576xf32>
    %47 = arith.addf %36, %46 : vector<12x576xf32>
    %c8 = arith.constant 8 : index
    %c0_38 = arith.constant 0 : index
    %48 = vector.load %arg13[%c8, %c0_38] : memref<96x576xf32, #tpu.memory_space<vmem>>, vector<8x576xf32>
    %cst_39 = arith.constant dense<0xFF800000> : vector<576xf32>
    %49 = vector.multi_reduction <maximumf>, %48, %cst_39 [0] : vector<8x576xf32> to vector<576xf32>
    %50 = vector.shape_cast %49 : vector<576xf32> to vector<1x576xf32>
    %c1_i32 = arith.constant 1 : i32
    %51 = vector.broadcast %c1_i32 : i32 to vector<12x1xi32>
    %52 = arith.cmpi eq, %35, %51 : vector<12x1xi32>
    %53 = arith.extui %52 : vector<12x1xi1> to vector<12x1xi32>
    %54 = arith.sitofp %53 : vector<12x1xi32> to vector<12x1xf32>
    %55 = vector.broadcast %54 : vector<12x1xf32> to vector<12x576xf32>
    %56 = vector.broadcast %50 : vector<1x576xf32> to vector<12x576xf32>
    %57 = arith.mulf %55, %56 : vector<12x576xf32>
    %58 = arith.addf %47, %57 : vector<12x576xf32>
    %c16 = arith.constant 16 : index
    %c0_40 = arith.constant 0 : index
    %59 = vector.load %arg13[%c16, %c0_40] : memref<96x576xf32, #tpu.memory_space<vmem>>, vector<8x576xf32>
    %cst_41 = arith.constant dense<0xFF800000> : vector<576xf32>
    %60 = vector.multi_reduction <maximumf>, %59, %cst_41 [0] : vector<8x576xf32> to vector<576xf32>
    %61 = vector.shape_cast %60 : vector<576xf32> to vector<1x576xf32>
    %c2_i32 = arith.constant 2 : i32
    %62 = vector.broadcast %c2_i32 : i32 to vector<12x1xi32>
    %63 = arith.cmpi eq, %35, %62 : vector<12x1xi32>
    %64 = arith.extui %63 : vector<12x1xi1> to vector<12x1xi32>
    %65 = arith.sitofp %64 : vector<12x1xi32> to vector<12x1xf32>
    %66 = vector.broadcast %65 : vector<12x1xf32> to vector<12x576xf32>
    %67 = vector.broadcast %61 : vector<1x576xf32> to vector<12x576xf32>
    %68 = arith.mulf %66, %67 : vector<12x576xf32>
    %69 = arith.addf %58, %68 : vector<12x576xf32>
    %c24 = arith.constant 24 : index
    %c0_42 = arith.constant 0 : index
    %70 = vector.load %arg13[%c24, %c0_42] : memref<96x576xf32, #tpu.memory_space<vmem>>, vector<8x576xf32>
    %cst_43 = arith.constant dense<0xFF800000> : vector<576xf32>
    %71 = vector.multi_reduction <maximumf>, %70, %cst_43 [0] : vector<8x576xf32> to vector<576xf32>
    %72 = vector.shape_cast %71 : vector<576xf32> to vector<1x576xf32>
    %c3_i32 = arith.constant 3 : i32
    %73 = vector.broadcast %c3_i32 : i32 to vector<12x1xi32>
    %74 = arith.cmpi eq, %35, %73 : vector<12x1xi32>
    %75 = arith.extui %74 : vector<12x1xi1> to vector<12x1xi32>
    %76 = arith.sitofp %75 : vector<12x1xi32> to vector<12x1xf32>
    %77 = vector.broadcast %76 : vector<12x1xf32> to vector<12x576xf32>
    %78 = vector.broadcast %72 : vector<1x576xf32> to vector<12x576xf32>
    %79 = arith.mulf %77, %78 : vector<12x576xf32>
    %80 = arith.addf %69, %79 : vector<12x576xf32>
    %c32 = arith.constant 32 : index
    %c0_44 = arith.constant 0 : index
    %81 = vector.load %arg13[%c32, %c0_44] : memref<96x576xf32, #tpu.memory_space<vmem>>, vector<8x576xf32>
    %cst_45 = arith.constant dense<0xFF800000> : vector<576xf32>
    %82 = vector.multi_reduction <maximumf>, %81, %cst_45 [0] : vector<8x576xf32> to vector<576xf32>
    %83 = vector.shape_cast %82 : vector<576xf32> to vector<1x576xf32>
    %c4_i32 = arith.constant 4 : i32
    %84 = vector.broadcast %c4_i32 : i32 to vector<12x1xi32>
    %85 = arith.cmpi eq, %35, %84 : vector<12x1xi32>
    %86 = arith.extui %85 : vector<12x1xi1> to vector<12x1xi32>
    %87 = arith.sitofp %86 : vector<12x1xi32> to vector<12x1xf32>
    %88 = vector.broadcast %87 : vector<12x1xf32> to vector<12x576xf32>
    %89 = vector.broadcast %83 : vector<1x576xf32> to vector<12x576xf32>
    %90 = arith.mulf %88, %89 : vector<12x576xf32>
    %91 = arith.addf %80, %90 : vector<12x576xf32>
    %c40 = arith.constant 40 : index
    %c0_46 = arith.constant 0 : index
    %92 = vector.load %arg13[%c40, %c0_46] : memref<96x576xf32, #tpu.memory_space<vmem>>, vector<8x576xf32>
    %cst_47 = arith.constant dense<0xFF800000> : vector<576xf32>
    %93 = vector.multi_reduction <maximumf>, %92, %cst_47 [0] : vector<8x576xf32> to vector<576xf32>
    %94 = vector.shape_cast %93 : vector<576xf32> to vector<1x576xf32>
    %c5_i32 = arith.constant 5 : i32
    %95 = vector.broadcast %c5_i32 : i32 to vector<12x1xi32>
    %96 = arith.cmpi eq, %35, %95 : vector<12x1xi32>
    %97 = arith.extui %96 : vector<12x1xi1> to vector<12x1xi32>
    %98 = arith.sitofp %97 : vector<12x1xi32> to vector<12x1xf32>
    %99 = vector.broadcast %98 : vector<12x1xf32> to vector<12x576xf32>
    %100 = vector.broadcast %94 : vector<1x576xf32> to vector<12x576xf32>
    %101 = arith.mulf %99, %100 : vector<12x576xf32>
    %102 = arith.addf %91, %101 : vector<12x576xf32>
    %c48 = arith.constant 48 : index
    %c0_48 = arith.constant 0 : index
    %103 = vector.load %arg13[%c48, %c0_48] : memref<96x576xf32, #tpu.memory_space<vmem>>, vector<8x576xf32>
    %cst_49 = arith.constant dense<0xFF800000> : vector<576xf32>
    %104 = vector.multi_reduction <maximumf>, %103, %cst_49 [0] : vector<8x576xf32> to vector<576xf32>
    %105 = vector.shape_cast %104 : vector<576xf32> to vector<1x576xf32>
    %c6_i32 = arith.constant 6 : i32
    %106 = vector.broadcast %c6_i32 : i32 to vector<12x1xi32>
    %107 = arith.cmpi eq, %35, %106 : vector<12x1xi32>
    %108 = arith.extui %107 : vector<12x1xi1> to vector<12x1xi32>
    %109 = arith.sitofp %108 : vector<12x1xi32> to vector<12x1xf32>
    %110 = vector.broadcast %109 : vector<12x1xf32> to vector<12x576xf32>
    %111 = vector.broadcast %105 : vector<1x576xf32> to vector<12x576xf32>
    %112 = arith.mulf %110, %111 : vector<12x576xf32>
    %113 = arith.addf %102, %112 : vector<12x576xf32>
    %c56 = arith.constant 56 : index
    %c0_50 = arith.constant 0 : index
    %114 = vector.load %arg13[%c56, %c0_50] : memref<96x576xf32, #tpu.memory_space<vmem>>, vector<8x576xf32>
    %cst_51 = arith.constant dense<0xFF800000> : vector<576xf32>
    %115 = vector.multi_reduction <maximumf>, %114, %cst_51 [0] : vector<8x576xf32> to vector<576xf32>
    %116 = vector.shape_cast %115 : vector<576xf32> to vector<1x576xf32>
    %c7_i32 = arith.constant 7 : i32
    %117 = vector.broadcast %c7_i32 : i32 to vector<12x1xi32>
    %118 = arith.cmpi eq, %35, %117 : vector<12x1xi32>
    %119 = arith.extui %118 : vector<12x1xi1> to vector<12x1xi32>
    %120 = arith.sitofp %119 : vector<12x1xi32> to vector<12x1xf32>
    %121 = vector.broadcast %120 : vector<12x1xf32> to vector<12x576xf32>
    %122 = vector.broadcast %116 : vector<1x576xf32> to vector<12x576xf32>
    %123 = arith.mulf %121, %122 : vector<12x576xf32>
    %124 = arith.addf %113, %123 : vector<12x576xf32>
    %c64 = arith.constant 64 : index
    %c0_52 = arith.constant 0 : index
    %125 = vector.load %arg13[%c64, %c0_52] : memref<96x576xf32, #tpu.memory_space<vmem>>, vector<8x576xf32>
    %cst_53 = arith.constant dense<0xFF800000> : vector<576xf32>
    %126 = vector.multi_reduction <maximumf>, %125, %cst_53 [0] : vector<8x576xf32> to vector<576xf32>
    %127 = vector.shape_cast %126 : vector<576xf32> to vector<1x576xf32>
    %c8_i32 = arith.constant 8 : i32
    %128 = vector.broadcast %c8_i32 : i32 to vector<12x1xi32>
    %129 = arith.cmpi eq, %35, %128 : vector<12x1xi32>
    %130 = arith.extui %129 : vector<12x1xi1> to vector<12x1xi32>
    %131 = arith.sitofp %130 : vector<12x1xi32> to vector<12x1xf32>
    %132 = vector.broadcast %131 : vector<12x1xf32> to vector<12x576xf32>
    %133 = vector.broadcast %127 : vector<1x576xf32> to vector<12x576xf32>
    %134 = arith.mulf %132, %133 : vector<12x576xf32>
    %135 = arith.addf %124, %134 : vector<12x576xf32>
    %c72 = arith.constant 72 : index
    %c0_54 = arith.constant 0 : index
    %136 = vector.load %arg13[%c72, %c0_54] : memref<96x576xf32, #tpu.memory_space<vmem>>, vector<8x576xf32>
    %cst_55 = arith.constant dense<0xFF800000> : vector<576xf32>
    %137 = vector.multi_reduction <maximumf>, %136, %cst_55 [0] : vector<8x576xf32> to vector<576xf32>
    %138 = vector.shape_cast %137 : vector<576xf32> to vector<1x576xf32>
    %c9_i32 = arith.constant 9 : i32
    %139 = vector.broadcast %c9_i32 : i32 to vector<12x1xi32>
    %140 = arith.cmpi eq, %35, %139 : vector<12x1xi32>
    %141 = arith.extui %140 : vector<12x1xi1> to vector<12x1xi32>
    %142 = arith.sitofp %141 : vector<12x1xi32> to vector<12x1xf32>
    %143 = vector.broadcast %142 : vector<12x1xf32> to vector<12x576xf32>
    %144 = vector.broadcast %138 : vector<1x576xf32> to vector<12x576xf32>
    %145 = arith.mulf %143, %144 : vector<12x576xf32>
    %146 = arith.addf %135, %145 : vector<12x576xf32>
    %c80 = arith.constant 80 : index
    %c0_56 = arith.constant 0 : index
    %147 = vector.load %arg13[%c80, %c0_56] : memref<96x576xf32, #tpu.memory_space<vmem>>, vector<8x576xf32>
    %cst_57 = arith.constant dense<0xFF800000> : vector<576xf32>
    %148 = vector.multi_reduction <maximumf>, %147, %cst_57 [0] : vector<8x576xf32> to vector<576xf32>
    %149 = vector.shape_cast %148 : vector<576xf32> to vector<1x576xf32>
    %c10_i32 = arith.constant 10 : i32
    %150 = vector.broadcast %c10_i32 : i32 to vector<12x1xi32>
    %151 = arith.cmpi eq, %35, %150 : vector<12x1xi32>
    %152 = arith.extui %151 : vector<12x1xi1> to vector<12x1xi32>
    %153 = arith.sitofp %152 : vector<12x1xi32> to vector<12x1xf32>
    %154 = vector.broadcast %153 : vector<12x1xf32> to vector<12x576xf32>
    %155 = vector.broadcast %149 : vector<1x576xf32> to vector<12x576xf32>
    %156 = arith.mulf %154, %155 : vector<12x576xf32>
    %157 = arith.addf %146, %156 : vector<12x576xf32>
    %c88 = arith.constant 88 : index
    %c0_58 = arith.constant 0 : index
    %158 = vector.load %arg13[%c88, %c0_58] : memref<96x576xf32, #tpu.memory_space<vmem>>, vector<8x576xf32>
    %cst_59 = arith.constant dense<0xFF800000> : vector<576xf32>
    %159 = vector.multi_reduction <maximumf>, %158, %cst_59 [0] : vector<8x576xf32> to vector<576xf32>
    %160 = vector.shape_cast %159 : vector<576xf32> to vector<1x576xf32>
    %c11_i32 = arith.constant 11 : i32
    %161 = vector.broadcast %c11_i32 : i32 to vector<12x1xi32>
    %162 = arith.cmpi eq, %35, %161 : vector<12x1xi32>
    %163 = arith.extui %162 : vector<12x1xi1> to vector<12x1xi32>
    %164 = arith.sitofp %163 : vector<12x1xi32> to vector<12x1xf32>
    %165 = vector.broadcast %164 : vector<12x1xf32> to vector<12x576xf32>
    %166 = vector.broadcast %160 : vector<1x576xf32> to vector<12x576xf32>
    %167 = arith.mulf %165, %166 : vector<12x576xf32>
    %168 = arith.addf %157, %167 : vector<12x576xf32>
    %c0_60 = arith.constant 0 : index
    %c0_61 = arith.constant 0 : index
    %169 = vector.load %arg14[%c0_60, %c0_61] : memref<12x576xf32, #tpu.memory_space<vmem>>, vector<12x576xf32>
    tpu.vector_store %arg14[%c0_60, %c0_61], %168 {strides = array<i32>} : memref<12x576xf32, #tpu.memory_space<vmem>>, vector<12x576xf32>,
    %170 = tpu.iota {dimensions = array<i32: 1>} : vector<1x72xi32>
    %cst_62 = arith.constant 0.000000e+00 : f32
    %171 = vector.broadcast %cst_62 : f32 to vector<12x72xf32>
    %c0_63 = arith.constant 0 : index
    %c0_64 = arith.constant 0 : index
    %172 = vector.load %arg14[%c0_63, %c0_64] : memref<12x576xf32, #tpu.memory_space<vmem>>, vector<12x8xf32>
    %cst_65 = arith.constant dense<0xFF800000> : vector<12xf32>
    %173 = vector.multi_reduction <maximumf>, %172, %cst_65 [1] : vector<12x8xf32> to vector<12xf32>
    %174 = vector.shape_cast %173 : vector<12xf32> to vector<12x1xf32>
    %c0_i32_66 = arith.constant 0 : i32
    %175 = vector.broadcast %c0_i32_66 : i32 to vector<1x72xi32>
    %176 = arith.cmpi eq, %170, %175 : vector<1x72xi32>
    %177 = arith.extui %176 : vector<1x72xi1> to vector<1x72xi32>
    %178 = arith.sitofp %177 : vector<1x72xi32> to vector<1x72xf32>
    %179 = vector.broadcast %174 : vector<12x1xf32> to vector<12x72xf32>
    %180 = vector.broadcast %178 : vector<1x72xf32> to vector<12x72xf32>
    %181 = arith.mulf %179, %180 : vector<12x72xf32>
    %182 = arith.addf %171, %181 : vector<12x72xf32>
    %c0_67 = arith.constant 0 : index
    %c8_68 = arith.constant 8 : index
    %183 = vector.load %arg14[%c0_67, %c8_68] : memref<12x576xf32, #tpu.memory_space<vmem>>, vector<12x8xf32>
    %cst_69 = arith.constant dense<0xFF800000> : vector<12xf32>
    %184 = vector.multi_reduction <maximumf>, %183, %cst_69 [1] : vector<12x8xf32> to vector<12xf32>
    %185 = vector.shape_cast %184 : vector<12xf32> to vector<12x1xf32>
    %c1_i32_70 = arith.constant 1 : i32
    %186 = vector.broadcast %c1_i32_70 : i32 to vector<1x72xi32>
    %187 = arith.cmpi eq, %170, %186 : vector<1x72xi32>
    %188 = arith.extui %187 : vector<1x72xi1> to vector<1x72xi32>
    %189 = arith.sitofp %188 : vector<1x72xi32> to vector<1x72xf32>
    %190 = vector.broadcast %185 : vector<12x1xf32> to vector<12x72xf32>
    %191 = vector.broadcast %189 : vector<1x72xf32> to vector<12x72xf32>
    %192 = arith.mulf %190, %191 : vector<12x72xf32>
    %193 = arith.addf %182, %192 : vector<12x72xf32>
    %c0_71 = arith.constant 0 : index
    %c16_72 = arith.constant 16 : index
    %194 = vector.load %arg14[%c0_71, %c16_72] : memref<12x576xf32, #tpu.memory_space<vmem>>, vector<12x8xf32>
    %cst_73 = arith.constant dense<0xFF800000> : vector<12xf32>
    %195 = vector.multi_reduction <maximumf>, %194, %cst_73 [1] : vector<12x8xf32> to vector<12xf32>
    %196 = vector.shape_cast %195 : vector<12xf32> to vector<12x1xf32>
    %c2_i32_74 = arith.constant 2 : i32
    %197 = vector.broadcast %c2_i32_74 : i32 to vector<1x72xi32>
    %198 = arith.cmpi eq, %170, %197 : vector<1x72xi32>
    %199 = arith.extui %198 : vector<1x72xi1> to vector<1x72xi32>
    %200 = arith.sitofp %199 : vector<1x72xi32> to vector<1x72xf32>
    %201 = vector.broadcast %196 : vector<12x1xf32> to vector<12x72xf32>
    %202 = vector.broadcast %200 : vector<1x72xf32> to vector<12x72xf32>
    %203 = arith.mulf %201, %202 : vector<12x72xf32>
    %204 = arith.addf %193, %203 : vector<12x72xf32>
    %c0_75 = arith.constant 0 : index
    %c24_76 = arith.constant 24 : index
    %205 = vector.load %arg14[%c0_75, %c24_76] : memref<12x576xf32, #tpu.memory_space<vmem>>, vector<12x8xf32>
    %cst_77 = arith.constant dense<0xFF800000> : vector<12xf32>
    %206 = vector.multi_reduction <maximumf>, %205, %cst_77 [1] : vector<12x8xf32> to vector<12xf32>
    %207 = vector.shape_cast %206 : vector<12xf32> to vector<12x1xf32>
    %c3_i32_78 = arith.constant 3 : i32
    %208 = vector.broadcast %c3_i32_78 : i32 to vector<1x72xi32>
    %209 = arith.cmpi eq, %170, %208 : vector<1x72xi32>
    %210 = arith.extui %209 : vector<1x72xi1> to vector<1x72xi32>
    %211 = arith.sitofp %210 : vector<1x72xi32> to vector<1x72xf32>
    %212 = vector.broadcast %207 : vector<12x1xf32> to vector<12x72xf32>
    %213 = vector.broadcast %211 : vector<1x72xf32> to vector<12x72xf32>
    %214 = arith.mulf %212, %213 : vector<12x72xf32>
    %215 = arith.addf %204, %214 : vector<12x72xf32>
    %c0_79 = arith.constant 0 : index
    %c32_80 = arith.constant 32 : index
    %216 = vector.load %arg14[%c0_79, %c32_80] : memref<12x576xf32, #tpu.memory_space<vmem>>, vector<12x8xf32>
    %cst_81 = arith.constant dense<0xFF800000> : vector<12xf32>
    %217 = vector.multi_reduction <maximumf>, %216, %cst_81 [1] : vector<12x8xf32> to vector<12xf32>
    %218 = vector.shape_cast %217 : vector<12xf32> to vector<12x1xf32>
    %c4_i32_82 = arith.constant 4 : i32
    %219 = vector.broadcast %c4_i32_82 : i32 to vector<1x72xi32>
    %220 = arith.cmpi eq, %170, %219 : vector<1x72xi32>
    %221 = arith.extui %220 : vector<1x72xi1> to vector<1x72xi32>
    %222 = arith.sitofp %221 : vector<1x72xi32> to vector<1x72xf32>
    %223 = vector.broadcast %218 : vector<12x1xf32> to vector<12x72xf32>
    %224 = vector.broadcast %222 : vector<1x72xf32> to vector<12x72xf32>
    %225 = arith.mulf %223, %224 : vector<12x72xf32>
    %226 = arith.addf %215, %225 : vector<12x72xf32>
    %c0_83 = arith.constant 0 : index
    %c40_84 = arith.constant 40 : index
    %227 = vector.load %arg14[%c0_83, %c40_84] : memref<12x576xf32, #tpu.memory_space<vmem>>, vector<12x8xf32>
    %cst_85 = arith.constant dense<0xFF800000> : vector<12xf32>
    %228 = vector.multi_reduction <maximumf>, %227, %cst_85 [1] : vector<12x8xf32> to vector<12xf32>
    %229 = vector.shape_cast %228 : vector<12xf32> to vector<12x1xf32>
    %c5_i32_86 = arith.constant 5 : i32
    %230 = vector.broadcast %c5_i32_86 : i32 to vector<1x72xi32>
    %231 = arith.cmpi eq, %170, %230 : vector<1x72xi32>
    %232 = arith.extui %231 : vector<1x72xi1> to vector<1x72xi32>
    %233 = arith.sitofp %232 : vector<1x72xi32> to vector<1x72xf32>
    %234 = vector.broadcast %229 : vector<12x1xf32> to vector<12x72xf32>
    %235 = vector.broadcast %233 : vector<1x72xf32> to vector<12x72xf32>
    %236 = arith.mulf %234, %235 : vector<12x72xf32>
    %237 = arith.addf %226, %236 : vector<12x72xf32>
    %c0_87 = arith.constant 0 : index
    %c48_88 = arith.constant 48 : index
    %238 = vector.load %arg14[%c0_87, %c48_88] : memref<12x576xf32, #tpu.memory_space<vmem>>, vector<12x8xf32>
    %cst_89 = arith.constant dense<0xFF800000> : vector<12xf32>
    %239 = vector.multi_reduction <maximumf>, %238, %cst_89 [1] : vector<12x8xf32> to vector<12xf32>
    %240 = vector.shape_cast %239 : vector<12xf32> to vector<12x1xf32>
    %c6_i32_90 = arith.constant 6 : i32
    %241 = vector.broadcast %c6_i32_90 : i32 to vector<1x72xi32>
    %242 = arith.cmpi eq, %170, %241 : vector<1x72xi32>
    %243 = arith.extui %242 : vector<1x72xi1> to vector<1x72xi32>
    %244 = arith.sitofp %243 : vector<1x72xi32> to vector<1x72xf32>
    %245 = vector.broadcast %240 : vector<12x1xf32> to vector<12x72xf32>
    %246 = vector.broadcast %244 : vector<1x72xf32> to vector<12x72xf32>
    %247 = arith.mulf %245, %246 : vector<12x72xf32>
    %248 = arith.addf %237, %247 : vector<12x72xf32>
    %c0_91 = arith.constant 0 : index
    %c56_92 = arith.constant 56 : index
    %249 = vector.load %arg14[%c0_91, %c56_92] : memref<12x576xf32, #tpu.memory_space<vmem>>, vector<12x8xf32>
    %cst_93 = arith.constant dense<0xFF800000> : vector<12xf32>
    %250 = vector.multi_reduction <maximumf>, %249, %cst_93 [1] : vector<12x8xf32> to vector<12xf32>
    %251 = vector.shape_cast %250 : vector<12xf32> to vector<12x1xf32>
    %c7_i32_94 = arith.constant 7 : i32
    %252 = vector.broadcast %c7_i32_94 : i32 to vector<1x72xi32>
    %253 = arith.cmpi eq, %170, %252 : vector<1x72xi32>
    %254 = arith.extui %253 : vector<1x72xi1> to vector<1x72xi32>
    %255 = arith.sitofp %254 : vector<1x72xi32> to vector<1x72xf32>
    %256 = vector.broadcast %251 : vector<12x1xf32> to vector<12x72xf32>
    %257 = vector.broadcast %255 : vector<1x72xf32> to vector<12x72xf32>
    %258 = arith.mulf %256, %257 : vector<12x72xf32>
    %259 = arith.addf %248, %258 : vector<12x72xf32>
    %c0_95 = arith.constant 0 : index
    %c64_96 = arith.constant 64 : index
    %260 = vector.load %arg14[%c0_95, %c64_96] : memref<12x576xf32, #tpu.memory_space<vmem>>, vector<12x8xf32>
    %cst_97 = arith.constant dense<0xFF800000> : vector<12xf32>
    %261 = vector.multi_reduction <maximumf>, %260, %cst_97 [1] : vector<12x8xf32> to vector<12xf32>
    %262 = vector.shape_cast %261 : vector<12xf32> to vector<12x1xf32>
    %c8_i32_98 = arith.constant 8 : i32
    %263 = vector.broadcast %c8_i32_98 : i32 to vector<1x72xi32>
    %264 = arith.cmpi eq, %170, %263 : vector<1x72xi32>
    %265 = arith.extui %264 : vector<1x72xi1> to vector<1x72xi32>
    %266 = arith.sitofp %265 : vector<1x72xi32> to vector<1x72xf32>
    %267 = vector.broadcast %262 : vector<12x1xf32> to vector<12x72xf32>
    %268 = vector.broadcast %266 : vector<1x72xf32> to vector<12x72xf32>
    %269 = arith.mulf %267, %268 : vector<12x72xf32>
    %270 = arith.addf %259, %269 : vector<12x72xf32>
    %c0_99 = arith.constant 0 : index
    %c72_100 = arith.constant 72 : index
    %271 = vector.load %arg14[%c0_99, %c72_100] : memref<12x576xf32, #tpu.memory_space<vmem>>, vector<12x8xf32>
    %cst_101 = arith.constant dense<0xFF800000> : vector<12xf32>
    %272 = vector.multi_reduction <maximumf>, %271, %cst_101 [1] : vector<12x8xf32> to vector<12xf32>
    %273 = vector.shape_cast %272 : vector<12xf32> to vector<12x1xf32>
    %c9_i32_102 = arith.constant 9 : i32
    %274 = vector.broadcast %c9_i32_102 : i32 to vector<1x72xi32>
    %275 = arith.cmpi eq, %170, %274 : vector<1x72xi32>
    %276 = arith.extui %275 : vector<1x72xi1> to vector<1x72xi32>
    %277 = arith.sitofp %276 : vector<1x72xi32> to vector<1x72xf32>
    %278 = vector.broadcast %273 : vector<12x1xf32> to vector<12x72xf32>
    %279 = vector.broadcast %277 : vector<1x72xf32> to vector<12x72xf32>
    %280 = arith.mulf %278, %279 : vector<12x72xf32>
    %281 = arith.addf %270, %280 : vector<12x72xf32>
    %c0_103 = arith.constant 0 : index
    %c80_104 = arith.constant 80 : index
    %282 = vector.load %arg14[%c0_103, %c80_104] : memref<12x576xf32, #tpu.memory_space<vmem>>, vector<12x8xf32>
    %cst_105 = arith.constant dense<0xFF800000> : vector<12xf32>
    %283 = vector.multi_reduction <maximumf>, %282, %cst_105 [1] : vector<12x8xf32> to vector<12xf32>
    %284 = vector.shape_cast %283 : vector<12xf32> to vector<12x1xf32>
    %c10_i32_106 = arith.constant 10 : i32
    %285 = vector.broadcast %c10_i32_106 : i32 to vector<1x72xi32>
    %286 = arith.cmpi eq, %170, %285 : vector<1x72xi32>
    %287 = arith.extui %286 : vector<1x72xi1> to vector<1x72xi32>
    %288 = arith.sitofp %287 : vector<1x72xi32> to vector<1x72xf32>
    %289 = vector.broadcast %284 : vector<12x1xf32> to vector<12x72xf32>
    %290 = vector.broadcast %288 : vector<1x72xf32> to vector<12x72xf32>
    %291 = arith.mulf %289, %290 : vector<12x72xf32>
    %292 = arith.addf %281, %291 : vector<12x72xf32>
    %c0_107 = arith.constant 0 : index
    %c88_108 = arith.constant 88 : index
    %293 = vector.load %arg14[%c0_107, %c88_108] : memref<12x576xf32, #tpu.memory_space<vmem>>, vector<12x8xf32>
    %cst_109 = arith.constant dense<0xFF800000> : vector<12xf32>
    %294 = vector.multi_reduction <maximumf>, %293, %cst_109 [1] : vector<12x8xf32> to vector<12xf32>
    %295 = vector.shape_cast %294 : vector<12xf32> to vector<12x1xf32>
    %c11_i32_110 = arith.constant 11 : i32
    %296 = vector.broadcast %c11_i32_110 : i32 to vector<1x72xi32>
    %297 = arith.cmpi eq, %170, %296 : vector<1x72xi32>
    %298 = arith.extui %297 : vector<1x72xi1> to vector<1x72xi32>
    %299 = arith.sitofp %298 : vector<1x72xi32> to vector<1x72xf32>
    %300 = vector.broadcast %295 : vector<12x1xf32> to vector<12x72xf32>
    %301 = vector.broadcast %299 : vector<1x72xf32> to vector<12x72xf32>
    %302 = arith.mulf %300, %301 : vector<12x72xf32>
    %303 = arith.addf %292, %302 : vector<12x72xf32>
    %c0_111 = arith.constant 0 : index
    %c96 = arith.constant 96 : index
    %304 = vector.load %arg14[%c0_111, %c96] : memref<12x576xf32, #tpu.memory_space<vmem>>, vector<12x8xf32>
    %cst_112 = arith.constant dense<0xFF800000> : vector<12xf32>
    %305 = vector.multi_reduction <maximumf>, %304, %cst_112 [1] : vector<12x8xf32> to vector<12xf32>
    %306 = vector.shape_cast %305 : vector<12xf32> to vector<12x1xf32>
    %c12_i32 = arith.constant 12 : i32
    %307 = vector.broadcast %c12_i32 : i32 to vector<1x72xi32>
    %308 = arith.cmpi eq, %170, %307 : vector<1x72xi32>
    %309 = arith.extui %308 : vector<1x72xi1> to vector<1x72xi32>
    %310 = arith.sitofp %309 : vector<1x72xi32> to vector<1x72xf32>
    %311 = vector.broadcast %306 : vector<12x1xf32> to vector<12x72xf32>
    %312 = vector.broadcast %310 : vector<1x72xf32> to vector<12x72xf32>
    %313 = arith.mulf %311, %312 : vector<12x72xf32>
    %314 = arith.addf %303, %313 : vector<12x72xf32>
    %c0_113 = arith.constant 0 : index
    %c104 = arith.constant 104 : index
    %315 = vector.load %arg14[%c0_113, %c104] : memref<12x576xf32, #tpu.memory_space<vmem>>, vector<12x8xf32>
    %cst_114 = arith.constant dense<0xFF800000> : vector<12xf32>
    %316 = vector.multi_reduction <maximumf>, %315, %cst_114 [1] : vector<12x8xf32> to vector<12xf32>
    %317 = vector.shape_cast %316 : vector<12xf32> to vector<12x1xf32>
    %c13_i32 = arith.constant 13 : i32
    %318 = vector.broadcast %c13_i32 : i32 to vector<1x72xi32>
    %319 = arith.cmpi eq, %170, %318 : vector<1x72xi32>
    %320 = arith.extui %319 : vector<1x72xi1> to vector<1x72xi32>
    %321 = arith.sitofp %320 : vector<1x72xi32> to vector<1x72xf32>
    %322 = vector.broadcast %317 : vector<12x1xf32> to vector<12x72xf32>
    %323 = vector.broadcast %321 : vector<1x72xf32> to vector<12x72xf32>
    %324 = arith.mulf %322, %323 : vector<12x72xf32>
    %325 = arith.addf %314, %324 : vector<12x72xf32>
    %c0_115 = arith.constant 0 : index
    %c112 = arith.constant 112 : index
    %326 = vector.load %arg14[%c0_115, %c112] : memref<12x576xf32, #tpu.memory_space<vmem>>, vector<12x8xf32>
    %cst_116 = arith.constant dense<0xFF800000> : vector<12xf32>
    %327 = vector.multi_reduction <maximumf>, %326, %cst_116 [1] : vector<12x8xf32> to vector<12xf32>
    %328 = vector.shape_cast %327 : vector<12xf32> to vector<12x1xf32>
    %c14_i32 = arith.constant 14 : i32
    %329 = vector.broadcast %c14_i32 : i32 to vector<1x72xi32>
    %330 = arith.cmpi eq, %170, %329 : vector<1x72xi32>
    %331 = arith.extui %330 : vector<1x72xi1> to vector<1x72xi32>
    %332 = arith.sitofp %331 : vector<1x72xi32> to vector<1x72xf32>
    %333 = vector.broadcast %328 : vector<12x1xf32> to vector<12x72xf32>
    %334 = vector.broadcast %332 : vector<1x72xf32> to vector<12x72xf32>
    %335 = arith.mulf %333, %334 : vector<12x72xf32>
    %336 = arith.addf %325, %335 : vector<12x72xf32>
    %c0_117 = arith.constant 0 : index
    %c120 = arith.constant 120 : index
    %337 = vector.load %arg14[%c0_117, %c120] : memref<12x576xf32, #tpu.memory_space<vmem>>, vector<12x8xf32>
    %cst_118 = arith.constant dense<0xFF800000> : vector<12xf32>
    %338 = vector.multi_reduction <maximumf>, %337, %cst_118 [1] : vector<12x8xf32> to vector<12xf32>
    %339 = vector.shape_cast %338 : vector<12xf32> to vector<12x1xf32>
    %c15_i32 = arith.constant 15 : i32
    %340 = vector.broadcast %c15_i32 : i32 to vector<1x72xi32>
    %341 = arith.cmpi eq, %170, %340 : vector<1x72xi32>
    %342 = arith.extui %341 : vector<1x72xi1> to vector<1x72xi32>
    %343 = arith.sitofp %342 : vector<1x72xi32> to vector<1x72xf32>
    %344 = vector.broadcast %339 : vector<12x1xf32> to vector<12x72xf32>
    %345 = vector.broadcast %343 : vector<1x72xf32> to vector<12x72xf32>
    %346 = arith.mulf %344, %345 : vector<12x72xf32>
    %347 = arith.addf %336, %346 : vector<12x72xf32>
    %c0_119 = arith.constant 0 : index
    %c128 = arith.constant 128 : index
    %348 = vector.load %arg14[%c0_119, %c128] : memref<12x576xf32, #tpu.memory_space<vmem>>, vector<12x8xf32>
    %cst_120 = arith.constant dense<0xFF800000> : vector<12xf32>
    %349 = vector.multi_reduction <maximumf>, %348, %cst_120 [1] : vector<12x8xf32> to vector<12xf32>
    %350 = vector.shape_cast %349 : vector<12xf32> to vector<12x1xf32>
    %c16_i32 = arith.constant 16 : i32
    %351 = vector.broadcast %c16_i32 : i32 to vector<1x72xi32>
    %352 = arith.cmpi eq, %170, %351 : vector<1x72xi32>
    %353 = arith.extui %352 : vector<1x72xi1> to vector<1x72xi32>
    %354 = arith.sitofp %353 : vector<1x72xi32> to vector<1x72xf32>
    %355 = vector.broadcast %350 : vector<12x1xf32> to vector<12x72xf32>
    %356 = vector.broadcast %354 : vector<1x72xf32> to vector<12x72xf32>
    %357 = arith.mulf %355, %356 : vector<12x72xf32>
    %358 = arith.addf %347, %357 : vector<12x72xf32>
    %c0_121 = arith.constant 0 : index
    %c136 = arith.constant 136 : index
    %359 = vector.load %arg14[%c0_121, %c136] : memref<12x576xf32, #tpu.memory_space<vmem>>, vector<12x8xf32>
    %cst_122 = arith.constant dense<0xFF800000> : vector<12xf32>
    %360 = vector.multi_reduction <maximumf>, %359, %cst_122 [1] : vector<12x8xf32> to vector<12xf32>
    %361 = vector.shape_cast %360 : vector<12xf32> to vector<12x1xf32>
    %c17_i32 = arith.constant 17 : i32
    %362 = vector.broadcast %c17_i32 : i32 to vector<1x72xi32>
    %363 = arith.cmpi eq, %170, %362 : vector<1x72xi32>
    %364 = arith.extui %363 : vector<1x72xi1> to vector<1x72xi32>
    %365 = arith.sitofp %364 : vector<1x72xi32> to vector<1x72xf32>
    %366 = vector.broadcast %361 : vector<12x1xf32> to vector<12x72xf32>
    %367 = vector.broadcast %365 : vector<1x72xf32> to vector<12x72xf32>
    %368 = arith.mulf %366, %367 : vector<12x72xf32>
    %369 = arith.addf %358, %368 : vector<12x72xf32>
    %c0_123 = arith.constant 0 : index
    %c144 = arith.constant 144 : index
    %370 = vector.load %arg14[%c0_123, %c144] : memref<12x576xf32, #tpu.memory_space<vmem>>, vector<12x8xf32>
    %cst_124 = arith.constant dense<0xFF800000> : vector<12xf32>
    %371 = vector.multi_reduction <maximumf>, %370, %cst_124 [1] : vector<12x8xf32> to vector<12xf32>
    %372 = vector.shape_cast %371 : vector<12xf32> to vector<12x1xf32>
    %c18_i32 = arith.constant 18 : i32
    %373 = vector.broadcast %c18_i32 : i32 to vector<1x72xi32>
    %374 = arith.cmpi eq, %170, %373 : vector<1x72xi32>
    %375 = arith.extui %374 : vector<1x72xi1> to vector<1x72xi32>
    %376 = arith.sitofp %375 : vector<1x72xi32> to vector<1x72xf32>
    %377 = vector.broadcast %372 : vector<12x1xf32> to vector<12x72xf32>
    %378 = vector.broadcast %376 : vector<1x72xf32> to vector<12x72xf32>
    %379 = arith.mulf %377, %378 : vector<12x72xf32>
    %380 = arith.addf %369, %379 : vector<12x72xf32>
    %c0_125 = arith.constant 0 : index
    %c152 = arith.constant 152 : index
    %381 = vector.load %arg14[%c0_125, %c152] : memref<12x576xf32, #tpu.memory_space<vmem>>, vector<12x8xf32>
    %cst_126 = arith.constant dense<0xFF800000> : vector<12xf32>
    %382 = vector.multi_reduction <maximumf>, %381, %cst_126 [1] : vector<12x8xf32> to vector<12xf32>
    %383 = vector.shape_cast %382 : vector<12xf32> to vector<12x1xf32>
    %c19_i32 = arith.constant 19 : i32
    %384 = vector.broadcast %c19_i32 : i32 to vector<1x72xi32>
    %385 = arith.cmpi eq, %170, %384 : vector<1x72xi32>
    %386 = arith.extui %385 : vector<1x72xi1> to vector<1x72xi32>
    %387 = arith.sitofp %386 : vector<1x72xi32> to vector<1x72xf32>
    %388 = vector.broadcast %383 : vector<12x1xf32> to vector<12x72xf32>
    %389 = vector.broadcast %387 : vector<1x72xf32> to vector<12x72xf32>
    %390 = arith.mulf %388, %389 : vector<12x72xf32>
    %391 = arith.addf %380, %390 : vector<12x72xf32>
    %c0_127 = arith.constant 0 : index
    %c160 = arith.constant 160 : index
    %392 = vector.load %arg14[%c0_127, %c160] : memref<12x576xf32, #tpu.memory_space<vmem>>, vector<12x8xf32>
    %cst_128 = arith.constant dense<0xFF800000> : vector<12xf32>
    %393 = vector.multi_reduction <maximumf>, %392, %cst_128 [1] : vector<12x8xf32> to vector<12xf32>
    %394 = vector.shape_cast %393 : vector<12xf32> to vector<12x1xf32>
    %c20_i32 = arith.constant 20 : i32
    %395 = vector.broadcast %c20_i32 : i32 to vector<1x72xi32>
    %396 = arith.cmpi eq, %170, %395 : vector<1x72xi32>
    %397 = arith.extui %396 : vector<1x72xi1> to vector<1x72xi32>
    %398 = arith.sitofp %397 : vector<1x72xi32> to vector<1x72xf32>
    %399 = vector.broadcast %394 : vector<12x1xf32> to vector<12x72xf32>
    %400 = vector.broadcast %398 : vector<1x72xf32> to vector<12x72xf32>
    %401 = arith.mulf %399, %400 : vector<12x72xf32>
    %402 = arith.addf %391, %401 : vector<12x72xf32>
    %c0_129 = arith.constant 0 : index
    %c168 = arith.constant 168 : index
    %403 = vector.load %arg14[%c0_129, %c168] : memref<12x576xf32, #tpu.memory_space<vmem>>, vector<12x8xf32>
    %cst_130 = arith.constant dense<0xFF800000> : vector<12xf32>
    %404 = vector.multi_reduction <maximumf>, %403, %cst_130 [1] : vector<12x8xf32> to vector<12xf32>
    %405 = vector.shape_cast %404 : vector<12xf32> to vector<12x1xf32>
    %c21_i32 = arith.constant 21 : i32
    %406 = vector.broadcast %c21_i32 : i32 to vector<1x72xi32>
    %407 = arith.cmpi eq, %170, %406 : vector<1x72xi32>
    %408 = arith.extui %407 : vector<1x72xi1> to vector<1x72xi32>
    %409 = arith.sitofp %408 : vector<1x72xi32> to vector<1x72xf32>
    %410 = vector.broadcast %405 : vector<12x1xf32> to vector<12x72xf32>
    %411 = vector.broadcast %409 : vector<1x72xf32> to vector<12x72xf32>
    %412 = arith.mulf %410, %411 : vector<12x72xf32>
    %413 = arith.addf %402, %412 : vector<12x72xf32>
    %c0_131 = arith.constant 0 : index
    %c176 = arith.constant 176 : index
    %414 = vector.load %arg14[%c0_131, %c176] : memref<12x576xf32, #tpu.memory_space<vmem>>, vector<12x8xf32>
    %cst_132 = arith.constant dense<0xFF800000> : vector<12xf32>
    %415 = vector.multi_reduction <maximumf>, %414, %cst_132 [1] : vector<12x8xf32> to vector<12xf32>
    %416 = vector.shape_cast %415 : vector<12xf32> to vector<12x1xf32>
    %c22_i32 = arith.constant 22 : i32
    %417 = vector.broadcast %c22_i32 : i32 to vector<1x72xi32>
    %418 = arith.cmpi eq, %170, %417 : vector<1x72xi32>
    %419 = arith.extui %418 : vector<1x72xi1> to vector<1x72xi32>
    %420 = arith.sitofp %419 : vector<1x72xi32> to vector<1x72xf32>
    %421 = vector.broadcast %416 : vector<12x1xf32> to vector<12x72xf32>
    %422 = vector.broadcast %420 : vector<1x72xf32> to vector<12x72xf32>
    %423 = arith.mulf %421, %422 : vector<12x72xf32>
    %424 = arith.addf %413, %423 : vector<12x72xf32>
    %c0_133 = arith.constant 0 : index
    %c184 = arith.constant 184 : index
    %425 = vector.load %arg14[%c0_133, %c184] : memref<12x576xf32, #tpu.memory_space<vmem>>, vector<12x8xf32>
    %cst_134 = arith.constant dense<0xFF800000> : vector<12xf32>
    %426 = vector.multi_reduction <maximumf>, %425, %cst_134 [1] : vector<12x8xf32> to vector<12xf32>
    %427 = vector.shape_cast %426 : vector<12xf32> to vector<12x1xf32>
    %c23_i32 = arith.constant 23 : i32
    %428 = vector.broadcast %c23_i32 : i32 to vector<1x72xi32>
    %429 = arith.cmpi eq, %170, %428 : vector<1x72xi32>
    %430 = arith.extui %429 : vector<1x72xi1> to vector<1x72xi32>
    %431 = arith.sitofp %430 : vector<1x72xi32> to vector<1x72xf32>
    %432 = vector.broadcast %427 : vector<12x1xf32> to vector<12x72xf32>
    %433 = vector.broadcast %431 : vector<1x72xf32> to vector<12x72xf32>
    %434 = arith.mulf %432, %433 : vector<12x72xf32>
    %435 = arith.addf %424, %434 : vector<12x72xf32>
    %c0_135 = arith.constant 0 : index
    %c192 = arith.constant 192 : index
    %436 = vector.load %arg14[%c0_135, %c192] : memref<12x576xf32, #tpu.memory_space<vmem>>, vector<12x8xf32>
    %cst_136 = arith.constant dense<0xFF800000> : vector<12xf32>
    %437 = vector.multi_reduction <maximumf>, %436, %cst_136 [1] : vector<12x8xf32> to vector<12xf32>
    %438 = vector.shape_cast %437 : vector<12xf32> to vector<12x1xf32>
    %c24_i32 = arith.constant 24 : i32
    %439 = vector.broadcast %c24_i32 : i32 to vector<1x72xi32>
    %440 = arith.cmpi eq, %170, %439 : vector<1x72xi32>
    %441 = arith.extui %440 : vector<1x72xi1> to vector<1x72xi32>
    %442 = arith.sitofp %441 : vector<1x72xi32> to vector<1x72xf32>
    %443 = vector.broadcast %438 : vector<12x1xf32> to vector<12x72xf32>
    %444 = vector.broadcast %442 : vector<1x72xf32> to vector<12x72xf32>
    %445 = arith.mulf %443, %444 : vector<12x72xf32>
    %446 = arith.addf %435, %445 : vector<12x72xf32>
    %c0_137 = arith.constant 0 : index
    %c200 = arith.constant 200 : index
    %447 = vector.load %arg14[%c0_137, %c200] : memref<12x576xf32, #tpu.memory_space<vmem>>, vector<12x8xf32>
    %cst_138 = arith.constant dense<0xFF800000> : vector<12xf32>
    %448 = vector.multi_reduction <maximumf>, %447, %cst_138 [1] : vector<12x8xf32> to vector<12xf32>
    %449 = vector.shape_cast %448 : vector<12xf32> to vector<12x1xf32>
    %c25_i32 = arith.constant 25 : i32
    %450 = vector.broadcast %c25_i32 : i32 to vector<1x72xi32>
    %451 = arith.cmpi eq, %170, %450 : vector<1x72xi32>
    %452 = arith.extui %451 : vector<1x72xi1> to vector<1x72xi32>
    %453 = arith.sitofp %452 : vector<1x72xi32> to vector<1x72xf32>
    %454 = vector.broadcast %449 : vector<12x1xf32> to vector<12x72xf32>
    %455 = vector.broadcast %453 : vector<1x72xf32> to vector<12x72xf32>
    %456 = arith.mulf %454, %455 : vector<12x72xf32>
    %457 = arith.addf %446, %456 : vector<12x72xf32>
    %c0_139 = arith.constant 0 : index
    %c208 = arith.constant 208 : index
    %458 = vector.load %arg14[%c0_139, %c208] : memref<12x576xf32, #tpu.memory_space<vmem>>, vector<12x8xf32>
    %cst_140 = arith.constant dense<0xFF800000> : vector<12xf32>
    %459 = vector.multi_reduction <maximumf>, %458, %cst_140 [1] : vector<12x8xf32> to vector<12xf32>
    %460 = vector.shape_cast %459 : vector<12xf32> to vector<12x1xf32>
    %c26_i32 = arith.constant 26 : i32
    %461 = vector.broadcast %c26_i32 : i32 to vector<1x72xi32>
    %462 = arith.cmpi eq, %170, %461 : vector<1x72xi32>
    %463 = arith.extui %462 : vector<1x72xi1> to vector<1x72xi32>
    %464 = arith.sitofp %463 : vector<1x72xi32> to vector<1x72xf32>
    %465 = vector.broadcast %460 : vector<12x1xf32> to vector<12x72xf32>
    %466 = vector.broadcast %464 : vector<1x72xf32> to vector<12x72xf32>
    %467 = arith.mulf %465, %466 : vector<12x72xf32>
    %468 = arith.addf %457, %467 : vector<12x72xf32>
    %c0_141 = arith.constant 0 : index
    %c216 = arith.constant 216 : index
    %469 = vector.load %arg14[%c0_141, %c216] : memref<12x576xf32, #tpu.memory_space<vmem>>, vector<12x8xf32>
    %cst_142 = arith.constant dense<0xFF800000> : vector<12xf32>
    %470 = vector.multi_reduction <maximumf>, %469, %cst_142 [1] : vector<12x8xf32> to vector<12xf32>
    %471 = vector.shape_cast %470 : vector<12xf32> to vector<12x1xf32>
    %c27_i32 = arith.constant 27 : i32
    %472 = vector.broadcast %c27_i32 : i32 to vector<1x72xi32>
    %473 = arith.cmpi eq, %170, %472 : vector<1x72xi32>
    %474 = arith.extui %473 : vector<1x72xi1> to vector<1x72xi32>
    %475 = arith.sitofp %474 : vector<1x72xi32> to vector<1x72xf32>
    %476 = vector.broadcast %471 : vector<12x1xf32> to vector<12x72xf32>
    %477 = vector.broadcast %475 : vector<1x72xf32> to vector<12x72xf32>
    %478 = arith.mulf %476, %477 : vector<12x72xf32>
    %479 = arith.addf %468, %478 : vector<12x72xf32>
    %c0_143 = arith.constant 0 : index
    %c224 = arith.constant 224 : index
    %480 = vector.load %arg14[%c0_143, %c224] : memref<12x576xf32, #tpu.memory_space<vmem>>, vector<12x8xf32>
    %cst_144 = arith.constant dense<0xFF800000> : vector<12xf32>
    %481 = vector.multi_reduction <maximumf>, %480, %cst_144 [1] : vector<12x8xf32> to vector<12xf32>
    %482 = vector.shape_cast %481 : vector<12xf32> to vector<12x1xf32>
    %c28_i32 = arith.constant 28 : i32
    %483 = vector.broadcast %c28_i32 : i32 to vector<1x72xi32>
    %484 = arith.cmpi eq, %170, %483 : vector<1x72xi32>
    %485 = arith.extui %484 : vector<1x72xi1> to vector<1x72xi32>
    %486 = arith.sitofp %485 : vector<1x72xi32> to vector<1x72xf32>
    %487 = vector.broadcast %482 : vector<12x1xf32> to vector<12x72xf32>
    %488 = vector.broadcast %486 : vector<1x72xf32> to vector<12x72xf32>
    %489 = arith.mulf %487, %488 : vector<12x72xf32>
    %490 = arith.addf %479, %489 : vector<12x72xf32>
    %c0_145 = arith.constant 0 : index
    %c232 = arith.constant 232 : index
    %491 = vector.load %arg14[%c0_145, %c232] : memref<12x576xf32, #tpu.memory_space<vmem>>, vector<12x8xf32>
    %cst_146 = arith.constant dense<0xFF800000> : vector<12xf32>
    %492 = vector.multi_reduction <maximumf>, %491, %cst_146 [1] : vector<12x8xf32> to vector<12xf32>
    %493 = vector.shape_cast %492 : vector<12xf32> to vector<12x1xf32>
    %c29_i32 = arith.constant 29 : i32
    %494 = vector.broadcast %c29_i32 : i32 to vector<1x72xi32>
    %495 = arith.cmpi eq, %170, %494 : vector<1x72xi32>
    %496 = arith.extui %495 : vector<1x72xi1> to vector<1x72xi32>
    %497 = arith.sitofp %496 : vector<1x72xi32> to vector<1x72xf32>
    %498 = vector.broadcast %493 : vector<12x1xf32> to vector<12x72xf32>
    %499 = vector.broadcast %497 : vector<1x72xf32> to vector<12x72xf32>
    %500 = arith.mulf %498, %499 : vector<12x72xf32>
    %501 = arith.addf %490, %500 : vector<12x72xf32>
    %c0_147 = arith.constant 0 : index
    %c240 = arith.constant 240 : index
    %502 = vector.load %arg14[%c0_147, %c240] : memref<12x576xf32, #tpu.memory_space<vmem>>, vector<12x8xf32>
    %cst_148 = arith.constant dense<0xFF800000> : vector<12xf32>
    %503 = vector.multi_reduction <maximumf>, %502, %cst_148 [1] : vector<12x8xf32> to vector<12xf32>
    %504 = vector.shape_cast %503 : vector<12xf32> to vector<12x1xf32>
    %c30_i32 = arith.constant 30 : i32
    %505 = vector.broadcast %c30_i32 : i32 to vector<1x72xi32>
    %506 = arith.cmpi eq, %170, %505 : vector<1x72xi32>
    %507 = arith.extui %506 : vector<1x72xi1> to vector<1x72xi32>
    %508 = arith.sitofp %507 : vector<1x72xi32> to vector<1x72xf32>
    %509 = vector.broadcast %504 : vector<12x1xf32> to vector<12x72xf32>
    %510 = vector.broadcast %508 : vector<1x72xf32> to vector<12x72xf32>
    %511 = arith.mulf %509, %510 : vector<12x72xf32>
    %512 = arith.addf %501, %511 : vector<12x72xf32>
    %c0_149 = arith.constant 0 : index
    %c248 = arith.constant 248 : index
    %513 = vector.load %arg14[%c0_149, %c248] : memref<12x576xf32, #tpu.memory_space<vmem>>, vector<12x8xf32>
    %cst_150 = arith.constant dense<0xFF800000> : vector<12xf32>
    %514 = vector.multi_reduction <maximumf>, %513, %cst_150 [1] : vector<12x8xf32> to vector<12xf32>
    %515 = vector.shape_cast %514 : vector<12xf32> to vector<12x1xf32>
    %c31_i32 = arith.constant 31 : i32
    %516 = vector.broadcast %c31_i32 : i32 to vector<1x72xi32>
    %517 = arith.cmpi eq, %170, %516 : vector<1x72xi32>
    %518 = arith.extui %517 : vector<1x72xi1> to vector<1x72xi32>
    %519 = arith.sitofp %518 : vector<1x72xi32> to vector<1x72xf32>
    %520 = vector.broadcast %515 : vector<12x1xf32> to vector<12x72xf32>
    %521 = vector.broadcast %519 : vector<1x72xf32> to vector<12x72xf32>
    %522 = arith.mulf %520, %521 : vector<12x72xf32>
    %523 = arith.addf %512, %522 : vector<12x72xf32>
    %c0_151 = arith.constant 0 : index
    %c256 = arith.constant 256 : index
    %524 = vector.load %arg14[%c0_151, %c256] : memref<12x576xf32, #tpu.memory_space<vmem>>, vector<12x8xf32>
    %cst_152 = arith.constant dense<0xFF800000> : vector<12xf32>
    %525 = vector.multi_reduction <maximumf>, %524, %cst_152 [1] : vector<12x8xf32> to vector<12xf32>
    %526 = vector.shape_cast %525 : vector<12xf32> to vector<12x1xf32>
    %c32_i32 = arith.constant 32 : i32
    %527 = vector.broadcast %c32_i32 : i32 to vector<1x72xi32>
    %528 = arith.cmpi eq, %170, %527 : vector<1x72xi32>
    %529 = arith.extui %528 : vector<1x72xi1> to vector<1x72xi32>
    %530 = arith.sitofp %529 : vector<1x72xi32> to vector<1x72xf32>
    %531 = vector.broadcast %526 : vector<12x1xf32> to vector<12x72xf32>
    %532 = vector.broadcast %530 : vector<1x72xf32> to vector<12x72xf32>
    %533 = arith.mulf %531, %532 : vector<12x72xf32>
    %534 = arith.addf %523, %533 : vector<12x72xf32>
    %c0_153 = arith.constant 0 : index
    %c264 = arith.constant 264 : index
    %535 = vector.load %arg14[%c0_153, %c264] : memref<12x576xf32, #tpu.memory_space<vmem>>, vector<12x8xf32>
    %cst_154 = arith.constant dense<0xFF800000> : vector<12xf32>
    %536 = vector.multi_reduction <maximumf>, %535, %cst_154 [1] : vector<12x8xf32> to vector<12xf32>
    %537 = vector.shape_cast %536 : vector<12xf32> to vector<12x1xf32>
    %c33_i32 = arith.constant 33 : i32
    %538 = vector.broadcast %c33_i32 : i32 to vector<1x72xi32>
    %539 = arith.cmpi eq, %170, %538 : vector<1x72xi32>
    %540 = arith.extui %539 : vector<1x72xi1> to vector<1x72xi32>
    %541 = arith.sitofp %540 : vector<1x72xi32> to vector<1x72xf32>
    %542 = vector.broadcast %537 : vector<12x1xf32> to vector<12x72xf32>
    %543 = vector.broadcast %541 : vector<1x72xf32> to vector<12x72xf32>
    %544 = arith.mulf %542, %543 : vector<12x72xf32>
    %545 = arith.addf %534, %544 : vector<12x72xf32>
    %c0_155 = arith.constant 0 : index
    %c272 = arith.constant 272 : index
    %546 = vector.load %arg14[%c0_155, %c272] : memref<12x576xf32, #tpu.memory_space<vmem>>, vector<12x8xf32>
    %cst_156 = arith.constant dense<0xFF800000> : vector<12xf32>
    %547 = vector.multi_reduction <maximumf>, %546, %cst_156 [1] : vector<12x8xf32> to vector<12xf32>
    %548 = vector.shape_cast %547 : vector<12xf32> to vector<12x1xf32>
    %c34_i32 = arith.constant 34 : i32
    %549 = vector.broadcast %c34_i32 : i32 to vector<1x72xi32>
    %550 = arith.cmpi eq, %170, %549 : vector<1x72xi32>
    %551 = arith.extui %550 : vector<1x72xi1> to vector<1x72xi32>
    %552 = arith.sitofp %551 : vector<1x72xi32> to vector<1x72xf32>
    %553 = vector.broadcast %548 : vector<12x1xf32> to vector<12x72xf32>
    %554 = vector.broadcast %552 : vector<1x72xf32> to vector<12x72xf32>
    %555 = arith.mulf %553, %554 : vector<12x72xf32>
    %556 = arith.addf %545, %555 : vector<12x72xf32>
    %c0_157 = arith.constant 0 : index
    %c280 = arith.constant 280 : index
    %557 = vector.load %arg14[%c0_157, %c280] : memref<12x576xf32, #tpu.memory_space<vmem>>, vector<12x8xf32>
    %cst_158 = arith.constant dense<0xFF800000> : vector<12xf32>
    %558 = vector.multi_reduction <maximumf>, %557, %cst_158 [1] : vector<12x8xf32> to vector<12xf32>
    %559 = vector.shape_cast %558 : vector<12xf32> to vector<12x1xf32>
    %c35_i32 = arith.constant 35 : i32
    %560 = vector.broadcast %c35_i32 : i32 to vector<1x72xi32>
    %561 = arith.cmpi eq, %170, %560 : vector<1x72xi32>
    %562 = arith.extui %561 : vector<1x72xi1> to vector<1x72xi32>
    %563 = arith.sitofp %562 : vector<1x72xi32> to vector<1x72xf32>
    %564 = vector.broadcast %559 : vector<12x1xf32> to vector<12x72xf32>
    %565 = vector.broadcast %563 : vector<1x72xf32> to vector<12x72xf32>
    %566 = arith.mulf %564, %565 : vector<12x72xf32>
    %567 = arith.addf %556, %566 : vector<12x72xf32>
    %c0_159 = arith.constant 0 : index
    %c288 = arith.constant 288 : index
    %568 = vector.load %arg14[%c0_159, %c288] : memref<12x576xf32, #tpu.memory_space<vmem>>, vector<12x8xf32>
    %cst_160 = arith.constant dense<0xFF800000> : vector<12xf32>
    %569 = vector.multi_reduction <maximumf>, %568, %cst_160 [1] : vector<12x8xf32> to vector<12xf32>
    %570 = vector.shape_cast %569 : vector<12xf32> to vector<12x1xf32>
    %c36_i32 = arith.constant 36 : i32
    %571 = vector.broadcast %c36_i32 : i32 to vector<1x72xi32>
    %572 = arith.cmpi eq, %170, %571 : vector<1x72xi32>
    %573 = arith.extui %572 : vector<1x72xi1> to vector<1x72xi32>
    %574 = arith.sitofp %573 : vector<1x72xi32> to vector<1x72xf32>
    %575 = vector.broadcast %570 : vector<12x1xf32> to vector<12x72xf32>
    %576 = vector.broadcast %574 : vector<1x72xf32> to vector<12x72xf32>
    %577 = arith.mulf %575, %576 : vector<12x72xf32>
    %578 = arith.addf %567, %577 : vector<12x72xf32>
    %c0_161 = arith.constant 0 : index
    %c296 = arith.constant 296 : index
    %579 = vector.load %arg14[%c0_161, %c296] : memref<12x576xf32, #tpu.memory_space<vmem>>, vector<12x8xf32>
    %cst_162 = arith.constant dense<0xFF800000> : vector<12xf32>
    %580 = vector.multi_reduction <maximumf>, %579, %cst_162 [1] : vector<12x8xf32> to vector<12xf32>
    %581 = vector.shape_cast %580 : vector<12xf32> to vector<12x1xf32>
    %c37_i32 = arith.constant 37 : i32
    %582 = vector.broadcast %c37_i32 : i32 to vector<1x72xi32>
    %583 = arith.cmpi eq, %170, %582 : vector<1x72xi32>
    %584 = arith.extui %583 : vector<1x72xi1> to vector<1x72xi32>
    %585 = arith.sitofp %584 : vector<1x72xi32> to vector<1x72xf32>
    %586 = vector.broadcast %581 : vector<12x1xf32> to vector<12x72xf32>
    %587 = vector.broadcast %585 : vector<1x72xf32> to vector<12x72xf32>
    %588 = arith.mulf %586, %587 : vector<12x72xf32>
    %589 = arith.addf %578, %588 : vector<12x72xf32>
    %c0_163 = arith.constant 0 : index
    %c304 = arith.constant 304 : index
    %590 = vector.load %arg14[%c0_163, %c304] : memref<12x576xf32, #tpu.memory_space<vmem>>, vector<12x8xf32>
    %cst_164 = arith.constant dense<0xFF800000> : vector<12xf32>
    %591 = vector.multi_reduction <maximumf>, %590, %cst_164 [1] : vector<12x8xf32> to vector<12xf32>
    %592 = vector.shape_cast %591 : vector<12xf32> to vector<12x1xf32>
    %c38_i32 = arith.constant 38 : i32
    %593 = vector.broadcast %c38_i32 : i32 to vector<1x72xi32>
    %594 = arith.cmpi eq, %170, %593 : vector<1x72xi32>
    %595 = arith.extui %594 : vector<1x72xi1> to vector<1x72xi32>
    %596 = arith.sitofp %595 : vector<1x72xi32> to vector<1x72xf32>
    %597 = vector.broadcast %592 : vector<12x1xf32> to vector<12x72xf32>
    %598 = vector.broadcast %596 : vector<1x72xf32> to vector<12x72xf32>
    %599 = arith.mulf %597, %598 : vector<12x72xf32>
    %600 = arith.addf %589, %599 : vector<12x72xf32>
    %c0_165 = arith.constant 0 : index
    %c312 = arith.constant 312 : index
    %601 = vector.load %arg14[%c0_165, %c312] : memref<12x576xf32, #tpu.memory_space<vmem>>, vector<12x8xf32>
    %cst_166 = arith.constant dense<0xFF800000> : vector<12xf32>
    %602 = vector.multi_reduction <maximumf>, %601, %cst_166 [1] : vector<12x8xf32> to vector<12xf32>
    %603 = vector.shape_cast %602 : vector<12xf32> to vector<12x1xf32>
    %c39_i32 = arith.constant 39 : i32
    %604 = vector.broadcast %c39_i32 : i32 to vector<1x72xi32>
    %605 = arith.cmpi eq, %170, %604 : vector<1x72xi32>
    %606 = arith.extui %605 : vector<1x72xi1> to vector<1x72xi32>
    %607 = arith.sitofp %606 : vector<1x72xi32> to vector<1x72xf32>
    %608 = vector.broadcast %603 : vector<12x1xf32> to vector<12x72xf32>
    %609 = vector.broadcast %607 : vector<1x72xf32> to vector<12x72xf32>
    %610 = arith.mulf %608, %609 : vector<12x72xf32>
    %611 = arith.addf %600, %610 : vector<12x72xf32>
    %c0_167 = arith.constant 0 : index
    %c320 = arith.constant 320 : index
    %612 = vector.load %arg14[%c0_167, %c320] : memref<12x576xf32, #tpu.memory_space<vmem>>, vector<12x8xf32>
    %cst_168 = arith.constant dense<0xFF800000> : vector<12xf32>
    %613 = vector.multi_reduction <maximumf>, %612, %cst_168 [1] : vector<12x8xf32> to vector<12xf32>
    %614 = vector.shape_cast %613 : vector<12xf32> to vector<12x1xf32>
    %c40_i32 = arith.constant 40 : i32
    %615 = vector.broadcast %c40_i32 : i32 to vector<1x72xi32>
    %616 = arith.cmpi eq, %170, %615 : vector<1x72xi32>
    %617 = arith.extui %616 : vector<1x72xi1> to vector<1x72xi32>
    %618 = arith.sitofp %617 : vector<1x72xi32> to vector<1x72xf32>
    %619 = vector.broadcast %614 : vector<12x1xf32> to vector<12x72xf32>
    %620 = vector.broadcast %618 : vector<1x72xf32> to vector<12x72xf32>
    %621 = arith.mulf %619, %620 : vector<12x72xf32>
    %622 = arith.addf %611, %621 : vector<12x72xf32>
    %c0_169 = arith.constant 0 : index
    %c328 = arith.constant 328 : index
    %623 = vector.load %arg14[%c0_169, %c328] : memref<12x576xf32, #tpu.memory_space<vmem>>, vector<12x8xf32>
    %cst_170 = arith.constant dense<0xFF800000> : vector<12xf32>
    %624 = vector.multi_reduction <maximumf>, %623, %cst_170 [1] : vector<12x8xf32> to vector<12xf32>
    %625 = vector.shape_cast %624 : vector<12xf32> to vector<12x1xf32>
    %c41_i32 = arith.constant 41 : i32
    %626 = vector.broadcast %c41_i32 : i32 to vector<1x72xi32>
    %627 = arith.cmpi eq, %170, %626 : vector<1x72xi32>
    %628 = arith.extui %627 : vector<1x72xi1> to vector<1x72xi32>
    %629 = arith.sitofp %628 : vector<1x72xi32> to vector<1x72xf32>
    %630 = vector.broadcast %625 : vector<12x1xf32> to vector<12x72xf32>
    %631 = vector.broadcast %629 : vector<1x72xf32> to vector<12x72xf32>
    %632 = arith.mulf %630, %631 : vector<12x72xf32>
    %633 = arith.addf %622, %632 : vector<12x72xf32>
    %c0_171 = arith.constant 0 : index
    %c336 = arith.constant 336 : index
    %634 = vector.load %arg14[%c0_171, %c336] : memref<12x576xf32, #tpu.memory_space<vmem>>, vector<12x8xf32>
    %cst_172 = arith.constant dense<0xFF800000> : vector<12xf32>
    %635 = vector.multi_reduction <maximumf>, %634, %cst_172 [1] : vector<12x8xf32> to vector<12xf32>
    %636 = vector.shape_cast %635 : vector<12xf32> to vector<12x1xf32>
    %c42_i32 = arith.constant 42 : i32
    %637 = vector.broadcast %c42_i32 : i32 to vector<1x72xi32>
    %638 = arith.cmpi eq, %170, %637 : vector<1x72xi32>
    %639 = arith.extui %638 : vector<1x72xi1> to vector<1x72xi32>
    %640 = arith.sitofp %639 : vector<1x72xi32> to vector<1x72xf32>
    %641 = vector.broadcast %636 : vector<12x1xf32> to vector<12x72xf32>
    %642 = vector.broadcast %640 : vector<1x72xf32> to vector<12x72xf32>
    %643 = arith.mulf %641, %642 : vector<12x72xf32>
    %644 = arith.addf %633, %643 : vector<12x72xf32>
    %c0_173 = arith.constant 0 : index
    %c344 = arith.constant 344 : index
    %645 = vector.load %arg14[%c0_173, %c344] : memref<12x576xf32, #tpu.memory_space<vmem>>, vector<12x8xf32>
    %cst_174 = arith.constant dense<0xFF800000> : vector<12xf32>
    %646 = vector.multi_reduction <maximumf>, %645, %cst_174 [1] : vector<12x8xf32> to vector<12xf32>
    %647 = vector.shape_cast %646 : vector<12xf32> to vector<12x1xf32>
    %c43_i32 = arith.constant 43 : i32
    %648 = vector.broadcast %c43_i32 : i32 to vector<1x72xi32>
    %649 = arith.cmpi eq, %170, %648 : vector<1x72xi32>
    %650 = arith.extui %649 : vector<1x72xi1> to vector<1x72xi32>
    %651 = arith.sitofp %650 : vector<1x72xi32> to vector<1x72xf32>
    %652 = vector.broadcast %647 : vector<12x1xf32> to vector<12x72xf32>
    %653 = vector.broadcast %651 : vector<1x72xf32> to vector<12x72xf32>
    %654 = arith.mulf %652, %653 : vector<12x72xf32>
    %655 = arith.addf %644, %654 : vector<12x72xf32>
    %c0_175 = arith.constant 0 : index
    %c352 = arith.constant 352 : index
    %656 = vector.load %arg14[%c0_175, %c352] : memref<12x576xf32, #tpu.memory_space<vmem>>, vector<12x8xf32>
    %cst_176 = arith.constant dense<0xFF800000> : vector<12xf32>
    %657 = vector.multi_reduction <maximumf>, %656, %cst_176 [1] : vector<12x8xf32> to vector<12xf32>
    %658 = vector.shape_cast %657 : vector<12xf32> to vector<12x1xf32>
    %c44_i32 = arith.constant 44 : i32
    %659 = vector.broadcast %c44_i32 : i32 to vector<1x72xi32>
    %660 = arith.cmpi eq, %170, %659 : vector<1x72xi32>
    %661 = arith.extui %660 : vector<1x72xi1> to vector<1x72xi32>
    %662 = arith.sitofp %661 : vector<1x72xi32> to vector<1x72xf32>
    %663 = vector.broadcast %658 : vector<12x1xf32> to vector<12x72xf32>
    %664 = vector.broadcast %662 : vector<1x72xf32> to vector<12x72xf32>
    %665 = arith.mulf %663, %664 : vector<12x72xf32>
    %666 = arith.addf %655, %665 : vector<12x72xf32>
    %c0_177 = arith.constant 0 : index
    %c360 = arith.constant 360 : index
    %667 = vector.load %arg14[%c0_177, %c360] : memref<12x576xf32, #tpu.memory_space<vmem>>, vector<12x8xf32>
    %cst_178 = arith.constant dense<0xFF800000> : vector<12xf32>
    %668 = vector.multi_reduction <maximumf>, %667, %cst_178 [1] : vector<12x8xf32> to vector<12xf32>
    %669 = vector.shape_cast %668 : vector<12xf32> to vector<12x1xf32>
    %c45_i32 = arith.constant 45 : i32
    %670 = vector.broadcast %c45_i32 : i32 to vector<1x72xi32>
    %671 = arith.cmpi eq, %170, %670 : vector<1x72xi32>
    %672 = arith.extui %671 : vector<1x72xi1> to vector<1x72xi32>
    %673 = arith.sitofp %672 : vector<1x72xi32> to vector<1x72xf32>
    %674 = vector.broadcast %669 : vector<12x1xf32> to vector<12x72xf32>
    %675 = vector.broadcast %673 : vector<1x72xf32> to vector<12x72xf32>
    %676 = arith.mulf %674, %675 : vector<12x72xf32>
    %677 = arith.addf %666, %676 : vector<12x72xf32>
    %c0_179 = arith.constant 0 : index
    %c368 = arith.constant 368 : index
    %678 = vector.load %arg14[%c0_179, %c368] : memref<12x576xf32, #tpu.memory_space<vmem>>, vector<12x8xf32>
    %cst_180 = arith.constant dense<0xFF800000> : vector<12xf32>
    %679 = vector.multi_reduction <maximumf>, %678, %cst_180 [1] : vector<12x8xf32> to vector<12xf32>
    %680 = vector.shape_cast %679 : vector<12xf32> to vector<12x1xf32>
    %c46_i32 = arith.constant 46 : i32
    %681 = vector.broadcast %c46_i32 : i32 to vector<1x72xi32>
    %682 = arith.cmpi eq, %170, %681 : vector<1x72xi32>
    %683 = arith.extui %682 : vector<1x72xi1> to vector<1x72xi32>
    %684 = arith.sitofp %683 : vector<1x72xi32> to vector<1x72xf32>
    %685 = vector.broadcast %680 : vector<12x1xf32> to vector<12x72xf32>
    %686 = vector.broadcast %684 : vector<1x72xf32> to vector<12x72xf32>
    %687 = arith.mulf %685, %686 : vector<12x72xf32>
    %688 = arith.addf %677, %687 : vector<12x72xf32>
    %c0_181 = arith.constant 0 : index
    %c376 = arith.constant 376 : index
    %689 = vector.load %arg14[%c0_181, %c376] : memref<12x576xf32, #tpu.memory_space<vmem>>, vector<12x8xf32>
    %cst_182 = arith.constant dense<0xFF800000> : vector<12xf32>
    %690 = vector.multi_reduction <maximumf>, %689, %cst_182 [1] : vector<12x8xf32> to vector<12xf32>
    %691 = vector.shape_cast %690 : vector<12xf32> to vector<12x1xf32>
    %c47_i32 = arith.constant 47 : i32
    %692 = vector.broadcast %c47_i32 : i32 to vector<1x72xi32>
    %693 = arith.cmpi eq, %170, %692 : vector<1x72xi32>
    %694 = arith.extui %693 : vector<1x72xi1> to vector<1x72xi32>
    %695 = arith.sitofp %694 : vector<1x72xi32> to vector<1x72xf32>
    %696 = vector.broadcast %691 : vector<12x1xf32> to vector<12x72xf32>
    %697 = vector.broadcast %695 : vector<1x72xf32> to vector<12x72xf32>
    %698 = arith.mulf %696, %697 : vector<12x72xf32>
    %699 = arith.addf %688, %698 : vector<12x72xf32>
    %c0_183 = arith.constant 0 : index
    %c384 = arith.constant 384 : index
    %700 = vector.load %arg14[%c0_183, %c384] : memref<12x576xf32, #tpu.memory_space<vmem>>, vector<12x8xf32>
    %cst_184 = arith.constant dense<0xFF800000> : vector<12xf32>
    %701 = vector.multi_reduction <maximumf>, %700, %cst_184 [1] : vector<12x8xf32> to vector<12xf32>
    %702 = vector.shape_cast %701 : vector<12xf32> to vector<12x1xf32>
    %c48_i32 = arith.constant 48 : i32
    %703 = vector.broadcast %c48_i32 : i32 to vector<1x72xi32>
    %704 = arith.cmpi eq, %170, %703 : vector<1x72xi32>
    %705 = arith.extui %704 : vector<1x72xi1> to vector<1x72xi32>
    %706 = arith.sitofp %705 : vector<1x72xi32> to vector<1x72xf32>
    %707 = vector.broadcast %702 : vector<12x1xf32> to vector<12x72xf32>
    %708 = vector.broadcast %706 : vector<1x72xf32> to vector<12x72xf32>
    %709 = arith.mulf %707, %708 : vector<12x72xf32>
    %710 = arith.addf %699, %709 : vector<12x72xf32>
    %c0_185 = arith.constant 0 : index
    %c392 = arith.constant 392 : index
    %711 = vector.load %arg14[%c0_185, %c392] : memref<12x576xf32, #tpu.memory_space<vmem>>, vector<12x8xf32>
    %cst_186 = arith.constant dense<0xFF800000> : vector<12xf32>
    %712 = vector.multi_reduction <maximumf>, %711, %cst_186 [1] : vector<12x8xf32> to vector<12xf32>
    %713 = vector.shape_cast %712 : vector<12xf32> to vector<12x1xf32>
    %c49_i32 = arith.constant 49 : i32
    %714 = vector.broadcast %c49_i32 : i32 to vector<1x72xi32>
    %715 = arith.cmpi eq, %170, %714 : vector<1x72xi32>
    %716 = arith.extui %715 : vector<1x72xi1> to vector<1x72xi32>
    %717 = arith.sitofp %716 : vector<1x72xi32> to vector<1x72xf32>
    %718 = vector.broadcast %713 : vector<12x1xf32> to vector<12x72xf32>
    %719 = vector.broadcast %717 : vector<1x72xf32> to vector<12x72xf32>
    %720 = arith.mulf %718, %719 : vector<12x72xf32>
    %721 = arith.addf %710, %720 : vector<12x72xf32>
    %c0_187 = arith.constant 0 : index
    %c400 = arith.constant 400 : index
    %722 = vector.load %arg14[%c0_187, %c400] : memref<12x576xf32, #tpu.memory_space<vmem>>, vector<12x8xf32>
    %cst_188 = arith.constant dense<0xFF800000> : vector<12xf32>
    %723 = vector.multi_reduction <maximumf>, %722, %cst_188 [1] : vector<12x8xf32> to vector<12xf32>
    %724 = vector.shape_cast %723 : vector<12xf32> to vector<12x1xf32>
    %c50_i32 = arith.constant 50 : i32
    %725 = vector.broadcast %c50_i32 : i32 to vector<1x72xi32>
    %726 = arith.cmpi eq, %170, %725 : vector<1x72xi32>
    %727 = arith.extui %726 : vector<1x72xi1> to vector<1x72xi32>
    %728 = arith.sitofp %727 : vector<1x72xi32> to vector<1x72xf32>
    %729 = vector.broadcast %724 : vector<12x1xf32> to vector<12x72xf32>
    %730 = vector.broadcast %728 : vector<1x72xf32> to vector<12x72xf32>
    %731 = arith.mulf %729, %730 : vector<12x72xf32>
    %732 = arith.addf %721, %731 : vector<12x72xf32>
    %c0_189 = arith.constant 0 : index
    %c408 = arith.constant 408 : index
    %733 = vector.load %arg14[%c0_189, %c408] : memref<12x576xf32, #tpu.memory_space<vmem>>, vector<12x8xf32>
    %cst_190 = arith.constant dense<0xFF800000> : vector<12xf32>
    %734 = vector.multi_reduction <maximumf>, %733, %cst_190 [1] : vector<12x8xf32> to vector<12xf32>
    %735 = vector.shape_cast %734 : vector<12xf32> to vector<12x1xf32>
    %c51_i32 = arith.constant 51 : i32
    %736 = vector.broadcast %c51_i32 : i32 to vector<1x72xi32>
    %737 = arith.cmpi eq, %170, %736 : vector<1x72xi32>
    %738 = arith.extui %737 : vector<1x72xi1> to vector<1x72xi32>
    %739 = arith.sitofp %738 : vector<1x72xi32> to vector<1x72xf32>
    %740 = vector.broadcast %735 : vector<12x1xf32> to vector<12x72xf32>
    %741 = vector.broadcast %739 : vector<1x72xf32> to vector<12x72xf32>
    %742 = arith.mulf %740, %741 : vector<12x72xf32>
    %743 = arith.addf %732, %742 : vector<12x72xf32>
    %c0_191 = arith.constant 0 : index
    %c416 = arith.constant 416 : index
    %744 = vector.load %arg14[%c0_191, %c416] : memref<12x576xf32, #tpu.memory_space<vmem>>, vector<12x8xf32>
    %cst_192 = arith.constant dense<0xFF800000> : vector<12xf32>
    %745 = vector.multi_reduction <maximumf>, %744, %cst_192 [1] : vector<12x8xf32> to vector<12xf32>
    %746 = vector.shape_cast %745 : vector<12xf32> to vector<12x1xf32>
    %c52_i32 = arith.constant 52 : i32
    %747 = vector.broadcast %c52_i32 : i32 to vector<1x72xi32>
    %748 = arith.cmpi eq, %170, %747 : vector<1x72xi32>
    %749 = arith.extui %748 : vector<1x72xi1> to vector<1x72xi32>
    %750 = arith.sitofp %749 : vector<1x72xi32> to vector<1x72xf32>
    %751 = vector.broadcast %746 : vector<12x1xf32> to vector<12x72xf32>
    %752 = vector.broadcast %750 : vector<1x72xf32> to vector<12x72xf32>
    %753 = arith.mulf %751, %752 : vector<12x72xf32>
    %754 = arith.addf %743, %753 : vector<12x72xf32>
    %c0_193 = arith.constant 0 : index
    %c424 = arith.constant 424 : index
    %755 = vector.load %arg14[%c0_193, %c424] : memref<12x576xf32, #tpu.memory_space<vmem>>, vector<12x8xf32>
    %cst_194 = arith.constant dense<0xFF800000> : vector<12xf32>
    %756 = vector.multi_reduction <maximumf>, %755, %cst_194 [1] : vector<12x8xf32> to vector<12xf32>
    %757 = vector.shape_cast %756 : vector<12xf32> to vector<12x1xf32>
    %c53_i32 = arith.constant 53 : i32
    %758 = vector.broadcast %c53_i32 : i32 to vector<1x72xi32>
    %759 = arith.cmpi eq, %170, %758 : vector<1x72xi32>
    %760 = arith.extui %759 : vector<1x72xi1> to vector<1x72xi32>
    %761 = arith.sitofp %760 : vector<1x72xi32> to vector<1x72xf32>
    %762 = vector.broadcast %757 : vector<12x1xf32> to vector<12x72xf32>
    %763 = vector.broadcast %761 : vector<1x72xf32> to vector<12x72xf32>
    %764 = arith.mulf %762, %763 : vector<12x72xf32>
    %765 = arith.addf %754, %764 : vector<12x72xf32>
    %c0_195 = arith.constant 0 : index
    %c432 = arith.constant 432 : index
    %766 = vector.load %arg14[%c0_195, %c432] : memref<12x576xf32, #tpu.memory_space<vmem>>, vector<12x8xf32>
    %cst_196 = arith.constant dense<0xFF800000> : vector<12xf32>
    %767 = vector.multi_reduction <maximumf>, %766, %cst_196 [1] : vector<12x8xf32> to vector<12xf32>
    %768 = vector.shape_cast %767 : vector<12xf32> to vector<12x1xf32>
    %c54_i32 = arith.constant 54 : i32
    %769 = vector.broadcast %c54_i32 : i32 to vector<1x72xi32>
    %770 = arith.cmpi eq, %170, %769 : vector<1x72xi32>
    %771 = arith.extui %770 : vector<1x72xi1> to vector<1x72xi32>
    %772 = arith.sitofp %771 : vector<1x72xi32> to vector<1x72xf32>
    %773 = vector.broadcast %768 : vector<12x1xf32> to vector<12x72xf32>
    %774 = vector.broadcast %772 : vector<1x72xf32> to vector<12x72xf32>
    %775 = arith.mulf %773, %774 : vector<12x72xf32>
    %776 = arith.addf %765, %775 : vector<12x72xf32>
    %c0_197 = arith.constant 0 : index
    %c440 = arith.constant 440 : index
    %777 = vector.load %arg14[%c0_197, %c440] : memref<12x576xf32, #tpu.memory_space<vmem>>, vector<12x8xf32>
    %cst_198 = arith.constant dense<0xFF800000> : vector<12xf32>
    %778 = vector.multi_reduction <maximumf>, %777, %cst_198 [1] : vector<12x8xf32> to vector<12xf32>
    %779 = vector.shape_cast %778 : vector<12xf32> to vector<12x1xf32>
    %c55_i32 = arith.constant 55 : i32
    %780 = vector.broadcast %c55_i32 : i32 to vector<1x72xi32>
    %781 = arith.cmpi eq, %170, %780 : vector<1x72xi32>
    %782 = arith.extui %781 : vector<1x72xi1> to vector<1x72xi32>
    %783 = arith.sitofp %782 : vector<1x72xi32> to vector<1x72xf32>
    %784 = vector.broadcast %779 : vector<12x1xf32> to vector<12x72xf32>
    %785 = vector.broadcast %783 : vector<1x72xf32> to vector<12x72xf32>
    %786 = arith.mulf %784, %785 : vector<12x72xf32>
    %787 = arith.addf %776, %786 : vector<12x72xf32>
    %c0_199 = arith.constant 0 : index
    %c448 = arith.constant 448 : index
    %788 = vector.load %arg14[%c0_199, %c448] : memref<12x576xf32, #tpu.memory_space<vmem>>, vector<12x8xf32>
    %cst_200 = arith.constant dense<0xFF800000> : vector<12xf32>
    %789 = vector.multi_reduction <maximumf>, %788, %cst_200 [1] : vector<12x8xf32> to vector<12xf32>
    %790 = vector.shape_cast %789 : vector<12xf32> to vector<12x1xf32>
    %c56_i32 = arith.constant 56 : i32
    %791 = vector.broadcast %c56_i32 : i32 to vector<1x72xi32>
    %792 = arith.cmpi eq, %170, %791 : vector<1x72xi32>
    %793 = arith.extui %792 : vector<1x72xi1> to vector<1x72xi32>
    %794 = arith.sitofp %793 : vector<1x72xi32> to vector<1x72xf32>
    %795 = vector.broadcast %790 : vector<12x1xf32> to vector<12x72xf32>
    %796 = vector.broadcast %794 : vector<1x72xf32> to vector<12x72xf32>
    %797 = arith.mulf %795, %796 : vector<12x72xf32>
    %798 = arith.addf %787, %797 : vector<12x72xf32>
    %c0_201 = arith.constant 0 : index
    %c456 = arith.constant 456 : index
    %799 = vector.load %arg14[%c0_201, %c456] : memref<12x576xf32, #tpu.memory_space<vmem>>, vector<12x8xf32>
    %cst_202 = arith.constant dense<0xFF800000> : vector<12xf32>
    %800 = vector.multi_reduction <maximumf>, %799, %cst_202 [1] : vector<12x8xf32> to vector<12xf32>
    %801 = vector.shape_cast %800 : vector<12xf32> to vector<12x1xf32>
    %c57_i32 = arith.constant 57 : i32
    %802 = vector.broadcast %c57_i32 : i32 to vector<1x72xi32>
    %803 = arith.cmpi eq, %170, %802 : vector<1x72xi32>
    %804 = arith.extui %803 : vector<1x72xi1> to vector<1x72xi32>
    %805 = arith.sitofp %804 : vector<1x72xi32> to vector<1x72xf32>
    %806 = vector.broadcast %801 : vector<12x1xf32> to vector<12x72xf32>
    %807 = vector.broadcast %805 : vector<1x72xf32> to vector<12x72xf32>
    %808 = arith.mulf %806, %807 : vector<12x72xf32>
    %809 = arith.addf %798, %808 : vector<12x72xf32>
    %c0_203 = arith.constant 0 : index
    %c464 = arith.constant 464 : index
    %810 = vector.load %arg14[%c0_203, %c464] : memref<12x576xf32, #tpu.memory_space<vmem>>, vector<12x8xf32>
    %cst_204 = arith.constant dense<0xFF800000> : vector<12xf32>
    %811 = vector.multi_reduction <maximumf>, %810, %cst_204 [1] : vector<12x8xf32> to vector<12xf32>
    %812 = vector.shape_cast %811 : vector<12xf32> to vector<12x1xf32>
    %c58_i32 = arith.constant 58 : i32
    %813 = vector.broadcast %c58_i32 : i32 to vector<1x72xi32>
    %814 = arith.cmpi eq, %170, %813 : vector<1x72xi32>
    %815 = arith.extui %814 : vector<1x72xi1> to vector<1x72xi32>
    %816 = arith.sitofp %815 : vector<1x72xi32> to vector<1x72xf32>
    %817 = vector.broadcast %812 : vector<12x1xf32> to vector<12x72xf32>
    %818 = vector.broadcast %816 : vector<1x72xf32> to vector<12x72xf32>
    %819 = arith.mulf %817, %818 : vector<12x72xf32>
    %820 = arith.addf %809, %819 : vector<12x72xf32>
    %c0_205 = arith.constant 0 : index
    %c472 = arith.constant 472 : index
    %821 = vector.load %arg14[%c0_205, %c472] : memref<12x576xf32, #tpu.memory_space<vmem>>, vector<12x8xf32>
    %cst_206 = arith.constant dense<0xFF800000> : vector<12xf32>
    %822 = vector.multi_reduction <maximumf>, %821, %cst_206 [1] : vector<12x8xf32> to vector<12xf32>
    %823 = vector.shape_cast %822 : vector<12xf32> to vector<12x1xf32>
    %c59_i32 = arith.constant 59 : i32
    %824 = vector.broadcast %c59_i32 : i32 to vector<1x72xi32>
    %825 = arith.cmpi eq, %170, %824 : vector<1x72xi32>
    %826 = arith.extui %825 : vector<1x72xi1> to vector<1x72xi32>
    %827 = arith.sitofp %826 : vector<1x72xi32> to vector<1x72xf32>
    %828 = vector.broadcast %823 : vector<12x1xf32> to vector<12x72xf32>
    %829 = vector.broadcast %827 : vector<1x72xf32> to vector<12x72xf32>
    %830 = arith.mulf %828, %829 : vector<12x72xf32>
    %831 = arith.addf %820, %830 : vector<12x72xf32>
    %c0_207 = arith.constant 0 : index
    %c480 = arith.constant 480 : index
    %832 = vector.load %arg14[%c0_207, %c480] : memref<12x576xf32, #tpu.memory_space<vmem>>, vector<12x8xf32>
    %cst_208 = arith.constant dense<0xFF800000> : vector<12xf32>
    %833 = vector.multi_reduction <maximumf>, %832, %cst_208 [1] : vector<12x8xf32> to vector<12xf32>
    %834 = vector.shape_cast %833 : vector<12xf32> to vector<12x1xf32>
    %c60_i32 = arith.constant 60 : i32
    %835 = vector.broadcast %c60_i32 : i32 to vector<1x72xi32>
    %836 = arith.cmpi eq, %170, %835 : vector<1x72xi32>
    %837 = arith.extui %836 : vector<1x72xi1> to vector<1x72xi32>
    %838 = arith.sitofp %837 : vector<1x72xi32> to vector<1x72xf32>
    %839 = vector.broadcast %834 : vector<12x1xf32> to vector<12x72xf32>
    %840 = vector.broadcast %838 : vector<1x72xf32> to vector<12x72xf32>
    %841 = arith.mulf %839, %840 : vector<12x72xf32>
    %842 = arith.addf %831, %841 : vector<12x72xf32>
    %c0_209 = arith.constant 0 : index
    %c488 = arith.constant 488 : index
    %843 = vector.load %arg14[%c0_209, %c488] : memref<12x576xf32, #tpu.memory_space<vmem>>, vector<12x8xf32>
    %cst_210 = arith.constant dense<0xFF800000> : vector<12xf32>
    %844 = vector.multi_reduction <maximumf>, %843, %cst_210 [1] : vector<12x8xf32> to vector<12xf32>
    %845 = vector.shape_cast %844 : vector<12xf32> to vector<12x1xf32>
    %c61_i32 = arith.constant 61 : i32
    %846 = vector.broadcast %c61_i32 : i32 to vector<1x72xi32>
    %847 = arith.cmpi eq, %170, %846 : vector<1x72xi32>
    %848 = arith.extui %847 : vector<1x72xi1> to vector<1x72xi32>
    %849 = arith.sitofp %848 : vector<1x72xi32> to vector<1x72xf32>
    %850 = vector.broadcast %845 : vector<12x1xf32> to vector<12x72xf32>
    %851 = vector.broadcast %849 : vector<1x72xf32> to vector<12x72xf32>
    %852 = arith.mulf %850, %851 : vector<12x72xf32>
    %853 = arith.addf %842, %852 : vector<12x72xf32>
    %c0_211 = arith.constant 0 : index
    %c496 = arith.constant 496 : index
    %854 = vector.load %arg14[%c0_211, %c496] : memref<12x576xf32, #tpu.memory_space<vmem>>, vector<12x8xf32>
    %cst_212 = arith.constant dense<0xFF800000> : vector<12xf32>
    %855 = vector.multi_reduction <maximumf>, %854, %cst_212 [1] : vector<12x8xf32> to vector<12xf32>
    %856 = vector.shape_cast %855 : vector<12xf32> to vector<12x1xf32>
    %c62_i32 = arith.constant 62 : i32
    %857 = vector.broadcast %c62_i32 : i32 to vector<1x72xi32>
    %858 = arith.cmpi eq, %170, %857 : vector<1x72xi32>
    %859 = arith.extui %858 : vector<1x72xi1> to vector<1x72xi32>
    %860 = arith.sitofp %859 : vector<1x72xi32> to vector<1x72xf32>
    %861 = vector.broadcast %856 : vector<12x1xf32> to vector<12x72xf32>
    %862 = vector.broadcast %860 : vector<1x72xf32> to vector<12x72xf32>
    %863 = arith.mulf %861, %862 : vector<12x72xf32>
    %864 = arith.addf %853, %863 : vector<12x72xf32>
    %c0_213 = arith.constant 0 : index
    %c504 = arith.constant 504 : index
    %865 = vector.load %arg14[%c0_213, %c504] : memref<12x576xf32, #tpu.memory_space<vmem>>, vector<12x8xf32>
    %cst_214 = arith.constant dense<0xFF800000> : vector<12xf32>
    %866 = vector.multi_reduction <maximumf>, %865, %cst_214 [1] : vector<12x8xf32> to vector<12xf32>
    %867 = vector.shape_cast %866 : vector<12xf32> to vector<12x1xf32>
    %c63_i32 = arith.constant 63 : i32
    %868 = vector.broadcast %c63_i32 : i32 to vector<1x72xi32>
    %869 = arith.cmpi eq, %170, %868 : vector<1x72xi32>
    %870 = arith.extui %869 : vector<1x72xi1> to vector<1x72xi32>
    %871 = arith.sitofp %870 : vector<1x72xi32> to vector<1x72xf32>
    %872 = vector.broadcast %867 : vector<12x1xf32> to vector<12x72xf32>
    %873 = vector.broadcast %871 : vector<1x72xf32> to vector<12x72xf32>
    %874 = arith.mulf %872, %873 : vector<12x72xf32>
    %875 = arith.addf %864, %874 : vector<12x72xf32>
    %c0_215 = arith.constant 0 : index
    %c512 = arith.constant 512 : index
    %876 = vector.load %arg14[%c0_215, %c512] : memref<12x576xf32, #tpu.memory_space<vmem>>, vector<12x8xf32>
    %cst_216 = arith.constant dense<0xFF800000> : vector<12xf32>
    %877 = vector.multi_reduction <maximumf>, %876, %cst_216 [1] : vector<12x8xf32> to vector<12xf32>
    %878 = vector.shape_cast %877 : vector<12xf32> to vector<12x1xf32>
    %c64_i32 = arith.constant 64 : i32
    %879 = vector.broadcast %c64_i32 : i32 to vector<1x72xi32>
    %880 = arith.cmpi eq, %170, %879 : vector<1x72xi32>
    %881 = arith.extui %880 : vector<1x72xi1> to vector<1x72xi32>
    %882 = arith.sitofp %881 : vector<1x72xi32> to vector<1x72xf32>
    %883 = vector.broadcast %878 : vector<12x1xf32> to vector<12x72xf32>
    %884 = vector.broadcast %882 : vector<1x72xf32> to vector<12x72xf32>
    %885 = arith.mulf %883, %884 : vector<12x72xf32>
    %886 = arith.addf %875, %885 : vector<12x72xf32>
    %c0_217 = arith.constant 0 : index
    %c520 = arith.constant 520 : index
    %887 = vector.load %arg14[%c0_217, %c520] : memref<12x576xf32, #tpu.memory_space<vmem>>, vector<12x8xf32>
    %cst_218 = arith.constant dense<0xFF800000> : vector<12xf32>
    %888 = vector.multi_reduction <maximumf>, %887, %cst_218 [1] : vector<12x8xf32> to vector<12xf32>
    %889 = vector.shape_cast %888 : vector<12xf32> to vector<12x1xf32>
    %c65_i32 = arith.constant 65 : i32
    %890 = vector.broadcast %c65_i32 : i32 to vector<1x72xi32>
    %891 = arith.cmpi eq, %170, %890 : vector<1x72xi32>
    %892 = arith.extui %891 : vector<1x72xi1> to vector<1x72xi32>
    %893 = arith.sitofp %892 : vector<1x72xi32> to vector<1x72xf32>
    %894 = vector.broadcast %889 : vector<12x1xf32> to vector<12x72xf32>
    %895 = vector.broadcast %893 : vector<1x72xf32> to vector<12x72xf32>
    %896 = arith.mulf %894, %895 : vector<12x72xf32>
    %897 = arith.addf %886, %896 : vector<12x72xf32>
    %c0_219 = arith.constant 0 : index
    %c528 = arith.constant 528 : index
    %898 = vector.load %arg14[%c0_219, %c528] : memref<12x576xf32, #tpu.memory_space<vmem>>, vector<12x8xf32>
    %cst_220 = arith.constant dense<0xFF800000> : vector<12xf32>
    %899 = vector.multi_reduction <maximumf>, %898, %cst_220 [1] : vector<12x8xf32> to vector<12xf32>
    %900 = vector.shape_cast %899 : vector<12xf32> to vector<12x1xf32>
    %c66_i32 = arith.constant 66 : i32
    %901 = vector.broadcast %c66_i32 : i32 to vector<1x72xi32>
    %902 = arith.cmpi eq, %170, %901 : vector<1x72xi32>
    %903 = arith.extui %902 : vector<1x72xi1> to vector<1x72xi32>
    %904 = arith.sitofp %903 : vector<1x72xi32> to vector<1x72xf32>
    %905 = vector.broadcast %900 : vector<12x1xf32> to vector<12x72xf32>
    %906 = vector.broadcast %904 : vector<1x72xf32> to vector<12x72xf32>
    %907 = arith.mulf %905, %906 : vector<12x72xf32>
    %908 = arith.addf %897, %907 : vector<12x72xf32>
    %c0_221 = arith.constant 0 : index
    %c536 = arith.constant 536 : index
    %909 = vector.load %arg14[%c0_221, %c536] : memref<12x576xf32, #tpu.memory_space<vmem>>, vector<12x8xf32>
    %cst_222 = arith.constant dense<0xFF800000> : vector<12xf32>
    %910 = vector.multi_reduction <maximumf>, %909, %cst_222 [1] : vector<12x8xf32> to vector<12xf32>
    %911 = vector.shape_cast %910 : vector<12xf32> to vector<12x1xf32>
    %c67_i32 = arith.constant 67 : i32
    %912 = vector.broadcast %c67_i32 : i32 to vector<1x72xi32>
    %913 = arith.cmpi eq, %170, %912 : vector<1x72xi32>
    %914 = arith.extui %913 : vector<1x72xi1> to vector<1x72xi32>
    %915 = arith.sitofp %914 : vector<1x72xi32> to vector<1x72xf32>
    %916 = vector.broadcast %911 : vector<12x1xf32> to vector<12x72xf32>
    %917 = vector.broadcast %915 : vector<1x72xf32> to vector<12x72xf32>
    %918 = arith.mulf %916, %917 : vector<12x72xf32>
    %919 = arith.addf %908, %918 : vector<12x72xf32>
    %c0_223 = arith.constant 0 : index
    %c544 = arith.constant 544 : index
    %920 = vector.load %arg14[%c0_223, %c544] : memref<12x576xf32, #tpu.memory_space<vmem>>, vector<12x8xf32>
    %cst_224 = arith.constant dense<0xFF800000> : vector<12xf32>
    %921 = vector.multi_reduction <maximumf>, %920, %cst_224 [1] : vector<12x8xf32> to vector<12xf32>
    %922 = vector.shape_cast %921 : vector<12xf32> to vector<12x1xf32>
    %c68_i32 = arith.constant 68 : i32
    %923 = vector.broadcast %c68_i32 : i32 to vector<1x72xi32>
    %924 = arith.cmpi eq, %170, %923 : vector<1x72xi32>
    %925 = arith.extui %924 : vector<1x72xi1> to vector<1x72xi32>
    %926 = arith.sitofp %925 : vector<1x72xi32> to vector<1x72xf32>
    %927 = vector.broadcast %922 : vector<12x1xf32> to vector<12x72xf32>
    %928 = vector.broadcast %926 : vector<1x72xf32> to vector<12x72xf32>
    %929 = arith.mulf %927, %928 : vector<12x72xf32>
    %930 = arith.addf %919, %929 : vector<12x72xf32>
    %c0_225 = arith.constant 0 : index
    %c552 = arith.constant 552 : index
    %931 = vector.load %arg14[%c0_225, %c552] : memref<12x576xf32, #tpu.memory_space<vmem>>, vector<12x8xf32>
    %cst_226 = arith.constant dense<0xFF800000> : vector<12xf32>
    %932 = vector.multi_reduction <maximumf>, %931, %cst_226 [1] : vector<12x8xf32> to vector<12xf32>
    %933 = vector.shape_cast %932 : vector<12xf32> to vector<12x1xf32>
    %c69_i32 = arith.constant 69 : i32
    %934 = vector.broadcast %c69_i32 : i32 to vector<1x72xi32>
    %935 = arith.cmpi eq, %170, %934 : vector<1x72xi32>
    %936 = arith.extui %935 : vector<1x72xi1> to vector<1x72xi32>
    %937 = arith.sitofp %936 : vector<1x72xi32> to vector<1x72xf32>
    %938 = vector.broadcast %933 : vector<12x1xf32> to vector<12x72xf32>
    %939 = vector.broadcast %937 : vector<1x72xf32> to vector<12x72xf32>
    %940 = arith.mulf %938, %939 : vector<12x72xf32>
    %941 = arith.addf %930, %940 : vector<12x72xf32>
    %c0_227 = arith.constant 0 : index
    %c560 = arith.constant 560 : index
    %942 = vector.load %arg14[%c0_227, %c560] : memref<12x576xf32, #tpu.memory_space<vmem>>, vector<12x8xf32>
    %cst_228 = arith.constant dense<0xFF800000> : vector<12xf32>
    %943 = vector.multi_reduction <maximumf>, %942, %cst_228 [1] : vector<12x8xf32> to vector<12xf32>
    %944 = vector.shape_cast %943 : vector<12xf32> to vector<12x1xf32>
    %c70_i32 = arith.constant 70 : i32
    %945 = vector.broadcast %c70_i32 : i32 to vector<1x72xi32>
    %946 = arith.cmpi eq, %170, %945 : vector<1x72xi32>
    %947 = arith.extui %946 : vector<1x72xi1> to vector<1x72xi32>
    %948 = arith.sitofp %947 : vector<1x72xi32> to vector<1x72xf32>
    %949 = vector.broadcast %944 : vector<12x1xf32> to vector<12x72xf32>
    %950 = vector.broadcast %948 : vector<1x72xf32> to vector<12x72xf32>
    %951 = arith.mulf %949, %950 : vector<12x72xf32>
    %952 = arith.addf %941, %951 : vector<12x72xf32>
    %c0_229 = arith.constant 0 : index
    %c568 = arith.constant 568 : index
    %953 = vector.load %arg14[%c0_229, %c568] : memref<12x576xf32, #tpu.memory_space<vmem>>, vector<12x8xf32>
    %cst_230 = arith.constant dense<0xFF800000> : vector<12xf32>
    %954 = vector.multi_reduction <maximumf>, %953, %cst_230 [1] : vector<12x8xf32> to vector<12xf32>
    %955 = vector.shape_cast %954 : vector<12xf32> to vector<12x1xf32>
    %c71_i32 = arith.constant 71 : i32
    %956 = vector.broadcast %c71_i32 : i32 to vector<1x72xi32>
    %957 = arith.cmpi eq, %170, %956 : vector<1x72xi32>
    %958 = arith.extui %957 : vector<1x72xi1> to vector<1x72xi32>
    %959 = arith.sitofp %958 : vector<1x72xi32> to vector<1x72xf32>
    %960 = vector.broadcast %955 : vector<12x1xf32> to vector<12x72xf32>
    %961 = vector.broadcast %959 : vector<1x72xf32> to vector<12x72xf32>
    %962 = arith.mulf %960, %961 : vector<12x72xf32>
    %963 = arith.addf %952, %962 : vector<12x72xf32>
    %c0_231 = arith.constant 0 : index
    %c0_232 = arith.constant 0 : index
    %964 = vector.load %arg15[%c0_231, %c0_232] : memref<12x72xf32, #tpu.memory_space<vmem>>, vector<12x72xf32>
    tpu.vector_store %arg15[%c0_231, %c0_232], %963 {strides = array<i32>} : memref<12x72xf32, #tpu.memory_space<vmem>>, vector<12x72xf32>,
    %c0_233 = arith.constant 0 : index
    %c0_234 = arith.constant 0 : index
    %965 = vector.load %arg15[%c0_233, %c0_234] : memref<12x72xf32, #tpu.memory_space<vmem>>, vector<8x72xf32>
    %c0_235 = arith.constant 0 : index
    %c0_236 = arith.constant 0 : index
    %c0_237 = arith.constant 0 : index
    %966 = vector.load %arg4[%c0_235, %c0_236, %c0_237] : memref<5x72x128xf32, #tpu.memory_space<vmem>>, vector<1x72x128xf32>
    %967 = vector.shape_cast %966 : vector<1x72x128xf32> to vector<72x128xf32>
    %cst_238 = arith.constant dense<0.000000e+00> : vector<8x128xf32>
    %968 = tpu.matmul %965, %967, %cst_238 {dimension_numbers = #tpu.dot_dimension_numbers<[1], [0], [0], [1], [0, 0, 1, 1], [], []>} : vector<8x72xf32>, vector<72x128xf32>, vector<8x128xf32> -> vector<8x128xf32>
    %c1_239 = arith.constant 1 : index
    %c0_240 = arith.constant 0 : index
    %969 = vector.load %arg15[%c1_239, %c0_240] : memref<12x72xf32, #tpu.memory_space<vmem>>, vector<8x72xf32>
    %c1_241 = arith.constant 1 : index
    %c0_242 = arith.constant 0 : index
    %c0_243 = arith.constant 0 : index
    %970 = vector.load %arg4[%c1_241, %c0_242, %c0_243] : memref<5x72x128xf32, #tpu.memory_space<vmem>>, vector<1x72x128xf32>
    %971 = vector.shape_cast %970 : vector<1x72x128xf32> to vector<72x128xf32>
    %cst_244 = arith.constant dense<0.000000e+00> : vector<8x128xf32>
    %972 = tpu.matmul %969, %971, %cst_244 {dimension_numbers = #tpu.dot_dimension_numbers<[1], [0], [0], [1], [0, 0, 1, 1], [], []>} : vector<8x72xf32>, vector<72x128xf32>, vector<8x128xf32> -> vector<8x128xf32>
    %973 = arith.addf %968, %972 : vector<8x128xf32>
    %c2_245 = arith.constant 2 : index
    %c0_246 = arith.constant 0 : index
    %974 = vector.load %arg15[%c2_245, %c0_246] : memref<12x72xf32, #tpu.memory_space<vmem>>, vector<8x72xf32>
    %c2_247 = arith.constant 2 : index
    %c0_248 = arith.constant 0 : index
    %c0_249 = arith.constant 0 : index
    %975 = vector.load %arg4[%c2_247, %c0_248, %c0_249] : memref<5x72x128xf32, #tpu.memory_space<vmem>>, vector<1x72x128xf32>
    %976 = vector.shape_cast %975 : vector<1x72x128xf32> to vector<72x128xf32>
    %cst_250 = arith.constant dense<0.000000e+00> : vector<8x128xf32>
    %977 = tpu.matmul %974, %976, %cst_250 {dimension_numbers = #tpu.dot_dimension_numbers<[1], [0], [0], [1], [0, 0, 1, 1], [], []>} : vector<8x72xf32>, vector<72x128xf32>, vector<8x128xf32> -> vector<8x128xf32>
    %978 = arith.addf %973, %977 : vector<8x128xf32>
    %c3_251 = arith.constant 3 : index
    %c0_252 = arith.constant 0 : index
    %979 = vector.load %arg15[%c3_251, %c0_252] : memref<12x72xf32, #tpu.memory_space<vmem>>, vector<8x72xf32>
    %c3_253 = arith.constant 3 : index
    %c0_254 = arith.constant 0 : index
    %c0_255 = arith.constant 0 : index
    %980 = vector.load %arg4[%c3_253, %c0_254, %c0_255] : memref<5x72x128xf32, #tpu.memory_space<vmem>>, vector<1x72x128xf32>
    %981 = vector.shape_cast %980 : vector<1x72x128xf32> to vector<72x128xf32>
    %cst_256 = arith.constant dense<0.000000e+00> : vector<8x128xf32>
    %982 = tpu.matmul %979, %981, %cst_256 {dimension_numbers = #tpu.dot_dimension_numbers<[1], [0], [0], [1], [0, 0, 1, 1], [], []>} : vector<8x72xf32>, vector<72x128xf32>, vector<8x128xf32> -> vector<8x128xf32>
    %983 = arith.addf %978, %982 : vector<8x128xf32>
    %c4_257 = arith.constant 4 : index
    %c0_258 = arith.constant 0 : index
    %984 = vector.load %arg15[%c4_257, %c0_258] : memref<12x72xf32, #tpu.memory_space<vmem>>, vector<8x72xf32>
    %c4_259 = arith.constant 4 : index
    %c0_260 = arith.constant 0 : index
    %c0_261 = arith.constant 0 : index
    %985 = vector.load %arg4[%c4_259, %c0_260, %c0_261] : memref<5x72x128xf32, #tpu.memory_space<vmem>>, vector<1x72x128xf32>
    %986 = vector.shape_cast %985 : vector<1x72x128xf32> to vector<72x128xf32>
    %cst_262 = arith.constant dense<0.000000e+00> : vector<8x128xf32>
    %987 = tpu.matmul %984, %986, %cst_262 {dimension_numbers = #tpu.dot_dimension_numbers<[1], [0], [0], [1], [0, 0, 1, 1], [], []>} : vector<8x72xf32>, vector<72x128xf32>, vector<8x128xf32> -> vector<8x128xf32>
    %988 = arith.addf %983, %987 : vector<8x128xf32>
    %c0_263 = arith.constant 0 : index
    %c0_264 = arith.constant 0 : index
    %989 = vector.load %arg5[%c0_263, %c0_264] : memref<1x128xf32, #tpu.memory_space<vmem>>, vector<1x128xf32>
    %990 = vector.broadcast %989 : vector<1x128xf32> to vector<8x128xf32>
    %991 = arith.addf %988, %990 : vector<8x128xf32>
    %cst_265 = arith.constant 0.000000e+00 : f32
    %992 = vector.broadcast %cst_265 : f32 to vector<8x128xf32>
    %993 = arith.maximumf %991, %992 : vector<8x128xf32>
    %c0_266 = arith.constant 0 : index
    %c0_267 = arith.constant 0 : index
    %994 = vector.load %arg16[%c0_266, %c0_267] : memref<8x128xf32, #tpu.memory_space<vmem>>, vector<8x128xf32>
    tpu.vector_store %arg16[%c0_266, %c0_267], %993 {strides = array<i32>} : memref<8x128xf32, #tpu.memory_space<vmem>>, vector<8x128xf32>,
    %c0_268 = arith.constant 0 : index
    %c0_269 = arith.constant 0 : index
    %995 = vector.load %arg16[%c0_268, %c0_269] : memref<8x128xf32, #tpu.memory_space<vmem>>, vector<8x16xf32>
    %c0_270 = arith.constant 0 : index
    %c16_271 = arith.constant 16 : index
    %996 = vector.load %arg16[%c0_270, %c16_271] : memref<8x128xf32, #tpu.memory_space<vmem>>, vector<8x16xf32>
    %997 = arith.maximumf %995, %996 : vector<8x16xf32>
    %c0_272 = arith.constant 0 : index
    %c32_273 = arith.constant 32 : index
    %998 = vector.load %arg16[%c0_272, %c32_273] : memref<8x128xf32, #tpu.memory_space<vmem>>, vector<8x16xf32>
    %999 = arith.maximumf %997, %998 : vector<8x16xf32>
    %c0_274 = arith.constant 0 : index
    %c48_275 = arith.constant 48 : index
    %1000 = vector.load %arg16[%c0_274, %c48_275] : memref<8x128xf32, #tpu.memory_space<vmem>>, vector<8x16xf32>
    %1001 = arith.maximumf %999, %1000 : vector<8x16xf32>
    %c0_276 = arith.constant 0 : index
    %c64_277 = arith.constant 64 : index
    %1002 = vector.load %arg16[%c0_276, %c64_277] : memref<8x128xf32, #tpu.memory_space<vmem>>, vector<8x16xf32>
    %1003 = arith.maximumf %1001, %1002 : vector<8x16xf32>
    %c0_278 = arith.constant 0 : index
    %c80_279 = arith.constant 80 : index
    %1004 = vector.load %arg16[%c0_278, %c80_279] : memref<8x128xf32, #tpu.memory_space<vmem>>, vector<8x16xf32>
    %1005 = arith.maximumf %1003, %1004 : vector<8x16xf32>
    %c0_280 = arith.constant 0 : index
    %c96_281 = arith.constant 96 : index
    %1006 = vector.load %arg16[%c0_280, %c96_281] : memref<8x128xf32, #tpu.memory_space<vmem>>, vector<8x16xf32>
    %1007 = arith.maximumf %1005, %1006 : vector<8x16xf32>
    %c0_282 = arith.constant 0 : index
    %c112_283 = arith.constant 112 : index
    %1008 = vector.load %arg16[%c0_282, %c112_283] : memref<8x128xf32, #tpu.memory_space<vmem>>, vector<8x16xf32>
    %1009 = arith.maximumf %1007, %1008 : vector<8x16xf32>
    %cst_284 = arith.constant dense<0xFF800000> : vector<16xf32>
    %1010 = vector.multi_reduction <maximumf>, %1009, %cst_284 [0] : vector<8x16xf32> to vector<16xf32>
    %1011 = vector.shape_cast %1010 : vector<16xf32> to vector<1x16xf32>
    %1012 = vector.shape_cast %1011 : vector<1x16xf32> to vector<1x16xf32>
    %1013 = vector.broadcast %1012 : vector<1x16xf32> to vector<8x16xf32>
    %c0_285 = arith.constant 0 : index
    %c0_286 = arith.constant 0 : index
    %1014 = vector.load %arg6[%c0_285, %c0_286] : memref<16x100xf32, #tpu.memory_space<vmem>>, vector<16x100xf32>
    %cst_287 = arith.constant dense<0.000000e+00> : vector<8x100xf32>
    %1015 = tpu.matmul %1013, %1014, %cst_287 {dimension_numbers = #tpu.dot_dimension_numbers<[1], [0], [0], [1], [0, 0, 1, 1], [], []>} : vector<8x16xf32>, vector<16x100xf32>, vector<8x100xf32> -> vector<8x100xf32>
    %c0_288 = arith.constant 0 : index
    %c0_289 = arith.constant 0 : index
    %1016 = vector.load %arg7[%c0_288, %c0_289] : memref<1x100xf32, #tpu.memory_space<vmem>>, vector<1x100xf32>
    %1017 = vector.broadcast %1016 : vector<1x100xf32> to vector<8x100xf32>
    %1018 = arith.addf %1015, %1017 : vector<8x100xf32>
    %cst_290 = arith.constant 0.000000e+00 : f32
    %1019 = vector.broadcast %cst_290 : f32 to vector<8x100xf32>
    %1020 = arith.maximumf %1018, %1019 : vector<8x100xf32>
    %c0_291 = arith.constant 0 : index
    %c0_292 = arith.constant 0 : index
    %1021 = vector.load %arg8[%c0_291, %c0_292] : memref<100x50xf32, #tpu.memory_space<vmem>>, vector<100x50xf32>
    %cst_293 = arith.constant dense<0.000000e+00> : vector<8x50xf32>
    %1022 = tpu.matmul %1020, %1021, %cst_293 {dimension_numbers = #tpu.dot_dimension_numbers<[1], [0], [0], [1], [0, 0, 1, 1], [], []>} : vector<8x100xf32>, vector<100x50xf32>, vector<8x50xf32> -> vector<8x50xf32>
    %c0_294 = arith.constant 0 : index
    %c0_295 = arith.constant 0 : index
    %1023 = vector.load %arg9[%c0_294, %c0_295] : memref<1x50xf32, #tpu.memory_space<vmem>>, vector<1x50xf32>
    %1024 = vector.broadcast %1023 : vector<1x50xf32> to vector<8x50xf32>
    %1025 = arith.addf %1022, %1024 : vector<8x50xf32>
    %cst_296 = arith.constant 0.000000e+00 : f32
    %1026 = vector.broadcast %cst_296 : f32 to vector<8x50xf32>
    %1027 = arith.maximumf %1025, %1026 : vector<8x50xf32>
    %c0_297 = arith.constant 0 : index
    %c0_298 = arith.constant 0 : index
    %1028 = vector.load %arg10[%c0_297, %c0_298] : memref<50x128xf32, #tpu.memory_space<vmem>>, vector<50x128xf32>
    %cst_299 = arith.constant dense<0.000000e+00> : vector<8x128xf32>
    %1029 = tpu.matmul %1027, %1028, %cst_299 {dimension_numbers = #tpu.dot_dimension_numbers<[1], [0], [0], [1], [0, 0, 1, 1], [], []>} : vector<8x50xf32>, vector<50x128xf32>, vector<8x128xf32> -> vector<8x128xf32>
    %c0_300 = arith.constant 0 : index
    %c0_301 = arith.constant 0 : index
    %1030 = vector.load %arg11[%c0_300, %c0_301] : memref<1x128xf32, #tpu.memory_space<vmem>>, vector<1x128xf32>
    %1031 = vector.broadcast %1030 : vector<1x128xf32> to vector<8x128xf32>
    %1032 = arith.addf %1029, %1031 : vector<8x128xf32>
    %c0_302 = arith.constant 0 : index
    %c0_303 = arith.constant 0 : index
    %c0_304 = arith.constant 0 : index
    %1033 = vector.load %arg12[%c0_302, %c0_303, %c0_304] : memref<1x8x128xf32, #tpu.memory_space<vmem>>, vector<1x8x128xf32>
    %1034 = vector.shape_cast %1033 : vector<1x8x128xf32> to vector<8x128xf32>
    %1035 = vector.shape_cast %1032 : vector<8x128xf32> to vector<1x8x128xf32>
    tpu.vector_store %arg12[%c0_302, %c0_303, %c0_304], %1035 {strides = array<i32>} : memref<1x8x128xf32, #tpu.memory_space<vmem>>, vector<1x8x128xf32>,
    return
  }
  func.func @transform_0(%arg0: i32) -> (i32, i32, i32) {
    %c0_i32 = arith.constant 0 : i32
    %c0_i32_0 = arith.constant 0 : i32
    %c0_i32_1 = arith.constant 0 : i32
    return %arg0, %c0_i32, %c0_i32_0 : i32, i32, i32
  }
  func.func @transform_1(%arg0: i32) -> (i32, i32, i32) {
    %c0_i32 = arith.constant 0 : i32
    %c0_i32_0 = arith.constant 0 : i32
    %c0_i32_1 = arith.constant 0 : i32
    %c0_i32_2 = arith.constant 0 : i32
    return %c0_i32, %c0_i32_0, %c0_i32_1 : i32, i32, i32
  }
  func.func @transform_2(%arg0: i32) -> (i32, i32) {
    %c0_i32 = arith.constant 0 : i32
    %c0_i32_0 = arith.constant 0 : i32
    %c0_i32_1 = arith.constant 0 : i32
    return %c0_i32, %c0_i32_0 : i32, i32
  }
  func.func @transform_3(%arg0: i32) -> (i32, i32, i32) {
    %c0_i32 = arith.constant 0 : i32
    %c0_i32_0 = arith.constant 0 : i32
    %c0_i32_1 = arith.constant 0 : i32
    %c0_i32_2 = arith.constant 0 : i32
    return %c0_i32, %c0_i32_0, %c0_i32_1 : i32, i32, i32
  }
  func.func @transform_4(%arg0: i32) -> (i32, i32) {
    %c0_i32 = arith.constant 0 : i32
    %c0_i32_0 = arith.constant 0 : i32
    %c0_i32_1 = arith.constant 0 : i32
    return %c0_i32, %c0_i32_0 : i32, i32
  }
  func.func @transform_5(%arg0: i32) -> (i32, i32) {
    %c0_i32 = arith.constant 0 : i32
    %c0_i32_0 = arith.constant 0 : i32
    %c0_i32_1 = arith.constant 0 : i32
    return %c0_i32, %c0_i32_0 : i32, i32
  }
  func.func @transform_6(%arg0: i32) -> (i32, i32) {
    %c0_i32 = arith.constant 0 : i32
    %c0_i32_0 = arith.constant 0 : i32
    %c0_i32_1 = arith.constant 0 : i32
    return %c0_i32, %c0_i32_0 : i32, i32
  }
  func.func @transform_7(%arg0: i32) -> (i32, i32) {
    %c0_i32 = arith.constant 0 : i32
    %c0_i32_0 = arith.constant 0 : i32
    %c0_i32_1 = arith.constant 0 : i32
    return %c0_i32, %c0_i32_0 : i32, i32
  }
  func.func @transform_8(%arg0: i32) -> (i32, i32) {
    %c0_i32 = arith.constant 0 : i32
    %c0_i32_0 = arith.constant 0 : i32
    %c0_i32_1 = arith.constant 0 : i32
    return %c0_i32, %c0_i32_0 : i32, i32
  }
  func.func @transform_9(%arg0: i32) -> (i32, i32) {
    %c0_i32 = arith.constant 0 : i32
    %c0_i32_0 = arith.constant 0 : i32
    %c0_i32_1 = arith.constant 0 : i32
    return %c0_i32, %c0_i32_0 : i32, i32
  }
  func.func @transform_10(%arg0: i32) -> (i32, i32) {
    %c0_i32 = arith.constant 0 : i32
    %c0_i32_0 = arith.constant 0 : i32
    %c0_i32_1 = arith.constant 0 : i32
    return %c0_i32, %c0_i32_0 : i32, i32
  }
  func.func @transform_11(%arg0: i32) -> (i32, i32, i32) {
    %c0_i32 = arith.constant 0 : i32
    %c0_i32_0 = arith.constant 0 : i32
    %c0_i32_1 = arith.constant 0 : i32
    return %arg0, %c0_i32, %c0_i32_0 : i32, i32, i32
  }
}

</mosaic_0001>

<bundles_post_ra>
// kernel: net_forward.1
= control target key start
LH: loop header
LB: loop body
LE: loop exit
PB: predicated region body
PF: predicated region fallthrough
CT: control target
= control target key end

     0   :  { %16 = vsyncpa [#allocation7], 0  ;;  %s10404_s0 = inlined_call_operand.vmem [shape: f32[2,100,100], index: 0, kind: input, shape index: {}]   ;;  %s10405_s1 = inlined_call_operand.hbm [shape: f32[5,100,576], index: 1, kind: input, shape index: {}]   ;;  %s10406_s2 = inlined_call_operand.hbm [shape: f32[1,576], index: 2, kind: input, shape index: {}]   ;;  %s10407_s3 = inlined_call_operand.hbm [shape: f32[5,72,128], index: 3, kind: input, shape index: {}]   ;;  %s10408_s4 = inlined_call_operand.hbm [shape: f32[1,128], index: 4, kind: input, shape index: {}]   ;;  %s10409_s5 = inlined_call_operand.hbm [shape: f32[16,100], index: 5, kind: input, shape index: {}]   ;;  %s10410_s6 = inlined_call_operand.hbm [shape: f32[1,100], index: 6, kind: input, shape index: {}]   ;;  %s10411_s7 = inlined_call_operand.vmem [shape: f32[100,50], index: 7, kind: input, shape index: {}]   ;;  %s10412_s8 = inlined_call_operand.hbm [shape: f32[1,50], index: 8, kind: input, shape index: {}]   ;;  %s10413_s9 = inlined_call_operand.hbm [shape: f32[50,128], index: 9, kind: input, shape index: {}]   ;;  %s10414_s10 = inlined_call_operand.hbm [shape: f32[1,128], index: 10, kind: input, shape index: {}]   ;;  %s10415_s11 = inlined_call_operand.vmem [shape: f32[2,8,128], index: 11, kind: output, shape index: {}]  }
   0x1   :  { %17 = vsyncpa [#allocation9], 0 }
   0x2   :  { %18 = vsyncpa [#allocation12], 0 }
   0x3   :  { %19 = vsyncpa [#allocation15], 0 }
   0x4   :  { %20 = vsyncpa [#allocation18], 0  ;;  %s8238_s17 = smov 0  }
   0x5 LB: > { %s8155_s18 = smov [#allocation8]   ;;  %s8244_s20 = sadd.s32 4294967295, %s8153_s17   ;;  %s8153_s17 = sphi %s8238_s17, %s26_s17  }
   0x6   : > { %s319_s19 = sshll.u32 %s8155_s18, 4  ;;  %p6163_p0 = scmp.ge.s32.totalorder %s8153_s17, 1  ;;  %s8249_s19 = int_to_ptr.vmem [resolvable:$true] %s319_s19 }
   0x7   : > { %p293_p1 = scmp.lt.s32.totalorder %s8153_s17, 3  ;;  %p10416_p2 = scmp.eq.s32.totalorder %s8244_s20, 0 }
   0x8   : > { %s8156_s22 = smov [#allocation11]   ;;  %s8157_s24 = smov [#allocation14]  }
   0x9   : > { %p8251_p3 = pnand %p6163_p0, %p293_p1  ;;  %s343_s23 = sshll.u32 %s8156_s22, 4  ;;  %s8257_s23 = int_to_ptr.vmem [resolvable:$true] %s343_s23 }
   0xa   : > { %s367_s25 = sshll.u32 %s8157_s24, 4  ;;  %s8158_s27 = smov [#allocation17]   ;;  %s8265_s25 = int_to_ptr.vmem [resolvable:$true] %s367_s25 }
   0xb   : > { %s10449_s21 = scalar_select %p8251_p3, 1, 0 }
   0xc   : > { %p7796_p4 = pneg %p8251_p3  ;;  %s8267_s28 = sshll.u32 %s8158_s27, 4  ;;  %s392_s28 = int_to_ptr.vmem [resolvable:$true] %s8267_s28 }
   0xd   : > { %s7875_s12 = scalar_lea.hbm %s10406_s2, 80 }
   0xe   : > { %p8261_p5 = pnand %p10416_p2, %p7796_p4  ;;  %p7876_p6 = scmp.ne.s32.totalorder %s10406_s2, %s7875_s12 }
   0xf   : > { %p7882_p10 = scmp.lt.u32.totalorder %s7875_s12, %s10406_s2 }
  0x10   : > { %p8277_p7 = pneg %p8261_p5 }
  0x12   : > { %p7878_p8 = pnand %p8277_p7, %p7876_p6 }
  0x14   : > { %p7879_p9 = pneg %p7878_p8 }
  0x16   : > { %p7884_p11 = pnand %p7882_p10, %p7879_p9 }
  0x18   : > { %7887 = shalt.err (!%p7884_p11)
}
  0x19   : > { %s7888_s22 = scalar_lea.vmem %s8249_s19, 80  ;;  %s7895_s24 = scalar_lea.vmem %s8249_s19, 96 }
  0x1a   : > { %p7889_p12 = scmp.ne.s32.totalorder %s8249_s19, %s7888_s22  ;;  %p7896_p1 = scmp.lt.s32.totalorder %s8249_s19, %s8249_s19 }
  0x1b   : > { %p7897_p4 = scmp.lt.s32.totalorder %s7895_s24, %s7888_s22 }
  0x1c   : > { %p7891_p13 = pnand %p7889_p12, %p8277_p7 }
  0x1d   : > { %p7898_p6 = por %p7897_p4, %p7896_p1 }
  0x1e   : > { %p7892_p0 = pneg %p7891_p13 }
  0x20   : > { %p7899_p8 = pnand %p7898_p6, %p7892_p0 }
  0x22   : > { %7902 = shalt.err (!%p7899_p8)
}
  0x23   : > { %7802 = dma.hbm_to_vmem [thread:$0]  (!%p8261_p5), %s10406_s2, 80, %s8249_s19, [#allocation9]  }
  0x24   : > { %s7903_s13 = scalar_lea.hbm %s10408_s4, 16 }
  0x25   : > { %p7904_p9 = scmp.ne.s32.totalorder %s10408_s4, %s7903_s13  ;;  %p7910_p12 = scmp.lt.u32.totalorder %s7903_s13, %s10408_s4 }
  0x27   : > { %p7906_p10 = pnand %p7904_p9, %p8277_p7 }
  0x29   : > { %p7907_p11 = pneg %p7906_p10 }
  0x2b   : > { %p7912_p13 = pnand %p7910_p12, %p7907_p11 }
  0x2d   : > { %7915 = shalt.err (!%p7912_p13)
}
  0x2e   : > { %s7916_s19 = scalar_lea.vmem %s8257_s23, 16  ;;  %s7923_s24 = scalar_lea.vmem %s8257_s23, 32 }
  0x2f   : > { %p7917_p0 = scmp.ne.s32.totalorder %s8257_s23, %s7916_s19  ;;  %p7924_p6 = scmp.lt.s32.totalorder %s8257_s23, %s8257_s23 }
  0x30   : > { %p7925_p8 = scmp.lt.s32.totalorder %s7923_s24, %s7916_s19 }
  0x31   : > { %p7919_p1 = pnand %p7917_p0, %p8277_p7 }
  0x32   : > { %p7926_p9 = por %p7925_p8, %p7924_p6 }
  0x33   : > { %p7920_p4 = pneg %p7919_p1 }
  0x35   : > { %p7927_p10 = pnand %p7926_p9, %p7920_p4 }
  0x37   : > { %7930 = shalt.err (!%p7927_p10)
}
  0x38   : > { %7808 = dma.hbm_to_vmem [thread:$0]  (!%p8261_p5), %s10408_s4, 16, %s8257_s23, [#allocation12]  }
  0x39   : > { %s7931_s13 = scalar_lea.hbm %s10410_s6, 16 }
  0x3a   : > { %p7932_p11 = scmp.ne.s32.totalorder %s10410_s6, %s7931_s13  ;;  %p7938_p0 = scmp.lt.u32.totalorder %s7931_s13, %s10410_s6 }
  0x3c   : > { %p7934_p12 = pnand %p7932_p11, %p8277_p7 }
  0x3e   : > { %p7935_p13 = pneg %p7934_p12 }
  0x40   : > { %p7940_p1 = pnand %p7938_p0, %p7935_p13 }
  0x42   : > { %7943 = shalt.err (!%p7940_p1)
}
  0x43   : > { %s7944_s23 = scalar_lea.vmem %s8265_s25, 16  ;;  %s7951_s19 = scalar_lea.vmem %s8265_s25, 32 }
  0x44   : > { %p7945_p4 = scmp.ne.s32.totalorder %s8265_s25, %s7944_s23  ;;  %p7952_p9 = scmp.lt.s32.totalorder %s8265_s25, %s8265_s25 }
  0x45   : > { %p7953_p10 = scmp.lt.s32.totalorder %s7951_s19, %s7944_s23 }
  0x46   : > { %p7947_p6 = pnand %p7945_p4, %p8277_p7 }
  0x47   : > { %p7954_p11 = por %p7953_p10, %p7952_p9 }
  0x48   : > { %p7948_p8 = pneg %p7947_p6 }
  0x4a   : > { %p7955_p12 = pnand %p7954_p11, %p7948_p8 }
  0x4c   : > { %7958 = shalt.err (!%p7955_p12)
}
  0x4d   : > { %7814 = dma.hbm_to_vmem [thread:$0]  (!%p8261_p5), %s10410_s6, 16, %s8265_s25, [#allocation15]  }
  0x4e   : > { %s7959_s12 = scalar_lea.hbm %s10413_s9, 896 }
  0x4f   : > { %p7960_p13 = scmp.ne.s32.totalorder %s10413_s9, %s7959_s12  ;;  %p7966_p4 = scmp.lt.u32.totalorder %s7959_s12, %s10413_s9 }
  0x51   : > { %p7962_p0 = pnand %p7960_p13, %p8277_p7 }
  0x53   : > { %p7963_p1 = pneg %p7962_p0 }
  0x55   : > { %p7968_p6 = pnand %p7966_p4, %p7963_p1 }
  0x57   : > { %7971 = shalt.err (!%p7968_p6)
}
  0x58   : > { %s7972_s22 = scalar_lea.vmem %s392_s28, 896  ;;  %p7980_p11 = scmp.lt.s32.totalorder %s392_s28, %s392_s28 }
  0x59   : > { %p7973_p8 = scmp.ne.s32.totalorder %s392_s28, %s7972_s22  ;;  %p7981_p12 = scmp.lt.s32.totalorder %s7972_s22, %s7972_s22 }
  0x5b   : > { %p7975_p9 = pnand %p7973_p8, %p8277_p7  ;;  %p7982_p2 = por %p7981_p12, %p7980_p11 }
  0x5d   : > { %p7976_p10 = pneg %p7975_p9 }
  0x5f   : > { %p7983_p3 = pnand %p7982_p2, %p7976_p10 }
  0x61   : > { %7986 = shalt.err (!%p7983_p3)
}
  0x62   : > { %s10418_s25 = smov 128   ;;  %s10420_s23 = smov 8  }
  0x63   : > { %7820 = dma.hbm_to_vmem [thread:$0]  (!%p8261_p5), %s10413_s9, 896, %s392_s28, [#allocation18], %s10418_s25, %s10418_s25, %s10420_s23  }
  0x64   : > { %s8161_s27 = smov [#allocation6]   ;;  %s7987_s13 = scalar_lea.hbm %s10405_s1, 41600 }
  0x65   : > { %s305_s29 = sshll.u32 %s8161_s27, 4  ;;  %p7988_p2 = scmp.ne.s32.totalorder %s10405_s1, %s7987_s13  ;;  %s306_s29 = int_to_ptr.vmem [resolvable:$true] %s305_s29 }
  0x66   : > { %p7994_p0 = scmp.lt.u32.totalorder %s7987_s13, %s10405_s1 }
  0x67   : > { %p7990_p3 = pnand %p7988_p2, %p8277_p7 }
  0x69   : > { %p7991_p13 = pneg %p7990_p3 }
  0x6b   : > { %p7996_p1 = pnand %p7994_p0, %p7991_p13 }
  0x6d   : > { %7999 = shalt.err (!%p7996_p1)
}
  0x6e   : > { %s8000_s28 = scalar_lea.vmem %s306_s29, 41600  ;;  %p8008_p9 = scmp.lt.s32.totalorder %s306_s29, %s306_s29 }
  0x6f   : > { %p8001_p4 = scmp.ne.s32.totalorder %s306_s29, %s8000_s28  ;;  %p8009_p10 = scmp.lt.s32.totalorder %s8000_s28, %s8000_s28 }
  0x71   : > { %p8003_p6 = pnand %p8001_p4, %p8277_p7  ;;  %p8010_p11 = por %p8009_p10, %p8008_p9 }
  0x73   : > { %p8004_p8 = pneg %p8003_p6 }
  0x75   : > { %p8011_p12 = pnand %p8010_p11, %p8004_p8 }
  0x77   : > { %8014 = shalt.err (!%p8011_p12)
}
  0x78   : > { %s8162_s19 = smov 640   ;;  %s8163_s24 = smov 40  }
  0x79   : > { %7799 = dma.hbm_to_vmem [thread:$0]  (!%p8261_p5), %s10405_s1, 41600, %s306_s29, [#allocation7], %s8162_s19, %s8162_s19, %s8163_s24  }
  0x7a   : > { %s8164_s12 = smov [#allocation10]   ;;  %s8165_s14 = smov [#allocation13]  }
  0x7b   : > { %s329_s13 = sshll.u32 %s8164_s12, 4  ;;  %s353_s16 = sshll.u32 %s8165_s14, 4  ;;  %s330_s13 = int_to_ptr.vmem [resolvable:$true] %s329_s13  ;;  %s8387_s16 = int_to_ptr.vmem [resolvable:$true] %s353_s16 }
  0x7c   : > { %s8015_s28 = scalar_lea.hbm %s10407_s3, 5760 }
  0x7d   : > { %p8016_p2 = scmp.ne.s32.totalorder %s10407_s3, %s8015_s28  ;;  %p8022_p0 = scmp.lt.u32.totalorder %s8015_s28, %s10407_s3 }
  0x7f   : > { %p8018_p3 = pnand %p8016_p2, %p8277_p7 }
  0x81   : > { %p8019_p13 = pneg %p8018_p3 }
  0x83   : > { %p8024_p1 = pnand %p8022_p0, %p8019_p13 }
  0x85   : > { %8027 = shalt.err (!%p8024_p1)
}
  0x86   : > { %s8028_s19 = scalar_lea.vmem %s330_s13, 5760  ;;  %p8036_p9 = scmp.lt.s32.totalorder %s330_s13, %s330_s13 }
  0x87   : > { %p8029_p4 = scmp.ne.s32.totalorder %s330_s13, %s8028_s19  ;;  %p8037_p10 = scmp.lt.s32.totalorder %s8028_s19, %s8028_s19 }
  0x89   : > { %p8031_p6 = pnand %p8029_p4, %p8277_p7  ;;  %p8038_p11 = por %p8037_p10, %p8036_p9 }
  0x8b   : > { %p8032_p8 = pneg %p8031_p6 }
  0x8d   : > { %p8039_p12 = pnand %p8038_p11, %p8032_p8 }
  0x8f   : > { %8042 = shalt.err (!%p8039_p12)
}
  0x90   : > { %s10452_s25 = smov 8   ;;  %s10453_s23 = smov 128  }
  0x91   : > { %7805 = dma.hbm_to_vmem [thread:$0]  (!%p8261_p5), %s10407_s3, 5760, %s330_s13, [#allocation9], %s10453_s23, %s10453_s23, %s10452_s25  }
  0x92   : > { %s8043_s18 = scalar_lea.hbm %s10409_s5, 256 }
  0x93   : > { %p8044_p2 = scmp.ne.s32.totalorder %s10409_s5, %s8043_s18  ;;  %p8050_p0 = scmp.lt.u32.totalorder %s8043_s18, %s10409_s5 }
  0x95   : > { %p8046_p3 = pnand %p8044_p2, %p8277_p7 }
  0x97   : > { %p8047_p13 = pneg %p8046_p3 }
  0x99   : > { %p8052_p1 = pnand %p8050_p0, %p8047_p13 }
  0x9b   : > { %8055 = shalt.err (!%p8052_p1)
}
  0x9c   : > { %s8056_s13 = scalar_lea.vmem %s8387_s16, 256  ;;  %p8064_p9 = scmp.lt.s32.totalorder %s8387_s16, %s8387_s16 }
  0x9d   : > { %p8057_p4 = scmp.ne.s32.totalorder %s8387_s16, %s8056_s13  ;;  %p8065_p10 = scmp.lt.s32.totalorder %s8056_s13, %s8056_s13 }
  0x9f   : > { %p8059_p6 = pnand %p8057_p4, %p8277_p7  ;;  %p8066_p11 = por %p8065_p10, %p8064_p9 }
  0xa1   : > { %p8060_p8 = pneg %p8059_p6 }
  0xa3   : > { %p8067_p12 = pnand %p8066_p11, %p8060_p8 }
  0xa5   : > { %8070 = shalt.err (!%p8067_p12)
}
  0xa6   : > { %7811 = dma.hbm_to_vmem [thread:$0]  (!%p8261_p5), %s10409_s5, 256, %s8387_s16, [#allocation12], %s10453_s23, %s10453_s23, %s10452_s25  }
  0xa7   : > { %s8166_s30 = smov [#allocation16]   ;;  %s8167_s14 = smov [#allocation19]  }
  0xa8   : > { %s381_s12 = sshll.u32 %s8166_s30, 4  ;;  %s405_s18 = sshll.u32 %s8167_s14, 4  ;;  %s382_s12 = int_to_ptr.vmem [resolvable:$true] %s381_s12  ;;  %s8436_s18 = int_to_ptr.vmem [resolvable:$true] %s405_s18 }
  0xa9   : > { %s8071_s27 = scalar_lea.hbm %s10412_s8, 16 }
  0xaa   : > { %p8072_p2 = scmp.ne.s32.totalorder %s10412_s8, %s8071_s27  ;;  %p8078_p0 = scmp.lt.u32.totalorder %s8071_s27, %s10412_s8 }
  0xac   : > { %p8074_p3 = pnand %p8072_p2, %p8277_p7 }
  0xae   : > { %p8075_p13 = pneg %p8074_p3 }
  0xb0   : > { %p8080_p1 = pnand %p8078_p0, %p8075_p13 }
  0xb2   : > { %8083 = shalt.err (!%p8080_p1)
}
  0xb3   : > { %s8084_s25 = scalar_lea.vmem %s382_s12, 16  ;;  %s8091_s23 = scalar_lea.vmem %s382_s12, 32 }
  0xb4   : > { %p8085_p4 = scmp.ne.s32.totalorder %s382_s12, %s8084_s25  ;;  %p8092_p9 = scmp.lt.s32.totalorder %s382_s12, %s382_s12 }
  0xb5   : > { %p8093_p10 = scmp.lt.s32.totalorder %s8091_s23, %s8084_s25 }
  0xb6   : > { %p8087_p6 = pnand %p8085_p4, %p8277_p7 }
  0xb7   : > { %p8094_p11 = por %p8093_p10, %p8092_p9 }
  0xb8   : > { %p8088_p8 = pneg %p8087_p6 }
  0xba   : > { %p8095_p12 = pnand %p8094_p11, %p8088_p8 }
  0xbc   : > { %8098 = shalt.err (!%p8095_p12)
}
  0xbd   : > { %7817 = dma.hbm_to_vmem [thread:$0]  (!%p8261_p5), %s10412_s8, 16, %s382_s12, [#allocation15]  }
  0xbe   : > { %s8099_s28 = scalar_lea.hbm %s10414_s10, 16 }
  0xbf   : > { %p8100_p2 = scmp.ne.s32.totalorder %s10414_s10, %s8099_s28  ;;  %p8106_p0 = scmp.lt.u32.totalorder %s8099_s28, %s10414_s10 }
  0xc1   : > { %p8102_p3 = pnand %p8100_p2, %p8277_p7 }
  0xc3   : > { %p8103_p13 = pneg %p8102_p3 }
  0xc5   : > { %p8108_p1 = pnand %p8106_p0, %p8103_p13 }
  0xc7   : > { %8111 = shalt.err (!%p8108_p1)
}
  0xc8   : > { %s8112_s12 = scalar_lea.vmem %s8436_s18, 16  ;;  %s8119_s16 = scalar_lea.vmem %s8436_s18, 32 }
  0xc9   : > { %p8113_p4 = scmp.ne.s32.totalorder %s8436_s18, %s8112_s12  ;;  %p8120_p9 = scmp.lt.s32.totalorder %s8436_s18, %s8436_s18 }
  0xca   : > { %p8121_p10 = scmp.lt.s32.totalorder %s8119_s16, %s8112_s12 }
  0xcb   : > { %p8115_p6 = pnand %p8113_p4, %p8277_p7 }
  0xcc   : > { %p8122_p11 = por %p8121_p10, %p8120_p9 }
  0xcd   : > { %p8116_p8 = pneg %p8115_p6 }
  0xcf   : > { %p8123_p12 = pnand %p8122_p11, %p8116_p8 }
  0xd1   : > { %8126 = shalt.err (!%p8123_p12)
}
  0xd2   : > { %7823 = dma.hbm_to_vmem [thread:$0]  (!%p8261_p5), %s10414_s10, 16, %s8436_s18, [#allocation18]  }
  0xd3   : > { %p10454_p2 = scmp.ne.s32.totalorder %s10449_s21, 0 }
  0xd5   : > { %426 = sbr.rel (%p10454_p2) target bundleno = 2318 (0x90e), region = 64 }
  0xdc   : > { %p10455_p7 = scmp.eq.s32.totalorder %s8244_s20, 0 }
  0xde   : > { %8132 = dma.done.wait (%p10455_p7), [#allocation7], 41600   ;;  %p10456_p3 = pmov %p10455_p7 }
  0xe0   : > { %8134 = vsyncadd (%p10456_p3), [#allocation7], 4294925696  ;;  %p10457_p13 = pmov %p10456_p3 }
  0xe1   : > { %p10458_p0 = pmov %p10456_p3 }
  0xe2   : > { %8136 = dma.done.wait (%p10457_p13), [#allocation9], 5840  }
  0xe3   : > { %8138 = vsyncadd (%p10458_p0), [#allocation9], 4294961456  ;;  %p10459_p1 = pmov %p10458_p0 }
  0xe4   : > { %p10460_p5 = pmov %p10458_p0 }
  0xe5   : > { %8140 = dma.done.wait (%p10459_p1), [#allocation12], 272  }
  0xe6   : > { %8142 = vsyncadd (%p10460_p5), [#allocation12], 4294967024  ;;  %p10461_p4 = pmov %p10458_p0 }
  0xe7   : > { %p10462_p6 = pmov %p10458_p0 }
  0xe8   : > { %8144 = dma.done.wait (%p10461_p4), [#allocation15], 32  }
  0xe9   : > { %8146 = vsyncadd (%p10462_p6), [#allocation15], 4294967264  ;;  %p10463_p8 = pmov %p10458_p0 }
  0xea   : > { %p10464_p9 = pmov %p10458_p0 }
  0xeb   : > { %8148 = dma.done.wait (%p10463_p8), [#allocation18], 912  }
  0xec   : > { %8150 = vsyncadd (%p10464_p9), [#allocation18], 4294966384  ;;  %v10436_v0 = vmov 0.0   ;;  %v597_v1 = vld [vmem:[#allocation6 + $0x210] sm:$0xff]  ;;  %v602_v2 = vld [vmem:[#allocation6 + $0x238] sm:$0xff]  ;;  %p497_p10 = scmp.lt.s32.totalorder %s8244_s20, 1 }
  0xed   : > { %778 = vmatprep.mubr.f32.mxu0 %v10436_v0  ;;  %915 = vmatprep.mubr.f32.mxu1 %v10436_v0  ;;  %v599_v3 = vld [vmem:[#allocation6 + $0x220] sm:$0xff]  ;;  %v7069_v4 = vpack.c.bf16 %v602_v2, %v597_v1  ;;  %v604_v5 = vld [vmem:[#allocation6 + $0x248] sm:$0xff]  ;;  %v601_v7 = vld [vmem:[#allocation6 + $0x230] sm:$0xff]  ;;  %vm10423_vm0 = vcmask 1043456   ;;  %vm10422_vm1 = vcmask 818176   ;;  %vm10427_vm14 = vcmask 64512  }
  0xee   : > { %v596_v6 = vld [vmem:[#allocation6 + $0x208] sm:$0xff]  ;;  %v7093_v8 = vpack.c.bf16 %v604_v5, %v599_v3  ;;  %v598_v10 = vld [vmem:[#allocation6 + $0x218] sm:$0xff]  ;;  %v603_v11 = vld [vmem:[#allocation6 + $0x240] sm:$0xff]  ;;  %s10622_s20 = smov (!%p497_p10, %s8244_s20), 1  ;;  %vm10426_vm15 = vcmask 130112   ;;  %s8171_s24 = smov 96  }
  0xef   : > { %v7071_v9 = vpack.c.bf16 %v601_v7, %v596_v6  ;;  %v607_v12 = vld [vmem:[#allocation6 + $0x260] sm:$0xff]  ;;  %7070 = vmatprep.subr.bf16.mxu0 %v7069_v4  ;;  %v7095_v13 = vpack.c.bf16 %v603_v11, %v598_v10  ;;  %v612_v14 = vld [vmem:[#allocation6 + $0x288] sm:$0xff]  ;;  %v609_v15 = vld [vmem:[#allocation6 + $0x270] sm:$0xff]  ;;  %s7759_s21 = smul.u32 104, %s10622_s20  ;;  %s8172_s30 = smov 112  }
  0xf0   : > { %v614_v16 = vld [vmem:[#allocation6 + $0x298] sm:$0xff]  ;;  %7094 = vmatprep.subr.bf16.mxu1 %v7093_v8  ;;  %v7073_v17 = vpack.c.bf16 %v612_v14, %v607_v12  ;;  %v611_v20 = vld [vmem:[#allocation6 + $0x280] sm:$0xff]  ;;  %v608_v21 = vld [vmem:[#allocation6 + $0x268] sm:$0xff]  ;;  %s8173_s14 = smov 80   ;;  %s8174_s22 = smov 48  }
  0xf1   : > { %7072 = vmatpush1.bf16.msra.mxu0 %v7071_v9  ;;  %v7097_v18 = vpack.c.bf16 %v614_v16, %v609_v15  ;;  %v606_v19 = vld [vmem:[#allocation6 + $0x258] sm:$0xff]  ;;  %7096 = vmatpush1.bf16.msra.mxu1 %v7095_v13  ;;  %v613_v23 = vld [vmem:[#allocation6 + $0x290] sm:$0xff]  ;;  %v619_v28 = vld [vmem:[#allocation6 + $0x2c0] sm:$0xff]  ;;  %s8514_s18 = scalar_lea.vmem %s10404_s0, %s7759_s21  ;;  %s8175_s28 = smov 64  }
  0xf2   : > { %v7075_v22 = vpack.c.bf16 %v611_v20, %v606_v19  ;;  %v617_v24 = vld [vmem:[#allocation6 + $0x2b0] sm:$0xff]  ;;  %v622_v25 = vld [vmem:[#allocation6 + $0x2d8] sm:$0xff]  ;;  %7074 = vmatprep.subr.bf16.mxu0 %v7073_v17  ;;  %v7099_v26 = vpack.c.bf16 %v613_v23, %v608_v21  ;;  %v624_v29 = vld [vmem:[#allocation6 + $0x2e8] sm:$0xff]  ;;  %s8176_s27 = smov 16   ;;  %s8177_s29 = smov 32  }
  0xf3   : > { %7098 = vmatprep.subr.bf16.mxu1 %v7097_v18  ;;  %v7077_v27 = vpack.c.bf16 %v622_v25, %v617_v24  ;;  %v616_v30 = vld [vmem:[#allocation6 + $0x2a8] sm:$0xff]  ;;  %v7101_v31 = vpack.c.bf16 %v624_v29, %v619_v28  ;;  %v621_v32 = vld [vmem:[#allocation6 + $0x2d0] sm:$0xff]  ;;  %v618_v33 = vld [vmem:[#allocation6 + $0x2b8] sm:$0xff] }
  0xf4   : > { %v623_v34 = vld [vmem:[#allocation6 + $0x2e0] sm:$0xff]  ;;  %v7079_v35 = vpack.c.bf16 %v621_v32, %v616_v30  ;;  %v632_v37 = vld [vmem:[#allocation6 + $0x328] sm:$0xff]  ;;  %v629_v38 = vld [vmem:[#allocation6 + $0x310] sm:$0xff] }
  0xf5   : > { %7076 = vmatpush1.bf16.msra.mxu0 %v7075_v22  ;;  %v627_v36 = vld [vmem:[#allocation6 + $0x300] sm:$0xff]  ;;  %7100 = vmatpush1.bf16.msra.mxu1 %v7099_v26  ;;  %v7103_v39 = vpack.c.bf16 %v623_v34, %v618_v33  ;;  %v634_v41 = vld [vmem:[#allocation6 + $0x338] sm:$0xff]  ;;  %v628_v45 = vld [vmem:[#allocation6 + $0x308] sm:$0xff] }
  0xf6   : > { %7078 = vmatprep.subr.bf16.mxu0 %v7077_v27  ;;  %v7081_v40 = vpack.c.bf16 %v632_v37, %v627_v36  ;;  %v626_v42 = vld [vmem:[#allocation6 + $0x2f8] sm:$0xff]  ;;  %v631_v43 = vld [vmem:[#allocation6 + $0x320] sm:$0xff]  ;;  %7102 = vmatprep.subr.bf16.mxu1 %v7101_v31  ;;  %v7105_v44 = vpack.c.bf16 %v634_v41, %v629_v38  ;;  %v633_v46 = vld [vmem:[#allocation6 + $0x330] sm:$0xff] }
  0xf7   : > { %v637_v47 = vld [vmem:[#allocation6 + $0x350] sm:$0xff]  ;;  %v642_v48 = vld [vmem:[#allocation6 + $0x378] sm:$0xff]  ;;  %v639_v49 = vld [vmem:[#allocation6 + $0x360] sm:$0xff]  ;;  %v7083_v51 = vpack.c.bf16 %v631_v43, %v626_v42  ;;  %v7107_v52 = vpack.c.bf16 %v633_v46, %v628_v45 }
  0xf8   : > { %v644_v50 = vld [vmem:[#allocation6 + $0x388] sm:$0xff]  ;;  %v7085_v53 = vpack.c.bf16 %v642_v48, %v637_v47  ;;  %v641_v55 = vld [vmem:[#allocation6 + $0x370] sm:$0xff]  ;;  %v638_v56 = vld [vmem:[#allocation6 + $0x358] sm:$0xff] }
  0xf9   : > { %7080 = vmatpush1.bf16.msra.mxu0 %v7079_v35  ;;  %7104 = vmatpush1.bf16.msra.mxu1 %v7103_v39  ;;  %v636_v54 = vld [vmem:[#allocation6 + $0x348] sm:$0xff]  ;;  %v7109_v57 = vpack.c.bf16 %v644_v50, %v639_v49  ;;  %v643_v58 = vld [vmem:[#allocation6 + $0x380] sm:$0xff]  ;;  %v649_v61 = vld [vmem:[#allocation6 + $0x3b0] sm:$0xff] }
  0xfa   : > { %7082 = vmatprep.subr.bf16.mxu0 %v7081_v40  ;;  %7106 = vmatprep.subr.bf16.mxu1 %v7105_v44  ;;  %v647_v59 = vld [vmem:[#allocation6 + $0x3a0] sm:$0xff]  ;;  %v652_v60 = vld [vmem:[#allocation6 + $0x3c8] sm:$0xff]  ;;  %v654_v62 = vld [vmem:[#allocation6 + $0x3d8] sm:$0xff]  ;;  %v7087_v63 = vpack.c.bf16 %v641_v55, %v636_v54  ;;  %v7111_v1 = vpack.c.bf16 %v643_v58, %v638_v56 }
  0xfb   : > { %v7089_v2 = vpack.c.bf16 %v652_v60, %v647_v59  ;;  %v646_v3 = vld [vmem:[#allocation6 + $0x398] sm:$0xff]  ;;  %v651_v4 = vld [vmem:[#allocation6 + $0x3c0] sm:$0xff]  ;;  %v7113_v5 = vpack.c.bf16 %v654_v62, %v649_v61  ;;  %v648_v6 = vld [vmem:[#allocation6 + $0x3a8] sm:$0xff] }
  0xfc   : > { %v653_v7 = vld [vmem:[#allocation6 + $0x3d0] sm:$0xff]  ;;  %v7091_v8 = vpack.c.bf16 %v651_v4, %v646_v3  ;;  %v659_v11 = vld [vmem:[#allocation6 + $0x400] sm:$0xf]  ;;  %v600_v12 = vld [vmem:[#allocation6 + $0x228] sm:$0xff] }
  0xfd   : > { %7084 = vmatpush1.bf16.msra.mxu0 %v7083_v51  ;;  %7108 = vmatpush1.bf16.msra.mxu1 %v7107_v52  ;;  %v7115_v9 = vpack.c.bf16 %v653_v7, %v648_v6  ;;  %v657_v10 = vld [vmem:[#allocation6 + $0x3f0] sm:$0xf]  ;;  %v656_v14 = vld [vmem:[#allocation6 + $0x3e8] sm:$0xf]  ;;  %v658_v15 = vld [vmem:[#allocation6 + $0x3f8] sm:$0xf] }
  0xfe   : > { %7086 = vmatprep.subr.bf16.mxu0 %v7085_v53  ;;  %7110 = vmatprep.subr.bf16.mxu1 %v7109_v57  ;;  %v605_v13 = vld [vmem:[#allocation6 + $0x250] sm:$0xff]  ;;  %v610_v16 = vld [vmem:[#allocation6 + $0x278] sm:$0xff]  ;;  %v615_v17 = vld [vmem:[#allocation6 + $0x2a0] sm:$0xff] }
  0xff   : > { %v8519_v18 = vld [vmem:[%s8514_s18 + $0x1] sm:$0xff]  ;;  %v7117_v19 = vpack.c.bf16 %v605_v13, %v600_v12  ;;  %v521_v20 = vld [vmem:[#allocation6 + $0x18] sm:$0xff]  ;;  %v7121_v22 = vpack.c.bf16 %v615_v17, %v610_v16  ;;  %v625_v24 = vld [vmem:[#allocation6 + $0x2f0] sm:$0xff] }
 0x100   : > { %v526_v21 = vld [vmem:[#allocation6 + $0x40] sm:$0xff]  ;;  %v620_v23 = vld [vmem:[#allocation6 + $0x2c8] sm:$0xff]  ;;  %v520_v26 = vld [vmem:[#allocation6 + $0x10] sm:$0xff] }
 0x101   : > { %7088 = vmatpush1.bf16.msra.mxu0 %v7087_v63  ;;  %7112 = vmatpush1.bf16.msra.mxu1 %v7111_v1  ;;  %v7165_v25 = vpack.c.bf16 %v526_v21, %v521_v20  ;;  %v525_v27 = vld [vmem:[#allocation6 + $0x38] sm:$0xff]  ;;  %v8528_v28 = vld [vmem:[%s8514_s18 + $0x9] sm:$0xff]  ;;  %v7125_v31 = vpack.c.bf16 %v625_v24, %v620_v23  ;;  %v635_v34 = vld [vmem:[#allocation6 + $0x340] sm:$0xff] }
 0x102   : > { %7090 = vmatprep.subr.bf16.mxu0 %v7089_v2  ;;  %7114 = vmatprep.subr.bf16.mxu1 %v7113_v5  ;;  %v531_v29 = vld [vmem:[#allocation6 + $0x68] sm:$0xff]  ;;  %v536_v30 = vld [vmem:[#allocation6 + $0x90] sm:$0xff]  ;;  %v630_v32 = vld [vmem:[#allocation6 + $0x318] sm:$0xff]  ;;  %v7167_v33 = vpack.c.bf16 %v525_v27, %v520_v26 }
 0x103   : > { %v7169_v35 = vpack.c.bf16 %v536_v30, %v531_v29  ;;  %v530_v36 = vld [vmem:[#allocation6 + $0x60] sm:$0xff]  ;;  %v535_v37 = vld [vmem:[#allocation6 + $0x88] sm:$0xff]  ;;  %v8538_v38 = vld [vmem:[%s8514_s18 + $0x11] sm:$0xff]  ;;  %v7129_v41 = vpack.c.bf16 %v635_v34, %v630_v32 }
 0x104   : > { %v541_v39 = vld [vmem:[#allocation6 + $0xb8] sm:$0xff]  ;;  %v546_v40 = vld [vmem:[#allocation6 + $0xe0] sm:$0xff]  ;;  %v7171_v42 = vpack.c.bf16 %v535_v37, %v530_v36  ;;  %v640_v43 = vld [vmem:[#allocation6 + $0x368] sm:$0xff] }
 0x105   : > { %7092 = vmatpush1.bf16.msra.mxu0 %v7091_v8  ;;  %7116 = vmatpush1.bf16.msra.mxu1 %v7115_v9  ;;  %v645_v44 = vld [vmem:[#allocation6 + $0x390] sm:$0xff]  ;;  %v7173_v45 = vpack.c.bf16 %v546_v40, %v541_v39  ;;  %v545_v47 = vld [vmem:[#allocation6 + $0xd8] sm:$0xff]  ;;  %v551_v49 = vld [vmem:[#allocation6 + $0x108] sm:$0xff] }
 0x106   : > { %6186 = vmatprep.subr.msk.mxu0 %vm10423_vm0, %v657_v10  ;;  %6200 = vmatprep.subr.msk.mxu1 %vm10423_vm0, %v659_v11  ;;  %v540_v46 = vld [vmem:[#allocation6 + $0xb0] sm:$0xff]  ;;  %v8547_v48 = vld [vmem:[%s8514_s18 + $0x19] sm:$0xff]  ;;  %v7133_v51 = vpack.c.bf16 %v645_v44, %v640_v43  ;;  %v555_v55 = vld [vmem:[#allocation6 + $0x128] sm:$0xff] }
 0x107   : > { %v556_v50 = vld [vmem:[#allocation6 + $0x130] sm:$0xff]  ;;  %v7175_v52 = vpack.c.bf16 %v545_v47, %v540_v46  ;;  %v550_v53 = vld [vmem:[#allocation6 + $0x100] sm:$0xff]  ;;  %v650_v56 = vld [vmem:[#allocation6 + $0x3b8] sm:$0xff] }
 0x108   : > { %v7177_v54 = vpack.c.bf16 %v556_v50, %v551_v49  ;;  %v655_v57 = vld [vmem:[#allocation6 + $0x3e0] sm:$0xff]  ;;  %v561_v59 = vld [vmem:[#allocation6 + $0x158] sm:$0xff]  ;;  %v7179_v61 = vpack.c.bf16 %v555_v55, %v550_v53  ;;  %v560_v1 = vld [vmem:[#allocation6 + $0x150] sm:$0xff] }
 0x109   : > { %6187 = vmatpush1.msk.msra.mxu0 %vm10423_vm0, %v656_v14  ;;  %6201 = vmatpush1.msk.msra.mxu1 %vm10423_vm0, %v658_v15  ;;  %v8556_v58 = vld [vmem:[%s8514_s18 + $0x21] sm:$0xff]  ;;  %v7137_v62 = vpack.c.bf16 %v655_v57, %v650_v56  ;;  %v565_v2 = vld [vmem:[#allocation6 + $0x178] sm:$0xff]  ;;  %v8565_v3 = vld [vmem:[%s8514_s18 + $0x29] sm:$0xff] }
 0x10a   : > { %6188 = vmatmul.mubr.msk.f32.vlgmr.msra.gmra.mrb[0].mxu0 %vm10422_vm1, %v8519_v18  ;;  %6202 = vmatmul.mubr.msk.f32.vlgmr.msra.gmra.mrb[0].mxu1 %vm10422_vm1, %v8519_v18  ;;  %v566_v60 = vld [vmem:[#allocation6 + $0x180] sm:$0xff]  ;;  %v571_v4 = vld [vmem:[#allocation6 + $0x1a8] sm:$0xff]  ;;  %v576_v5 = vld [vmem:[#allocation6 + $0x1d0] sm:$0xff]  ;;  %v7183_v6 = vpack.c.bf16 %v565_v2, %v560_v1 }
 0x10b   : > { %7118 = vmatprep.subr.bf16.mxu0 %v7117_v19  ;;  %784 = vmatprep.mubr.f32.mxu0 %v10436_v0  ;;  %v7181_v63 = vpack.c.bf16 %v566_v60, %v561_v59  ;;  %v660_v7 = vld [vmem:[#allocation6 + $0x408] sm:$0xf]  ;;  %v570_v8 = vld [vmem:[#allocation6 + $0x1a0] sm:$0xff]  ;;  %v7185_v9 = vpack.c.bf16 %v576_v5, %v571_v4  ;;  %v524_v12 = vld [vmem:[#allocation6 + $0x30] sm:$0xff] }
 0x10c   : > { %7120 = vmatpush3.bf16.msra.mxu0 %v7117_v19  ;;  %921 = vmatprep.mubr.f32.mxu1 %v10436_v0  ;;  %v575_v10 = vld [vmem:[#allocation6 + $0x1c8] sm:$0xff]  ;;  %v8574_v13 = vld [vmem:[%s8514_s18 + $0x31] sm:$0xff]  ;;  %v8581_v16 = vld [vmem:[%s8514_s18 + $0x39] sm:$0xff] }
 0x10d   : > { %7122 = vmatprep.subr.bf16.mxu0 %v7121_v22  ;;  %7166 = vmatprep.subr.bf16.mxu1 %v7165_v25  ;;  %v519_v11 = vld [vmem:[#allocation6 + $0x8] sm:$0xff]  ;;  %v7187_v14 = vpack.c.bf16 %v575_v10, %v570_v8  ;;  %v581_v17 = vld [vmem:[#allocation6 + $0x1f8] sm:$0xf]  ;;  %v1584_v20 = vld [vmem:[#allocation6 + $0x450] sm:$0xff] }
 0x10e   : > { %6189 = vmatmul.mubr.msk.f32.gmra.mrb[2].mxu0 %vm10422_vm1, %v8528_v28  ;;  %6203 = vmatmul.mubr.msk.f32.gmra.mrb[2].mxu1 %vm10422_vm1, %v8528_v28  ;;  %v7141_v15 = vpack.c.bf16 %v524_v12, %v519_v11  ;;  %v1579_v19 = vld [vmem:[#allocation6 + $0x428] sm:$0xff]  ;;  %v580_v21 = vld [vmem:[#allocation6 + $0x1f0] sm:$0xf]  ;;  %v8623_v26 = vld [vmem:[%s8514_s18 + $0x59] sm:$0xff] }
 0x10f   : > { %790 = vmatprep.mubr.f32.mxu0 %v10436_v0  ;;  %927 = vmatprep.mubr.f32.mxu1 %v10436_v0  ;;  %v8595_v23 = vld [vmem:[%s8514_s18 + $0x41] sm:$0xff]  ;;  %v8605_v24 = vld [vmem:[%s8514_s18 + $0x49] sm:$0xff]  ;;  %v8614_v25 = vld [vmem:[%s8514_s18 + $0x51] sm:$0xff] }
 0x110   : > { %7124 = vmatpush3.bf16.msra.mxu0 %v7121_v22  ;;  %7168 = vmatpush1.bf16.msra.mxu1 %v7167_v33  ;;  %v7237_v22 = vpack.c.bf16 %v1584_v20, %v1579_v19  ;;  %v518_v27 = vld [vmem:[#allocation6] sm:$0xff]  ;;  %v523_v29 = vld [vmem:[#allocation6 + $0x28] sm:$0xff]  ;;  %v529_v30 = vld [vmem:[#allocation6 + $0x58] sm:$0xff] }
 0x111   : > { %7126 = vmatprep.subr.bf16.mxu0 %v7125_v31  ;;  %7170 = vmatprep.subr.bf16.mxu1 %v7169_v35  ;;  %v1578_v32 = vld [vmem:[#allocation6 + $0x420] sm:$0xff]  ;;  %v1583_v33 = vld [vmem:[#allocation6 + $0x448] sm:$0xff]  ;;  %v7143_v34 = vpack.c.bf16 %v523_v29, %v518_v27  ;;  %v1589_v35 = vld [vmem:[#allocation6 + $0x478] sm:$0xff] }
 0x112   : > { %6190 = vmatmul.mubr.msk.f32.gmra.mrb[4].mxu0 %vm10422_vm1, %v8538_v38  ;;  %6204 = vmatmul.mubr.msk.f32.gmra.mrb[4].mxu1 %vm10422_vm1, %v8538_v38  ;;  %v1594_v36 = vld [vmem:[#allocation6 + $0x4a0] sm:$0xff]  ;;  %v528_v40 = vld [vmem:[#allocation6 + $0x50] sm:$0xff]  ;;  %v7239_v44 = vpack.c.bf16 %v1583_v33, %v1578_v32  ;;  %v1599_v49 = vld [vmem:[#allocation6 + $0x4c8] sm:$0xff] }
 0x113   : > { %796 = vmatprep.mubr.f32.mxu0 %v10436_v0  ;;  %933 = vmatprep.mubr.f32.mxu1 %v10436_v0  ;;  %v8634_v37 = vld [vmem:[%s8514_s18] sm:$0xff]  ;;  %v544_v43 = vld [vmem:[#allocation6 + $0xd0] sm:$0xff]  ;;  %v1603_v60 = vld [vmem:[#allocation6 + $0x4e8] sm:$0xff] }
 0x114   : > { %7128 = vmatpush3.bf16.msra.mxu0 %v7125_v31  ;;  %7172 = vmatpush1.bf16.msra.mxu1 %v7171_v42  ;;  %v534_v31 = vld [vmem:[#allocation6 + $0x80] sm:$0xff]  ;;  %v539_v42 = vld [vmem:[#allocation6 + $0xa8] sm:$0xff]  ;;  %v1588_v46 = vld [vmem:[#allocation6 + $0x470] sm:$0xff] }
 0x115   : > { %7130 = vmatprep.subr.bf16.mxu0 %v7129_v41  ;;  %7174 = vmatprep.subr.bf16.mxu1 %v7173_v45  ;;  %v7145_v39 = vpack.c.bf16 %v534_v31, %v529_v30  ;;  %v7241_v45 = vpack.c.bf16 %v1594_v36, %v1589_v35  ;;  %v1604_v50 = vld [vmem:[#allocation6 + $0x4f0] sm:$0xff]  ;;  %v538_v53 = vld [vmem:[#allocation6 + $0xa0] sm:$0xff]  ;;  %v553_v4 = vld [vmem:[#allocation6 + $0x118] sm:$0xff] }
 0x116   : > { %6191 = vmatmul.mubr.msk.f32.gmra.mrb[6].mxu0 %vm10422_vm1, %v8547_v48  ;;  %6205 = vmatmul.mubr.msk.f32.gmra.mrb[6].mxu1 %vm10422_vm1, %v8547_v48  ;;  %v554_v55 = vld [vmem:[#allocation6 + $0x120] sm:$0xff]  ;;  %v7245_v57 = vpack.c.bf16 %v1604_v50, %v1599_v49  ;;  %v548_v2 = vld [vmem:[#allocation6 + $0xf0] sm:$0xff]  ;;  %v1619_v11 = vld [vmem:[#allocation6 + $0x568] sm:$0xff] }
 0x117   : > { %802 = vmatprep.mubr.f32.mxu0 %v10436_v0  ;;  %939 = vmatprep.mubr.f32.mxu1 %v10436_v0  ;;  %v1598_v59 = vld [vmem:[#allocation6 + $0x4c0] sm:$0xff]  ;;  %v564_v5 = vld [vmem:[#allocation6 + $0x170] sm:$0xff]  ;;  %v7155_v10 = vpack.c.bf16 %v553_v4, %v548_v2  ;;  %v1623_v27 = vld [vmem:[#allocation6 + $0x588] sm:$0xff] }
 0x118   : > { %7132 = vmatpush3.bf16.msra.mxu0 %v7129_v41  ;;  %7176 = vmatpush1.bf16.msra.mxu1 %v7175_v52  ;;  %v533_v41 = vld [vmem:[#allocation6 + $0x78] sm:$0xff]  ;;  %v7149_v52 = vpack.c.bf16 %v544_v43, %v539_v42  ;;  %v1608_v8 = vld [vmem:[#allocation6 + $0x510] sm:$0xff]  ;;  %v574_v19 = vld [vmem:[#allocation6 + $0x1c0] sm:$0xff] }
 0x119   : > { %7134 = vmatprep.subr.bf16.mxu0 %v7133_v51  ;;  %7178 = vmatprep.subr.bf16.mxu1 %v7177_v54  ;;  %v7147_v47 = vpack.c.bf16 %v533_v41, %v528_v40  ;;  %v543_v54 = vld [vmem:[#allocation6 + $0xc8] sm:$0xff]  ;;  %v1624_v12 = vld [vmem:[#allocation6 + $0x590] sm:$0xff]  ;;  %v1629_v30 = vld [vmem:[#allocation6 + $0x5b8] sm:$0xff] }
 0x11a   : > { %6192 = vmatmul.mubr.msk.f32.gmra.mrb[8].mxu0 %vm10422_vm1, %v8556_v58  ;;  %6206 = vmatmul.mubr.msk.f32.gmra.mrb[8].mxu1 %vm10422_vm1, %v8556_v58  ;;  %v1634_v31 = vld [vmem:[#allocation6 + $0x5e0] sm:$0xff]  ;;  %v568_v33 = vld [vmem:[#allocation6 + $0x190] sm:$0xff]  ;;  %v8682_v41 = vld [vmem:[%s8514_s18 + $0x28] sm:$0xff] }
 0x11b   : > { %808 = vmatprep.mubr.f32.mxu0 %v10436_v0  ;;  %945 = vmatprep.mubr.f32.mxu1 %v10436_v0  ;;  %v7257_v35 = vpack.c.bf16 %v1634_v31, %v1629_v30  ;;  %v1628_v36 = vld [vmem:[#allocation6 + $0x5b0] sm:$0xff]  ;;  %v527_v42 = vld [vmem:[#allocation6 + $0x48] sm:$0xff]  ;;  %v542_v49 = vld [vmem:[#allocation6 + $0xc0] sm:$0xff] }
 0x11c   : > { %7136 = vmatpush3.bf16.msra.mxu0 %v7133_v51  ;;  %7180 = vmatpush1.bf16.msra.mxu1 %v7179_v61  ;;  %v8642_v51 = vld [vmem:[%s8514_s18 + $0x8] sm:$0xff]  ;;  %v7151_v61 = vpack.c.bf16 %v543_v54, %v538_v53  ;;  %v2167_v53 = vld [vmem:[#allocation6 + $0x630] sm:$0xff]  ;;  %v2172_v54 = vld [vmem:[#allocation6 + $0x658] sm:$0xff] }
 0x11d   : > { %7138 = vmatprep.subr.bf16.mxu0 %v7137_v62  ;;  %7182 = vmatprep.subr.bf16.mxu1 %v7181_v63  ;;  %v1614_v63 = vld [vmem:[#allocation6 + $0x540] sm:$0xff]  ;;  %v547_v50 = vld [vmem:[#allocation6 + $0xe8] sm:$0xff]  ;;  %v572_v4 = vld [vmem:[#allocation6 + $0x1b0] sm:$0xff] }
 0x11e   : > { %6193 = vmatmul.mubr.msk.f32.gmra.mrb[10].mxu0 %vm10422_vm1, %v8565_v3  ;;  %6207 = vmatmul.mubr.msk.f32.gmra.mrb[10].mxu1 %vm10422_vm1, %v8565_v3  ;;  %v2192_v30 = vld [vmem:[#allocation6 + $0x6f8] sm:$0xff] }
 0x11f   : > { %814 = vmatprep.mubr.f32.mxu0 %v10436_v0  ;;  %951 = vmatprep.mubr.f32.mxu1 %v10436_v0 }
 0x120   : > { %7140 = vmatpush3.bf16.msra.mxu0 %v7137_v62  ;;  %7184 = vmatpush1.bf16.msra.mxu1 %v7183_v6  ;;  %v1609_v62 = vld [vmem:[#allocation6 + $0x518] sm:$0xff]  ;;  %v7247_v6 = vpack.c.bf16 %v1603_v60, %v1598_v59  ;;  %v7309_v59 = vpack.c.bf16 %v2172_v54, %v2167_v53  ;;  %v8713_v60 = vld [vmem:[%s8514_s18 + $0x40] sm:$0xff] }
 0x121   : > { %6715 = vmatprep.subr.msk.mxu0 %vm10423_vm0, %v660_v7  ;;  %7186 = vmatprep.subr.bf16.mxu1 %v7185_v9  ;;  %v1613_v9 = vld [vmem:[#allocation6 + $0x538] sm:$0xff] }
 0x122   : > { %6194 = vmatmul.mubr.msk.f32.gmra.mrb[12].mxu0 %vm10422_vm1, %v8574_v13  ;;  %6208 = vmatmul.mubr.msk.f32.gmra.mrb[12].mxu1 %vm10422_vm1, %v8574_v13  ;;  %v7251_v20 = vpack.c.bf16 %v1613_v9, %v1608_v8  ;;  %v582_v8 = vld [vmem:[#allocation6 + $0x200] sm:$0xf]  ;;  %v2166_v9 = vld [vmem:[#allocation6 + $0x628] sm:$0xff] }
 0x123   : > { %820 = vmatprep.mubr.f32.mxu0 %v10436_v0  ;;  %957 = vmatprep.mubr.f32.mxu1 %v10436_v0 }
 0x124   : > { %6716 = vmatpush3.msk.msra.mxu0 %vm10423_vm0, %v660_v7  ;;  %7188 = vmatpush1.bf16.msra.mxu1 %v7187_v14  ;;  %v7249_v7 = vpack.c.bf16 %v1614_v63, %v1609_v62  ;;  %v562_v62 = vld [vmem:[#allocation6 + $0x160] sm:$0xff]  ;;  %v567_v63 = vld [vmem:[#allocation6 + $0x188] sm:$0xff] }
 0x125   : > { %7142 = vmatprep.subr.bf16.mxu0 %v7141_v15  ;;  %6241 = vmatprep.subr.msk.mxu1 %vm10423_vm0, %v581_v17  ;;  %v558_v15 = vld [vmem:[#allocation6 + $0x140] sm:$0xff]  ;;  %v563_v17 = vld [vmem:[#allocation6 + $0x168] sm:$0xff]  ;;  %v7205_v2 = vpack.c.bf16 %v567_v63, %v562_v62  ;;  %v8803_v62 = vld [vmem:[%s8514_s18 + $0x32] sm:$0xff] }
 0x126   : > { %6195 = vmatmul.mubr.msk.f32.gmra.mrb[14].mxu0 %vm10422_vm1, %v8581_v16  ;;  %6209 = vmatmul.mubr.msk.f32.gmra.mrb[14].mxu1 %vm10422_vm1, %v8581_v16  ;;  %v7159_v29 = vpack.c.bf16 %v563_v17, %v558_v15  ;;  %v2177_v15 = vld [vmem:[#allocation6 + $0x680] sm:$0xff]  ;;  %v2182_v17 = vld [vmem:[#allocation6 + $0x6a8] sm:$0xff] }
 0x127   : > { %826 = vmatprep.mubr.f32.mxu0 %v10436_v0  ;;  %963 = vmatprep.mubr.f32.mxu1 %v10436_v0  ;;  %v1587_v63 = vld [vmem:[#allocation6 + $0x468] sm:$0xff] }
 0x128   : > { %6242 = vmatpush1.msk.msra.mxu1 %vm10423_vm0, %v580_v21  ;;  %v7253_v21 = vpack.c.bf16 %v1624_v12, %v1619_v11  ;;  %v1577_v11 = vld [vmem:[#allocation6 + $0x418] sm:$0xff]  ;;  %v1582_v12 = vld [vmem:[#allocation6 + $0x440] sm:$0xff] }
 0x129   : > { %7238 = vmatprep.subr.bf16.mxu1 %v7237_v22  ;;  %v1618_v22 = vld [vmem:[#allocation6 + $0x560] sm:$0xff] }
 0x12a   : > { %6196 = vmatmul.mubr.msk.f32.gmra.mrb[16].mxu0 %vm10422_vm1, %v8595_v23  ;;  %6210 = vmatmul.mubr.msk.f32.gmra.mrb[16].mxu1 %vm10422_vm1, %v8595_v23 }
 0x12b   : > { %832 = vmatprep.mubr.f32.mxu0 %v10436_v0  ;;  %969 = vmatprep.mubr.f32.mxu1 %v10436_v0 }
 0x12e   : > { %6197 = vmatmul.mubr.msk.f32.gmra.mrb[18].mxu0 %vm10422_vm1, %v8605_v24  ;;  %6211 = vmatmul.mubr.msk.f32.gmra.mrb[18].mxu1 %vm10422_vm1, %v8605_v24 }
 0x12f   : > { %838 = vmatprep.mubr.f32.mxu0 %v10436_v0  ;;  %975 = vmatprep.mubr.f32.mxu1 %v10436_v0 }
 0x132   : > { %6198 = vmatmul.mubr.msk.f32.gmra.mrb[20].mxu0 %vm10422_vm1, %v8614_v25  ;;  %6212 = vmatmul.mubr.msk.f32.gmra.mrb[20].mxu1 %vm10422_vm1, %v8614_v25 }
 0x133   : > { %844 = vmatprep.mubr.f32.mxu0 %v10436_v0  ;;  %981 = vmatprep.mubr.f32.mxu1 %v10436_v0 }
 0x136   : > { %6199 = vmatmul.mubr.msk.f32.gmra.mrb[22].mxu0 %vm10422_vm1, %v8623_v26  ;;  %6213 = vmatmul.mubr.msk.f32.gmra.mrb[22].mxu1 %vm10422_vm1, %v8623_v26 }
 0x137   : > { %6717 = vmatprep.mubr.msk.f32.mxu0 %vm10422_vm1, %v8519_v18  ;;  %1365 = vmatprep.mubr.f32.mxu1 %v10436_v0  ;;  %v1593_v18 = vld [vmem:[#allocation6 + $0x498] sm:$0xff] }
 0x138   : > { %v7243_v56 = vpack.c.bf16 %v1593_v18, %v1588_v46  ;;  %v1639_v46 = vld [vmem:[#allocation6 + $0x608] sm:$0xf]  ;;  %v8693_v18 = vld [vmem:[%s8514_s18 + $0x30] sm:$0xff] }
 0x13a   : > { %6718 = vmatmul.mubr.msk.f32.vlgmr.msra.gmra.mrb[24].mxu0 %vm10422_vm1, %v8528_v28  ;;  %6243 = vmatmul.mubr.msk.f32.vlgmr.msra.gmra.mrb[0].mxu1 %vm10422_vm1, %v8634_v37  ;;  %v549_v28 = vld [vmem:[#allocation6 + $0xf8] sm:$0xff] }
 0x13b   : > { %7144 = vmatpush1.bf16.msra.mxu0 %v7143_v34  ;;  %1371 = vmatprep.mubr.f32.mxu1 %v10436_v0  ;;  %v7153_v1 = vpack.c.bf16 %v554_v55, %v549_v28  ;;  %v7255_v34 = vpack.c.bf16 %v1623_v27, %v1618_v22  ;;  %v7197_v28 = vpack.c.bf16 %v547_v50, %v542_v49  ;;  %v552_v55 = vld [vmem:[#allocation6 + $0x110] sm:$0xff]  ;;  %v2181_v22 = vld [vmem:[#allocation6 + $0x6a0] sm:$0xff]  ;;  %v2222_v50 = vld [vmem:[#allocation6 + $0x7e8] sm:$0xff] }
 0x13c   : > { %7146 = vmatprep.subr.bf16.mxu0 %v7145_v39  ;;  %6720 = vmatprep.mubr.msk.f32.mxu0 %vm10422_vm1, %v8538_v38  ;;  %v8652_v38 = vld [vmem:[%s8514_s18 + $0x10] sm:$0xff]  ;;  %v1633_v39 = vld [vmem:[#allocation6 + $0x5d8] sm:$0xff]  ;;  %v2217_v49 = vld [vmem:[#allocation6 + $0x7c0] sm:$0xff] }
 0x13d   : > { %7240 = vmatpush1.bf16.msra.mxu1 %v7239_v44  ;;  %v7259_v43 = vpack.c.bf16 %v1633_v39, %v1628_v36  ;;  %v532_v44 = vld [vmem:[#allocation6 + $0x70] sm:$0xff]  ;;  %v2202_v36 = vld [vmem:[#allocation6 + $0x748] sm:$0xff]  ;;  %v7329_v54 = vpack.c.bf16 %v2222_v50, %v2217_v49  ;;  %v1637_v50 = vld [vmem:[#allocation6 + $0x5f8] sm:$0xf] }
 0x13e   : > { %6721 = vmatmul.mubr.msk.f32.gmra.mrb[26].mxu0 %vm10422_vm1, %v8547_v48  ;;  %7242 = vmatprep.subr.bf16.mxu1 %v7241_v45  ;;  %v559_v48 = vld [vmem:[#allocation6 + $0x148] sm:$0xff]  ;;  %v537_v45 = vld [vmem:[#allocation6 + $0x98] sm:$0xff]  ;;  %v2770_v49 = vld [vmem:[#allocation6 + $0x8b0] sm:$0xff] }
 0x13f   : > { %7148 = vmatpush1.bf16.msra.mxu0 %v7147_v47  ;;  %6244 = vmatmul.mubr.msk.f32.gmra.mrb[2].mxu1 %vm10422_vm1, %v8642_v51  ;;  %v7157_v14 = vpack.c.bf16 %v564_v5, %v559_v48  ;;  %v577_v48 = vld [vmem:[#allocation6 + $0x1d8] sm:$0xff]  ;;  %v8732_v5 = vld [vmem:[%s8514_s18 + $0x50] sm:$0xff] }
 0x140   : > { %7150 = vmatprep.subr.bf16.mxu0 %v7149_v52  ;;  %1377 = vmatprep.mubr.f32.mxu1 %v10436_v0  ;;  %v8703_v52 = vld [vmem:[%s8514_s18 + $0x38] sm:$0xff]  ;;  %v8760_v27 = vld [vmem:[%s8514_s18 + $0xa] sm:$0xff] }
 0x141   : > { %6723 = vmatprep.mubr.msk.f32.mxu0 %vm10422_vm1, %v8556_v58  ;;  %7244 = vmatpush1.bf16.msra.mxu1 %v7243_v56  ;;  %v8662_v58 = vld [vmem:[%s8514_s18 + $0x18] sm:$0xff] }
 0x142   : > { %6724 = vmatmul.mubr.msk.f32.gmra.mrb[28].mxu0 %vm10422_vm1, %v8565_v3  ;;  %7246 = vmatprep.subr.bf16.mxu1 %v7245_v57  ;;  %v569_v3 = vld [vmem:[#allocation6 + $0x198] sm:$0xff]  ;;  %v1638_v57 = vld [vmem:[#allocation6 + $0x600] sm:$0xf] }
 0x143   : > { %7152 = vmatpush1.bf16.msra.mxu0 %v7151_v61  ;;  %6245 = vmatmul.mubr.msk.f32.gmra.mrb[4].mxu1 %vm10422_vm1, %v8652_v38  ;;  %v7161_v32 = vpack.c.bf16 %v574_v19, %v569_v3  ;;  %v557_v56 = vld [vmem:[#allocation6 + $0x138] sm:$0xff]  ;;  %v7213_v19 = vpack.c.bf16 %v1582_v12, %v1577_v11  ;;  %v1591_v11 = vld [vmem:[#allocation6 + $0x488] sm:$0xff] }
 0x144   : > { %7154 = vmatprep.subr.bf16.mxu0 %v7153_v1  ;;  %1383 = vmatprep.mubr.f32.mxu1 %v10436_v0  ;;  %v7201_v61 = vpack.c.bf16 %v557_v56, %v552_v55  ;;  %v8723_v1 = vld [vmem:[%s8514_s18 + $0x48] sm:$0xff]  ;;  %v2221_v55 = vld [vmem:[#allocation6 + $0x7e0] sm:$0xff]  ;;  %v1597_v12 = vld [vmem:[#allocation6 + $0x4b8] sm:$0xff] }
 0x145   : > { %6726 = vmatprep.mubr.msk.f32.mxu0 %vm10422_vm1, %v8574_v13  ;;  %7248 = vmatpush1.bf16.msra.mxu1 %v7247_v6  ;;  %v8672_v13 = vld [vmem:[%s8514_s18 + $0x20] sm:$0xff]  ;;  %v7209_v6 = vpack.c.bf16 %v577_v48, %v572_v4  ;;  %v8797_v56 = vld [vmem:[%s8514_s18 + $0x2a] sm:$0xff]  ;;  %v2755_v48 = vld [vmem:[#allocation6 + $0x838] sm:$0xff] }
 0x146   : > { %6727 = vmatmul.mubr.msk.f32.gmra.mrb[30].mxu0 %vm10422_vm1, %v8581_v16  ;;  %7250 = vmatprep.subr.bf16.mxu1 %v7249_v7  ;;  %v573_v16 = vld [vmem:[#allocation6 + $0x1b8] sm:$0xff]  ;;  %v2227_v4 = vld [vmem:[#allocation6 + $0x810] sm:$0xf] }
 0x147   : > { %7156 = vmatpush1.bf16.msra.mxu0 %v7155_v10  ;;  %6246 = vmatmul.mubr.msk.f32.gmra.mrb[6].mxu1 %vm10422_vm1, %v8662_v58  ;;  %v7163_v40 = vpack.c.bf16 %v573_v16, %v568_v33  ;;  %v8741_v7 = vld [vmem:[%s8514_s18 + $0x58] sm:$0xff]  ;;  %v2171_v10 = vld [vmem:[#allocation6 + $0x650] sm:$0xff]  ;;  %v2186_v33 = vld [vmem:[#allocation6 + $0x6c8] sm:$0xff] }
 0x148   : > { %7158 = vmatprep.subr.bf16.mxu0 %v7157_v14  ;;  %1389 = vmatprep.mubr.f32.mxu1 %v10436_v0  ;;  %v8750_v14 = vld [vmem:[%s8514_s18 + $0x2] sm:$0xff]  ;;  %v7311_v3 = vpack.c.bf16 %v2171_v10, %v2166_v9  ;;  %v2191_v16 = vld [vmem:[#allocation6 + $0x6f0] sm:$0xff] }
 0x149   : > { %6729 = vmatprep.mubr.msk.f32.mxu0 %vm10422_vm1, %v8595_v23  ;;  %7252 = vmatpush1.bf16.msra.mxu1 %v7251_v20  ;;  %v579_v23 = vld [vmem:[#allocation6 + $0x1e8] sm:$0xf]  ;;  %v7313_v20 = vpack.c.bf16 %v2182_v17, %v2177_v15  ;;  %v7319_v39 = vpack.c.bf16 %v2191_v16, %v2186_v33  ;;  %v1586_v10 = vld [vmem:[#allocation6 + $0x460] sm:$0xff]  ;;  %v1617_v16 = vld [vmem:[#allocation6 + $0x558] sm:$0xff] }
 0x14a   : > { %6730 = vmatmul.mubr.msk.f32.gmra.mrb[32].mxu0 %vm10422_vm1, %v8605_v24  ;;  %7254 = vmatprep.subr.bf16.mxu1 %v7253_v21  ;;  %v522_v24 = vld [vmem:[#allocation6 + $0x20] sm:$0xff]  ;;  %v2176_v21 = vld [vmem:[#allocation6 + $0x678] sm:$0xff]  ;;  %v2226_v17 = vld [vmem:[#allocation6 + $0x808] sm:$0xf] }
 0x14b   : > { %7160 = vmatpush1.bf16.msra.mxu0 %v7159_v29  ;;  %6247 = vmatmul.mubr.msk.f32.gmra.mrb[8].mxu1 %vm10422_vm1, %v8672_v13  ;;  %v7189_v47 = vpack.c.bf16 %v527_v42, %v522_v24  ;;  %v2187_v29 = vld [vmem:[#allocation6 + $0x6d0] sm:$0xff]  ;;  %v7315_v31 = vpack.c.bf16 %v2181_v22, %v2176_v21  ;;  %v2201_v24 = vld [vmem:[#allocation6 + $0x740] sm:$0xff]  ;;  %v1601_v22 = vld [vmem:[#allocation6 + $0x4d8] sm:$0xff] }
 0x14c   : > { %7162 = vmatprep.subr.bf16.mxu0 %v7161_v32  ;;  %1395 = vmatprep.mubr.f32.mxu1 %v10436_v0  ;;  %v7317_v32 = vpack.c.bf16 %v2192_v30, %v2187_v29  ;;  %v8779_v42 = vld [vmem:[%s8514_s18 + $0x1a] sm:$0xff]  ;;  %v1596_v21 = vld [vmem:[#allocation6 + $0x4b0] sm:$0xff]  ;;  %v1611_v33 = vld [vmem:[#allocation6 + $0x528] sm:$0xff] }
 0x14d   : > { %6732 = vmatprep.mubr.msk.f32.mxu0 %vm10422_vm1, %v8614_v25  ;;  %7256 = vmatpush1.bf16.msra.mxu1 %v7255_v34  ;;  %v578_v25 = vld [vmem:[#allocation6 + $0x1e0] sm:$0xf]  ;;  %v8770_v34 = vld [vmem:[%s8514_s18 + $0x12] sm:$0xff]  ;;  %v7223_v30 = vpack.c.bf16 %v1601_v22, %v1596_v21 }
 0x14e   : > { %6733 = vmatmul.mubr.msk.f32.gmra.mrb[34].mxu0 %vm10422_vm1, %v8623_v26  ;;  %7258 = vmatprep.subr.bf16.mxu1 %v7257_v35  ;;  %v7193_v26 = vpack.c.bf16 %v537_v45, %v532_v44  ;;  %v2197_v35 = vld [vmem:[#allocation6 + $0x720] sm:$0xff]  ;;  %v2212_v44 = vld [vmem:[#allocation6 + $0x798] sm:$0xff]  ;;  %v1612_v29 = vld [vmem:[#allocation6 + $0x530] sm:$0xff] }
 0x14f   : > { %7164 = vmatpush1.bf16.msra.mxu0 %v7163_v40  ;;  %6248 = vmatmul.mubr.msk.f32.gmra.mrb[10].mxu1 %vm10422_vm1, %v8682_v41  ;;  %v7321_v40 = vpack.c.bf16 %v2202_v36, %v2197_v35  ;;  %v1602_v15 = vld [vmem:[#allocation6 + $0x4e0] sm:$0xff] }
 0x150   : > { %6227 = vmatprep.subr.msk.mxu0 %vm10423_vm0, %v579_v23  ;;  %1401 = vmatprep.mubr.f32.mxu1 %v10436_v0  ;;  %v2196_v23 = vld [vmem:[#allocation6 + $0x718] sm:$0xff]  ;;  %v1622_v35 = vld [vmem:[#allocation6 + $0x580] sm:$0xff] }
 0x151   : > { %1228 = vmatprep.mubr.f32.mxu0 %v10436_v0  ;;  %7260 = vmatpush1.bf16.msra.mxu1 %v7259_v43  ;;  %v2207_v43 = vld [vmem:[#allocation6 + $0x770] sm:$0xff]  ;;  %v7323_v45 = vpack.c.bf16 %v2201_v24, %v2196_v23  ;;  %v7229_v36 = vpack.c.bf16 %v1622_v35, %v1617_v16  ;;  %v1627_v23 = vld [vmem:[#allocation6 + $0x5a8] sm:$0xff]  ;;  %v1610_v21 = vld [vmem:[#allocation6 + $0x520] sm:$0xff] }
 0x152   : > { %6282 = vmatprep.subr.msk.mxu1 %vm10423_vm0, %v1639_v46  ;;  %v7325_v46 = vpack.c.bf16 %v2212_v44, %v2207_v43  ;;  %v1632_v24 = vld [vmem:[#allocation6 + $0x5d0] sm:$0xff]  ;;  %v1626_v44 = vld [vmem:[#allocation6 + $0x5a0] sm:$0xff] }
 0x153   : > { %6228 = vmatpush1.msk.msra.mxu0 %vm10423_vm0, %v578_v25  ;;  %6249 = vmatmul.mubr.msk.f32.gmra.mrb[12].mxu1 %vm10422_vm1, %v8693_v18  ;;  %v2206_v25 = vld [vmem:[#allocation6 + $0x768] sm:$0xff]  ;;  %v7233_v43 = vpack.c.bf16 %v1632_v24, %v1627_v23  ;;  %v8895_v16 = vld [vmem:[%s8514_s18 + $0x1b] sm:$0xff]  ;;  %v2794_v23 = vld [vmem:[#allocation6 + $0x970] sm:$0xff] }
 0x154   : > { %6229 = vmatmul.mubr.msk.f32.vlgmr.msra.gmra.mrb[0].mxu0 %vm10422_vm1, %v8634_v37  ;;  %7190 = vmatprep.subr.bf16.mxu0 %v7189_v47  ;;  %v2799_v24 = vld [vmem:[#allocation6 + $0x998] sm:$0xff] }
 0x155   : > { %1407 = vmatprep.mubr.f32.mxu1 %v10436_v0  ;;  %7192 = vmatpush3.bf16.msra.mxu0 %v7189_v47  ;;  %v2211_v47 = vld [vmem:[#allocation6 + $0x790] sm:$0xff] }
 0x156   : > { %1234 = vmatprep.mubr.f32.mxu0 %v10436_v0  ;;  %7194 = vmatprep.subr.bf16.mxu0 %v7193_v26  ;;  %v7327_v53 = vpack.c.bf16 %v2211_v47, %v2206_v25  ;;  %v2759_v25 = vld [vmem:[#allocation6 + $0x858] sm:$0xff]  ;;  %v2765_v47 = vld [vmem:[#allocation6 + $0x888] sm:$0xff] }
 0x157   : > { %6250 = vmatmul.mubr.msk.f32.gmra.mrb[14].mxu1 %vm10422_vm1, %v8703_v52 }
 0x158   : > { %6230 = vmatmul.mubr.msk.f32.gmra.mrb[2].mxu0 %vm10422_vm1, %v8642_v51  ;;  %1413 = vmatprep.mubr.f32.mxu1 %v10436_v0 }
 0x159   : > { %1240 = vmatprep.mubr.f32.mxu0 %v10436_v0  ;;  %7196 = vmatpush3.bf16.msra.mxu0 %v7193_v26  ;;  %v8788_v26 = vld [vmem:[%s8514_s18 + $0x22] sm:$0xff] }
 0x15a   : > { %7198 = vmatprep.subr.bf16.mxu0 %v7197_v28  ;;  %6283 = vmatpush1.msk.msra.mxu1 %vm10423_vm0, %v1638_v57  ;;  %v1576_v57 = vld [vmem:[#allocation6 + $0x410] sm:$0xff] }
 0x15b   : > { %6251 = vmatmul.mubr.msk.f32.gmra.mrb[16].mxu1 %vm10422_vm1, %v8713_v60  ;;  %7310 = vmatprep.subr.bf16.mxu1 %v7309_v59  ;;  %v1581_v59 = vld [vmem:[#allocation6 + $0x438] sm:$0xff] }
 0x15c   : > { %6231 = vmatmul.mubr.msk.f32.gmra.mrb[4].mxu0 %vm10422_vm1, %v8652_v38  ;;  %1419 = vmatprep.mubr.f32.mxu1 %v10436_v0 }
 0x15d   : > { %1246 = vmatprep.mubr.f32.mxu0 %v10436_v0  ;;  %7200 = vmatpush3.bf16.msra.mxu0 %v7197_v28  ;;  %v2216_v28 = vld [vmem:[#allocation6 + $0x7b8] sm:$0xff] }
 0x15e   : > { %7202 = vmatprep.subr.bf16.mxu0 %v7201_v61 }
 0x15f   : > { %6252 = vmatmul.mubr.msk.f32.gmra.mrb[18].mxu1 %vm10422_vm1, %v8723_v1 }
 0x160   : > { %6232 = vmatmul.mubr.msk.f32.gmra.mrb[6].mxu0 %vm10422_vm1, %v8662_v58  ;;  %1425 = vmatprep.mubr.f32.mxu1 %v10436_v0 }
 0x161   : > { %1252 = vmatprep.mubr.f32.mxu0 %v10436_v0  ;;  %7204 = vmatpush3.bf16.msra.mxu0 %v7201_v61  ;;  %v7331_v61 = vpack.c.bf16 %v2221_v55, %v2216_v28  ;;  %v1636_v28 = vld [vmem:[#allocation6 + $0x5f0] sm:$0xf]  ;;  %v1590_v55 = vld [vmem:[#allocation6 + $0x480] sm:$0xff] }
 0x162   : > { %7206 = vmatprep.subr.bf16.mxu0 %v7205_v2 }
 0x163   : > { %6253 = vmatmul.mubr.msk.f32.gmra.mrb[20].mxu1 %vm10422_vm1, %v8732_v5 }
 0x164   : > { %6233 = vmatmul.mubr.msk.f32.gmra.mrb[8].mxu0 %vm10422_vm1, %v8672_v13  ;;  %1431 = vmatprep.mubr.f32.mxu1 %v10436_v0 }
 0x165   : > { %1258 = vmatprep.mubr.f32.mxu0 %v10436_v0  ;;  %7208 = vmatpush3.bf16.msra.mxu0 %v7205_v2  ;;  %v1592_v2 = vld [vmem:[#allocation6 + $0x490] sm:$0xff] }
 0x166   : > { %7210 = vmatprep.subr.bf16.mxu0 %v7209_v6  ;;  %v7217_v9 = vpack.c.bf16 %v1592_v2, %v1587_v63  ;;  %v2764_v63 = vld [vmem:[#allocation6 + $0x880] sm:$0xff]  ;;  %v2769_v2 = vld [vmem:[#allocation6 + $0x8a8] sm:$0xff] }
 0x167   : > { %6254 = vmatmul.mubr.msk.f32.gmra.mrb[22].mxu1 %vm10422_vm1, %v8741_v7 }
 0x168   : > { %6234 = vmatmul.mubr.msk.f32.gmra.mrb[10].mxu0 %vm10422_vm1, %v8682_v41  ;;  %1893 = vmatprep.mubr.f32.mxu1 %v10436_v0 }
 0x169   : > { %1264 = vmatprep.mubr.f32.mxu0 %v10436_v0  ;;  %7212 = vmatpush3.bf16.msra.mxu0 %v7209_v6  ;;  %v2760_v6 = vld [vmem:[#allocation6 + $0x860] sm:$0xff] }
 0x16a   : > { %6759 = vmatprep.subr.msk.mxu0 %vm10423_vm0, %v582_v8 }
 0x16b   : > { %6284 = vmatmul.mubr.msk.f32.vlgmr.msra.gmra.mrb[0].mxu1 %vm10422_vm1, %v8750_v14 }
 0x16c   : > { %6235 = vmatmul.mubr.msk.f32.gmra.mrb[12].mxu0 %vm10422_vm1, %v8693_v18  ;;  %1899 = vmatprep.mubr.f32.mxu1 %v10436_v0 }
 0x16d   : > { %1270 = vmatprep.mubr.f32.mxu0 %v10436_v0  ;;  %6760 = vmatpush3.msk.msra.mxu0 %vm10423_vm0, %v582_v8  ;;  %v7215_v8 = vpack.c.bf16 %v1581_v59, %v1576_v57  ;;  %v7385_v57 = vpack.c.bf16 %v2770_v49, %v2765_v47  ;;  %v2804_v49 = vld [vmem:[#allocation6 + $0x9c0] sm:$0xff] }
 0x16e   : > { %7312 = vmatpush1.bf16.msra.mxu1 %v7311_v3  ;;  %7214 = vmatprep.subr.bf16.mxu0 %v7213_v19  ;;  %v7381_v3 = vpack.c.bf16 %v2760_v6, %v2755_v48  ;;  %v7219_v19 = vpack.c.bf16 %v1591_v11, %v1586_v10  ;;  %v8876_v48 = vld [vmem:[%s8514_s18 + $0xb] sm:$0xff]  ;;  %v1605_v10 = vld [vmem:[#allocation6 + $0x4f8] sm:$0xff] }
 0x16f   : > { %6285 = vmatmul.mubr.msk.f32.gmra.mrb[2].mxu1 %vm10422_vm1, %v8760_v27  ;;  %7314 = vmatprep.subr.bf16.mxu1 %v7313_v20  ;;  %v7221_v20 = vpack.c.bf16 %v1602_v15, %v1597_v12  ;;  %v2774_v12 = vld [vmem:[#allocation6 + $0x8d0] sm:$0xff]  ;;  %v2779_v15 = vld [vmem:[#allocation6 + $0x8f8] sm:$0xff] }
 0x170   : > { %6236 = vmatmul.mubr.msk.f32.gmra.mrb[14].mxu0 %vm10422_vm1, %v8703_v52  ;;  %1905 = vmatprep.mubr.f32.mxu1 %v10436_v0  ;;  %v7391_v22 = vpack.c.bf16 %v2779_v15, %v2774_v12  ;;  %v2169_v12 = vld [vmem:[#allocation6 + $0x640] sm:$0xff]  ;;  %v2175_v15 = vld [vmem:[#allocation6 + $0x670] sm:$0xff] }
 0x171   : > { %1276 = vmatprep.mubr.f32.mxu0 %v10436_v0 }
 0x172   : > { %7316 = vmatpush1.bf16.msra.mxu1 %v7315_v31 }
 0x173   : > { %6286 = vmatmul.mubr.msk.f32.gmra.mrb[4].mxu1 %vm10422_vm1, %v8770_v34  ;;  %7318 = vmatprep.subr.bf16.mxu1 %v7317_v32  ;;  %v1606_v32 = vld [vmem:[#allocation6 + $0x500] sm:$0xff] }
 0x174   : > { %6237 = vmatmul.mubr.msk.f32.gmra.mrb[16].mxu0 %vm10422_vm1, %v8713_v60  ;;  %1911 = vmatprep.mubr.f32.mxu1 %v10436_v0 }
 0x175   : > { %1282 = vmatprep.mubr.f32.mxu0 %v10436_v0 }
 0x176   : > { %7320 = vmatpush1.bf16.msra.mxu1 %v7319_v39  ;;  %v1616_v39 = vld [vmem:[#allocation6 + $0x550] sm:$0xff] }
 0x177   : > { %6287 = vmatmul.mubr.msk.f32.gmra.mrb[6].mxu1 %vm10422_vm1, %v8779_v42  ;;  %7322 = vmatprep.subr.bf16.mxu1 %v7321_v40  ;;  %v1621_v40 = vld [vmem:[#allocation6 + $0x578] sm:$0xff] }
 0x178   : > { %6238 = vmatmul.mubr.msk.f32.gmra.mrb[18].mxu0 %vm10422_vm1, %v8723_v1  ;;  %1917 = vmatprep.mubr.f32.mxu1 %v10436_v0 }
 0x179   : > { %1288 = vmatprep.mubr.f32.mxu0 %v10436_v0 }
 0x17a   : > { %7324 = vmatpush1.bf16.msra.mxu1 %v7323_v45  ;;  %v1631_v45 = vld [vmem:[#allocation6 + $0x5c8] sm:$0xff] }
 0x17b   : > { %6288 = vmatmul.mubr.msk.f32.gmra.mrb[8].mxu1 %vm10422_vm1, %v8788_v26  ;;  %7326 = vmatprep.subr.bf16.mxu1 %v7325_v46  ;;  %v2754_v46 = vld [vmem:[#allocation6 + $0x830] sm:$0xff] }
 0x17c   : > { %6239 = vmatmul.mubr.msk.f32.gmra.mrb[20].mxu0 %vm10422_vm1, %v8732_v5  ;;  %1923 = vmatprep.mubr.f32.mxu1 %v10436_v0 }
 0x17d   : > { %1294 = vmatprep.mubr.f32.mxu0 %v10436_v0 }
 0x17e   : > { %7328 = vmatpush1.bf16.msra.mxu1 %v7327_v53  ;;  %v1585_v53 = vld [vmem:[#allocation6 + $0x458] sm:$0xff] }
 0x17f   : > { %6289 = vmatmul.mubr.msk.f32.gmra.mrb[10].mxu1 %vm10422_vm1, %v8797_v56  ;;  %7330 = vmatprep.subr.bf16.mxu1 %v7329_v54  ;;  %v8868_v54 = vld [vmem:[%s8514_s18 + $0x3] sm:$0xff] }
 0x180   : > { %6240 = vmatmul.mubr.msk.f32.gmra.mrb[22].mxu0 %vm10422_vm1, %v8741_v7  ;;  %1929 = vmatprep.mubr.f32.mxu1 %v10436_v0 }
 0x181   : > { %6761 = vmatprep.mubr.msk.f32.mxu0 %vm10422_vm1, %v8634_v37  ;;  %v8817_v37 = vld [vmem:[%s8514_s18 + $0x3a] sm:$0xff] }
 0x182   : > { %7332 = vmatpush1.bf16.msra.mxu1 %v7331_v61  ;;  %v1595_v61 = vld [vmem:[#allocation6 + $0x4a8] sm:$0xff] }
 0x183   : > { %6290 = vmatmul.mubr.msk.f32.gmra.mrb[12].mxu1 %vm10422_vm1, %v8803_v62  ;;  %6323 = vmatprep.subr.msk.mxu1 %vm10423_vm0, %v2227_v4  ;;  %v2780_v4 = vld [vmem:[#allocation6 + $0x900] sm:$0xff]  ;;  %v7265_v6 = vpack.c.bf16 %v1595_v61, %v1590_v55  ;;  %v8922_v55 = vld [vmem:[%s8514_s18 + $0x33] sm:$0xff] }
 0x184   : > { %6762 = vmatmul.mubr.msk.f32.vlgmr.msra.gmra.mrb[24].mxu0 %vm10422_vm1, %v8642_v51  ;;  %1935 = vmatprep.mubr.f32.mxu1 %v10436_v0  ;;  %v1607_v51 = vld [vmem:[#allocation6 + $0x508] sm:$0xff]  ;;  %v2165_v61 = vld [vmem:[#allocation6 + $0x620] sm:$0xff] }
 0x185   : > { %7216 = vmatpush1.bf16.msra.mxu0 %v7215_v8  ;;  %6764 = vmatprep.mubr.msk.f32.mxu0 %vm10422_vm1, %v8652_v38  ;;  %v8828_v38 = vld [vmem:[%s8514_s18 + $0x42] sm:$0xff]  ;;  %v7225_v31 = vpack.c.bf16 %v1612_v29, %v1607_v51  ;;  %v1600_v8 = vld [vmem:[#allocation6 + $0x4d0] sm:$0xff] }
 0x186   : > { %7218 = vmatprep.subr.bf16.mxu0 %v7217_v9  ;;  %6324 = vmatpush1.msk.msra.mxu1 %vm10423_vm0, %v2226_v17  ;;  %v7387_v9 = vpack.c.bf16 %v2769_v2, %v2764_v63  ;;  %v2785_v17 = vld [vmem:[#allocation6 + $0x928] sm:$0xff]  ;;  %v8932_v2 = vld [vmem:[%s8514_s18 + $0x3b] sm:$0xff] }
 0x187   : > { %6291 = vmatmul.mubr.msk.f32.gmra.mrb[14].mxu1 %vm10422_vm1, %v8817_v37  ;;  %7382 = vmatprep.subr.bf16.mxu1 %v7381_v3  ;;  %v2790_v3 = vld [vmem:[#allocation6 + $0x950] sm:$0xff]  ;;  %v1615_v51 = vld [vmem:[#allocation6 + $0x548] sm:$0xff] }
 0x188   : > { %6765 = vmatmul.mubr.msk.f32.gmra.mrb[26].mxu0 %vm10422_vm1, %v8662_v58  ;;  %1941 = vmatprep.mubr.f32.mxu1 %v10436_v0  ;;  %v8838_v58 = vld [vmem:[%s8514_s18 + $0x4a] sm:$0xff]  ;;  %v7393_v29 = vpack.c.bf16 %v2790_v3, %v2785_v17  ;;  %v7273_v35 = vpack.c.bf16 %v1615_v51, %v1610_v21  ;;  %v2180_v17 = vld [vmem:[#allocation6 + $0x698] sm:$0xff] }
 0x189   : > { %7220 = vmatpush1.bf16.msra.mxu0 %v7219_v19  ;;  %6767 = vmatprep.mubr.msk.f32.mxu0 %vm10422_vm1, %v8672_v13  ;;  %v7227_v13 = vpack.c.bf16 %v1611_v33, %v1606_v32  ;;  %v8886_v19 = vld [vmem:[%s8514_s18 + $0x13] sm:$0xff]  ;;  %v2800_v33 = vld [vmem:[#allocation6 + $0x9a0] sm:$0xff]  ;;  %v2170_v63 = vld [vmem:[#allocation6 + $0x648] sm:$0xff]  ;;  %v7289_v21 = vpack.c.bf16 %v2180_v17, %v2175_v15 }
 0x18a   : > { %7222 = vmatprep.subr.bf16.mxu0 %v7221_v20  ;;  %v7269_v20 = vpack.c.bf16 %v1605_v10, %v1600_v8  ;;  %v2795_v32 = vld [vmem:[#allocation6 + $0x978] sm:$0xff]  ;;  %v8980_v10 = vld [vmem:[%s8514_s18 + $0x4] sm:$0xff]  ;;  %v2179_v51 = vld [vmem:[#allocation6 + $0x690] sm:$0xff] }
 0x18b   : > { %6292 = vmatmul.mubr.msk.f32.gmra.mrb[16].mxu1 %vm10422_vm1, %v8828_v38  ;;  %v8962_v8 = vld [vmem:[%s8514_s18 + $0x53] sm:$0xff]  ;;  %v2198_v15 = vld [vmem:[#allocation6 + $0x728] sm:$0xff] }
 0x18c   : > { %6768 = vmatmul.mubr.msk.f32.gmra.mrb[28].mxu0 %vm10422_vm1, %v8682_v41  ;;  %1947 = vmatprep.mubr.f32.mxu1 %v10436_v0  ;;  %v8848_v41 = vld [vmem:[%s8514_s18 + $0x52] sm:$0xff] }
 0x18d   : > { %7224 = vmatpush1.bf16.msra.mxu0 %v7223_v30  ;;  %6770 = vmatprep.mubr.msk.f32.mxu0 %vm10422_vm1, %v8693_v18  ;;  %v7231_v18 = vpack.c.bf16 %v1621_v40, %v1616_v39  ;;  %v2784_v30 = vld [vmem:[#allocation6 + $0x920] sm:$0xff]  ;;  %v1625_v39 = vld [vmem:[#allocation6 + $0x598] sm:$0xff]  ;;  %v7397_v40 = vpack.c.bf16 %v2800_v33, %v2795_v32  ;;  %v2203_v17 = vld [vmem:[#allocation6 + $0x750] sm:$0xff] }
 0x18e   : > { %7226 = vmatprep.subr.bf16.mxu0 %v7225_v31  ;;  %v2789_v31 = vld [vmem:[#allocation6 + $0x948] sm:$0xff]  ;;  %v2184_v33 = vld [vmem:[#allocation6 + $0x6b8] sm:$0xff] }
 0x18f   : > { %6293 = vmatmul.mubr.msk.f32.gmra.mrb[18].mxu1 %vm10422_vm1, %v8838_v58 }
 0x190   : > { %6771 = vmatmul.mubr.msk.f32.gmra.mrb[30].mxu0 %vm10422_vm1, %v8703_v52  ;;  %1953 = vmatprep.mubr.f32.mxu1 %v10436_v0  ;;  %v8858_v52 = vld [vmem:[%s8514_s18 + $0x5a] sm:$0xff] }
 0x191   : > { %7228 = vmatpush1.bf16.msra.mxu0 %v7227_v13  ;;  %6773 = vmatprep.mubr.msk.f32.mxu0 %vm10422_vm1, %v8713_v60  ;;  %v7235_v60 = vpack.c.bf16 %v1631_v45, %v1626_v44  ;;  %v1620_v13 = vld [vmem:[#allocation6 + $0x570] sm:$0xff]  ;;  %v8904_v44 = vld [vmem:[%s8514_s18 + $0x23] sm:$0xff] }
 0x192   : > { %7230 = vmatprep.subr.bf16.mxu0 %v7229_v36  ;;  %v7395_v36 = vpack.c.bf16 %v2789_v31, %v2784_v30  ;;  %v7277_v45 = vpack.c.bf16 %v1625_v39, %v1620_v13  ;;  %v2190_v30 = vld [vmem:[#allocation6 + $0x6e8] sm:$0xff]  ;;  %v2195_v13 = vld [vmem:[#allocation6 + $0x710] sm:$0xff] }
 0x193   : > { %6294 = vmatmul.mubr.msk.f32.gmra.mrb[20].mxu1 %vm10422_vm1, %v8848_v41 }
 0x194   : > { %6774 = vmatmul.mubr.msk.f32.gmra.mrb[32].mxu0 %vm10422_vm1, %v8723_v1  ;;  %1959 = vmatprep.mubr.f32.mxu1 %v10436_v0  ;;  %v1580_v1 = vld [vmem:[#allocation6 + $0x430] sm:$0xff] }
 0x195   : > { %7232 = vmatpush1.bf16.msra.mxu0 %v7231_v18  ;;  %6776 = vmatprep.mubr.msk.f32.mxu0 %vm10422_vm1, %v8732_v5  ;;  %v7383_v5 = vpack.c.bf16 %v2759_v25, %v2754_v46  ;;  %v7261_v59 = vpack.c.bf16 %v1585_v53, %v1580_v1  ;;  %v2805_v18 = vld [vmem:[#allocation6 + $0x9c8] sm:$0xff]  ;;  %v7399_v46 = vpack.c.bf16 %v2799_v24, %v2794_v23  ;;  %v2199_v23 = vld [vmem:[#allocation6 + $0x730] sm:$0xff]  ;;  %v2205_v24 = vld [vmem:[#allocation6 + $0x760] sm:$0xff] }
 0x196   : > { %7234 = vmatprep.subr.bf16.mxu0 %v7233_v43  ;;  %v2810_v43 = vld [vmem:[#allocation6 + $0x9f0] sm:$0xff]  ;;  %v1635_v25 = vld [vmem:[#allocation6 + $0x5e8] sm:$0xff] }
 0x197   : > { %6295 = vmatmul.mubr.msk.f32.gmra.mrb[22].mxu1 %vm10422_vm1, %v8858_v52  ;;  %v7401_v47 = vpack.c.bf16 %v2810_v43, %v2805_v18  ;;  %v8913_v1 = vld [vmem:[%s8514_s18 + $0x2b] sm:$0xff] }
 0x198   : > { %6777 = vmatmul.mubr.msk.f32.gmra.mrb[34].mxu0 %vm10422_vm1, %v8741_v7  ;;  %2481 = vmatprep.mubr.f32.mxu1 %v10436_v0  ;;  %v2775_v7 = vld [vmem:[#allocation6 + $0x8d8] sm:$0xff]  ;;  %v2210_v18 = vld [vmem:[#allocation6 + $0x788] sm:$0xff] }
 0x199   : > { %7236 = vmatpush1.bf16.msra.mxu0 %v7235_v60  ;;  %1756 = vmatprep.mubr.f32.mxu0 %v10436_v0  ;;  %v7389_v11 = vpack.c.bf16 %v2780_v4, %v2775_v7  ;;  %v1630_v60 = vld [vmem:[#allocation6 + $0x5c0] sm:$0xff]  ;;  %v7285_v7 = vpack.c.bf16 %v2170_v63, %v2165_v61  ;;  %v7301_v43 = vpack.c.bf16 %v2210_v18, %v2205_v24  ;;  %v2763_v24 = vld [vmem:[#allocation6 + $0x878] sm:$0xff] }
 0x19a   : > { %6268 = vmatprep.subr.msk.mxu0 %vm10423_vm0, %v1637_v50  ;;  %v2809_v50 = vld [vmem:[#allocation6 + $0x9e8] sm:$0xff]  ;;  %v7281_v53 = vpack.c.bf16 %v1635_v25, %v1630_v60  ;;  %v2209_v60 = vld [vmem:[#allocation6 + $0x780] sm:$0xff]  ;;  %v2220_v25 = vld [vmem:[#allocation6 + $0x7d8] sm:$0xff] }
 0x19b   : > { %6325 = vmatmul.mubr.msk.f32.vlgmr.msra.gmra.mrb[0].mxu1 %vm10422_vm1, %v8868_v54  ;;  %v8943_v4 = vld [vmem:[%s8514_s18 + $0x43] sm:$0xff] }
 0x19c   : > { %2487 = vmatprep.mubr.f32.mxu1 %v10436_v0  ;;  %7384 = vmatpush1.bf16.msra.mxu1 %v7383_v5  ;;  %v7403_v5 = vpack.c.bf16 %v2809_v50, %v2804_v49  ;;  %v2214_v49 = vld [vmem:[#allocation6 + $0x7a8] sm:$0xff]  ;;  %v2219_v50 = vld [vmem:[#allocation6 + $0x7d0] sm:$0xff]  ;;  %v9049_v61 = vld [vmem:[%s8514_s18 + $0x3c] sm:$0xff] }
 0x19d   : > { %6269 = vmatpush1.msk.msra.mxu0 %vm10423_vm0, %v1636_v28  ;;  %7386 = vmatprep.subr.bf16.mxu1 %v7385_v57  ;;  %v2815_v28 = vld [vmem:[#allocation6 + $0xa18] sm:$0xf]  ;;  %v1640_v57 = vld [vmem:[#allocation6 + $0x610] sm:$0xf]  ;;  %v2768_v18 = vld [vmem:[#allocation6 + $0x8a0] sm:$0xff] }
 0x19e   : > { %6270 = vmatmul.mubr.msk.f32.vlgmr.msra.gmra.mrb[0].mxu0 %vm10422_vm1, %v8750_v14  ;;  %7262 = vmatprep.subr.bf16.mxu0 %v7261_v59 }
 0x19f   : > { %7264 = vmatpush3.bf16.msra.mxu0 %v7261_v59  ;;  %6326 = vmatmul.mubr.msk.f32.gmra.mrb[2].mxu1 %vm10422_vm1, %v8876_v48  ;;  %v2814_v59 = vld [vmem:[#allocation6 + $0xa10] sm:$0xf] }
 0x1a0   : > { %1762 = vmatprep.mubr.f32.mxu0 %v10436_v0  ;;  %2493 = vmatprep.mubr.f32.mxu1 %v10436_v0 }
 0x1a1   : > { %7266 = vmatprep.subr.bf16.mxu0 %v7265_v6  ;;  %7388 = vmatpush1.bf16.msra.mxu1 %v7387_v9  ;;  %v8971_v9 = vld [vmem:[%s8514_s18 + $0x5b] sm:$0xff] }
 0x1a2   : > { %6271 = vmatmul.mubr.msk.f32.gmra.mrb[2].mxu0 %vm10422_vm1, %v8760_v27  ;;  %7390 = vmatprep.subr.bf16.mxu1 %v7389_v11  ;;  %v2164_v11 = vld [vmem:[#allocation6 + $0x618] sm:$0xff] }
 0x1a3   : > { %6327 = vmatmul.mubr.msk.f32.gmra.mrb[4].mxu1 %vm10422_vm1, %v8886_v19  ;;  %1768 = vmatprep.mubr.f32.mxu0 %v10436_v0  ;;  %v7287_v3 = vpack.c.bf16 %v2169_v12, %v2164_v11  ;;  %v9058_v11 = vld [vmem:[%s8514_s18 + $0x44] sm:$0xff] }
 0x1a4   : > { %7268 = vmatpush3.bf16.msra.mxu0 %v7265_v6  ;;  %2499 = vmatprep.mubr.f32.mxu1 %v10436_v0  ;;  %v8953_v6 = vld [vmem:[%s8514_s18 + $0x4b] sm:$0xff] }
 0x1a5   : > { %7270 = vmatprep.subr.bf16.mxu0 %v7269_v20  ;;  %7392 = vmatpush1.bf16.msra.mxu1 %v7391_v22  ;;  %v2174_v22 = vld [vmem:[#allocation6 + $0x668] sm:$0xff] }
 0x1a6   : > { %6272 = vmatmul.mubr.msk.f32.gmra.mrb[4].mxu0 %vm10422_vm1, %v8770_v34  ;;  %7394 = vmatprep.subr.bf16.mxu1 %v7393_v29  ;;  %v2185_v29 = vld [vmem:[#allocation6 + $0x6c0] sm:$0xff]  ;;  %v7291_v31 = vpack.c.bf16 %v2179_v51, %v2174_v22  ;;  %v2208_v22 = vld [vmem:[#allocation6 + $0x778] sm:$0xff] }
 0x1a7   : > { %6328 = vmatmul.mubr.msk.f32.gmra.mrb[6].mxu1 %vm10422_vm1, %v8895_v16  ;;  %1774 = vmatprep.mubr.f32.mxu0 %v10436_v0  ;;  %v7293_v32 = vpack.c.bf16 %v2190_v30, %v2185_v29  ;;  %v2213_v51 = vld [vmem:[#allocation6 + $0x7a0] sm:$0xff]  ;;  %v9077_v29 = vld [vmem:[%s8514_s18 + $0x54] sm:$0xff] }
 0x1a8   : > { %2505 = vmatprep.mubr.f32.mxu1 %v10436_v0  ;;  %7272 = vmatpush3.bf16.msra.mxu0 %v7269_v20  ;;  %v8990_v20 = vld [vmem:[%s8514_s18 + $0xc] sm:$0xff]  ;;  %v7349_v30 = vpack.c.bf16 %v2213_v51, %v2208_v22 }
 0x1a9   : > { %7274 = vmatprep.subr.bf16.mxu0 %v7273_v35  ;;  %7396 = vmatpush1.bf16.msra.mxu1 %v7395_v36  ;;  %v2200_v36 = vld [vmem:[#allocation6 + $0x738] sm:$0xff] }
 0x1aa   : > { %6273 = vmatmul.mubr.msk.f32.gmra.mrb[6].mxu0 %vm10422_vm1, %v8779_v42  ;;  %7398 = vmatprep.subr.bf16.mxu1 %v7397_v40  ;;  %v7297_v39 = vpack.c.bf16 %v2200_v36, %v2195_v13  ;;  %v2194_v40 = vld [vmem:[#allocation6 + $0x708] sm:$0xff]  ;;  %v2228_v13 = vld [vmem:[#allocation6 + $0x818] sm:$0xf] }
 0x1ab   : > { %6329 = vmatmul.mubr.msk.f32.gmra.mrb[8].mxu1 %vm10422_vm1, %v8904_v44  ;;  %1780 = vmatprep.mubr.f32.mxu0 %v10436_v0  ;;  %v2753_v36 = vld [vmem:[#allocation6 + $0x828] sm:$0xff] }
 0x1ac   : > { %2511 = vmatprep.mubr.f32.mxu1 %v10436_v0  ;;  %7276 = vmatpush3.bf16.msra.mxu0 %v7273_v35  ;;  %v2189_v35 = vld [vmem:[#allocation6 + $0x6e0] sm:$0xff] }
 0x1ad   : > { %7278 = vmatprep.subr.bf16.mxu0 %v7277_v45  ;;  %7400 = vmatpush1.bf16.msra.mxu1 %v7399_v46  ;;  %v2215_v46 = vld [vmem:[#allocation6 + $0x7b0] sm:$0xff] }
 0x1ae   : > { %6274 = vmatmul.mubr.msk.f32.gmra.mrb[8].mxu0 %vm10422_vm1, %v8788_v26  ;;  %7402 = vmatprep.subr.bf16.mxu1 %v7401_v47  ;;  %v7305_v47 = vpack.c.bf16 %v2220_v25, %v2215_v46  ;;  %v2773_v46 = vld [vmem:[#allocation6 + $0x8c8] sm:$0xff]  ;;  %v2778_v25 = vld [vmem:[#allocation6 + $0x8f0] sm:$0xff] }
 0x1af   : > { %6330 = vmatmul.mubr.msk.f32.gmra.mrb[10].mxu1 %vm10422_vm1, %v8913_v1  ;;  %1786 = vmatprep.mubr.f32.mxu0 %v10436_v0 }
 0x1b0   : > { %2517 = vmatprep.mubr.f32.mxu1 %v10436_v0  ;;  %7280 = vmatpush3.bf16.msra.mxu0 %v7277_v45  ;;  %v2204_v45 = vld [vmem:[#allocation6 + $0x758] sm:$0xff] }
 0x1b1   : > { %7282 = vmatprep.subr.bf16.mxu0 %v7281_v53  ;;  %7404 = vmatpush1.bf16.msra.mxu1 %v7403_v5  ;;  %v2168_v5 = vld [vmem:[#allocation6 + $0x638] sm:$0xff] }
 0x1b2   : > { %6275 = vmatmul.mubr.msk.f32.gmra.mrb[10].mxu0 %vm10422_vm1, %v8797_v56  ;;  %6364 = vmatprep.subr.msk.mxu1 %vm10423_vm0, %v2815_v28  ;;  %v2173_v28 = vld [vmem:[#allocation6 + $0x660] sm:$0xff] }
 0x1b3   : > { %6331 = vmatmul.mubr.msk.f32.gmra.mrb[12].mxu1 %vm10422_vm1, %v8922_v55  ;;  %1792 = vmatprep.mubr.f32.mxu0 %v10436_v0 }
 0x1b4   : > { %2523 = vmatprep.mubr.f32.mxu1 %v10436_v0  ;;  %7284 = vmatpush3.bf16.msra.mxu0 %v7281_v53  ;;  %v2225_v53 = vld [vmem:[#allocation6 + $0x800] sm:$0xf] }
 0x1b5   : > { %6803 = vmatprep.subr.msk.mxu0 %vm10423_vm0, %v1640_v57  ;;  %6365 = vmatpush1.msk.msra.mxu1 %vm10423_vm0, %v2814_v59  ;;  %v7333_v59 = vpack.c.bf16 %v2173_v28, %v2168_v5  ;;  %v2782_v5 = vld [vmem:[#allocation6 + $0x910] sm:$0xff]  ;;  %v2787_v28 = vld [vmem:[#allocation6 + $0x938] sm:$0xff] }
 0x1b6   : > { %6276 = vmatmul.mubr.msk.f32.gmra.mrb[12].mxu0 %vm10422_vm1, %v8803_v62 }
 0x1b7   : > { %6332 = vmatmul.mubr.msk.f32.gmra.mrb[14].mxu1 %vm10422_vm1, %v8932_v2  ;;  %1798 = vmatprep.mubr.f32.mxu0 %v10436_v0 }
 0x1b8   : > { %2529 = vmatprep.mubr.f32.mxu1 %v10436_v0  ;;  %6804 = vmatpush3.msk.msra.mxu0 %vm10423_vm0, %v1640_v57  ;;  %v2183_v57 = vld [vmem:[#allocation6 + $0x6b0] sm:$0xff] }
 0x1b9   : > { %7286 = vmatprep.subr.bf16.mxu0 %v7285_v7  ;;  %v2193_v7 = vld [vmem:[#allocation6 + $0x700] sm:$0xff] }
 0x1ba   : > { %6277 = vmatmul.mubr.msk.f32.gmra.mrb[14].mxu0 %vm10422_vm1, %v8817_v37 }
 0x1bb   : > { %6333 = vmatmul.mubr.msk.f32.gmra.mrb[16].mxu1 %vm10422_vm1, %v8943_v4  ;;  %1804 = vmatprep.mubr.f32.mxu0 %v10436_v0 }
 0x1bc   : > { %2535 = vmatprep.mubr.f32.mxu1 %v10436_v0 }
 0x1be   : > { %6278 = vmatmul.mubr.msk.f32.gmra.mrb[16].mxu0 %vm10422_vm1, %v8828_v38 }
 0x1bf   : > { %6334 = vmatmul.mubr.msk.f32.gmra.mrb[18].mxu1 %vm10422_vm1, %v8953_v6  ;;  %1810 = vmatprep.mubr.f32.mxu0 %v10436_v0 }
 0x1c0   : > { %2541 = vmatprep.mubr.f32.mxu1 %v10436_v0 }
 0x1c2   : > { %6279 = vmatmul.mubr.msk.f32.gmra.mrb[18].mxu0 %vm10422_vm1, %v8838_v58 }
 0x1c3   : > { %6335 = vmatmul.mubr.msk.f32.gmra.mrb[20].mxu1 %vm10422_vm1, %v8962_v8  ;;  %1816 = vmatprep.mubr.f32.mxu0 %v10436_v0 }
 0x1c4   : > { %2547 = vmatprep.mubr.f32.mxu1 %v10436_v0 }
 0x1c6   : > { %6280 = vmatmul.mubr.msk.f32.gmra.mrb[20].mxu0 %vm10422_vm1, %v8848_v41 }
 0x1c7   : > { %6336 = vmatmul.mubr.msk.f32.gmra.mrb[22].mxu1 %vm10422_vm1, %v8971_v9  ;;  %1822 = vmatprep.mubr.f32.mxu0 %v10436_v0 }
 0x1c8   : > { %3069 = vmatprep.mubr.f32.mxu1 %v10436_v0 }
 0x1ca   : > { %6281 = vmatmul.mubr.msk.f32.gmra.mrb[22].mxu0 %vm10422_vm1, %v8858_v52 }
 0x1cb   : > { %6366 = vmatmul.mubr.msk.f32.vlgmr.msra.gmra.mrb[0].mxu1 %vm10422_vm1, %v8980_v10  ;;  %6805 = vmatprep.mubr.msk.f32.mxu0 %vm10422_vm1, %v8750_v14  ;;  %v8999_v14 = vld [vmem:[%s8514_s18 + $0x14] sm:$0xff] }
 0x1cc   : > { %3075 = vmatprep.mubr.f32.mxu1 %v10436_v0 }
 0x1ce   : > { %6806 = vmatmul.mubr.msk.f32.vlgmr.msra.gmra.mrb[24].mxu0 %vm10422_vm1, %v8760_v27  ;;  %v7295_v27 = vpack.c.bf16 %v2189_v35, %v2184_v33  ;;  %v9086_v33 = vld [vmem:[%s8514_s18 + $0x5c] sm:$0xff] }
 0x1cf   : > { %7288 = vmatpush1.bf16.msra.mxu0 %v7287_v3  ;;  %6367 = vmatmul.mubr.msk.f32.gmra.mrb[2].mxu1 %vm10422_vm1, %v8990_v20  ;;  %v9068_v3 = vld [vmem:[%s8514_s18 + $0x4c] sm:$0xff] }
 0x1d0   : > { %7290 = vmatprep.subr.bf16.mxu0 %v7289_v21  ;;  %6808 = vmatprep.mubr.msk.f32.mxu0 %vm10422_vm1, %v8770_v34  ;;  %v9009_v34 = vld [vmem:[%s8514_s18 + $0x1c] sm:$0xff]  ;;  %v7345_v21 = vpack.c.bf16 %v2203_v17, %v2198_v15  ;;  %v2813_v15 = vld [vmem:[#allocation6 + $0xa08] sm:$0xf] }
 0x1d1   : > { %3081 = vmatprep.mubr.f32.mxu1 %v10436_v0  ;;  %v2761_v17 = vld [vmem:[#allocation6 + $0x868] sm:$0xff] }
 0x1d2   : > { %6809 = vmatmul.mubr.msk.f32.gmra.mrb[26].mxu0 %vm10422_vm1, %v8779_v42  ;;  %v7299_v42 = vpack.c.bf16 %v2199_v23, %v2194_v40  ;;  %v2752_v40 = vld [vmem:[#allocation6 + $0x820] sm:$0xff]  ;;  %v2757_v23 = vld [vmem:[#allocation6 + $0x848] sm:$0xff] }
 0x1d3   : > { %7292 = vmatpush1.bf16.msra.mxu0 %v7291_v31  ;;  %6368 = vmatmul.mubr.msk.f32.gmra.mrb[4].mxu1 %vm10422_vm1, %v8999_v14  ;;  %v2218_v31 = vld [vmem:[#allocation6 + $0x7c8] sm:$0xff] }
 0x1d4   : > { %7294 = vmatprep.subr.bf16.mxu0 %v7293_v32  ;;  %6811 = vmatprep.mubr.msk.f32.mxu0 %vm10422_vm1, %v8788_v26  ;;  %v9019_v26 = vld [vmem:[%s8514_s18 + $0x24] sm:$0xff]  ;;  %v2223_v32 = vld [vmem:[#allocation6 + $0x7f0] sm:$0xff] }
 0x1d5   : > { %3087 = vmatprep.mubr.f32.mxu1 %v10436_v0  ;;  %v7353_v35 = vpack.c.bf16 %v2223_v32, %v2218_v31  ;;  %v2786_v31 = vld [vmem:[#allocation6 + $0x930] sm:$0xff]  ;;  %v2791_v32 = vld [vmem:[#allocation6 + $0x958] sm:$0xff] }
 0x1d6   : > { %6812 = vmatmul.mubr.msk.f32.gmra.mrb[28].mxu0 %vm10422_vm1, %v8797_v56  ;;  %v7303_v56 = vpack.c.bf16 %v2209_v60, %v2204_v45  ;;  %v2762_v45 = vld [vmem:[#allocation6 + $0x870] sm:$0xff]  ;;  %v2767_v60 = vld [vmem:[#allocation6 + $0x898] sm:$0xff] }
 0x1d7   : > { %7296 = vmatpush1.bf16.msra.mxu0 %v7295_v27  ;;  %6369 = vmatmul.mubr.msk.f32.gmra.mrb[6].mxu1 %vm10422_vm1, %v9009_v34  ;;  %v2758_v27 = vld [vmem:[#allocation6 + $0x850] sm:$0xff] }
 0x1d8   : > { %7298 = vmatprep.subr.bf16.mxu0 %v7297_v39  ;;  %6814 = vmatprep.mubr.msk.f32.mxu0 %vm10422_vm1, %v8803_v62  ;;  %v9029_v62 = vld [vmem:[%s8514_s18 + $0x2c] sm:$0xff]  ;;  %v7357_v39 = vpack.c.bf16 %v2758_v27, %v2753_v36 }
 0x1d9   : > { %3093 = vmatprep.mubr.f32.mxu1 %v10436_v0  ;;  %v2801_v36 = vld [vmem:[#allocation6 + $0x9a8] sm:$0xff] }
 0x1da   : > { %6815 = vmatmul.mubr.msk.f32.gmra.mrb[30].mxu0 %vm10422_vm1, %v8817_v37  ;;  %v7307_v37 = vpack.c.bf16 %v2219_v50, %v2214_v49  ;;  %v2772_v49 = vld [vmem:[#allocation6 + $0x8c0] sm:$0xff]  ;;  %v2777_v50 = vld [vmem:[#allocation6 + $0x8e8] sm:$0xff] }
 0x1db   : > { %7300 = vmatpush1.bf16.msra.mxu0 %v7299_v42  ;;  %6370 = vmatmul.mubr.msk.f32.gmra.mrb[8].mxu1 %vm10422_vm1, %v9019_v26  ;;  %v7359_v42 = vpack.c.bf16 %v2757_v23, %v2752_v40  ;;  %v2811_v40 = vld [vmem:[#allocation6 + $0x9f8] sm:$0xff] }
 0x1dc   : > { %7302 = vmatprep.subr.bf16.mxu0 %v7301_v43  ;;  %6817 = vmatprep.mubr.msk.f32.mxu0 %vm10422_vm1, %v8828_v38  ;;  %v9039_v38 = vld [vmem:[%s8514_s18 + $0x34] sm:$0xff]  ;;  %v7361_v43 = vpack.c.bf16 %v2768_v18, %v2763_v24  ;;  %v2816_v24 = vld [vmem:[#allocation6 + $0xa20] sm:$0xf]  ;;  %s6185_s18 = sshll.u32 %s10622_s20, 3 }
 0x1dd   : > { %3099 = vmatprep.mubr.f32.mxu1 %v10436_v0 }
 0x1de   : > { %6818 = vmatmul.mubr.msk.f32.gmra.mrb[32].mxu0 %vm10422_vm1, %v8838_v58  ;;  %v2178_v58 = vld [vmem:[#allocation6 + $0x688] sm:$0xff] }
 0x1df   : > { %7304 = vmatpush1.bf16.msra.mxu0 %v7303_v56  ;;  %6371 = vmatmul.mubr.msk.f32.gmra.mrb[10].mxu1 %vm10422_vm1, %v9029_v62  ;;  %v7337_v63 = vpack.c.bf16 %v2183_v57, %v2178_v58  ;;  %v7363_v56 = vpack.c.bf16 %v2767_v60, %v2762_v45  ;;  %v2798_v58 = vld [vmem:[#allocation6 + $0x990] sm:$0xff]  ;;  %v7371_v57 = vpack.c.bf16 %v2787_v28, %v2782_v5 }
 0x1e0   : > { %7306 = vmatprep.subr.bf16.mxu0 %v7305_v47  ;;  %6820 = vmatprep.mubr.msk.f32.mxu0 %vm10422_vm1, %v8848_v41  ;;  %v2224_v41 = vld [vmem:[#allocation6 + $0x7f8] sm:$0xf]  ;;  %v7365_v47 = vpack.c.bf16 %v2778_v25, %v2773_v46 }
 0x1e1   : > { %3105 = vmatprep.mubr.f32.mxu1 %v10436_v0 }
 0x1e2   : > { %6821 = vmatmul.mubr.msk.f32.gmra.mrb[34].mxu0 %vm10422_vm1, %v8858_v52  ;;  %v2188_v52 = vld [vmem:[#allocation6 + $0x6d8] sm:$0xff] }
 0x1e3   : > { %7308 = vmatpush1.bf16.msra.mxu0 %v7307_v37  ;;  %6372 = vmatmul.mubr.msk.f32.gmra.mrb[12].mxu1 %vm10422_vm1, %v9039_v38  ;;  %v7341_v12 = vpack.c.bf16 %v2193_v7, %v2188_v52  ;;  %v2783_v37 = vld [vmem:[#allocation6 + $0x918] sm:$0xff]  ;;  %v2802_v7 = vld [vmem:[#allocation6 + $0x9b0] sm:$0xff] }
 0x1e4   : > { %6309 = vmatprep.subr.msk.mxu0 %vm10423_vm0, %v2225_v53  ;;  %2344 = vmatprep.mubr.f32.mxu0 %v10436_v0  ;;  %v7367_v53 = vpack.c.bf16 %v2777_v50, %v2772_v49 }
 0x1e5   : > { %3111 = vmatprep.mubr.f32.mxu1 %v10436_v0 }
 0x1e7   : > { %6310 = vmatpush1.msk.msra.mxu0 %vm10423_vm0, %v2224_v41  ;;  %6373 = vmatmul.mubr.msk.f32.gmra.mrb[14].mxu1 %vm10422_vm1, %v9049_v61  ;;  %v2792_v41 = vld [vmem:[#allocation6 + $0x960] sm:$0xff] }
 0x1e8   : > { %6311 = vmatmul.mubr.msk.f32.vlgmr.msra.gmra.mrb[0].mxu0 %vm10422_vm1, %v8868_v54  ;;  %7334 = vmatprep.subr.bf16.mxu0 %v7333_v59 }
 0x1e9   : > { %7336 = vmatpush3.bf16.msra.mxu0 %v7333_v59  ;;  %2350 = vmatprep.mubr.f32.mxu0 %v10436_v0  ;;  %v2797_v59 = vld [vmem:[#allocation6 + $0x988] sm:$0xff] }
 0x1ea   : > { %3117 = vmatprep.mubr.f32.mxu1 %v10436_v0  ;;  %7338 = vmatprep.subr.bf16.mxu0 %v7337_v63  ;;  %v7375_v52 = vpack.c.bf16 %v2797_v59, %v2792_v41 }
 0x1eb   : > { %6374 = vmatmul.mubr.msk.f32.gmra.mrb[16].mxu1 %vm10422_vm1, %v9058_v11 }
 0x1ec   : > { %6312 = vmatmul.mubr.msk.f32.gmra.mrb[2].mxu0 %vm10422_vm1, %v8876_v48  ;;  %3123 = vmatprep.mubr.f32.mxu1 %v10436_v0 }
 0x1ed   : > { %2356 = vmatprep.mubr.f32.mxu0 %v10436_v0  ;;  %7340 = vmatpush3.bf16.msra.mxu0 %v7337_v63  ;;  %v2808_v63 = vld [vmem:[#allocation6 + $0x9e0] sm:$0xff] }
 0x1ee   : > { %7342 = vmatprep.subr.bf16.mxu0 %v7341_v12 }
 0x1ef   : > { %6375 = vmatmul.mubr.msk.f32.gmra.mrb[18].mxu1 %vm10422_vm1, %v9068_v3 }
 0x1f0   : > { %6313 = vmatmul.mubr.msk.f32.gmra.mrb[4].mxu0 %vm10422_vm1, %v8886_v19  ;;  %3129 = vmatprep.mubr.f32.mxu1 %v10436_v0 }
 0x1f1   : > { %2362 = vmatprep.mubr.f32.mxu0 %v10436_v0  ;;  %7344 = vmatpush3.bf16.msra.mxu0 %v7341_v12  ;;  %v2807_v12 = vld [vmem:[#allocation6 + $0x9d8] sm:$0xff] }
 0x1f2   : > { %7346 = vmatprep.subr.bf16.mxu0 %v7345_v21 }
 0x1f3   : > { %6376 = vmatmul.mubr.msk.f32.gmra.mrb[20].mxu1 %vm10422_vm1, %v9077_v29 }
 0x1f4   : > { %6314 = vmatmul.mubr.msk.f32.gmra.mrb[6].mxu0 %vm10422_vm1, %v8895_v16  ;;  %3135 = vmatprep.mubr.f32.mxu1 %v10436_v0 }
 0x1f5   : > { %2368 = vmatprep.mubr.f32.mxu0 %v10436_v0  ;;  %7348 = vmatpush3.bf16.msra.mxu0 %v7345_v21  ;;  %v2771_v21 = vld [vmem:[#allocation6 + $0x8b8] sm:$0xff] }
 0x1f6   : > { %7350 = vmatprep.subr.bf16.mxu0 %v7349_v30 }
 0x1f7   : > { %6377 = vmatmul.mubr.msk.f32.gmra.mrb[22].mxu1 %vm10422_vm1, %v9086_v33 }
 0x1f8   : > { %6315 = vmatmul.mubr.msk.f32.gmra.mrb[8].mxu0 %vm10422_vm1, %v8904_v44 }
 0x1f9   : > { %2374 = vmatprep.mubr.f32.mxu0 %v10436_v0  ;;  %7352 = vmatpush3.bf16.msra.mxu0 %v7349_v30  ;;  %v2781_v30 = vld [vmem:[#allocation6 + $0x908] sm:$0xff] }
 0x1fa   : > { %7354 = vmatprep.subr.bf16.mxu0 %v7353_v35 }
 0x1fc   : > { %6316 = vmatmul.mubr.msk.f32.gmra.mrb[10].mxu0 %vm10422_vm1, %v8913_v1 }
 0x1fd   : > { %2380 = vmatprep.mubr.f32.mxu0 %v10436_v0  ;;  %7356 = vmatpush3.bf16.msra.mxu0 %v7353_v35  ;;  %v7417_v35 = vpack.c.bf16 %v2791_v32, %v2786_v31 }
 0x1fe   : > { %6847 = vmatprep.subr.msk.mxu0 %vm10423_vm0, %v2228_v13 }
 0x200   : > { %6317 = vmatmul.mubr.msk.f32.gmra.mrb[12].mxu0 %vm10422_vm1, %v8922_v55 }
 0x201   : > { %2386 = vmatprep.mubr.f32.mxu0 %v10436_v0  ;;  %6848 = vmatpush3.msk.msra.mxu0 %vm10423_vm0, %v2228_v13  ;;  %v2796_v13 = vld [vmem:[#allocation6 + $0x980] sm:$0xff] }
 0x202   : > { %7358 = vmatprep.subr.bf16.mxu0 %v7357_v39  ;;  %v7421_v27 = vpack.c.bf16 %v2801_v36, %v2796_v13  ;;  %v2806_v39 = vld [vmem:[#allocation6 + $0x9d0] sm:$0xff] }
 0x203   : > { %v7425_v23 = vpack.c.bf16 %v2811_v40, %v2806_v39 }
 0x204   : > { %6318 = vmatmul.mubr.msk.f32.gmra.mrb[14].mxu0 %vm10422_vm1, %v8932_v2 }
 0x205   : > { %2392 = vmatprep.mubr.f32.mxu0 %v10436_v0 }
 0x208   : > { %6319 = vmatmul.mubr.msk.f32.gmra.mrb[16].mxu0 %vm10422_vm1, %v8943_v4 }
 0x209   : > { %2398 = vmatprep.mubr.f32.mxu0 %v10436_v0 }
 0x20c   : > { %6320 = vmatmul.mubr.msk.f32.gmra.mrb[18].mxu0 %vm10422_vm1, %v8953_v6 }
 0x20d   : > { %2404 = vmatprep.mubr.f32.mxu0 %v10436_v0 }
 0x210   : > { %6321 = vmatmul.mubr.msk.f32.gmra.mrb[20].mxu0 %vm10422_vm1, %v8962_v8 }
 0x211   : > { %2410 = vmatprep.mubr.f32.mxu0 %v10436_v0 }
 0x214   : > { %6322 = vmatmul.mubr.msk.f32.gmra.mrb[22].mxu0 %vm10422_vm1, %v8971_v9 }
 0x215   : > { %6849 = vmatprep.mubr.msk.f32.mxu0 %vm10422_vm1, %v8868_v54  ;;  %v2788_v54 = vld [vmem:[#allocation6 + $0x940] sm:$0xff] }
 0x218   : > { %6850 = vmatmul.mubr.msk.f32.vlgmr.msra.gmra.mrb[24].mxu0 %vm10422_vm1, %v8876_v48  ;;  %v7369_v48 = vpack.c.bf16 %v2788_v54, %v2783_v37 }
 0x219   : > { %7360 = vmatpush1.bf16.msra.mxu0 %v7359_v42  ;;  %6852 = vmatprep.mubr.msk.f32.mxu0 %vm10422_vm1, %v8886_v19  ;;  %v2793_v19 = vld [vmem:[#allocation6 + $0x968] sm:$0xff] }
 0x21a   : > { %7362 = vmatprep.subr.bf16.mxu0 %v7361_v43 }
 0x21c   : > { %6853 = vmatmul.mubr.msk.f32.gmra.mrb[26].mxu0 %vm10422_vm1, %v8895_v16  ;;  %v7373_v16 = vpack.c.bf16 %v2798_v58, %v2793_v19 }
 0x21d   : > { %7364 = vmatpush1.bf16.msra.mxu0 %v7363_v56  ;;  %6855 = vmatprep.mubr.msk.f32.mxu0 %vm10422_vm1, %v8904_v44  ;;  %v2803_v44 = vld [vmem:[#allocation6 + $0x9b8] sm:$0xff] }
 0x21e   : > { %7366 = vmatprep.subr.bf16.mxu0 %v7365_v47 }
 0x220   : > { %6856 = vmatmul.mubr.msk.f32.gmra.mrb[28].mxu0 %vm10422_vm1, %v8913_v1  ;;  %v7377_v1 = vpack.c.bf16 %v2808_v63, %v2803_v44 }
 0x221   : > { %7368 = vmatpush1.bf16.msra.mxu0 %v7367_v53  ;;  %6858 = vmatprep.mubr.msk.f32.mxu0 %vm10422_vm1, %v8922_v55  ;;  %v7379_v55 = vpack.c.bf16 %v2807_v12, %v2802_v7 }
 0x222   : > { %7370 = vmatprep.subr.bf16.mxu0 %v7369_v48 }
 0x224   : > { %6859 = vmatmul.mubr.msk.f32.gmra.mrb[30].mxu0 %vm10422_vm1, %v8932_v2  ;;  %v2756_v2 = vld [vmem:[#allocation6 + $0x840] sm:$0xff] }
 0x225   : > { %7372 = vmatpush1.bf16.msra.mxu0 %v7371_v57  ;;  %6861 = vmatprep.mubr.msk.f32.mxu0 %vm10422_vm1, %v8943_v4  ;;  %v2766_v4 = vld [vmem:[#allocation6 + $0x890] sm:$0xff]  ;;  %v7405_v22 = vpack.c.bf16 %v2761_v17, %v2756_v2 }
 0x226   : > { %7374 = vmatprep.subr.bf16.mxu0 %v7373_v16  ;;  %v7409_v51 = vpack.c.bf16 %v2771_v21, %v2766_v4 }
 0x228   : > { %6862 = vmatmul.mubr.msk.f32.gmra.mrb[32].mxu0 %vm10422_vm1, %v8953_v6  ;;  %v2812_v6 = vld [vmem:[#allocation6 + $0xa00] sm:$0xf] }
 0x229   : > { %7376 = vmatpush1.bf16.msra.mxu0 %v7375_v52  ;;  %6864 = vmatprep.mubr.msk.f32.mxu0 %vm10422_vm1, %v8962_v8  ;;  %v2776_v8 = vld [vmem:[#allocation6 + $0x8e0] sm:$0xff] }
 0x22a   : > { %7378 = vmatprep.subr.bf16.mxu0 %v7377_v1 }
 0x22c   : > { %6865 = vmatmul.mubr.msk.f32.gmra.mrb[34].mxu0 %vm10422_vm1, %v8971_v9  ;;  %v7413_v9 = vpack.c.bf16 %v2781_v30, %v2776_v8 }
 0x22d   : > { %7380 = vmatpush1.bf16.msra.mxu0 %v7379_v55  ;;  %2932 = vmatprep.mubr.f32.mxu0 %v10436_v0 }
 0x22e   : > { %6350 = vmatprep.subr.msk.mxu0 %vm10423_vm0, %v2813_v15 }
 0x231   : > { %6351 = vmatpush1.msk.msra.mxu0 %vm10423_vm0, %v2812_v6 }
 0x232   : > { %6352 = vmatmul.mubr.msk.f32.vlgmr.msra.gmra.mrb[0].mxu0 %vm10422_vm1, %v8980_v10  ;;  %7406 = vmatprep.subr.bf16.mxu0 %v7405_v22 }
 0x233   : > { %2938 = vmatprep.mubr.f32.mxu0 %v10436_v0  ;;  %7408 = vmatpush3.bf16.msra.mxu0 %v7405_v22 }
 0x234   : > { %7410 = vmatprep.subr.bf16.mxu0 %v7409_v51 }
 0x236   : > { %6353 = vmatmul.mubr.msk.f32.gmra.mrb[2].mxu0 %vm10422_vm1, %v8990_v20 }
 0x237   : > { %2944 = vmatprep.mubr.f32.mxu0 %v10436_v0  ;;  %7412 = vmatpush3.bf16.msra.mxu0 %v7409_v51 }
 0x238   : > { %7414 = vmatprep.subr.bf16.mxu0 %v7413_v9 }
 0x23a   : > { %6354 = vmatmul.mubr.msk.f32.gmra.mrb[4].mxu0 %vm10422_vm1, %v8999_v14 }
 0x23b   : > { %2950 = vmatprep.mubr.f32.mxu0 %v10436_v0  ;;  %7416 = vmatpush3.bf16.msra.mxu0 %v7413_v9 }
 0x23c   : > { %7418 = vmatprep.subr.bf16.mxu0 %v7417_v35 }
 0x23e   : > { %6355 = vmatmul.mubr.msk.f32.gmra.mrb[6].mxu0 %vm10422_vm1, %v9009_v34 }
 0x23f   : > { %2956 = vmatprep.mubr.f32.mxu0 %v10436_v0  ;;  %7420 = vmatpush3.bf16.msra.mxu0 %v7417_v35 }
 0x240   : > { %7422 = vmatprep.subr.bf16.mxu0 %v7421_v27 }
 0x242   : > { %6356 = vmatmul.mubr.msk.f32.gmra.mrb[8].mxu0 %vm10422_vm1, %v9019_v26 }
 0x243   : > { %2962 = vmatprep.mubr.f32.mxu0 %v10436_v0  ;;  %7424 = vmatpush3.bf16.msra.mxu0 %v7421_v27 }
 0x244   : > { %7426 = vmatprep.subr.bf16.mxu0 %v7425_v23 }
 0x246   : > { %6357 = vmatmul.mubr.msk.f32.gmra.mrb[10].mxu0 %vm10422_vm1, %v9029_v62 }
 0x247   : > { %2968 = vmatprep.mubr.f32.mxu0 %v10436_v0  ;;  %7428 = vmatpush3.bf16.msra.mxu0 %v7425_v23 }
 0x248   : > { %6891 = vmatprep.subr.msk.mxu0 %vm10423_vm0, %v2816_v24 }
 0x24a   : > { %6358 = vmatmul.mubr.msk.f32.gmra.mrb[12].mxu0 %vm10422_vm1, %v9039_v38 }
 0x24b   : > { %2974 = vmatprep.mubr.f32.mxu0 %v10436_v0  ;;  %6892 = vmatpush3.msk.msra.mxu0 %vm10423_vm0, %v2816_v24  ;;  %vm4451_vm0 = vcmask 716416  }
 0x24e   : > { %6359 = vmatmul.mubr.msk.f32.gmra.mrb[14].mxu0 %vm10422_vm1, %v9049_v61 }
 0x24f   : > { %2980 = vmatprep.mubr.f32.mxu0 %v10436_v0 }
 0x252   : > { %6360 = vmatmul.mubr.msk.f32.gmra.mrb[16].mxu0 %vm10422_vm1, %v9058_v11 }
 0x253   : > { %2986 = vmatprep.mubr.f32.mxu0 %v10436_v0 }
 0x256   : > { %6361 = vmatmul.mubr.msk.f32.gmra.mrb[18].mxu0 %vm10422_vm1, %v9068_v3 }
 0x257   : > { %2992 = vmatprep.mubr.f32.mxu0 %v10436_v0 }
 0x25a   : > { %6362 = vmatmul.mubr.msk.f32.gmra.mrb[20].mxu0 %vm10422_vm1, %v9077_v29 }
 0x25b   : > { %2998 = vmatprep.mubr.f32.mxu0 %v10436_v0 }
 0x25e   : > { %6363 = vmatmul.mubr.msk.f32.gmra.mrb[22].mxu0 %vm10422_vm1, %v9086_v33 }
 0x25f   : > { %6893 = vmatprep.mubr.msk.f32.mxu0 %vm10422_vm1, %v8980_v10  ;;  %v10438_v10 = vlaneseq }
 0x262   : > { %6894 = vmatmul.mubr.msk.f32.vlgmr.msra.gmra.mrb[24].mxu0 %vm10422_vm1, %v8990_v20  ;;  %v9205_v20 = vshrl.u32 %v10438_v10, 7 }
 0x263   : > { %6896 = vmatprep.mubr.msk.f32.mxu0 %vm10422_vm1, %v8999_v14 }
 0x264   : > { %v3339_v14 = vsub.s32 2, %v9205_v20  ;;  %vm3574_vm2 = vcmp.eq.s32.totalorder %v9205_v20, 0  ;;  %vm3636_vm3 = vcmp.eq.s32.totalorder %v9205_v20, 1  ;;  %vm3698_vm4 = vcmp.eq.s32.totalorder %v9205_v20, 2 }
 0x265   : > { %v9223_v18 = vsel %vm3574_vm2, 1.0, %v10436_v0  ;;  %vm3760_vm5 = vcmp.eq.s32.totalorder %v9205_v20, 3  ;;  %vm3822_vm6 = vcmp.eq.s32.totalorder %v9205_v20, 4  ;;  %v9228_v45 = vsel %vm3636_vm3, 1.0, %v10436_v0 }
 0x266   : > { %6897 = vmatmul.mubr.msk.f32.gmra.mrb[26].mxu0 %vm10422_vm1, %v9009_v34  ;;  %v9208_v34 = vld [vmem:[#allocation8] sm:$0x1f]  ;;  %10465 = vst [vmem:[#allocation25_spill] sm:$0xff] %v9223_v18  ;;  %vm3884_vm7 = vcmp.eq.s32.totalorder %v9205_v20, 5  ;;  %v9232_v60 = vadd.s32 8, %v9205_v20  ;;  %v9236_v47 = vsel %vm3698_vm4, 1.0, %v10436_v0 }
 0x267   : > { %6899 = vmatprep.mubr.msk.f32.mxu0 %vm10422_vm1, %v9019_v26  ;;  %v3343_v26 = vsub.s32 3, %v9205_v20  ;;  %vm3946_vm8 = vcmp.eq.s32.totalorder %v9205_v20, 6  ;;  %v9241_v37 = vsel %vm3760_vm5, 1.0, %v10436_v0  ;;  %v9244_v54 = vsel %vm3822_vm6, 1.0, %v10436_v0 }
 0x268   : > { %v9247_v5 = vsel %vm3884_vm7, 1.0, %v10436_v0  ;;  %vm4008_vm9 = vcmp.eq.s32.totalorder %v9205_v20, 7  ;;  %v9251_v57 = vsel %vm3946_vm8, 1.0, %v10436_v0  ;;  %vm4071_vm10 = vcmp.eq.s32.totalorder %v9232_v60, 8 }
 0x269   : > { %vm4133_vm11 = vcmp.eq.s32.totalorder %v9232_v60, 9  ;;  %v9258_v7 = vsel %vm4008_vm9, 1.0, %v10436_v0  ;;  %v9261_v2 = vsel %vm4071_vm10, 1.0, %v10436_v0  ;;  %vm4195_vm12 = vcmp.eq.s32.totalorder %v9232_v60, 10 }
 0x26a   : > { %6900 = vmatmul.mubr.msk.f32.gmra.mrb[28].mxu0 %vm10422_vm1, %v9029_v62  ;;  %v9212_v62 = vrot.slane %v9208_v34, %v3339_v14  ;;  %v9264_v22 = vsel %vm4133_vm11, 1.0, %v10436_v0  ;;  %vm4257_vm13 = vcmp.eq.s32.totalorder %v9232_v60, 11  ;;  %vm10424_vm2 = vcmask 60416  }
 0x26b   : > { %6902 = vmatprep.mubr.msk.f32.mxu0 %vm10422_vm1, %v9039_v38  ;;  %v9215_v38 = vrot.slane %v9208_v34, %v3343_v26  ;;  %10466 = vst [vmem:[#allocation26_spill] sm:$0xff] %v9264_v22  ;;  %vm10425_vm3 = vcmask 195712   ;;  %vm10428_vm4 = vcmask 126016   ;;  %vm10429_vm5 = vcmask 261312  }
 0x26c   : > { %vm10430_vm6 = vcmask 326912   ;;  %vm10432_vm7 = vcmask 392512   ;;  %vm10433_vm8 = vcmask 458112   ;;  %vm10435_vm9 = vcmask 523712  }
 0x26d   : > { %vm4466_vm10 = vcmask 782016   ;;  %vm4511_vm11 = vcmask 978816  }
 0x26e   : > { %6903 = vmatmul.mubr.msk.f32.gmra.mrb[30].mxu0 %vm10422_vm1, %v9049_v61 }
 0x26f   : > { %6905 = vmatprep.mubr.msk.f32.mxu0 %vm10422_vm1, %v9058_v11 }
 0x272   : > { %6906 = vmatmul.mubr.msk.f32.gmra.mrb[32].mxu0 %vm10422_vm1, %v9068_v3 }
 0x273   : > { %6908 = vmatprep.mubr.msk.f32.mxu0 %vm10422_vm1, %v9077_v29 }
 0x276   : > { %6909 = vmatmul.mubr.msk.f32.gmra.mrb[34].mxu0 %vm10422_vm1, %v9086_v33  ;;  %vm10434_vm1 = vcmask 851712  }
 0x29e   : > { %v3071_v61 = vpop.f32.mrb[0].mxu1 }
 0x29f   : > { %v3356_v11 = vadd.f32 %v9212_v62, %v3071_v61  ;;  %v3073_v3 = vpop.f32.mrb[1].mxu1 }
 0x2a0   : > { %v3357_v29 = vadd.f32 %v9215_v38, %v3073_v3 }
 0x2a1   : > { %v3416_v33 = vmax.f32 %v3356_v11, 0.0 }
 0x2a2   : > { %v3417_v42 = vmax.f32 %v3357_v29, 0.0  ;;  %v3077_v43 = vpop.f32.mrb[2].mxu1 }
 0x2a3   : > { %v3555_v46 = vrot.slane %v3416_v33, 4  ;;  %v3361_v25 = vadd.f32 %v9212_v62, %v3077_v43  ;;  %v3079_v56 = vpop.f32.mrb[3].mxu1 }
 0x2a4   : > { %v3561_v49 = vrot.slane %v3417_v42, 4  ;;  %v3362_v50 = vadd.f32 %v9215_v38, %v3079_v56 }
 0x2a5   : > { %v3556_v53 = vmax.f32 %v3416_v33, %v3555_v46  ;;  %v3421_v48 = vmax.f32 %v3361_v25, 0.0 }
 0x2a6   : > { %v3562_v28 = vmax.f32 %v3417_v42, %v3561_v49  ;;  %v3422_v19 = vmax.f32 %v3362_v50, 0.0  ;;  %v3083_v58 = vpop.f32.mrb[4].mxu1 }
 0x2a7   : > { %v3557_v16 = vrot.slane %v3556_v53, 2  ;;  %v3617_v41 = vrot.slane %v3421_v48, 4  ;;  %v3366_v59 = vadd.f32 %v9212_v62, %v3083_v58  ;;  %v3085_v44 = vpop.f32.mrb[5].mxu1 }
 0x2a8   : > { %v3563_v63 = vrot.slane %v3562_v28, 2  ;;  %v3623_v52 = vrot.slane %v3422_v19, 4  ;;  %v3367_v1 = vadd.f32 %v9215_v38, %v3085_v44 }
 0x2a9   : > { %v3558_v12 = vmax.f32 %v3556_v53, %v3557_v16  ;;  %v3618_v55 = vmax.f32 %v3421_v48, %v3617_v41  ;;  %v3426_v15 = vmax.f32 %v3366_v59, 0.0 }
 0x2aa   : > { %v3564_v17 = vmax.f32 %v3562_v28, %v3563_v63  ;;  %v3624_v4 = vmax.f32 %v3422_v19, %v3623_v52  ;;  %v3427_v21 = vmax.f32 %v3367_v1, 0.0  ;;  %v3089_v6 = vpop.f32.mrb[6].mxu1 }
 0x2ab   : > { %v3559_v51 = vrot.slane %v3558_v12, 1  ;;  %v3619_v8 = vrot.slane %v3618_v55, 2  ;;  %v3679_v30 = vrot.slane %v3426_v15, 4  ;;  %v3371_v9 = vadd.f32 %v9212_v62, %v3089_v6  ;;  %v3091_v31 = vpop.f32.mrb[7].mxu1 }
 0x2ac   : > { %v3565_v32 = vrot.slane %v3564_v17, 1  ;;  %v3625_v35 = vrot.slane %v3624_v4, 2  ;;  %v3685_v13 = vrot.slane %v3427_v21, 4  ;;  %v3372_v36 = vadd.f32 %v9215_v38, %v3091_v31 }
 0x2ad   : > { %v3560_v27 = vmax.f32 %v3558_v12, %v3559_v51  ;;  %v3620_v39 = vmax.f32 %v3618_v55, %v3619_v8  ;;  %v3680_v40 = vmax.f32 %v3426_v15, %v3679_v30  ;;  %v3431_v23 = vmax.f32 %v3371_v9, 0.0 }
 0x2ae   : > { %v3566_v24 = vmax.f32 %v3564_v17, %v3565_v32  ;;  %v3626_v14 = vmax.f32 %v3624_v4, %v3625_v35  ;;  %v3686_v26 = vmax.f32 %v3427_v21, %v3685_v13  ;;  %v3432_v61 = vmax.f32 %v3372_v36, 0.0  ;;  %v3095_v11 = vpop.f32.mrb[8].mxu1 }
 0x2af   : > { %v3582_v3 = vmul.f32 %v9223_v18, %v3560_v27  ;;  %v3587_v29 = vmul.f32 0.0, %v3560_v27  ;;  %v3621_v33 = vrot.slane %v3620_v39, 1  ;;  %v3681_v42 = vrot.slane %v3680_v40, 2  ;;  %v3097_v43 = vpop.f32.mrb[9].mxu1 }
 0x2b0   : > { %v3583_v46 = vmul.f32 %v9223_v18, %v3566_v24  ;;  %v3588_v25 = vmul.f32 0.0, %v3566_v24  ;;  %v3627_v56 = vrot.slane %v3626_v14, 1  ;;  %v3687_v49 = vrot.slane %v3686_v26, 2 }
 0x2b1   : > { %v3622_v50 = vmax.f32 %v3620_v39, %v3621_v33  ;;  %v3682_v53 = vmax.f32 %v3680_v40, %v3681_v42  ;;  %v3741_v48 = vrot.slane %v3431_v23, 4  ;;  %v3747_v28 = vrot.slane %v3432_v61, 4 }
 0x2b2   : > { %v3628_v19 = vmax.f32 %v3626_v14, %v3627_v56  ;;  %v3688_v58 = vmax.f32 %v3686_v26, %v3687_v49  ;;  %v3376_v16 = vadd.f32 %v9212_v62, %v3095_v11  ;;  %v3377_v41 = vadd.f32 %v9215_v38, %v3097_v43  ;;  %v3101_v59 = vpop.f32.mrb[10].mxu1 }
 0x2b3   : > { %v3644_v44 = vmul.f32 %v9228_v45, %v3622_v50  ;;  %v3649_v63 = vmul.f32 0.0, %v3622_v50  ;;  %v3683_v52 = vrot.slane %v3682_v53, 1  ;;  %v3742_v1 = vmax.f32 %v3431_v23, %v3741_v48  ;;  %v3103_v12 = vpop.f32.mrb[11].mxu1 }
 0x2b4   : > { %v3645_v55 = vmul.f32 %v9228_v45, %v3628_v19  ;;  %v3650_v15 = vmul.f32 0.0, %v3628_v19  ;;  %v3689_v17 = vrot.slane %v3688_v58, 1  ;;  %v3748_v4 = vmax.f32 %v3432_v61, %v3747_v28 }
 0x2b5   : > { %v3654_v21 = vadd.f32 %v3644_v44, %v3582_v3  ;;  %v3659_v6 = vadd.f32 %v3649_v63, %v3587_v29  ;;  %v3684_v51 = vmax.f32 %v3682_v53, %v3683_v52  ;;  %v3743_v8 = vrot.slane %v3742_v1, 2 }
 0x2b6   : > { %v3655_v30 = vadd.f32 %v3645_v55, %v3583_v46  ;;  %v3660_v9 = vadd.f32 %v3650_v15, %v3588_v25  ;;  %v3690_v31 = vmax.f32 %v3688_v58, %v3689_v17  ;;  %v3749_v32 = vrot.slane %v3748_v4, 2  ;;  %v3107_v35 = vpop.f32.mrb[12].mxu1 }
 0x2b7   : > { %v3706_v13 = vmul.f32 %v9236_v47, %v3684_v51  ;;  %v3711_v36 = vmul.f32 0.0, %v3684_v51  ;;  %v3744_v27 = vmax.f32 %v3742_v1, %v3743_v8  ;;  %v3436_v39 = vmax.f32 %v3376_v16, 0.0  ;;  %v3109_v40 = vpop.f32.mrb[13].mxu1 }
 0x2b8   : > { %v3707_v23 = vmul.f32 %v9236_v47, %v3690_v31  ;;  %v3712_v24 = vmul.f32 0.0, %v3690_v31  ;;  %v3750_v14 = vmax.f32 %v3748_v4, %v3749_v32  ;;  %v3437_v26 = vmax.f32 %v3377_v41, 0.0 }
 0x2b9   : > { %v3716_v61 = vadd.f32 %v3706_v13, %v3654_v21  ;;  %v3721_v11 = vadd.f32 %v3711_v36, %v3659_v6  ;;  %v3745_v3 = vrot.slane %v3744_v27, 1  ;;  %v3803_v29 = vrot.slane %v3436_v39, 4 }
 0x2ba   : > { %v3717_v33 = vadd.f32 %v3707_v23, %v3655_v30  ;;  %v3722_v42 = vadd.f32 %v3712_v24, %v3660_v9  ;;  %v3751_v43 = vrot.slane %v3750_v14, 1  ;;  %v3809_v46 = vrot.slane %v3437_v26, 4  ;;  %v3113_v25 = vpop.f32.mrb[14].mxu1 }
 0x2bb   : > { %v3746_v56 = vmax.f32 %v3744_v27, %v3745_v3  ;;  %v3804_v49 = vmax.f32 %v3436_v39, %v3803_v29  ;;  %v3381_v50 = vadd.f32 %v9212_v62, %v3101_v59  ;;  %v3382_v53 = vadd.f32 %v9215_v38, %v3103_v12  ;;  %v3115_v48 = vpop.f32.mrb[15].mxu1 }
 0x2bc   : > { %v3752_v28 = vmax.f32 %v3750_v14, %v3751_v43  ;;  %v3810_v19 = vmax.f32 %v3437_v26, %v3809_v46  ;;  %v3386_v58 = vadd.f32 %v9212_v62, %v3107_v35  ;;  %v3387_v16 = vadd.f32 %v9215_v38, %v3109_v40 }
 0x2bd   : > { %v3768_v41 = vmul.f32 %v9241_v37, %v3746_v56  ;;  %v3773_v44 = vmul.f32 0.0, %v3746_v56  ;;  %v3805_v63 = vrot.slane %v3804_v49, 2  ;;  %v3441_v52 = vmax.f32 %v3381_v50, 0.0 }
 0x2be   : > { %v3769_v1 = vmul.f32 %v9241_v37, %v3752_v28  ;;  %v3774_v55 = vmul.f32 0.0, %v3752_v28  ;;  %v3811_v15 = vrot.slane %v3810_v19, 2  ;;  %v3442_v17 = vmax.f32 %v3382_v53, 0.0  ;;  %v3119_v59 = vpop.f32.mrb[16].mxu1 }
 0x2bf   : > { %v3778_v4 = vadd.f32 %v3768_v41, %v3716_v61  ;;  %v3783_v12 = vadd.f32 %v3773_v44, %v3721_v11  ;;  %v3806_v21 = vmax.f32 %v3804_v49, %v3805_v63  ;;  %v3865_v6 = vrot.slane %v3441_v52, 4  ;;  %v3121_v51 = vpop.f32.mrb[17].mxu1 }
 0x2c0   : > { %v3779_v8 = vadd.f32 %v3769_v1, %v3717_v33  ;;  %v3784_v30 = vadd.f32 %v3774_v55, %v3722_v42  ;;  %v3812_v9 = vmax.f32 %v3810_v19, %v3811_v15  ;;  %v3871_v31 = vrot.slane %v3442_v17, 4 }
 0x2c1   : > { %v3807_v32 = vrot.slane %v3806_v21, 1  ;;  %v3866_v35 = vmax.f32 %v3441_v52, %v3865_v6  ;;  %v3446_v13 = vmax.f32 %v3386_v58, 0.0  ;;  %v3447_v36 = vmax.f32 %v3387_v16, 0.0 }
 0x2c2   : > { %v3813_v27 = vrot.slane %v3812_v9, 1  ;;  %v3872_v39 = vmax.f32 %v3442_v17, %v3871_v31  ;;  %v3391_v40 = vadd.f32 %v9212_v62, %v3113_v25  ;;  %v3392_v23 = vadd.f32 %v9215_v38, %v3115_v48  ;;  %v9284_v24 = vpop.f32.mrb[18].mxu1 }
 0x2c3   : > { %v3808_v14 = vmax.f32 %v3806_v21, %v3807_v32  ;;  %v3867_v26 = vrot.slane %v3866_v35, 2  ;;  %v3927_v61 = vrot.slane %v3446_v13, 4  ;;  %v3933_v11 = vrot.slane %v3447_v36, 4  ;;  %v9286_v3 = vpop.f32.mrb[19].mxu1 }
 0x2c4   : > { %v3814_v29 = vmax.f32 %v3812_v9, %v3813_v27  ;;  %v3873_v33 = vrot.slane %v3872_v39, 2  ;;  %v3451_v42 = vmax.f32 %v3391_v40, 0.0  ;;  %v3452_v43 = vmax.f32 %v3392_v23, 0.0 }
 0x2c5   : > { %v3830_v46 = vmul.f32 %v9244_v54, %v3808_v14  ;;  %v3835_v56 = vmul.f32 0.0, %v3808_v14  ;;  %v3868_v49 = vmax.f32 %v3866_v35, %v3867_v26  ;;  %v3928_v50 = vmax.f32 %v3446_v13, %v3927_v61 }
 0x2c6   : > { %v3831_v25 = vmul.f32 %v9244_v54, %v3814_v29  ;;  %v3836_v53 = vmul.f32 0.0, %v3814_v29  ;;  %v3874_v48 = vmax.f32 %v3872_v39, %v3873_v33  ;;  %v3934_v28 = vmax.f32 %v3447_v36, %v3933_v11  ;;  %v3131_v19 = vpop.f32.mrb[20].mxu1 }
 0x2c7   : > { %v3840_v58 = vadd.f32 %v3830_v46, %v3778_v4  ;;  %v3845_v16 = vadd.f32 %v3835_v56, %v3783_v12  ;;  %v3869_v41 = vrot.slane %v3868_v49, 1  ;;  %v3929_v44 = vrot.slane %v3928_v50, 2  ;;  %v3133_v63 = vpop.f32.mrb[21].mxu1 }
 0x2c8   : > { %v3841_v52 = vadd.f32 %v3831_v25, %v3779_v8  ;;  %v3846_v1 = vadd.f32 %v3836_v53, %v3784_v30  ;;  %v3875_v55 = vrot.slane %v3874_v48, 1  ;;  %v3935_v15 = vrot.slane %v3934_v28, 2 }
 0x2c9   : > { %v3870_v17 = vmax.f32 %v3868_v49, %v3869_v41  ;;  %v3930_v21 = vmax.f32 %v3928_v50, %v3929_v44  ;;  %v3989_v6 = vrot.slane %v3451_v42, 4  ;;  %v3995_v9 = vrot.slane %v3452_v43, 4 }
 0x2ca   : > { %v3876_v31 = vmax.f32 %v3874_v48, %v3875_v55  ;;  %v3936_v32 = vmax.f32 %v3934_v28, %v3935_v15  ;;  %v3396_v35 = vadd.f32 %v9212_v62, %v3119_v59  ;;  %v3397_v13 = vadd.f32 %v9215_v38, %v3121_v51  ;;  %v9292_v36 = vpop.f32.mrb[22].mxu1 }
 0x2cb   : > { %v3892_v4 = vmul.f32 %v9247_v5, %v3870_v17  ;;  %v3897_v12 = vmul.f32 0.0, %v3870_v17  ;;  %v3931_v27 = vrot.slane %v3930_v21, 1  ;;  %v3990_v8 = vmax.f32 %v3451_v42, %v3989_v6  ;;  %v3139_v30 = vpop.f32.mrb[23].mxu1 }
 0x2cc   : > { %v3893_v39 = vmul.f32 %v9247_v5, %v3876_v31  ;;  %v3898_v40 = vmul.f32 0.0, %v3876_v31  ;;  %v3937_v23 = vrot.slane %v3936_v32, 1  ;;  %v3996_v14 = vmax.f32 %v3452_v43, %v3995_v9 }
 0x2cd   : > { %v3902_v26 = vadd.f32 %v3892_v4, %v3840_v58  ;;  %v3907_v61 = vadd.f32 %v3897_v12, %v3845_v16  ;;  %v3932_v11 = vmax.f32 %v3930_v21, %v3931_v27  ;;  %v3991_v29 = vrot.slane %v3990_v8, 2 }
 0x2ce   : > { %v3903_v59 = vadd.f32 %v3893_v39, %v3841_v52  ;;  %v3908_v33 = vadd.f32 %v3898_v40, %v3846_v1  ;;  %v3938_v51 = vmax.f32 %v3936_v32, %v3937_v23  ;;  %v3997_v46 = vrot.slane %v3996_v14, 2 }
 0x2cf   : > { %v3954_v56 = vmul.f32 %v9251_v57, %v3932_v11  ;;  %v3959_v49 = vmul.f32 0.0, %v3932_v11  ;;  %v3992_v50 = vmax.f32 %v3990_v8, %v3991_v29  ;;  %v3456_v25 = vmax.f32 %v3396_v35, 0.0 }
 0x2d0   : > { %v3955_v42 = vmul.f32 %v9251_v57, %v3938_v51  ;;  %v3960_v53 = vmul.f32 0.0, %v3938_v51  ;;  %v3998_v48 = vmax.f32 %v3996_v14, %v3997_v46  ;;  %v3457_v28 = vmax.f32 %v3397_v13, 0.0 }
 0x2d1   : > { %v3964_v41 = vadd.f32 %v3954_v56, %v3902_v26  ;;  %v3969_v43 = vadd.f32 %v3959_v49, %v3907_v61  ;;  %v3993_v58 = vrot.slane %v3992_v50, 1  ;;  %v4051_v16 = vrot.slane %v3456_v25, 4 }
 0x2d2   : > { %v3965_v44 = vadd.f32 %v3955_v42, %v3903_v59  ;;  %v3970_v55 = vadd.f32 %v3960_v53, %v3908_v33  ;;  %v3999_v52 = vrot.slane %v3998_v48, 1  ;;  %v4057_v1 = vrot.slane %v3457_v28, 4 }
 0x2d3   : > { %v3994_v15 = vmax.f32 %v3992_v50, %v3993_v58  ;;  %v4052_v17 = vmax.f32 %v3456_v25, %v4051_v16  ;;  %v3401_v21 = vadd.f32 %v9212_v62, %v9284_v24  ;;  %v3402_v6 = vadd.f32 %v9215_v38, %v9286_v3 }
 0x2d4   : > { %v4000_v9 = vmax.f32 %v3998_v48, %v3999_v52  ;;  %v4058_v31 = vmax.f32 %v3457_v28, %v4057_v1  ;;  %v3406_v32 = vadd.f32 %v9212_v62, %v3131_v19  ;;  %v3407_v35 = vadd.f32 %v9215_v38, %v3133_v63 }
 0x2d5   : > { %v4016_v13 = vmul.f32 %v9258_v7, %v3994_v15  ;;  %v4021_v4 = vmul.f32 0.0, %v3994_v15  ;;  %v4053_v12 = vrot.slane %v4052_v17, 2  ;;  %v3461_v27 = vmax.f32 %v3401_v21, 0.0 }
 0x2d6   : > { %v4017_v8 = vmul.f32 %v9258_v7, %v4000_v9  ;;  %v4022_v39 = vmul.f32 0.0, %v4000_v9  ;;  %v4059_v40 = vrot.slane %v4058_v31, 2  ;;  %v3462_v23 = vmax.f32 %v3402_v6, 0.0 }
 0x2d7   : > { %v4026_v24 = vadd.f32 %v4016_v13, %v3964_v41  ;;  %v4031_v14 = vadd.f32 %v4021_v4, %v3969_v43  ;;  %v4054_v26 = vmax.f32 %v4052_v17, %v4053_v12  ;;  %v4113_v3 = vrot.slane %v3461_v27, 4 }
 0x2d8   : > { %v4027_v61 = vadd.f32 %v4017_v8, %v3965_v44  ;;  %v4032_v19 = vadd.f32 %v4022_v39, %v3970_v55  ;;  %v4060_v11 = vmax.f32 %v4058_v31, %v4059_v40  ;;  %v4119_v63 = vrot.slane %v3462_v23, 4 }
 0x2d9   : > { %v4055_v29 = vrot.slane %v4054_v26, 1  ;;  %v4114_v59 = vmax.f32 %v3461_v27, %v4113_v3  ;;  %v3466_v33 = vmax.f32 %v3406_v32, 0.0  ;;  %v3467_v51 = vmax.f32 %v3407_v35, 0.0 }
 0x2da   : > { %v4061_v46 = vrot.slane %v4060_v11, 1  ;;  %v4120_v56 = vmax.f32 %v3462_v23, %v4119_v63  ;;  %v3411_v49 = vadd.f32 %v9212_v62, %v9292_v36  ;;  %v3412_v50 = vadd.f32 %v9215_v38, %v3139_v30 }
 0x2db   : > { %v4056_v25 = vmax.f32 %v4054_v26, %v4055_v29  ;;  %v4115_v42 = vrot.slane %v4114_v59, 2  ;;  %v4175_v53 = vrot.slane %v3466_v33, 4  ;;  %v4181_v48 = vrot.slane %v3467_v51, 4 }
 0x2dc   : > { %v4062_v28 = vmax.f32 %v4060_v11, %v4061_v46  ;;  %v4121_v41 = vrot.slane %v4120_v56, 2  ;;  %v3471_v43 = vmax.f32 %v3411_v49, 0.0  ;;  %v3472_v58 = vmax.f32 %v3412_v50, 0.0 }
 0x2dd   : > { %v4078_v16 = vmul.f32 0.0, %v4056_v25  ;;  %v4083_v44 = vmul.f32 %v9261_v2, %v4056_v25  ;;  %v4116_v55 = vmax.f32 %v4114_v59, %v4115_v42  ;;  %v4176_v52 = vmax.f32 %v3466_v33, %v4175_v53 }
 0x2de   : > { %v4079_v1 = vmul.f32 0.0, %v4062_v28  ;;  %v4084_v15 = vmul.f32 %v9261_v2, %v4062_v28  ;;  %v4122_v17 = vmax.f32 %v4120_v56, %v4121_v41  ;;  %v4182_v62 = vmax.f32 %v3467_v51, %v4181_v48 }
 0x2df   : > { %v4088_v36 = vadd.f32 %v4078_v16, %v4026_v24  ;;  %v4093_v38 = vadd.f32 %v4083_v44, %v4031_v14  ;;  %v4117_v30 = vrot.slane %v4116_v55, 1  ;;  %v4177_v21 = vrot.slane %v4176_v52, 2 }
 0x2e0   : > { %v4089_v6 = vadd.f32 %v4079_v1, %v4027_v61  ;;  %v4094_v9 = vadd.f32 %v4084_v15, %v4032_v19  ;;  %v4123_v31 = vrot.slane %v4122_v17, 1  ;;  %v4183_v32 = vrot.slane %v4182_v62, 2 }
 0x2e1   : > { %v4118_v35 = vmax.f32 %v4116_v55, %v4117_v30  ;;  %v4178_v13 = vmax.f32 %v4176_v52, %v4177_v21  ;;  %v4237_v4 = vrot.slane %v3471_v43, 4  ;;  %v4243_v12 = vrot.slane %v3472_v58, 4 }
 0x2e2   : > { %v4124_v27 = vmax.f32 %v4122_v17, %v4123_v31  ;;  %v9315_v8 = vsel %vm4195_vm12, 1.0, %v10436_v0  ;;  %v4184_v39 = vmax.f32 %v4182_v62, %v4183_v32  ;;  %v9323_v44 = vsel %vm4257_vm13, 1.0, %v10436_v0 }
 0x2e3   : > { %10467 = vst [vmem:[#allocation27_spill] sm:$0xff] %v9315_v8  ;;  %v4140_v40 = vmul.f32 0.0, %v4118_v35  ;;  %v4145_v23 = vmul.f32 %v9264_v22, %v4118_v35  ;;  %v4179_v24 = vrot.slane %v4178_v13, 1  ;;  %v4238_v14 = vmax.f32 %v3471_v43, %v4237_v4  ;;  %10468 = vst [vmem:[#allocation28_spill] sm:$0xff] %v9323_v44 }
 0x2e4   : > { %v4141_v26 = vmul.f32 0.0, %v4124_v27  ;;  %v4146_v3 = vmul.f32 %v9264_v22, %v4124_v27  ;;  %v4185_v61 = vrot.slane %v4184_v39, 1  ;;  %v4244_v19 = vmax.f32 %v3472_v58, %v4243_v12 }
 0x2e5   : > { %v4150_v11 = vadd.f32 %v4140_v40, %v4088_v36  ;;  %v4155_v63 = vadd.f32 %v4145_v23, %v4093_v38  ;;  %v4180_v29 = vmax.f32 %v4178_v13, %v4179_v24  ;;  %v4239_v59 = vrot.slane %v4238_v14, 2 }
 0x2e6   : > { %v4151_v33 = vadd.f32 %v4141_v26, %v4089_v6  ;;  %v4156_v51 = vadd.f32 %v4146_v3, %v4094_v9  ;;  %v4186_v46 = vmax.f32 %v4184_v39, %v4185_v61  ;;  %v4245_v56 = vrot.slane %v4244_v19, 2 }
 0x2e7   : > { %v4202_v49 = vmul.f32 0.0, %v4180_v29  ;;  %v4207_v50 = vmul.f32 %v9315_v8, %v4180_v29  ;;  %v4240_v25 = vmax.f32 %v4238_v14, %v4239_v59  ;;  %v3331_v12 = vsub.s32 0, %v9205_v20 }
 0x2e8   : > { %v4203_v42 = vmul.f32 0.0, %v4186_v46  ;;  %v4208_v53 = vmul.f32 %v9315_v8, %v4186_v46  ;;  %v4246_v48 = vmax.f32 %v4244_v19, %v4245_v56  ;;  %v3335_v27 = vsub.s32 1, %v9205_v20 }
 0x2e9   : > { %v4212_v28 = vadd.f32 %v4202_v49, %v4150_v11  ;;  %v4217_v41 = vadd.f32 %v4207_v50, %v4155_v63  ;;  %v4241_v43 = vrot.slane %v4240_v25, 1  ;;  %v3347_v39 = vsub.s32 4, %v9205_v20 }
 0x2ea   : > { %v4213_v58 = vadd.f32 %v4203_v42, %v4151_v33  ;;  %v4218_v16 = vadd.f32 %v4208_v53, %v4156_v51  ;;  %v4247_v55 = vrot.slane %v4246_v48, 1  ;;  %vm4376_vm13 = vcmask 388416  }
 0x2eb   : > { %v4242_v52 = vmax.f32 %v4240_v25, %v4241_v43  ;;  %v9354_v24 = vrot.slane %v9208_v34, %v3331_v12  ;;  %v9357_v20 = vrot.slane %v9208_v34, %v3335_v27  ;;  %vm4526_vm12 = vcmask 1044416  }
 0x2ec   : > { %v4248_v1 = vmax.f32 %v4246_v48, %v4247_v55  ;;  %v9360_v14 = vrot.slane %v9208_v34, %v3347_v39 }
 0x2ed   : > { %v4264_v15 = vmul.f32 0.0, %v4242_v52  ;;  %v4269_v17 = vmul.f32 %v9323_v44, %v4242_v52 }
 0x2ee   : > { %v4265_v62 = vmul.f32 0.0, %v4248_v1  ;;  %v4270_v60 = vmul.f32 %v9323_v44, %v4248_v1  ;;  %10469 = vst [vmem:[#allocation29_spill] sm:$0xff] %v9360_v14 }
 0x2ef   : > { %v9327_v36 = vadd.f32 %v4264_v15, %v4212_v28  ;;  %v4279_v38 = vadd.f32 %v4269_v17, %v4217_v41 }
 0x2f0   : > { %v9329_v30 = vadd.f32 %v4265_v62, %v4213_v58  ;;  %v4280_v21 = vadd.f32 %v4270_v60, %v4218_v16 }
 0x2f1   : > { %4289 = vst [vmem:[#allocation3 + $0x38] sm:$0xf] %v4279_v38  ;;  %v4749_v6 = vsel %vm10427_vm14, %v9327_v36, -inf  ;;  %v4762_v9 = vsel %vm10426_vm15, %v9327_v36, -inf  ;;  %v4775_v35 = vsel %vm10425_vm3, %v9327_v36, -inf  ;;  %v4788_v4 = vsel %vm10429_vm5, %v9327_v36, -inf }
 0x2f2   : > { %4285 = vst [vmem:[#allocation3 + $0x18] sm:$0xff] %v9329_v30  ;;  %4290 = vst [vmem:[#allocation3 + $0x40] sm:$0xf] %v4280_v21  ;;  %4750 = vmax.xlane.f32.xlu0 %v4749_v6  ;;  %vm4346_vm14 = vcmask 257216   ;;  %v4801_v23 = vsel %vm10430_vm6, %v9327_v36, -inf  ;;  %vm4436_vm5 = vcmask 650816  }
 0x2f3   : > { %vm4481_vm15 = vcmask 847616   ;;  %vm4496_vm3 = vcmask 913216   ;;  %v4814_v26 = vsel %vm10432_vm7, %v9327_v36, -inf  ;;  %v4827_v3 = vsel %vm10433_vm8, %v9327_v36, -inf }
 0x2f4   : > { %v4840_v61 = vsel %vm10435_vm9, %v9327_v36, -inf  ;;  %vm10470_vm6 = vcmask 589312   ;;  %vm10472_vm7 = vcmask 720512   ;;  %vm10473_vm8 = vcmask 786112  }
 0x2f5   : > { %v9370_v19 = vsel %vm10470_vm6, %v9327_v36, -inf  ;;  %v9380_v29 = vsel %vm10472_vm7, %v9327_v36, -inf  ;;  %v9384_v59 = vsel %vm10473_vm8, %v9327_v36, -inf  ;;  %v9389_v46 = vsel %vm10434_vm1, %v9327_v36, -inf }
 0x2f6   : > { %4763 = vmax.xlane.f32.xlu0 %v4762_v9  ;;  %vm10475_vm6 = vcmask 982912   ;;  %vm10476_vm7 = vcmask 1048512   ;;  %vm10477_vm8 = vcmask 64512   ;;  %vm10478_vm1 = vcmask 130112  }
 0x2f7   : > { %v9397_v49 = vsel %vm10475_vm6, %v9327_v36, -inf  ;;  %v9402_v25 = vsel %vm10476_vm7, %v9327_v36, -inf  ;;  %v9406_v42 = vsel %vm10477_vm8, %v9329_v30, -inf  ;;  %v9410_v53 = vsel %vm10478_vm1, %v9329_v30, -inf }
 0x2f8   : > { %v9336_v31 = vld [vmem:[#allocation3 + $0x38] sm:$0xf]  ;;  %vm10480_vm6 = vcmask 195712   ;;  %vm10481_vm9 = vcmask 261312   ;;  %vm10482_vm1 = vcmask 519616   ;;  %vm10484_vm7 = vcmask 60416  }
 0x2f9   : > { %v4752_v32 = vsel %vm10424_vm2, %v9336_v31, -inf  ;;  %v4765_v13 = vsel %vm10428_vm4, %v9336_v31, -inf  ;;  %vm10431_vm2 = vcmask 191616   ;;  %vm4391_vm4 = vcmask 454016   ;;  %v4958_v9 = vld [vmem:[#allocation3 + $0x40] sm:$0xf] }
 0x2fa   : > { %4753 = vmax.xlane.f32.xlu1 %v4752_v32  ;;  %4776 = vmax.xlane.f32.xlu0 %v4775_v35  ;;  %v4778_v40 = vsel %vm10431_vm2, %v9336_v31, -inf  ;;  %v4791_v11 = vsel %vm4346_vm14, %v9336_v31, -inf  ;;  %vm10471_vm2 = vcmask 654912   ;;  %v9416_v41 = vsel %vm10480_vm6, %v9329_v30, -inf }
 0x2fb   : > { %v9376_v34 = vsel %vm10471_vm2, %v9327_v36, -inf  ;;  %vm10474_vm2 = vcmask 917312   ;;  %v9420_v43 = vsel %vm10481_vm9, %v9329_v30, -inf  ;;  %v4817_v16 = vsel %vm4376_vm13, %v9336_v31, -inf }
 0x2fc   : > { %v9393_v56 = vsel %vm10474_vm2, %v9327_v36, -inf  ;;  %vm10479_vm2 = vcmask 322816   ;;  %v4830_v52 = vsel %vm4391_vm4, %v9336_v31, -inf  ;;  %v9428_v1 = vsel %vm10482_vm1, %v9336_v31, -inf }
 0x2fd   : > { %v4804_v48 = vsel %vm10479_vm2, %v9336_v31, -inf  ;;  %vm10483_vm9 = vcmask 585216   ;;  %v9437_v36 = vsel %vm4436_vm5, %v9336_v31, -inf  ;;  %v9442_v21 = vsel %vm4451_vm0, %v9336_v31, -inf }
 0x2fe   : > { %4766 = vmax.xlane.f32.xlu1 %v4765_v13  ;;  %4789 = vmax.xlane.f32.xlu0 %v4788_v4  ;;  %v9433_v60 = vsel %vm10483_vm9, %v9336_v31, -inf  ;;  %v9446_v6 = vsel %vm4466_vm10, %v9336_v31, -inf  ;;  %v9450_v13 = vsel %vm4481_vm15, %v9336_v31, -inf  ;;  %v9454_v4 = vsel %vm4496_vm3, %v9336_v31, -inf }
 0x2ff   : > { %vm10485_vm8 = vcmask 126016   ;;  %vm10486_vm2 = vcmask 191616   ;;  %vm3478_vm6 = vcmask 523264   ;;  %vm10493_vm1 = vcmask 130112  }
 0x300   : > { %vm10494_vm9 = vcmask 64512  }
 0x302   : > { %4779 = vmax.xlane.f32.xlu1 %v4778_v40  ;;  %4802 = vmax.xlane.f32.xlu0 %v4801_v23  ;;  %v9458_v40 = vsel %vm4511_vm11, %v9336_v31, -inf  ;;  %v9462_v23 = vsel %vm4526_vm12, %v9336_v31, -inf }
 0x305   : > { %v2934_v63 = vpop.f32.mrb[0].mxu0 }
 0x306   : > { %4792 = vmax.xlane.f32.xlu1 %v4791_v11  ;;  %v3354_v33 = vadd.f32 %v9354_v24, %v2934_v63  ;;  %v2936_v51 = vpop.f32.mrb[1].mxu0  ;;  %4815 = vmax.xlane.f32.xlu0 %v4814_v26 }
 0x307   : > { %v3355_v50 = vadd.f32 %v9357_v20, %v2936_v51 }
 0x308   : > { %v3414_v28 = vmax.f32 %v3354_v33, 0.0  ;;  %v9466_v33 = vsel %vm10484_vm7, %v4958_v9, -inf  ;;  %vm10496_vm7 = vmmov %vm10485_vm8 }
 0x309   : > { %v3415_v58 = vmax.f32 %v3355_v50, 0.0  ;;  %v2940_v55 = vpop.f32.mrb[2].mxu0 }
 0x30a   : > { %4805 = vmax.xlane.f32.xlu1 %v4804_v48  ;;  %v3543_v15 = vrot.slane %v3414_v28, 4  ;;  %v3359_v17 = vadd.f32 %v9354_v24, %v2940_v55  ;;  %v2942_v62 = vpop.f32.mrb[3].mxu0  ;;  %4828 = vmax.xlane.f32.xlu0 %v4827_v3 }
 0x30b   : > { %v3549_v38 = vrot.slane %v3415_v58, 4  ;;  %v3360_v30 = vadd.f32 %v9357_v20, %v2942_v62 }
 0x30c   : > { %v3544_v32 = vmax.f32 %v3414_v28, %v3543_v15  ;;  %v3419_v35 = vmax.f32 %v3359_v17, 0.0  ;;  %v9470_v28 = vsel %vm10485_vm8, %v4958_v9, -inf  ;;  %vm10497_vm8 = vcmask 60416  }
 0x30d   : > { %v3550_v12 = vmax.f32 %v3415_v58, %v3549_v38  ;;  %v3420_v27 = vmax.f32 %v3360_v30, 0.0  ;;  %v2946_v39 = vpop.f32.mrb[4].mxu0  ;;  %v9476_v38 = vsel %vm4346_vm14, %v4958_v9, -inf }
 0x30e   : > { %v3545_v26 = vrot.slane %v3544_v32, 2  ;;  %4818 = vmax.xlane.f32.xlu1 %v4817_v16  ;;  %v3605_v3 = vrot.slane %v3419_v35, 4  ;;  %v3364_v11 = vadd.f32 %v9354_v24, %v2946_v39  ;;  %v2948_v63 = vpop.f32.mrb[5].mxu0  ;;  %4841 = vmax.xlane.f32.xlu0 %v4840_v61  ;;  %v9473_v16 = vsel %vm10486_vm2, %v4958_v9, -inf  ;;  %10487 = vst [vmem:[#allocation30_spill] sm:$0xff] %v9476_v38 }
 0x30f   : > { %v3551_v51 = vrot.slane %v3550_v12, 2  ;;  %v3611_v50 = vrot.slane %v3420_v27, 4  ;;  %v3365_v48 = vadd.f32 %v9357_v20, %v2948_v63  ;;  %vm10498_vm2 = vcmask 195712  }
 0x310   : > { %v3546_v58 = vmax.f32 %v3544_v32, %v3545_v26  ;;  %v3606_v31 = vmax.f32 %v3419_v35, %v3605_v3  ;;  %v3424_v55 = vmax.f32 %v3364_v11, 0.0 }
 0x311   : > { %v3552_v15 = vmax.f32 %v3550_v12, %v3551_v51  ;;  %v3612_v17 = vmax.f32 %v3420_v27, %v3611_v50  ;;  %v3425_v62 = vmax.f32 %v3365_v48, 0.0  ;;  %v2952_v61 = vpop.f32.mrb[6].mxu0 }
 0x312   : > { %v3547_v30 = vrot.slane %v3546_v58, 1  ;;  %v3607_v39 = vrot.slane %v3606_v31, 2  ;;  %4831 = vmax.xlane.f32.xlu1 %v4830_v52  ;;  %v3667_v63 = vrot.slane %v3424_v55, 4  ;;  %v3369_v0 = vadd.f32 %v9354_v24, %v2952_v61  ;;  %v2954_v10 = vpop.f32.mrb[7].mxu0  ;;  %4854 = vmax.xlane.f32.xlu0 %v9370_v19 }
 0x313   : > { %v3553_v32 = vrot.slane %v3552_v15, 1  ;;  %v3613_v35 = vrot.slane %v3612_v17, 2  ;;  %v3673_v26 = vrot.slane %v3425_v62, 4  ;;  %v3370_v12 = vadd.f32 %v9357_v20, %v2954_v10 }
 0x314   : > { %v3548_v27 = vmax.f32 %v3546_v58, %v3547_v30  ;;  %v3608_v3 = vmax.f32 %v3606_v31, %v3607_v39  ;;  %v3668_v11 = vmax.f32 %v3424_v55, %v3667_v63  ;;  %v3429_v51 = vmax.f32 %v3369_v0, 0.0 }
 0x315   : > { %v3554_v9 = vmax.f32 %v3552_v15, %v3553_v32  ;;  %v3614_v50 = vmax.f32 %v3612_v17, %v3613_v35  ;;  %v3674_v48 = vmax.f32 %v3425_v62, %v3673_v26  ;;  %v3430_v44 = vmax.f32 %v3370_v12, 0.0  ;;  %v2958_v52 = vpop.f32.mrb[8].mxu0 }
 0x316   : > { %v3580_v8 = vmul.f32 %v9223_v18, %v3548_v27  ;;  %v3585_v61 = vmul.f32 0.0, %v3548_v27  ;;  %v3609_v22 = vrot.slane %v3608_v3, 1  ;;  %v3669_v14 = vrot.slane %v3668_v11, 2  ;;  %4844 = vmax.xlane.f32.xlu1 %v9428_v1  ;;  %v2960_v19 = vpop.f32.mrb[9].mxu0  ;;  %4867 = vmax.xlane.f32.xlu0 %v9376_v34 }
 0x317   : > { %v3581_v10 = vmul.f32 %v9223_v18, %v3554_v9  ;;  %v3586_v58 = vmul.f32 0.0, %v3554_v9  ;;  %v3615_v31 = vrot.slane %v3614_v50, 1  ;;  %v3675_v0 = vrot.slane %v3674_v48, 2 }
 0x318   : > { %v3610_v55 = vmax.f32 %v3608_v3, %v3609_v22  ;;  %v3670_v15 = vmax.f32 %v3668_v11, %v3669_v14  ;;  %v3729_v17 = vrot.slane %v3429_v51, 4  ;;  %v3735_v62 = vrot.slane %v3430_v44, 4 }
 0x319   : > { %v3616_v30 = vmax.f32 %v3614_v50, %v3615_v31  ;;  %v3676_v39 = vmax.f32 %v3674_v48, %v3675_v0  ;;  %v3374_v63 = vadd.f32 %v9354_v24, %v2958_v52  ;;  %v3375_v32 = vadd.f32 %v9357_v20, %v2960_v19  ;;  %v2964_v35 = vpop.f32.mrb[10].mxu0 }
 0x31a   : > { %v3642_v1 = vmul.f32 %v9228_v45, %v3610_v55  ;;  %v3647_v26 = vmul.f32 0.0, %v3610_v55  ;;  %v3671_v34 = vrot.slane %v3670_v15, 1  ;;  %v3730_v12 = vmax.f32 %v3429_v51, %v3729_v17  ;;  %4857 = vmax.xlane.f32.xlu1 %v9433_v60  ;;  %v2966_v27 = vpop.f32.mrb[11].mxu0  ;;  %4880 = vmax.xlane.f32.xlu0 %v9380_v29 }
 0x31b   : > { %v3643_v22 = vmul.f32 %v9228_v45, %v3616_v30  ;;  %v3648_v14 = vmul.f32 0.0, %v3616_v30  ;;  %v3677_v3 = vrot.slane %v3676_v39, 1  ;;  %v3736_v11 = vmax.f32 %v3430_v44, %v3735_v62 }
 0x31c   : > { %v3652_v9 = vadd.f32 %v3642_v1, %v3580_v8  ;;  %v3657_v50 = vadd.f32 %v3647_v26, %v3585_v61  ;;  %v3672_v48 = vmax.f32 %v3670_v15, %v3671_v34  ;;  %v3731_v52 = vrot.slane %v3730_v12, 2 }
 0x31d   : > { %v3653_v19 = vadd.f32 %v3643_v22, %v3581_v10  ;;  %v3658_v31 = vadd.f32 %v3648_v14, %v3586_v58  ;;  %v3678_v0 = vmax.f32 %v3676_v39, %v3677_v3  ;;  %v3737_v55 = vrot.slane %v3736_v11, 2  ;;  %v2970_v18 = vpop.f32.mrb[12].mxu0 }
 0x31e   : > { %v3704_v51 = vmul.f32 %v9236_v47, %v3672_v48  ;;  %v3709_v60 = vmul.f32 0.0, %v3672_v48  ;;  %v3732_v17 = vmax.f32 %v3730_v12, %v3731_v52  ;;  %v3434_v38 = vmax.f32 %v3374_v63, 0.0  ;;  %4870 = vmax.xlane.f32.xlu1 %v9437_v36  ;;  %v2972_v29 = vpop.f32.mrb[13].mxu0  ;;  %4893 = vmax.xlane.f32.xlu0 %v9384_v59 }
 0x31f   : > { %v3705_v8 = vmul.f32 %v9236_v47, %v3678_v0  ;;  %v3710_v44 = vmul.f32 0.0, %v3678_v0  ;;  %v3738_v61 = vmax.f32 %v3736_v11, %v3737_v55  ;;  %v3435_v15 = vmax.f32 %v3375_v32, 0.0 }
 0x320   : > { %v3714_v10 = vadd.f32 %v3704_v51, %v3652_v9  ;;  %v3719_v58 = vadd.f32 %v3709_v60, %v3657_v50  ;;  %v3733_v62 = vrot.slane %v3732_v17, 1  ;;  %v3791_v30 = vrot.slane %v3434_v38, 4 }
 0x321   : > { %v3715_v39 = vadd.f32 %v3705_v8, %v3653_v19  ;;  %v3720_v1 = vadd.f32 %v3710_v44, %v3658_v31  ;;  %v3739_v26 = vrot.slane %v3738_v61, 1  ;;  %v3797_v34 = vrot.slane %v3435_v15, 4  ;;  %v2976_v12 = vpop.f32.mrb[14].mxu0 }
 0x322   : > { %v3734_v63 = vmax.f32 %v3732_v17, %v3733_v62  ;;  %v3792_v22 = vmax.f32 %v3434_v38, %v3791_v30  ;;  %v3379_v36 = vadd.f32 %v9354_v24, %v2964_v35  ;;  %v3380_v59 = vadd.f32 %v9357_v20, %v2966_v27  ;;  %4883 = vmax.xlane.f32.xlu1 %v9442_v21  ;;  %v2978_v14 = vpop.f32.mrb[15].mxu0 }
 0x323   : > { %v3740_v3 = vmax.f32 %v3738_v61, %v3739_v26  ;;  %v3798_v32 = vmax.f32 %v3435_v15, %v3797_v34  ;;  %v3384_v11 = vadd.f32 %v9354_v24, %v2970_v18  ;;  %v3385_v9 = vadd.f32 %v9357_v20, %v2972_v29  ;;  %4906 = vmax.xlane.f32.xlu0 %v9389_v46 }
 0x324   : > { %v3766_v50 = vmul.f32 %v9241_v37, %v3734_v63  ;;  %v3771_v48 = vmul.f32 0.0, %v3734_v63  ;;  %v3793_v52 = vrot.slane %v3792_v22, 2  ;;  %v3439_v38 = vmax.f32 %v3379_v36, 0.0 }
 0x325   : > { %v3767_v35 = vmul.f32 %v9241_v37, %v3740_v3  ;;  %v3772_v19 = vmul.f32 0.0, %v3740_v3  ;;  %v3799_v27 = vrot.slane %v3798_v32, 2  ;;  %v3440_v31 = vmax.f32 %v3380_v59, 0.0  ;;  %v2982_v21 = vpop.f32.mrb[16].mxu0 }
 0x326   : > { %v3776_v0 = vadd.f32 %v3766_v50, %v3714_v10  ;;  %v3781_v55 = vadd.f32 %v3771_v48, %v3719_v58  ;;  %v3794_v51 = vmax.f32 %v3792_v22, %v3793_v52  ;;  %v3853_v60 = vrot.slane %v3439_v38, 4  ;;  %4896 = vmax.xlane.f32.xlu1 %v9446_v6  ;;  %v2984_v18 = vpop.f32.mrb[17].mxu0 }
 0x327   : > { %v3777_v17 = vadd.f32 %v3767_v35, %v3715_v39  ;;  %v3782_v46 = vadd.f32 %v3772_v19, %v3720_v1  ;;  %v3800_v29 = vmax.f32 %v3798_v32, %v3799_v27  ;;  %v3859_v8 = vrot.slane %v3440_v31, 4  ;;  %4919 = vmax.xlane.f32.xlu0 %v9393_v56 }
 0x328   : > { %v3795_v44 = vrot.slane %v3794_v51, 1  ;;  %v3854_v61 = vmax.f32 %v3439_v38, %v3853_v60  ;;  %v3444_v15 = vmax.f32 %v3384_v11, 0.0  ;;  %v3445_v62 = vmax.f32 %v3385_v9, 0.0 }
 0x329   : > { %v3801_v30 = vrot.slane %v3800_v29, 1  ;;  %v3860_v26 = vmax.f32 %v3440_v31, %v3859_v8  ;;  %v3389_v10 = vadd.f32 %v9354_v24, %v2976_v12  ;;  %v3390_v58 = vadd.f32 %v9357_v20, %v2978_v14  ;;  %v9507_v34 = vpop.f32.mrb[18].mxu0 }
 0x32a   : > { %v3796_v6 = vmax.f32 %v3794_v51, %v3795_v44  ;;  %v3855_v63 = vrot.slane %v3854_v61, 2  ;;  %v3915_v39 = vrot.slane %v3444_v15, 4  ;;  %v3921_v1 = vrot.slane %v3445_v62, 4  ;;  %4909 = vmax.xlane.f32.xlu1 %v9450_v13  ;;  %v9510_v22 = vpop.f32.mrb[19].mxu0 }
 0x32b   : > { %v3802_v56 = vmax.f32 %v3800_v29, %v3801_v30  ;;  %v3861_v36 = vrot.slane %v3860_v26, 2  ;;  %v3449_v59 = vmax.f32 %v3389_v10, 0.0  ;;  %v3450_v3 = vmax.f32 %v3390_v58, 0.0  ;;  %4932 = vmax.xlane.f32.xlu0 %v9397_v49 }
 0x32c   : > { %v3828_v12 = vmul.f32 %v9244_v54, %v3796_v6  ;;  %v3833_v32 = vmul.f32 0.0, %v3796_v6  ;;  %v3856_v14 = vmax.f32 %v3854_v61, %v3855_v63  ;;  %v3916_v11 = vmax.f32 %v3444_v15, %v3915_v39 }
 0x32d   : > { %v3829_v9 = vmul.f32 %v9244_v54, %v3802_v56  ;;  %v3834_v50 = vmul.f32 0.0, %v3802_v56  ;;  %v3862_v48 = vmax.f32 %v3860_v26, %v3861_v36  ;;  %v3922_v52 = vmax.f32 %v3445_v62, %v3921_v1  ;;  %v9515_v38 = vpop.f32.mrb[20].mxu0 }
 0x32e   : > { %v3838_v13 = vadd.f32 %v3828_v12, %v3776_v0  ;;  %v3843_v35 = vadd.f32 %v3833_v32, %v3781_v55  ;;  %v3857_v19 = vrot.slane %v3856_v14, 1  ;;  %v3917_v27 = vrot.slane %v3916_v11, 2  ;;  %4922 = vmax.xlane.f32.xlu1 %v9454_v4  ;;  %v9518_v31 = vpop.f32.mrb[21].mxu0 }
 0x32f   : > { %v3839_v49 = vadd.f32 %v3829_v9, %v3777_v17  ;;  %v3844_v51 = vadd.f32 %v3834_v50, %v3782_v46  ;;  %v3863_v60 = vrot.slane %v3862_v48, 1  ;;  %v3923_v29 = vrot.slane %v3922_v52, 2  ;;  %4945 = vmax.xlane.f32.xlu0 %v9402_v25 }
 0x330   : > { %v3858_v8 = vmax.f32 %v3856_v14, %v3857_v19  ;;  %v3918_v44 = vmax.f32 %v3916_v11, %v3917_v27  ;;  %v3977_v61 = vrot.slane %v3449_v59, 4  ;;  %v3983_v15 = vrot.slane %v3450_v3, 4 }
 0x331   : > { %v3864_v62 = vmax.f32 %v3862_v48, %v3863_v60  ;;  %v3924_v30 = vmax.f32 %v3922_v52, %v3923_v29  ;;  %v3394_v0 = vadd.f32 %v9354_v24, %v2982_v21  ;;  %v3395_v55 = vadd.f32 %v9357_v20, %v2984_v18  ;;  %v9523_v26 = vpop.f32.mrb[22].mxu0 }
 0x332   : > { %v3890_v4 = vmul.f32 %v9247_v5, %v3858_v8  ;;  %v3895_v17 = vmul.f32 0.0, %v3858_v8  ;;  %v3919_v46 = vrot.slane %v3918_v44, 1  ;;  %v3978_v10 = vmax.f32 %v3449_v59, %v3977_v61  ;;  %4935 = vmax.xlane.f32.xlu1 %v9458_v40  ;;  %v9527_v25 = vpop.f32.mrb[23].mxu0 }
 0x333   : > { %v3891_v58 = vmul.f32 %v9247_v5, %v3864_v62  ;;  %v3896_v6 = vmul.f32 0.0, %v3864_v62  ;;  %v3925_v63 = vrot.slane %v3924_v30, 1  ;;  %v3984_v39 = vmax.f32 %v3450_v3, %v3983_v15  ;;  %4960 = vmax.xlane.f32.xlu0 %v9406_v42 }
 0x334   : > { %v3900_v21 = vadd.f32 %v3890_v4, %v3838_v13  ;;  %v3905_v18 = vadd.f32 %v3895_v17, %v3843_v35  ;;  %v3920_v1 = vmax.f32 %v3918_v44, %v3919_v46  ;;  %v3979_v56 = vrot.slane %v3978_v10, 2 }
 0x335   : > { %v3901_v36 = vadd.f32 %v3891_v58, %v3839_v49  ;;  %v3906_v12 = vadd.f32 %v3896_v6, %v3844_v51  ;;  %v3926_v32 = vmax.f32 %v3924_v30, %v3925_v63  ;;  %v3985_v14 = vrot.slane %v3984_v39, 2  ;;  %v9531_v59 = vpop.f32.mrb[24].mxu0 }
 0x336   : > { %v3952_v40 = vmul.f32 %v9251_v57, %v3920_v1  ;;  %v3957_v11 = vmul.f32 0.0, %v3920_v1  ;;  %v3980_v9 = vmax.f32 %v3978_v10, %v3979_v56  ;;  %v3454_v50 = vmax.f32 %v3394_v0, 0.0  ;;  %4948 = vmax.xlane.f32.xlu1 %v9462_v23  ;;  %v9535_v3 = vpop.f32.mrb[25].mxu0 }
 0x337   : > { %v3953_v42 = vmul.f32 %v9251_v57, %v3926_v32  ;;  %v3958_v48 = vmul.f32 0.0, %v3926_v32  ;;  %v3986_v52 = vmax.f32 %v3984_v39, %v3985_v14  ;;  %v3455_v13 = vmax.f32 %v3395_v55, 0.0  ;;  %4973 = vmax.xlane.f32.xlu0 %v9410_v53 }
 0x338   : > { %v3962_v35 = vadd.f32 %v3952_v40, %v3900_v21  ;;  %v3967_v19 = vadd.f32 %v3957_v11, %v3905_v18  ;;  %v3981_v27 = vrot.slane %v3980_v9, 1  ;;  %v4039_v49 = vrot.slane %v3454_v50, 4 }
 0x339   : > { %v3963_v51 = vadd.f32 %v3953_v42, %v3901_v36  ;;  %v3968_v60 = vadd.f32 %v3958_v48, %v3906_v12  ;;  %v3987_v29 = vrot.slane %v3986_v52, 1  ;;  %v4045_v8 = vrot.slane %v3455_v13, 4  ;;  %v9539_v44 = vpop.f32.mrb[26].mxu0 }
 0x33a   : > { %v3982_v23 = vmax.f32 %v3980_v9, %v3981_v27  ;;  %v4040_v61 = vmax.f32 %v3454_v50, %v4039_v49  ;;  %v3399_v15 = vadd.f32 %v9354_v24, %v9507_v34  ;;  %v3400_v62 = vadd.f32 %v9357_v20, %v9510_v22  ;;  %4963 = vmax.xlane.f32.xlu1 %v9466_v33  ;;  %v9546_v53 = vpop.f32.mrb[27].mxu0 }
 0x33b   : > { %v3988_v30 = vmax.f32 %v3986_v52, %v3987_v29  ;;  %v4046_v0 = vmax.f32 %v3455_v13, %v4045_v8  ;;  %v3404_v55 = vadd.f32 %v9354_v24, %v9515_v38  ;;  %v3405_v4 = vadd.f32 %v9357_v20, %v9518_v31  ;;  %4986 = vmax.xlane.f32.xlu0 %v9416_v41 }
 0x33c   : > { %v4014_v17 = vmul.f32 %v9258_v7, %v3982_v23  ;;  %v4019_v34 = vmul.f32 0.0, %v3982_v23  ;;  %v4041_v46 = vrot.slane %v4040_v61, 2  ;;  %v3459_v10 = vmax.f32 %v3399_v15, 0.0 }
 0x33d   : > { %v4015_v22 = vmul.f32 %v9258_v7, %v3988_v30  ;;  %v4020_v33 = vmul.f32 0.0, %v3988_v30  ;;  %v4047_v58 = vrot.slane %v4046_v0, 2  ;;  %v3460_v6 = vmax.f32 %v3400_v62, 0.0  ;;  %v9555_v63 = vpop.f32.mrb[28].mxu0 }
 0x33e   : > { %v4024_v39 = vadd.f32 %v4014_v17, %v3962_v35  ;;  %v4029_v21 = vadd.f32 %v4019_v34, %v3967_v19  ;;  %v4042_v38 = vmax.f32 %v4040_v61, %v4041_v46  ;;  %v4101_v18 = vrot.slane %v3459_v10, 4  ;;  %4976 = vmax.xlane.f32.xlu1 %v9470_v28  ;;  %v9558_v31 = vpop.f32.mrb[29].mxu0 }
 0x33f   : > { %v4025_v41 = vadd.f32 %v4015_v22, %v3963_v51  ;;  %v4030_v1 = vadd.f32 %v4020_v33, %v3968_v60  ;;  %v4048_v56 = vmax.f32 %v4046_v0, %v4047_v58  ;;  %v4107_v36 = vrot.slane %v3460_v6, 4  ;;  %4999 = vmax.xlane.f32.xlu0 %v9420_v43  ;;  %v10488_v0 = vld [vmem:[#allocation30_spill] sm:$0xff] }
 0x340   : > { %v4043_v12 = vrot.slane %v4042_v38, 1  ;;  %v4102_v32 = vmax.f32 %v3459_v10, %v4101_v18  ;;  %v3464_v14 = vmax.f32 %v3404_v55, 0.0  ;;  %v3465_v40 = vmax.f32 %v3405_v4, 0.0  ;;  %v10489_v18 = vld [vmem:[#allocation29_spill] sm:$0xff] }
 0x341   : > { %v4049_v11 = vrot.slane %v4048_v56, 1  ;;  %v4108_v9 = vmax.f32 %v3460_v6, %v4107_v36  ;;  %v3409_v50 = vadd.f32 %v9354_v24, %v9523_v26  ;;  %v3410_v28 = vadd.f32 %v9357_v20, %v9527_v25  ;;  %v9565_v42 = vpop.f32.mrb[30].mxu0 }
 0x342   : > { %v4044_v48 = vmax.f32 %v4042_v38, %v4043_v12  ;;  %v4103_v52 = vrot.slane %v4102_v32, 2  ;;  %v4163_v13 = vrot.slane %v3464_v14, 4  ;;  %v4169_v35 = vrot.slane %v3465_v40, 4  ;;  %4989 = vmax.xlane.f32.xlu1 %v9473_v16  ;;  %v9568_v43 = vpop.f32.mrb[31].mxu0  ;;  %v10490_v12 = vld [vmem:[#allocation26_spill] sm:$0xff] }
 0x343   : > { %v4050_v19 = vmax.f32 %v4048_v56, %v4049_v11  ;;  %v4109_v27 = vrot.slane %v4108_v9, 2  ;;  %v3469_v49 = vmax.f32 %v3409_v50, 0.0  ;;  %v3470_v51 = vmax.f32 %v3410_v28, 0.0 }
 0x344   : > { %v4076_v60 = vmul.f32 0.0, %v4044_v48  ;;  %v4081_v24 = vmul.f32 %v9261_v2, %v4044_v48  ;;  %v4104_v26 = vmax.f32 %v4102_v32, %v4103_v52  ;;  %v4164_v29 = vmax.f32 %v3464_v14, %v4163_v13 }
 0x345   : > { %v4077_v20 = vmul.f32 0.0, %v4050_v19  ;;  %v4082_v25 = vmul.f32 %v9261_v2, %v4050_v19  ;;  %v4110_v8 = vmax.f32 %v4108_v9, %v4109_v27  ;;  %v4170_v23 = vmax.f32 %v3465_v40, %v4169_v35  ;;  %v9572_v61 = vpop.f32.mrb[32].mxu0 }
 0x346   : > { %v4086_v16 = vadd.f32 %v4076_v60, %v4024_v39  ;;  %v4091_v15 = vadd.f32 %v4081_v24, %v4029_v21  ;;  %v4105_v62 = vrot.slane %v4104_v26, 1  ;;  %v4165_v30 = vrot.slane %v4164_v29, 2  ;;  %5002 = vmax.xlane.f32.xlu1 %v10488_v0  ;;  %v9575_v55 = vpop.f32.mrb[33].mxu0  ;;  %v10491_v60 = vld [vmem:[#allocation27_spill] sm:$0xff] }
 0x347   : > { %v4087_v4 = vadd.f32 %v4077_v20, %v4025_v41  ;;  %v4092_v17 = vadd.f32 %v4082_v25, %v4030_v1  ;;  %v4111_v34 = vrot.slane %v4110_v8, 1  ;;  %v4171_v46 = vrot.slane %v4170_v23, 2 }
 0x348   : > { %v4106_v10 = vmax.f32 %v4104_v26, %v4105_v62  ;;  %v4166_v22 = vmax.f32 %v4164_v29, %v4165_v30  ;;  %v4225_v33 = vrot.slane %v3469_v49, 4  ;;  %v4231_v58 = vrot.slane %v3470_v51, 4 }
 0x349   : > { %v4112_v6 = vmax.f32 %v4110_v8, %v4111_v34  ;;  %v4172_v38 = vmax.f32 %v4170_v23, %v4171_v46  ;;  %v3363_v39 = vadd.f32 %v9531_v59, %v10489_v18  ;;  %v3358_v21 = vadd.f32 %v10489_v18, %v9535_v3  ;;  %v9581_v56 = vpop.f32.mrb[34].mxu0 }
 0x34a   : > { %v4138_v36 = vmul.f32 0.0, %v4106_v10  ;;  %v4143_v41 = vmul.f32 %v10490_v12, %v4106_v10  ;;  %v4167_v1 = vrot.slane %v4166_v22, 1  ;;  %v4226_v32 = vmax.f32 %v3469_v49, %v4225_v33  ;;  %v3258_v14 = vpop.f32.mrb[35].mxu0 }
 0x34b   : > { %v4139_v40 = vmul.f32 0.0, %v4112_v6  ;;  %v4144_v11 = vmul.f32 %v10490_v12, %v4112_v6  ;;  %v4173_v9 = vrot.slane %v4172_v38, 1  ;;  %v4232_v50 = vmax.f32 %v3470_v51, %v4231_v58 }
 0x34c   : > { %v4148_v28 = vadd.f32 %v4138_v36, %v4086_v16  ;;  %v4153_v48 = vadd.f32 %v4143_v41, %v4091_v15  ;;  %v4168_v52 = vmax.f32 %v4166_v22, %v4167_v1  ;;  %v4227_v59 = vrot.slane %v4226_v32, 2 }
 0x34d   : > { %v4149_v13 = vadd.f32 %v4139_v40, %v4087_v4  ;;  %v4154_v35 = vadd.f32 %v4144_v11, %v4092_v17  ;;  %v4174_v3 = vmax.f32 %v4172_v38, %v4173_v9  ;;  %v4233_v19 = vrot.slane %v4232_v50, 2  ;;  %v10492_v38 = vld [vmem:[#allocation28_spill] sm:$0xff] }
 0x34e   : > { %v4200_v27 = vmul.f32 0.0, %v4168_v52  ;;  %v4205_v24 = vmul.f32 %v10491_v60, %v4168_v52  ;;  %v4228_v26 = vmax.f32 %v4226_v32, %v4227_v59  ;;  %v3423_v29 = vmax.f32 %v3363_v39, 0.0 }
 0x34f   : > { %v4201_v49 = vmul.f32 0.0, %v4174_v3  ;;  %v4206_v20 = vmul.f32 %v10491_v60, %v4174_v3  ;;  %v4234_v25 = vmax.f32 %v4232_v50, %v4233_v19  ;;  %v3418_v8 = vmax.f32 %v3358_v21, 0.0 }
 0x350   : > { %v4210_v23 = vadd.f32 %v4200_v27, %v4148_v28  ;;  %v4215_v51 = vadd.f32 %v4205_v24, %v4153_v48  ;;  %v4229_v16 = vrot.slane %v4228_v26, 1  ;;  %3484 = vst.msk [vmem:[#allocation2 + $0x48] sm:$0xff] %vm3478_vm6, %v3423_v29  ;;  %v3373_v15 = vadd.f32 %v9539_v44, %v10489_v18 }
 0x351   : > { %v4211_v62 = vadd.f32 %v4201_v49, %v4149_v13  ;;  %v4216_v30 = vadd.f32 %v4206_v20, %v4154_v35  ;;  %v4235_v0 = vrot.slane %v4234_v25, 1  ;;  %3479 = vst.msk [vmem:[#allocation2 + $0x20] sm:$0xff] %vm3478_vm6, %v3418_v8  ;;  %v3368_v4 = vadd.f32 %v10489_v18, %v9546_v53 }
 0x352   : > { %v4230_v17 = vmax.f32 %v4228_v26, %v4229_v16  ;;  %v3433_v34 = vmax.f32 %v3373_v15, 0.0  ;;  %v3383_v46 = vadd.f32 %v9555_v63, %v10489_v18  ;;  %v3378_v10 = vadd.f32 %v10489_v18, %v9558_v31 }
 0x353   : > { %v4236_v22 = vmax.f32 %v4234_v25, %v4235_v0  ;;  %v3428_v33 = vmax.f32 %v3368_v4, 0.0  ;;  %v3393_v44 = vadd.f32 %v9565_v42, %v10489_v18  ;;  %v3388_v58 = vadd.f32 %v10489_v18, %v9568_v43 }
 0x354   : > { %v4262_v6 = vmul.f32 0.0, %v4230_v17  ;;  %v4267_v39 = vmul.f32 %v10492_v38, %v4230_v17  ;;  %3494 = vst.msk [vmem:[#allocation2 + $0x98] sm:$0xff] %vm3478_vm6, %v3433_v34  ;;  %v3443_v53 = vmax.f32 %v3383_v46, 0.0  ;;  %v3438_v21 = vmax.f32 %v3378_v10, 0.0 }
 0x355   : > { %v4263_v36 = vmul.f32 0.0, %v4236_v22  ;;  %v4268_v63 = vmul.f32 %v10492_v38, %v4236_v22  ;;  %3489 = vst.msk [vmem:[#allocation2 + $0x70] sm:$0xff] %vm3478_vm6, %v3428_v33  ;;  %v3453_v31 = vmax.f32 %v3393_v44, 0.0  ;;  %v3448_v41 = vmax.f32 %v3388_v58, 0.0 }
 0x356   : > { %v9605_v1 = vadd.f32 %v4262_v6, %v4210_v23  ;;  %v4277_v42 = vadd.f32 %v4267_v39, %v4215_v51  ;;  %3504 = vst.msk [vmem:[#allocation2 + $0xe8] sm:$0xff] %vm3478_vm6, %v3443_v53  ;;  %3499 = vst.msk [vmem:[#allocation2 + $0xc0] sm:$0xff] %vm3478_vm6, %v3438_v21  ;;  %v3403_v43 = vadd.f32 %v9572_v61, %v10489_v18 }
 0x357   : > { %v3398_v32 = vadd.f32 %v10489_v18, %v9575_v55  ;;  %v9613_v40 = vadd.f32 %v4263_v36, %v4211_v62  ;;  %v4278_v11 = vadd.f32 %v4268_v63, %v4216_v30  ;;  %v3604_v9 = vld [vmem:[#allocation2 + $0x48] sm:$0xff]  ;;  %3514 = vst.msk [vmem:[#allocation2 + $0x138] sm:$0xff] %vm3478_vm6, %v3453_v31  ;;  %3509 = vst.msk [vmem:[#allocation2 + $0x110] sm:$0xff] %vm3478_vm6, %v3448_v41 }
 0x358   : > { %v3413_v50 = vadd.f32 %v9581_v56, %v10489_v18  ;;  %v3408_v28 = vadd.f32 %v10489_v18, %v3258_v14  ;;  %4287 = vst [vmem:[#allocation3 + $0x28] sm:$0xf] %v4277_v42  ;;  %v3629_v48 = vsel %vm3478_vm6, %v3604_v9, -inf  ;;  %v3542_v61 = vld [vmem:[#allocation2 + $0x20] sm:$0xff]  ;;  %v3463_v52 = vmax.f32 %v3403_v43, 0.0 }
 0x359   : > { %v3458_v59 = vmax.f32 %v3398_v32, 0.0  ;;  %v4313_v55 = vsel %vm10493_vm1, %v9605_v1, -inf  ;;  %4288 = vst [vmem:[#allocation3 + $0x30] sm:$0xf] %v4278_v11  ;;  %v3630_v13 = vrot.slane %v3629_v48, 4  ;;  %v3567_v35 = vsel %vm3478_vm6, %v3542_v61, -inf }
 0x35a   : > { %v3473_v3 = vmax.f32 %v3413_v50, 0.0  ;;  %v3468_v19 = vmax.f32 %v3408_v28, 0.0  ;;  %4314 = vmax.xlane.f32.xlu1 %v4313_v55  ;;  %v3568_v27 = vrot.slane %v3567_v35, 4  ;;  %3524 = vst.msk [vmem:[#allocation2 + $0x188] sm:$0xff] %vm3478_vm6, %v3463_v52  ;;  %v4298_v18 = vsel %vm10494_vm9, %v9605_v1, -inf }
 0x35b   : > { %3519 = vst.msk [vmem:[#allocation2 + $0x160] sm:$0xff] %vm3478_vm6, %v3458_v59  ;;  %v3631_v56 = vmax.f32 %v3629_v48, %v3630_v13  ;;  %v3728_v14 = vld [vmem:[#allocation2 + $0x98] sm:$0xff]  ;;  %4299 = vmax.xlane.f32.xlu0 %v4298_v18  ;;  %v10495_v59 = vld [vmem:[#allocation25_spill] sm:$0xff]  ;;  %vm10499_vm1 = vcmask 191616   ;;  %vm10500_vm9 = vcmask 261312  }
 0x35c   : > { %3534 = vst.msk [vmem:[#allocation2 + $0x1d8] sm:$0xff] %vm3478_vm6, %v3473_v3  ;;  %3529 = vst.msk [vmem:[#allocation2 + $0x1b0] sm:$0xff] %vm3478_vm6, %v3468_v19  ;;  %v3569_v24 = vmax.f32 %v3567_v35, %v3568_v27  ;;  %v3753_v26 = vsel %vm3478_vm6, %v3728_v14, -inf  ;;  %v3666_v29 = vld [vmem:[#allocation2 + $0x70] sm:$0xff] }
 0x35d   : > { %v3632_v49 = vrot.slane %v3631_v56, 2  ;;  %v3754_v20 = vrot.slane %v3753_v26, 4  ;;  %v3691_v25 = vsel %vm3478_vm6, %v3666_v29, -inf  ;;  %v3852_v8 = vld [vmem:[#allocation2 + $0xe8] sm:$0xff]  ;;  %v3790_v23 = vld [vmem:[#allocation2 + $0xc0] sm:$0xff] }
 0x35e   : > { %v3570_v51 = vrot.slane %v3569_v24, 2  ;;  %v3692_v16 = vrot.slane %v3691_v25, 4  ;;  %v3877_v15 = vsel %vm3478_vm6, %v3852_v8, -inf  ;;  %v3815_v62 = vsel %vm3478_vm6, %v3790_v23, -inf  ;;  %v3976_v30 = vld [vmem:[#allocation2 + $0x138] sm:$0xff]  ;;  %v3914_v0 = vld [vmem:[#allocation2 + $0x110] sm:$0xff] }
 0x35f   : > { %v3633_v4 = vmax.f32 %v3631_v56, %v3632_v49  ;;  %v3755_v17 = vmax.f32 %v3753_v26, %v3754_v20  ;;  %v3878_v34 = vrot.slane %v3877_v15, 4  ;;  %v3816_v46 = vrot.slane %v3815_v62, 4 }
 0x360   : > { %v3571_v10 = vmax.f32 %v3569_v24, %v3570_v51  ;;  %v3693_v22 = vmax.f32 %v3691_v25, %v3692_v16  ;;  %v4001_v33 = vsel %vm3478_vm6, %v3976_v30, -inf  ;;  %v3939_v44 = vsel %vm3478_vm6, %v3914_v0, -inf }
 0x361   : > { %v3634_v58 = vrot.slane %v3633_v4, 1  ;;  %v3756_v6 = vrot.slane %v3755_v17, 2  ;;  %v3879_v39 = vmax.f32 %v3877_v15, %v3878_v34  ;;  %v3817_v53 = vmax.f32 %v3815_v62, %v3816_v46  ;;  %v4100_v24 = vld [vmem:[#allocation2 + $0x188] sm:$0xff] }
 0x362   : > { %v3572_v21 = vrot.slane %v3571_v10, 1  ;;  %v3694_v36 = vrot.slane %v3693_v22, 2  ;;  %v4002_v63 = vrot.slane %v4001_v33, 4  ;;  %v3940_v31 = vrot.slane %v3939_v44, 4 }
 0x363   : > { %v3635_v41 = vmax.f32 %v3633_v4, %v3634_v58  ;;  %v3757_v42 = vmax.f32 %v3755_v17, %v3756_v6  ;;  %v3880_v43 = vrot.slane %v3879_v39, 2  ;;  %v3818_v32 = vrot.slane %v3817_v53, 2  ;;  %v4224_v16 = vld [vmem:[#allocation2 + $0x1d8] sm:$0xff] }
 0x364   : > { %v3573_v11 = vmax.f32 %v3571_v10, %v3572_v21  ;;  %v3695_v9 = vmax.f32 %v3693_v22, %v3694_v36  ;;  %v4003_v50 = vmax.f32 %v4001_v33, %v4002_v63  ;;  %v3941_v28 = vmax.f32 %v3939_v44, %v3940_v31  ;;  %v4162_v44 = vld [vmem:[#allocation2 + $0x1b0] sm:$0xff] }
 0x365   : > { %v3646_v48 = vmul.f32 %v9228_v45, %v3635_v41  ;;  %v3758_v61 = vrot.slane %v3757_v42, 1  ;;  %v3881_v52 = vmax.f32 %v3879_v39, %v3880_v43  ;;  %v3819_v35 = vmax.f32 %v3817_v53, %v3818_v32  ;;  %v4038_v45 = vld [vmem:[#allocation2 + $0x160] sm:$0xff] }
 0x366   : > { %v3584_v55 = vmul.f32 %v10495_v59, %v3573_v11  ;;  %v3696_v13 = vrot.slane %v3695_v9, 1  ;;  %v4004_v3 = vrot.slane %v4003_v50, 2  ;;  %v3942_v19 = vrot.slane %v3941_v28, 2 }
 0x367   : > { %v3759_v27 = vmax.f32 %v3757_v42, %v3758_v61  ;;  %v3882_v56 = vrot.slane %v3881_v52, 1  ;;  %v3820_v14 = vrot.slane %v3819_v35, 1  ;;  %v3651_v8 = vmul.f32 0.0, %v3635_v41 }
 0x368   : > { %v3697_v18 = vmax.f32 %v3695_v9, %v3696_v13  ;;  %v3656_v26 = vadd.f32 %v3646_v48, %v3584_v55  ;;  %v4005_v20 = vmax.f32 %v4003_v50, %v4004_v3  ;;  %v3943_v25 = vmax.f32 %v3941_v28, %v3942_v19 }
 0x369   : > { %v3821_v49 = vmax.f32 %v3819_v35, %v3820_v14  ;;  %v3589_v23 = vmul.f32 0.0, %v3573_v11  ;;  %v4125_v51 = vsel %vm3478_vm6, %v4100_v24, -inf  ;;  %v3770_v15 = vmul.f32 %v9241_v37, %v3759_v27 }
 0x36a   : > { %v3708_v29 = vmul.f32 %v9236_v47, %v3697_v18  ;;  %v3883_v30 = vmax.f32 %v3881_v52, %v3882_v56  ;;  %v3713_v4 = vmul.f32 0.0, %v3697_v18  ;;  %v3944_v17 = vrot.slane %v3943_v25, 1 }
 0x36b   : > { %v3832_v0 = vmul.f32 %v9244_v54, %v3821_v49  ;;  %v4126_v34 = vrot.slane %v4125_v51, 4  ;;  %v4063_v47 = vsel %vm3478_vm6, %v4038_v45, -inf  ;;  %v4006_v10 = vrot.slane %v4005_v20, 1  ;;  %v9645_v54 = vld [vmem:[#allocation3 + $0x28] sm:$0xf] }
 0x36c   : > { %v3718_v62 = vadd.f32 %v3708_v29, %v3656_v26  ;;  %v4064_v22 = vrot.slane %v4063_v47, 4  ;;  %v4249_v33 = vsel %vm3478_vm6, %v4224_v16, -inf  ;;  %v3661_v58 = vadd.f32 %v3651_v8, %v3589_v23 }
 0x36d   : > { %v3945_v6 = vmax.f32 %v3943_v25, %v3944_v17  ;;  %v4127_v39 = vmax.f32 %v4125_v51, %v4126_v34  ;;  %v3894_v37 = vmul.f32 %v9247_v5, %v3883_v30  ;;  %v4250_v36 = vrot.slane %v4249_v33, 4 }
 0x36e   : > { %v3780_v46 = vadd.f32 %v3770_v15, %v3718_v62  ;;  %v4065_v21 = vmax.f32 %v4063_v47, %v4064_v22  ;;  %v3723_v63 = vadd.f32 %v3713_v4, %v3661_v58  ;;  %v4187_v42 = vsel %vm3478_vm6, %v4162_v44, -inf }
 0x36f   : > { %v3956_v31 = vmul.f32 %v9251_v57, %v3945_v6  ;;  %v4128_v41 = vrot.slane %v4127_v39, 2  ;;  %v4007_v43 = vmax.f32 %v4005_v20, %v4006_v10  ;;  %v4251_v9 = vmax.f32 %v4249_v33, %v4250_v36 }
 0x370   : > { %v3842_v53 = vadd.f32 %v3832_v0, %v3780_v46  ;;  %v4066_v11 = vrot.slane %v4065_v21, 2  ;;  %v4188_v28 = vrot.slane %v4187_v42, 4  ;;  %v4317_v5 = vsel %vm10496_vm7, %v9645_v54, -inf }
 0x371   : > { %v4129_v50 = vmax.f32 %v4127_v39, %v4128_v41  ;;  %v4302_v48 = vsel %vm10497_vm8, %v9645_v54, -inf  ;;  %v4252_v59 = vrot.slane %v4251_v9, 2  ;;  %4318 = vmax.xlane.f32.xlu1 %v4317_v5  ;;  %v3775_v57 = vmul.f32 0.0, %v3759_v27 }
 0x372   : > { %v3904_v32 = vadd.f32 %v3894_v37, %v3842_v53  ;;  %v4067_v52 = vmax.f32 %v4065_v21, %v4066_v11  ;;  %4303 = vmax.xlane.f32.xlu0 %v4302_v48  ;;  %v4189_v13 = vmax.f32 %v4187_v42, %v4188_v28  ;;  %v4018_v35 = vmul.f32 %v9258_v7, %v4007_v43 }
 0x373   : > { %v4130_v55 = vrot.slane %v4129_v50, 1  ;;  %v4253_v19 = vmax.f32 %v4251_v9, %v4252_v59  ;;  %v4328_v18 = vsel %vm10498_vm2, %v9605_v1, -inf  ;;  %v3785_v56 = vadd.f32 %v3775_v57, %v3723_v63 }
 0x374   : > { %v3966_v61 = vadd.f32 %v3956_v31, %v3904_v32  ;;  %v4068_v3 = vrot.slane %v4067_v52, 1  ;;  %v3837_v14 = vmul.f32 0.0, %v3821_v49  ;;  %v4190_v24 = vrot.slane %v4189_v13, 2 }
 0x375   : > { %v4332_v26 = vsel %vm10499_vm1, %v9645_v54, -inf  ;;  %v4131_v29 = vmax.f32 %v4129_v50, %v4130_v55  ;;  %v4254_v27 = vrot.slane %v4253_v19, 1  ;;  %v4347_v51 = vsel %vm4346_vm14, %v9645_v54, -inf }
 0x376   : > { %v4028_v20 = vadd.f32 %v4018_v35, %v3966_v61  ;;  %v4069_v25 = vmax.f32 %v4067_v52, %v4068_v3  ;;  %4333 = vmax.xlane.f32.xlu1 %v4332_v26  ;;  %4329 = vmax.xlane.f32.xlu0 %v4328_v18  ;;  %v4191_v45 = vmax.f32 %v4189_v13, %v4190_v24  ;;  %v4343_v49 = vsel %vm10500_vm9, %v9605_v1, -inf }
 0x377   : > { %v3847_v7 = vadd.f32 %v3837_v14, %v3785_v56  ;;  %v4142_v16 = vmul.f32 0.0, %v4131_v29  ;;  %v3899_v62 = vmul.f32 0.0, %v3883_v30  ;;  %v4255_v0 = vmax.f32 %v4253_v19, %v4254_v27 }
 0x378   : > { %v4080_v8 = vmul.f32 0.0, %v4069_v25  ;;  %v4192_v23 = vrot.slane %v4191_v45, 1  ;;  %vm10501_vm7 = vcmask 326912   ;;  %v3961_v46 = vmul.f32 0.0, %v3945_v6 }
 0x379   : > { %v4358_v34 = vsel %vm10501_vm7, %v9605_v1, -inf  ;;  %v3909_v47 = vadd.f32 %v3899_v62, %v3847_v7  ;;  %vm10502_vm8 = vcmask 322816   ;;  %v4266_v44 = vmul.f32 0.0, %v4255_v0 }
 0x37a   : > { %v4090_v15 = vadd.f32 %v4080_v8, %v4028_v20  ;;  %4348 = vmax.xlane.f32.xlu1 %v4347_v51  ;;  %4344 = vmax.xlane.f32.xlu0 %v4343_v49  ;;  %v4193_v4 = vmax.f32 %v4191_v45, %v4192_v23  ;;  %v4362_v22 = vsel %vm10502_vm8, %v9645_v54, -inf  ;;  %v4377_v37 = vsel %vm4376_vm13, %v9645_v54, -inf }
 0x37b   : > { %v3971_v39 = vadd.f32 %v3961_v46, %v3909_v47  ;;  %vm10503_vm2 = vcmask 392512   ;;  %v4023_v6 = vmul.f32 0.0, %v4007_v43  ;;  %v4085_v63 = vmul.f32 %v9261_v2, %v4069_v25 }
 0x37c   : > { %v4152_v17 = vadd.f32 %v4142_v16, %v4090_v15  ;;  %v4204_v10 = vmul.f32 0.0, %v4193_v4  ;;  %v4373_v53 = vsel %vm10503_vm2, %v9605_v1, -inf  ;;  %v4392_v31 = vsel %vm4391_vm4, %v9645_v54, -inf }
 0x37d   : > { %v4033_v36 = vadd.f32 %v4023_v6, %v3971_v39  ;;  %vm10504_vm1 = vcmask 458112   ;;  %vm10505_vm9 = vcmask 519616   ;;  %v4147_v28 = vmul.f32 %v10490_v12, %v4131_v29 }
 0x37e   : > { %4363 = vmax.xlane.f32.xlu1 %v4362_v22  ;;  %4359 = vmax.xlane.f32.xlu0 %v4358_v34  ;;  %v4214_v58 = vadd.f32 %v4204_v10, %v4152_v17  ;;  %v4388_v41 = vsel %vm10504_vm1, %v9605_v1, -inf  ;;  %v4407_v43 = vsel %vm10505_vm9, %v9645_v54, -inf  ;;  %v4209_v48 = vmul.f32 %v10491_v60, %v4193_v4  ;;  %v9755_v34 = vld [vmem:[#allocation3 + $0x30] sm:$0xf] }
 0x37f   : > { %v9666_v33 = vpop.xlane.xlu0 %4750  ;;  %v4095_v11 = vadd.f32 %v4085_v63, %v4033_v36  ;;  %vm10507_vm7 = vcmask 585216   ;;  %vm10508_vm8 = vcmask 589312   ;;  %v4437_v13 = vsel %vm4436_vm5, %v9645_v54, -inf }
 0x380   : > { %v4276_v30 = vadd.f32 %v4266_v44, %v4214_v58  ;;  %v4422_v61 = vsel %vm10507_vm7, %v9645_v54, -inf  ;;  %v4418_v52 = vsel %vm10508_vm8, %v9605_v1, -inf  ;;  %vm10509_vm2 = vcmask 654912  }
 0x381   : > { %v4157_v5 = vadd.f32 %v4147_v28, %v4095_v11  ;;  %v4433_v12 = vsel %vm10509_vm2, %v9605_v1, -inf  ;;  %v4271_v3 = vmul.f32 %v10492_v38, %v4255_v0  ;;  %v4452_v18 = vsel %vm4451_vm0, %v9645_v54, -inf }
 0x382   : > { %4378 = vmax.xlane.f32.xlu1 %v4377_v37  ;;  %4374 = vmax.xlane.f32.xlu0 %v4373_v53  ;;  %4286 = vst.msk [vmem:[#allocation3 + $0x20] sm:$0xff] %vm3478_vm6, %v4276_v30  ;;  %vm10506_vm6 = vcmask 523712   ;;  %vm10510_vm1 = vcmask 720512   ;;  %vm4291_vm9 = vcmask 519168   ;;  %v4467_v26 = vsel %vm4466_vm10, %v9645_v54, -inf }
 0x383   : > { %v9672_v21 = vpop.xlane.xlu0 %4763  ;;  %v4403_v9 = vsel %vm10506_vm6, %v9605_v1, -inf  ;;  %v4219_v55 = vadd.f32 %v4209_v48, %v4157_v5  ;;  %v4448_v56 = vsel %vm10510_vm1, %v9605_v1, -inf  ;;  %vm10511_vm6 = vcmask 786112  }
 0x384   : > { %v4463_v38 = vsel %vm10511_vm6, %v9605_v1, -inf  ;;  %v4482_v25 = vsel %vm4481_vm15, %v9645_v54, -inf  ;;  %vm10513_vm7 = vcmask 851712   ;;  %v4497_v7 = vsel %vm4496_vm3, %v9645_v54, -inf }
 0x385   : > { %v4281_v19 = vadd.f32 %v4271_v3, %v4219_v55  ;;  %v4478_v27 = vsel %vm10513_vm7, %v9605_v1, -inf  ;;  %vm10515_vm8 = vcmask 917312   ;;  %v4512_v49 = vsel %vm4511_vm11, %v9645_v54, -inf }
 0x386   : > { %4393 = vmax.xlane.f32.xlu1 %v4392_v31  ;;  %4389 = vmax.xlane.f32.xlu0 %v4388_v41  ;;  %v4493_v23 = vsel %vm10515_vm8, %v9605_v1, -inf  ;;  %vm10516_vm2 = vcmask 982912   ;;  %v4527_v0 = vsel %vm4526_vm12, %v9645_v54, -inf  ;;  %vm10519_vm1 = vcmask 1048512  }
 0x387   : > { %v9680_v42 = vpop.xlane.xlu1 %4753  ;;  %v9682_v32 = vpop.xlane.xlu0 %4776  ;;  %4292 = vst.msk [vmem:[#allocation3 + $0x48] sm:$0xf] %vm4291_vm9, %v4281_v19  ;;  %v4508_v16 = vsel %vm10516_vm2, %v9605_v1, -inf  ;;  %v4523_v4 = vsel %vm10519_vm1, %v9605_v1, -inf  ;;  %vm10522_vm9 = vcmask 60416   ;;  %vm10523_vm6 = vcmask 64512  }
 0x388   : > { %v4542_v46 = vsel %vm10522_vm9, %v9755_v34, -inf  ;;  %v4539_v10 = vsel %vm10523_vm6, %v9613_v40, -inf  ;;  %vm10525_vm7 = vcmask 126016   ;;  %vm10526_vm8 = vcmask 130112  }
 0x389   : > { %v4555_v1 = vsel %vm10525_vm7, %v9755_v34, -inf  ;;  %v4552_v54 = vsel %vm10526_vm8, %v9613_v40, -inf  ;;  %vm10529_vm2 = vcmask 191616   ;;  %vm10530_vm1 = vcmask 195712  }
 0x38a   : > { %4408 = vmax.xlane.f32.xlu1 %v4407_v43  ;;  %4404 = vmax.xlane.f32.xlu0 %v4403_v9  ;;  %v4568_v39 = vsel %vm10529_vm2, %v9755_v34, -inf  ;;  %v4565_v30 = vsel %vm10530_vm1, %v9613_v40, -inf  ;;  %v4581_v6 = vsel %vm4346_vm14, %v9755_v34, -inf  ;;  %vm10533_vm9 = vcmask 261312  }
 0x38b   : > { %v9688_v2 = vpop.xlane.xlu1 %4766  ;;  %v9690_v50 = vpop.xlane.xlu0 %4789  ;;  %v4578_v36 = vsel %vm10533_vm9, %v9613_v40, -inf  ;;  %vm10535_vm6 = vcmask 322816   ;;  %vm10536_vm7 = vcmask 326912   ;;  %v4607_v43 = vsel %vm4376_vm13, %v9755_v34, -inf }
 0x38c   : > { %v4594_v31 = vsel %vm10535_vm6, %v9755_v34, -inf  ;;  %v4591_v41 = vsel %vm10536_vm7, %v9613_v40, -inf  ;;  %vm10538_vm8 = vcmask 392512   ;;  %v4620_v48 = vsel %vm4391_vm4, %v9755_v34, -inf }
 0x38d   : > { %v4604_v9 = vsel %vm10538_vm8, %v9613_v40, -inf  ;;  %vm10541_vm2 = vcmask 458112   ;;  %vm10543_vm1 = vcmask 519616   ;;  %vm10544_vm9 = vcmask 523712  }
 0x38e   : > { %4423 = vmax.xlane.f32.xlu1 %v4422_v61  ;;  %4419 = vmax.xlane.f32.xlu0 %v4418_v52  ;;  %v4617_v61 = vsel %vm10541_vm2, %v9613_v40, -inf  ;;  %v4633_v55 = vsel %vm10543_vm1, %v9755_v34, -inf  ;;  %vm10546_vm6 = vcmask 585216   ;;  %vm10547_vm7 = vcmask 589312  }
 0x38f   : > { %v9698_v59 = vpop.xlane.xlu1 %4779  ;;  %v9700_v57 = vpop.xlane.xlu0 %4802  ;;  %v4646_v3 = vsel %vm10546_vm6, %v9755_v34, -inf  ;;  %v4643_v19 = vsel %vm10547_vm7, %v9613_v40, -inf  ;;  %vm10550_vm8 = vcmask 654912   ;;  %vm10552_vm2 = vcmask 720512  }
 0x390   : > { %vm10554_vm1 = vcmask 786112   ;;  %vm10560_vm7 = vcmask 917312  }
 0x392   : > { %4438 = vmax.xlane.f32.xlu1 %v4437_v13  ;;  %4434 = vmax.xlane.f32.xlu0 %v4433_v12  ;;  %v4630_v13 = vsel %vm10544_vm9, %v9613_v40, -inf  ;;  %vm10558_vm9 = vcmask 851712  }
 0x393   : > { %v9706_v60 = vpop.xlane.xlu1 %4792  ;;  %v9708_v35 = vpop.xlane.xlu0 %4815 }
 0x396   : > { %4453 = vmax.xlane.f32.xlu1 %v4452_v18  ;;  %4449 = vmax.xlane.f32.xlu0 %v4448_v56 }
 0x397   : > { %v9715_v14 = vpop.xlane.xlu1 %4805  ;;  %v9717_v24 = vpop.xlane.xlu0 %4828 }
 0x39a   : > { %4468 = vmax.xlane.f32.xlu1 %v4467_v26  ;;  %4464 = vmax.xlane.f32.xlu0 %v4463_v38  ;;  %v4659_v26 = vsel %vm4436_vm5, %v9755_v34, -inf  ;;  %v4656_v38 = vsel %vm10550_vm8, %v9613_v40, -inf }
 0x39b   : > { %v9723_v29 = vpop.xlane.xlu1 %4818  ;;  %v9725_v20 = vpop.xlane.xlu0 %4841 }
 0x39c   : > { %10512 = vst [vmem:[#allocation30_spill] sm:$0xff] %v9725_v20  ;;  %v10593_v20 = vmov 0.0|0.0  }
 0x39e   : > { %4483 = vmax.xlane.f32.xlu1 %v4482_v25  ;;  %4479 = vmax.xlane.f32.xlu0 %v4478_v27  ;;  %v4672_v27 = vsel %vm4451_vm0, %v9755_v34, -inf }
 0x39f   : > { %v9731_v45 = vpop.xlane.xlu1 %4831  ;;  %v9733_v8 = vpop.xlane.xlu0 %4854 }
 0x3a0   : > { %10514 = vst [vmem:[#allocation29_spill] sm:$0xff] %v9733_v8 }
 0x3a2   : > { %4498 = vmax.xlane.f32.xlu1 %v4497_v7  ;;  %4494 = vmax.xlane.f32.xlu0 %v4493_v23  ;;  %v4669_v7 = vsel %vm10552_vm2, %v9613_v40, -inf  ;;  %vm10563_vm2 = vcmask 982912  }
 0x3a3   : > { %v9739_v51 = vpop.xlane.xlu1 %4844  ;;  %v9747_v62 = vpop.xlane.xlu0 %4867 }
 0x3a4   : > { %10518 = vst [vmem:[#allocation27_spill] sm:$0xff] %v9747_v62  ;;  %v10447_v62 = vmov 0.0|0.0  }
 0x3a5   : > { %7429 = vmatprep.subr.bf16.mxu1 %v10447_v62 }
 0x3a6   : > { %4513 = vmax.xlane.f32.xlu1 %v4512_v49  ;;  %4509 = vmax.xlane.f32.xlu0 %v4508_v16  ;;  %v4685_v49 = vsel %vm4466_vm10, %v9755_v34, -inf  ;;  %v4682_v16 = vsel %vm10554_vm1, %v9613_v40, -inf  ;;  %vm10564_vm1 = vcmask 1048512  }
 0x3a7   : > { %v9745_v15 = vpop.xlane.xlu1 %4857  ;;  %v9757_v47 = vpop.xlane.xlu0 %4880 }
 0x3a8   : > { %10517 = vst [vmem:[#allocation26_spill] sm:$0xff] %v9745_v15  ;;  %10521 = vst [vmem:[#allocation25_spill] sm:$0xff] %v9757_v47  ;;  %v5290_v47 = vld [vmem:[#allocation10 + $0x50] sm:$0xff] }
 0x3aa   : > { %4528 = vmax.xlane.f32.xlu1 %v4527_v0  ;;  %4524 = vmax.xlane.f32.xlu0 %v4523_v4 }
 0x3ab   : > { %v9753_v17 = vpop.xlane.xlu1 %4870  ;;  %v9771_v58 = vpop.xlane.xlu0 %4893 }
 0x3ac   : > { %10520 = vst [vmem:[#allocation28_spill] sm:$0xff] %v9753_v17  ;;  %10528 = vst [vmem:[#allocation33_spill] sm:$0xff] %v9771_v58 }
 0x3ae   : > { %4543 = vmax.xlane.f32.xlu1 %v4542_v46  ;;  %4540 = vmax.xlane.f32.xlu0 %v4539_v10  ;;  %v10557_v46 = vlaneseq }
 0x3af   : > { %v9763_v22 = vpop.xlane.xlu1 %4883 }
 0x3b0   : > { %10524 = vst [vmem:[#allocation31_spill] sm:$0xff] %v9763_v22  ;;  %v9779_v53 = vpop.xlane.xlu0 %4906  ;;  %v9842_v10 = vand.u32 127, %v10557_v46 }
 0x3b1   : > { %10532 = vst [vmem:[#allocation35_spill] sm:$0xff] %v9779_v53 }
 0x3b2   : > { %4556 = vmax.xlane.f32.xlu1 %v4555_v1  ;;  %4553 = vmax.xlane.f32.xlu0 %v4552_v54  ;;  %v4698_v1 = vsel %vm4481_vm15, %v9755_v34, -inf  ;;  %v4695_v54 = vsel %vm10558_vm9, %v9613_v40, -inf  ;;  %vm4320_vm6 = vcmp.eq.s32.totalorder %v9842_v10, 1  ;;  %vm4305_vm8 = vcmp.eq.s32.totalorder %v9842_v10, 0 }
 0x3b3   : > { %v9769_v44 = vpop.xlane.xlu1 %4896  ;;  %vm10565_vm9 = vcmask 322816  }
 0x3b4   : > { %10527 = vst [vmem:[#allocation32_spill] sm:$0xff] %v9769_v44  ;;  %v9791_v11 = vpop.xlane.xlu0 %4919  ;;  %v5289_v44 = vld [vmem:[#allocation10 + $0x48] sm:$0xff] }
 0x3b5   : > { %10537 = vst [vmem:[#allocation37_spill] sm:$0xff] %v9791_v11  ;;  %v7430_v17 = vpack.c.bf16 %v5290_v47, %v5289_v44 }
 0x3b6   : > { %4569 = vmax.xlane.f32.xlu1 %v4568_v39  ;;  %4566 = vmax.xlane.f32.xlu0 %v4565_v30  ;;  %v4711_v30 = vsel %vm4496_vm3, %v9755_v34, -inf }
 0x3b7   : > { %v9777_v37 = vpop.xlane.xlu1 %4909  ;;  %7431 = vmatpush3.bf16.msra.mxu1 %v7430_v17 }
 0x3b8   : > { %10531 = vst [vmem:[#allocation34_spill] sm:$0xff] %v9777_v37  ;;  %v9799_v5 = vpop.xlane.xlu0 %4932  ;;  %7432 = vmatprep.subr.bf16.mxu1 %v10447_v62 }
 0x3b9   : > { %10540 = vst [vmem:[#allocation39_spill] sm:$0xff] %v9799_v5 }
 0x3ba   : > { %4582 = vmax.xlane.f32.xlu1 %v4581_v6  ;;  %4579 = vmax.xlane.f32.xlu0 %v4578_v36  ;;  %v4708_v6 = vsel %vm10560_vm7, %v9613_v40, -inf  ;;  %vm10567_vm7 = vcmask 392512  }
 0x3bb   : > { %v9785_v63 = vpop.xlane.xlu1 %4922 }
 0x3bc   : > { %10534 = vst [vmem:[#allocation36_spill] sm:$0xff] %v9785_v63  ;;  %v9811_v12 = vpop.xlane.xlu0 %4945 }
 0x3bd   : > { %10545 = vst [vmem:[#allocation41_spill] sm:$0xff] %v9811_v12 }
 0x3be   : > { %4595 = vmax.xlane.f32.xlu1 %v4594_v31  ;;  %4592 = vmax.xlane.f32.xlu0 %v4591_v41  ;;  %v10562_v31 = vmov 0.0  }
 0x3bf   : > { %v9797_v28 = vpop.xlane.xlu1 %4935  ;;  %v9859_v41 = vsel %vm4320_vm6, 1.0, %v10562_v31  ;;  %vm10566_vm6 = vcmask 326912  }
 0x3c0   : > { %10539 = vst [vmem:[#allocation38_spill] sm:$0xff] %v9797_v28  ;;  %v9819_v56 = vpop.xlane.xlu0 %4960 }
 0x3c1   : > { %10549 = vst [vmem:[#allocation43_spill] sm:$0xff] %v9819_v56 }
 0x3c2   : > { %4608 = vmax.xlane.f32.xlu1 %v4607_v43  ;;  %4605 = vmax.xlane.f32.xlu0 %v4604_v9  ;;  %v9862_v9 = vsel %vm4305_vm8, 1.0, %v10562_v31  ;;  %vm10568_vm8 = vcmask 458112  }
 0x3c3   : > { %v9805_v52 = vpop.xlane.xlu1 %4948 }
 0x3c4   : > { %10542 = vst [vmem:[#allocation40_spill] sm:$0xff] %v9805_v52  ;;  %v9831_v23 = vpop.xlane.xlu0 %4973 }
 0x3c5   : > { %10553 = vst [vmem:[#allocation45_spill] sm:$0xff] %v9831_v23 }
 0x3c6   : > { %4621 = vmax.xlane.f32.xlu1 %v4620_v48  ;;  %4618 = vmax.xlane.f32.xlu0 %v4617_v61  ;;  %v4724_v48 = vsel %vm4511_vm11, %v9755_v34, -inf  ;;  %v4721_v61 = vsel %vm10563_vm2, %v9613_v40, -inf  ;;  %vm10569_vm2 = vcmask 519616  }
 0x3c7   : > { %v9817_v18 = vpop.xlane.xlu1 %4963 }
 0x3c8   : > { %10548 = vst [vmem:[#allocation42_spill] sm:$0xff] %v9817_v18  ;;  %v9839_v4 = vpop.xlane.xlu0 %4986 }
 0x3c9   : > { %10556 = vst [vmem:[#allocation47_spill] sm:$0xff] %v9839_v4 }
 0x3ca   : > { %4634 = vmax.xlane.f32.xlu1 %v4633_v55  ;;  %4631 = vmax.xlane.f32.xlu0 %v4630_v13 }
 0x3cb   : > { %v9825_v25 = vpop.xlane.xlu1 %4976 }
 0x3cc   : > { %10551 = vst [vmem:[#allocation44_spill] sm:$0xff] %v9825_v25  ;;  %v9856_v36 = vpop.xlane.xlu0 %4999 }
 0x3cd   : > { %10561 = vst [vmem:[#allocation49_spill] sm:$0xff] %v9856_v36 }
 0x3ce   : > { %4647 = vmax.xlane.f32.xlu1 %v4646_v3  ;;  %4644 = vmax.xlane.f32.xlu0 %v4643_v19  ;;  %v4737_v19 = vsel %vm4526_vm12, %v9755_v34, -inf }
 0x3cf   : > { %v9837_v0 = vpop.xlane.xlu1 %4989 }
 0x3d0   : > { %10555 = vst [vmem:[#allocation46_spill] sm:$0xff] %v9837_v0 }
 0x3d2   : > { %4660 = vmax.xlane.f32.xlu1 %v4659_v26  ;;  %4657 = vmax.xlane.f32.xlu0 %v4656_v38  ;;  %v4734_v26 = vsel %vm10564_vm1, %v9613_v40, -inf  ;;  %vm10570_vm1 = vcmask 523712  }
 0x3d3   : > { %v9849_v39 = vpop.xlane.xlu1 %5002 }
 0x3d4   : > { %10559 = vst [vmem:[#allocation48_spill] sm:$0xff] %v9849_v39 }
 0x3d6   : > { %4673 = vmax.xlane.f32.xlu1 %v4672_v27  ;;  %4670 = vmax.xlane.f32.xlu0 %v4669_v7  ;;  %v7873_v27 = vld [vmem:[#allocation3 + $0x40] sm:$0xf] }
 0x3d7   : > { %v5014_v7 = vsel %vm10565_vm9, %v7873_v27, -inf  ;;  %v5027_v46 = vsel %vm4376_vm13, %v7873_v27, -inf  ;;  %v5040_v40 = vsel %vm4391_vm4, %v7873_v27, -inf  ;;  %vm10571_vm9 = vcmask 585216  }
 0x3d8   : > { %v5157_v36 = vsel %vm4526_vm12, %v7873_v27, -inf  ;;  %vm10582_vm12 = vcmask 126016  }
 0x3da   : > { %4686 = vmax.xlane.f32.xlu1 %v4685_v49  ;;  %4683 = vmax.xlane.f32.xlu0 %v4682_v16  ;;  %v7874_v49 = vld [vmem:[#allocation3 + $0x18] sm:$0xff] }
 0x3db   : > { %v5011_v16 = vsel %vm10566_vm6, %v7874_v49, -inf  ;;  %v5037_v34 = vsel %vm10568_vm8, %v7874_v49, -inf  ;;  %vm10572_vm6 = vcmask 589312   ;;  %vm10574_vm8 = vcmask 720512  }
 0x3de   : > { %4699 = vmax.xlane.f32.xlu1 %v4698_v1  ;;  %4696 = vmax.xlane.f32.xlu0 %v4695_v54  ;;  %v5024_v1 = vsel %vm10567_vm7, %v7874_v49, -inf  ;;  %v5053_v54 = vsel %vm10569_vm2, %v7873_v27, -inf  ;;  %vm10573_vm7 = vcmask 654912   ;;  %vm10581_vm2 = vcmask 64512  }
 0x3e2   : > { %4712 = vmax.xlane.f32.xlu1 %v4711_v30  ;;  %4709 = vmax.xlane.f32.xlu0 %v4708_v6  ;;  %v5050_v30 = vsel %vm10570_vm1, %v7874_v49, -inf  ;;  %v5066_v6 = vsel %vm10571_vm9, %v7873_v27, -inf  ;;  %vm10583_vm1 = vcmask 130112   ;;  %vm10584_vm9 = vcmask 191616  }
 0x3e6   : > { %4725 = vmax.xlane.f32.xlu1 %v4724_v48  ;;  %4722 = vmax.xlane.f32.xlu0 %v4721_v61 }
 0x3e7   : > { %v4315_v43 = vpop.xlane.xlu1 %4314 }
 0x3e8   : > { %v4323_v55 = vmul.f32 %v9859_v41, %v4315_v43  ;;  %v4300_v13 = vpop.xlane.xlu0 %4299  ;;  %v5063_v43 = vsel %vm10572_vm6, %v7874_v49, -inf  ;;  %vm10585_vm6 = vcmask 195712  }
 0x3e9   : > { %v4308_v3 = vmul.f32 %v9862_v9, %v4300_v13  ;;  %v5076_v13 = vsel %vm10573_vm7, %v7874_v49, -inf  ;;  %vm10586_vm7 = vcmask 261312  }
 0x3ea   : > { %4738 = vmax.xlane.f32.xlu1 %v4737_v19  ;;  %4735 = vmax.xlane.f32.xlu0 %v4734_v26  ;;  %v5092_v26 = vsel %vm4451_vm0, %v7873_v27, -inf  ;;  %vm10576_vm0 = vcmask 851712  }
 0x3eb   : > { %v9874_v38 = vadd.f32 %v4323_v55, %v4308_v3  ;;  %v5079_v55 = vsel %vm4436_vm5, %v7873_v27, -inf  ;;  %vm10575_vm5 = vcmask 786112  }
 0x3ee   : > { %5015 = vmax.xlane.f32.xlu1 %v5014_v7  ;;  %5012 = vmax.xlane.f32.xlu0 %v5011_v16  ;;  %v5089_v7 = vsel %vm10574_vm8, %v7874_v49, -inf  ;;  %vm10587_vm8 = vcmask 322816  }
 0x3f2   : > { %5028 = vmax.xlane.f32.xlu1 %v5027_v46  ;;  %5025 = vmax.xlane.f32.xlu0 %v5024_v1  ;;  %v5105_v1 = vsel %vm4466_vm10, %v7873_v27, -inf  ;;  %vm10577_vm10 = vcmask 917312  }
 0x3f6   : > { %5041 = vmax.xlane.f32.xlu1 %v5040_v40  ;;  %5038 = vmax.xlane.f32.xlu0 %v5037_v34  ;;  %v5102_v40 = vsel %vm10575_vm5, %v7874_v49, -inf  ;;  %vm10588_vm5 = vcmask 326912  }
 0x3fa   : > { %5054 = vmax.xlane.f32.xlu1 %v5053_v54  ;;  %5051 = vmax.xlane.f32.xlu0 %v5050_v30  ;;  %v5118_v30 = vsel %vm4481_vm15, %v7873_v27, -inf  ;;  %vm10578_vm15 = vcmask 982912  }
 0x3fb   : > { %v5141_v39 = vsel %vm10578_vm15, %v7874_v49, -inf  ;;  %vm4350_vm15 = vcmp.eq.s32.totalorder %v9842_v10, 3 }
 0x3fc   : > { %v6406_v8 = vsel %vm4350_vm15, 1.0, %v10562_v31  ;;  %vm4545_vm15 = vcmp.eq.s32.totalorder %v9842_v10, 16 }
 0x3fe   : > { %5067 = vmax.xlane.f32.xlu1 %v5066_v6  ;;  %5064 = vmax.xlane.f32.xlu0 %v5063_v43  ;;  %v9886_v48 = vpop.xlane.xlu1 %4318  ;;  %v5115_v6 = vsel %vm10576_vm0, %v7874_v49, -inf  ;;  %vm4335_vm0 = vcmp.eq.s32.totalorder %v9842_v10, 2 }
 0x3ff   : > { %v9888_v61 = vpop.xlane.xlu0 %4303  ;;  %v4324_v22 = vmul.f32 %v9859_v41, %v9886_v48 }
 0x402   : > { %5080 = vmax.xlane.f32.xlu1 %v5079_v55  ;;  %5077 = vmax.xlane.f32.xlu0 %v5076_v13  ;;  %v5131_v13 = vsel %vm4496_vm3, %v7873_v27, -inf  ;;  %vm10579_vm3 = vcmask 1048512  }
 0x403   : > { %v9892_v3 = vpop.xlane.xlu1 %4333  ;;  %v9894_v19 = vpop.xlane.xlu0 %4329  ;;  %v5154_v0 = vsel %vm10579_vm3, %v7874_v49, -inf  ;;  %vm10591_vm3 = vcmask 523712  }
 0x406   : > { %5093 = vmax.xlane.f32.xlu1 %v5092_v26  ;;  %5090 = vmax.xlane.f32.xlu0 %v5089_v7  ;;  %v5128_v26 = vsel %vm10577_vm10, %v7874_v49, -inf  ;;  %vm10590_vm10 = vcmask 458112  }
 0x407   : > { %v9898_v16 = vpop.xlane.xlu1 %4348  ;;  %v9900_v46 = vpop.xlane.xlu0 %4344 }
 0x408   : > { %v4354_v44 = vmul.f32 %v6406_v8, %v9898_v16 }
 0x40a   : > { %5106 = vmax.xlane.f32.xlu1 %v5105_v1  ;;  %5103 = vmax.xlane.f32.xlu0 %v5102_v40  ;;  %v5144_v40 = vsel %vm4511_vm11, %v7873_v27, -inf  ;;  %vm10580_vm11 = vcmask 60416  }
 0x40b   : > { %v9904_v34 = vpop.xlane.xlu1 %4363  ;;  %v9906_v54 = vpop.xlane.xlu0 %4359 }
 0x40e   : > { %5119 = vmax.xlane.f32.xlu1 %v5118_v30  ;;  %5116 = vmax.xlane.f32.xlu0 %v5115_v6 }
 0x40f   : > { %v9910_v43 = vpop.xlane.xlu1 %4378  ;;  %v9912_v55 = vpop.xlane.xlu0 %4374 }
 0x412   : > { %5132 = vmax.xlane.f32.xlu1 %v5131_v13  ;;  %5129 = vmax.xlane.f32.xlu0 %v5128_v26  ;;  %v5168_v13 = vld [vmem:[#allocation3 + $0x48] sm:$0xf]  ;;  %v5167_v26 = vld [vmem:[#allocation3 + $0x20] sm:$0xff] }
 0x413   : > { %v9916_v7 = vpop.xlane.xlu1 %4393  ;;  %v9918_v1 = vpop.xlane.xlu0 %4389  ;;  %v5172_v23 = vsel %vm10580_vm11, %v5168_v13, -inf  ;;  %v5185_v27 = vsel %vm10582_vm12, %v5168_v13, -inf  ;;  %v5198_v18 = vsel %vm10584_vm9, %v5168_v13, -inf  ;;  %v5195_v12 = vsel %vm10585_vm6, %v5167_v26, -inf }
 0x414   : > { %v5211_v52 = vsel %vm4346_vm14, %v5168_v13, -inf  ;;  %v5208_v5 = vsel %vm10586_vm7, %v5167_v26, -inf  ;;  %v5224_v28 = vsel %vm10587_vm8, %v5168_v13, -inf  ;;  %v5221_v11 = vsel %vm10588_vm5, %v5167_v26, -inf }
 0x415   : > { %v5237_v63 = vsel %vm4376_vm13, %v5168_v13, -inf  ;;  %vm10589_vm14 = vcmask 392512   ;;  %v5250_v37 = vsel %vm4391_vm4, %v5168_v13, -inf  ;;  %vm4365_vm13 = vcmp.eq.s32.totalorder %v9842_v10, 4 }
 0x416   : > { %5145 = vmax.xlane.f32.xlu1 %v5144_v40  ;;  %5142 = vmax.xlane.f32.xlu0 %v5141_v39  ;;  %v5169_v39 = vsel %vm10581_vm2, %v5167_v26, -inf  ;;  %v5234_v53 = vsel %vm10589_vm14, %v5167_v26, -inf  ;;  %vm10592_vm4 = vcmask 519616   ;;  %vm4380_vm11 = vcmp.eq.s32.totalorder %v9842_v10, 5 }
 0x417   : > { %v9922_v30 = vpop.xlane.xlu1 %4408  ;;  %v9924_v6 = vpop.xlane.xlu0 %4404  ;;  %v6407_v48 = vsel %vm4365_vm13, 1.0, %v10562_v31  ;;  %vm4395_vm2 = vcmp.eq.s32.totalorder %v9842_v10, 6  ;;  %vm4410_vm12 = vcmp.eq.s32.totalorder %v9842_v10, 7  ;;  %vm4440_vm9 = vcmp.eq.s32.totalorder %v9842_v10, 9 }
 0x418   : > { %vm4455_vm6 = vcmp.eq.s32.totalorder %v9842_v10, 10  ;;  %vm4470_vm7 = vcmp.eq.s32.totalorder %v9842_v10, 11  ;;  %vm4485_vm8 = vcmp.eq.s32.totalorder %v9842_v10, 12  ;;  %vm4500_vm5 = vcmp.eq.s32.totalorder %v9842_v10, 13 }
 0x419   : > { %vm4515_vm14 = vcmp.eq.s32.totalorder %v9842_v10, 14  ;;  %vm4558_vm13 = vcmp.eq.s32.totalorder %v9842_v10, 17 }
 0x41a   : > { %5158 = vmax.xlane.f32.xlu1 %v5157_v36  ;;  %5155 = vmax.xlane.f32.xlu0 %v5154_v0  ;;  %v5182_v0 = vsel %vm10583_vm1, %v5167_v26, -inf  ;;  %vm4425_vm1 = vcmp.eq.s32.totalorder %v9842_v10, 8 }
 0x41b   : > { %v9928_v4 = vpop.xlane.xlu1 %4423  ;;  %v9930_v25 = vpop.xlane.xlu0 %4419 }
 0x41e   : > { %5173 = vmax.xlane.f32.xlu1 %v5172_v23  ;;  %5170 = vmax.xlane.f32.xlu0 %v5169_v39 }
 0x41f   : > { %v9934_v40 = vpop.xlane.xlu1 %4438  ;;  %v9936_v56 = vpop.xlane.xlu0 %4434 }
 0x422   : > { %5186 = vmax.xlane.f32.xlu1 %v5185_v27  ;;  %5183 = vmax.xlane.f32.xlu0 %v5182_v0 }
 0x423   : > { %v9940_v36 = vpop.xlane.xlu1 %4453  ;;  %v9942_v49 = vpop.xlane.xlu0 %4449 }
 0x426   : > { %5199 = vmax.xlane.f32.xlu1 %v5198_v18  ;;  %5196 = vmax.xlane.f32.xlu0 %v5195_v12 }
 0x427   : > { %v9946_v23 = vpop.xlane.xlu1 %4468  ;;  %v9948_v39 = vpop.xlane.xlu0 %4464 }
 0x42a   : > { %5212 = vmax.xlane.f32.xlu1 %v5211_v52  ;;  %5209 = vmax.xlane.f32.xlu0 %v5208_v5 }
 0x42b   : > { %v9952_v27 = vpop.xlane.xlu1 %4483  ;;  %v9954_v0 = vpop.xlane.xlu0 %4479 }
 0x42e   : > { %5225 = vmax.xlane.f32.xlu1 %v5224_v28  ;;  %5222 = vmax.xlane.f32.xlu0 %v5221_v11  ;;  %v5247_v11 = vsel %vm10590_vm10, %v5167_v26, -inf  ;;  %vm4530_vm10 = vcmp.eq.s32.totalorder %v9842_v10, 15 }
 0x42f   : > { %v9958_v12 = vpop.xlane.xlu1 %4498  ;;  %v9960_v18 = vpop.xlane.xlu0 %4494 }
 0x432   : > { %5238 = vmax.xlane.f32.xlu1 %v5237_v63  ;;  %5235 = vmax.xlane.f32.xlu0 %v5234_v53  ;;  %v6405_v53 = vsel %vm4335_vm0, 1.0, %v10562_v31  ;;  %v5260_v63 = vsel %vm10591_vm3, %v5167_v26, -inf  ;;  %vm8170_vm0 = vmmov 0   ;;  %vm4571_vm3 = vcmp.eq.s32.totalorder %v9842_v10, 18 }
 0x433   : > { %v9964_v5 = vpop.xlane.xlu1 %4513  ;;  %v9966_v52 = vpop.xlane.xlu0 %4509  ;;  %v4339_v26 = vmul.f32 %v6405_v53, %v9892_v3  ;;  %v6408_v3 = vsel %vm4380_vm11, 1.0, %v10562_v31  ;;  %6929 = vmatprep.mubr.msk.f32.mxu1 %vm8170_vm0, %v10562_v31  ;;  %vm4597_vm11 = vcmp.eq.s32.totalorder %v9842_v10, 20 }
 0x434   : > { %v4384_v62 = vmul.f32 %v6408_v3, %v9910_v43 }
 0x436   : > { %5251 = vmax.xlane.f32.xlu1 %v5250_v37  ;;  %5248 = vmax.xlane.f32.xlu0 %v5247_v11  ;;  %v4309_v37 = vmul.f32 %v9862_v9, %v9888_v61  ;;  %v5263_v11 = vsel %vm10592_vm4, %v5168_v13, -inf  ;;  %v4338_v9 = vmul.f32 %v6405_v53, %v9894_v19  ;;  %v4353_v61 = vmul.f32 %v6406_v8, %v9900_v46  ;;  %v5291_v13 = vld [vmem:[#allocation10 + $0x58] sm:$0xff] }
 0x437   : > { %v9972_v28 = vpop.xlane.xlu1 %4528  ;;  %v9974_v58 = vpop.xlane.xlu0 %4524  ;;  %v4369_v19 = vmul.f32 %v6407_v48, %v9904_v34  ;;  %v6409_v8 = vsel %vm4395_vm2, 1.0, %v10562_v31  ;;  %vm4584_vm4 = vcmp.eq.s32.totalorder %v9842_v10, 19  ;;  %vm4610_vm2 = vcmp.eq.s32.totalorder %v9842_v10, 21 }
 0x438   : > { %v4326_v47 = vadd.f32 %v4324_v22, %v4309_v37  ;;  %v4340_v16 = vadd.f32 %v4338_v9, %v9874_v38  ;;  %v4368_v37 = vmul.f32 %v6407_v48, %v9906_v54  ;;  %v4399_v54 = vmul.f32 %v6409_v8, %v9916_v7  ;;  %v5295_v7 = vld [vmem:[#allocation10 + $0x78] sm:$0xff] }
 0x43a   : > { %5264 = vmax.xlane.f32.xlu1 %v5263_v11  ;;  %5261 = vmax.xlane.f32.xlu0 %v5260_v63  ;;  %v5292_v63 = vld [vmem:[#allocation10 + $0x60] sm:$0xff]  ;;  %v4341_v17 = vadd.f32 %v4339_v26, %v4326_v47  ;;  %v4355_v34 = vadd.f32 %v4353_v61, %v4340_v16  ;;  %v4383_v26 = vmul.f32 %v6408_v3, %v9912_v55  ;;  %v6410_v47 = vsel %vm4410_vm12, 1.0, %v10562_v31 }
 0x43b   : > { %v9988_v15 = vpop.xlane.xlu1 %4543  ;;  %v9990_v41 = vpop.xlane.xlu0 %4540  ;;  %v7433_v22 = vpack.c.bf16 %v5292_v63, %v5291_v13  ;;  %v5293_v13 = vld [vmem:[#allocation10 + $0x68] sm:$0xff]  ;;  %v5294_v63 = vld [vmem:[#allocation10 + $0x70] sm:$0xff]  ;;  %v6411_v61 = vsel %vm4425_vm1, 1.0, %v10562_v31  ;;  %v4414_v3 = vmul.f32 %v6410_v47, %v9922_v30  ;;  %v5296_v16 = vld [vmem:[#allocation10 + $0x80] sm:$0xff]  ;;  %vm4623_vm12 = vcmp.eq.s32.totalorder %v9842_v10, 22 }
 0x43c   : > { %v4356_v46 = vadd.f32 %v4354_v44, %v4341_v17  ;;  %v7436_v43 = vpack.c.bf16 %v5294_v63, %v5293_v13  ;;  %v4370_v44 = vadd.f32 %v4368_v37, %v4355_v34  ;;  %v4398_v17 = vmul.f32 %v6409_v8, %v9918_v1 }
 0x43d   : > { %7434 = vmatpush3.bf16.msra.mxu1 %v7433_v22  ;;  %v4429_v1 = vmul.f32 %v6411_v61, %v9928_v4  ;;  %v6412_v8 = vsel %vm4440_vm9, 1.0, %v10562_v31  ;;  %v7439_v30 = vpack.c.bf16 %v5296_v16, %v5295_v7  ;;  %vm4636_vm1 = vcmp.eq.s32.totalorder %v9842_v10, 23 }
 0x43e   : > { %7435 = vmatprep.subr.bf16.mxu1 %v10593_v20  ;;  %v4371_v38 = vadd.f32 %v4369_v19, %v4356_v46  ;;  %v4385_v22 = vadd.f32 %v4383_v26, %v4370_v44  ;;  %v4413_v19 = vmul.f32 %v6410_v47, %v9924_v6  ;;  %v4428_v26 = vmul.f32 %v6411_v61, %v9930_v25  ;;  %v5297_v61 = vld [vmem:[#allocation10 + $0x88] sm:$0xff] }
 0x43f   : > { %v10003_v53 = vpop.xlane.xlu1 %4556  ;;  %v10005_v11 = vpop.xlane.xlu0 %4553  ;;  %v6413_v47 = vsel %vm4455_vm6, 1.0, %v10562_v31  ;;  %v4444_v63 = vmul.f32 %v6412_v8, %v9934_v40  ;;  %v4443_v4 = vmul.f32 %v6412_v8, %v9936_v56  ;;  %v6415_v56 = vsel %vm4485_vm8, 1.0, %v10562_v31 }
 0x440   : > { %v4386_v55 = vadd.f32 %v4384_v62, %v4371_v38  ;;  %v4400_v34 = vadd.f32 %v4398_v17, %v4385_v22  ;;  %v4459_v17 = vmul.f32 %v6413_v47, %v9940_v36  ;;  %v4458_v40 = vmul.f32 %v6413_v47, %v9942_v49 }
 0x441   : > { %7437 = vmatpush3.bf16.msra.mxu1 %v7436_v43  ;;  %v6416_v36 = vsel %vm4500_vm5, 1.0, %v10562_v31  ;;  %vm4649_vm9 = vcmp.eq.s32.totalorder %v9842_v10, 24  ;;  %vm4662_vm6 = vcmp.eq.s32.totalorder %v9842_v10, 25  ;;  %vm4688_vm8 = vcmp.eq.s32.totalorder %v9842_v10, 27 }
 0x442   : > { %7438 = vmatprep.subr.bf16.mxu1 %v10593_v20  ;;  %v4401_v37 = vadd.f32 %v4399_v54, %v4386_v55  ;;  %v4415_v13 = vadd.f32 %v4413_v19, %v4400_v34  ;;  %v6414_v54 = vsel %vm4470_vm7, 1.0, %v10562_v31  ;;  %v4504_v34 = vmul.f32 %v6416_v36, %v9958_v12 }
 0x443   : > { %v10016_v9 = vpop.xlane.xlu1 %4569  ;;  %v10018_v48 = vpop.xlane.xlu0 %4566  ;;  %v4474_v22 = vmul.f32 %v6414_v54, %v9946_v23  ;;  %v4473_v19 = vmul.f32 %v6414_v54, %v9948_v39  ;;  %v4488_v23 = vmul.f32 %v6415_v56, %v9954_v0  ;;  %v6417_v39 = vsel %vm4515_vm14, 1.0, %v10562_v31 }
 0x444   : > { %v4416_v6 = vadd.f32 %v4414_v3, %v4401_v37  ;;  %v4430_v44 = vadd.f32 %v4428_v26, %v4415_v13  ;;  %v4503_v26 = vmul.f32 %v6416_v36, %v9960_v18  ;;  %v6422_v36 = vsel %vm4584_vm4, 1.0, %v10562_v31 }
 0x445   : > { %7440 = vmatpush3.bf16.msra.mxu1 %v7439_v30  ;;  %vm4675_vm7 = vcmp.eq.s32.totalorder %v9842_v10, 26  ;;  %vm4701_vm5 = vcmp.eq.s32.totalorder %v9842_v10, 28  ;;  %vm4714_vm14 = vcmp.eq.s32.totalorder %v9842_v10, 29  ;;  %vm4781_vm4 = vcmp.eq.s32.totalorder %v9842_v10, 34 }
 0x446   : > { %6927 = vmatprep.subr.mxu1 %v10562_v31  ;;  %v4431_v38 = vadd.f32 %v4429_v1, %v4416_v6  ;;  %v4445_v3 = vadd.f32 %v4443_v4, %v4430_v44  ;;  %v4489_v1 = vmul.f32 %v6415_v56, %v9952_v27  ;;  %v6418_v6 = vsel %vm4530_vm10, 1.0, %v10562_v31 }
 0x447   : > { %v10029_v46 = vpop.xlane.xlu1 %4582  ;;  %v10031_v62 = vpop.xlane.xlu0 %4579  ;;  %v4518_v4 = vmul.f32 %v6417_v39, %v9966_v52  ;;  %v4534_v18 = vmul.f32 %v6418_v6, %v9972_v28  ;;  %v4533_v44 = vmul.f32 %v6418_v6, %v9974_v58  ;;  %vm4727_vm10 = vcmp.eq.s32.totalorder %v9842_v10, 30 }
 0x448   : > { %v4446_v55 = vadd.f32 %v4444_v63, %v4431_v38  ;;  %v4460_v37 = vadd.f32 %v4458_v40, %v4445_v3  ;;  %v4519_v63 = vmul.f32 %v6417_v39, %v9964_v5  ;;  %v6419_v38 = vsel %vm4545_vm15, 1.0, %v10562_v31 }
 0x449   : > { %6928 = vmatpush3.msra.mxu1 %v5297_v61  ;;  %v4549_v52 = vmul.f32 %v6419_v38, %v9988_v15  ;;  %v6421_v3 = vsel %vm4571_vm3, 1.0, %v10562_v31  ;;  %v6423_v39 = vsel %vm4597_vm11, 1.0, %v10562_v31  ;;  %vm4740_vm15 = vcmp.eq.s32.totalorder %v9842_v10, 31 }
 0x44a   : > { %7441 = vmatprep.subr.bf16.mxu1 %v10593_v20  ;;  %v4461_v16 = vadd.f32 %v4459_v17, %v4446_v55  ;;  %v4475_v30 = vadd.f32 %v4473_v19, %v4460_v37  ;;  %v6420_v17 = vsel %vm4558_vm13, 1.0, %v10562_v31  ;;  %v4548_v55 = vmul.f32 %v6419_v38, %v9990_v41 }
 0x44b   : > { %v10042_v25 = vpop.xlane.xlu1 %4595  ;;  %v10044_v43 = vpop.xlane.xlu0 %4592  ;;  %v4562_v58 = vmul.f32 %v6420_v17, %v10003_v53  ;;  %v4561_v19 = vmul.f32 %v6420_v17, %v10005_v11  ;;  %v4575_v41 = vmul.f32 %v6421_v3, %v10016_v9  ;;  %v4588_v11 = vmul.f32 %v6422_v36, %v10029_v46 }
 0x44c   : > { %v4476_v8 = vadd.f32 %v4474_v22, %v4461_v16  ;;  %v4490_v0 = vadd.f32 %v4488_v23, %v4475_v30  ;;  %v4574_v23 = vmul.f32 %v6421_v3, %v10018_v48  ;;  %v4587_v30 = vmul.f32 %v6422_v36, %v10031_v62 }
 0x44d   : > { %v4601_v48 = vmul.f32 %v6423_v39, %v10042_v25  ;;  %vm4755_vm13 = vcmp.eq.s32.totalorder %v9842_v10, 32  ;;  %vm4768_vm3 = vcmp.eq.s32.totalorder %v9842_v10, 33  ;;  %vm4794_vm11 = vcmp.eq.s32.totalorder %v9842_v10, 35 }
 0x44e   : > { %v4491_v13 = vadd.f32 %v4489_v1, %v4476_v8  ;;  %v4505_v12 = vadd.f32 %v4503_v26, %v4490_v0  ;;  %v4600_v0 = vmul.f32 %v6423_v39, %v10044_v43 }
 0x44f   : > { %v10059_v49 = vpop.xlane.xlu1 %4608  ;;  %v10061_v7 = vpop.xlane.xlu0 %4605 }
 0x450   : > { %v4506_v54 = vadd.f32 %v4504_v34, %v4491_v13  ;;  %v4520_v5 = vadd.f32 %v4518_v4, %v4505_v12  ;;  %v6424_v34 = vsel %vm4610_vm2, 1.0, %v10562_v31  ;;  %vm4807_vm2 = vcmp.eq.s32.totalorder %v9842_v10, 36 }
 0x451   : > { %v4614_v62 = vmul.f32 %v6424_v34, %v10059_v49  ;;  %v4613_v38 = vmul.f32 %v6424_v34, %v10061_v7  ;;  %v6428_v7 = vsel %vm4662_vm6, 1.0, %v10562_v31  ;;  %vm4859_vm6 = vcmp.eq.s32.totalorder %v9842_v10, 40 }
 0x452   : > { %v4521_v56 = vadd.f32 %v4519_v63, %v4506_v54  ;;  %v4535_v28 = vadd.f32 %v4533_v44, %v4520_v5  ;;  %v6425_v63 = vsel %vm4623_vm12, 1.0, %v10562_v31  ;;  %v6426_v54 = vsel %vm4636_vm1, 1.0, %v10562_v31 }
 0x453   : > { %v4622_v47 = vpop.xlane.xlu1 %4621  ;;  %v4619_v27 = vpop.xlane.xlu0 %4618  ;;  %vm4820_vm12 = vcmp.eq.s32.totalorder %v9842_v10, 37  ;;  %vm4833_vm1 = vcmp.eq.s32.totalorder %v9842_v10, 38 }
 0x454   : > { %v4536_v22 = vadd.f32 %v4534_v18, %v4521_v56  ;;  %v4550_v15 = vadd.f32 %v4548_v55, %v4535_v28  ;;  %v4627_v17 = vmul.f32 %v6425_v63, %v4622_v47  ;;  %v4626_v43 = vmul.f32 %v6425_v63, %v4619_v27 }
 0x455   : > { %v6427_v56 = vsel %vm4649_vm9, 1.0, %v10562_v31  ;;  %v6429_v47 = vsel %vm4675_vm7, 1.0, %v10562_v31  ;;  %vm4846_vm9 = vcmp.eq.s32.totalorder %v9842_v10, 39  ;;  %vm4872_vm7 = vcmp.eq.s32.totalorder %v9842_v10, 41 }
 0x456   : > { %v4551_v1 = vadd.f32 %v4549_v52, %v4536_v22  ;;  %v4563_v53 = vadd.f32 %v4561_v19, %v4550_v15 }
 0x457   : > { %v4635_v40 = vpop.xlane.xlu1 %4634  ;;  %v4632_v61 = vpop.xlane.xlu0 %4631 }
 0x458   : > { %v4564_v8 = vadd.f32 %v4562_v58, %v4551_v1  ;;  %v4576_v9 = vadd.f32 %v4574_v23, %v4563_v53  ;;  %v4640_v55 = vmul.f32 %v6426_v54, %v4635_v40  ;;  %v4639_v49 = vmul.f32 %v6426_v54, %v4632_v61 }
 0x459   : > { %v6430_v40 = vsel %vm4688_vm8, 1.0, %v10562_v31  ;;  %vm4885_vm8 = vcmp.eq.s32.totalorder %v9842_v10, 42 }
 0x45a   : > { %v4577_v13 = vadd.f32 %v4575_v41, %v4564_v8  ;;  %v4589_v46 = vadd.f32 %v4587_v30, %v4576_v9 }
 0x45b   : > { %v4648_v16 = vpop.xlane.xlu1 %4647  ;;  %v4645_v37 = vpop.xlane.xlu0 %4644 }
 0x45c   : > { %v4590_v4 = vadd.f32 %v4588_v11, %v4577_v13  ;;  %v4602_v25 = vadd.f32 %v4600_v0, %v4589_v46  ;;  %v4653_v19 = vmul.f32 %v6427_v56, %v4648_v16  ;;  %v4652_v36 = vmul.f32 %v6427_v56, %v4645_v37 }
 0x45d   : > { %v6431_v16 = vsel %vm4701_vm5, 1.0, %v10562_v31  ;;  %v6433_v46 = vsel %vm4727_vm10, 1.0, %v10562_v31  ;;  %vm4898_vm5 = vcmp.eq.s32.totalorder %v9842_v10, 43  ;;  %vm4924_vm10 = vcmp.eq.s32.totalorder %v9842_v10, 45 }
 0x45e   : > { %v4603_v44 = vadd.f32 %v4601_v48, %v4590_v4  ;;  %v4615_v52 = vadd.f32 %v4613_v38, %v4602_v25 }
 0x45f   : > { %v4661_v26 = vpop.xlane.xlu1 %4660  ;;  %v4658_v6 = vpop.xlane.xlu0 %4657 }
 0x460   : > { %v4616_v5 = vadd.f32 %v4614_v62, %v4603_v44  ;;  %v4628_v58 = vadd.f32 %v4626_v43, %v4615_v52  ;;  %v4666_v15 = vmul.f32 %v6428_v7, %v4661_v26  ;;  %v4665_v41 = vmul.f32 %v6428_v7, %v4658_v6 }
 0x461   : > { %v6432_v26 = vsel %vm4714_vm14, 1.0, %v10562_v31  ;;  %v6435_v52 = vsel %vm4755_vm13, 1.0, %v10562_v31  ;;  %vm4911_vm14 = vcmp.eq.s32.totalorder %v9842_v10, 44  ;;  %vm4950_vm13 = vcmp.eq.s32.totalorder %v9842_v10, 47 }
 0x462   : > { %v4629_v28 = vadd.f32 %v4627_v17, %v4616_v5  ;;  %v4641_v1 = vadd.f32 %v4639_v49, %v4628_v58  ;;  %v6434_v5 = vsel %vm4740_vm15, 1.0, %v10562_v31  ;;  %vm4937_vm15 = vcmp.eq.s32.totalorder %v9842_v10, 46 }
 0x463   : > { %v4674_v12 = vpop.xlane.xlu1 %4673  ;;  %v4671_v18 = vpop.xlane.xlu0 %4670 }
 0x464   : > { %v4642_v27 = vadd.f32 %v4640_v55, %v4629_v28  ;;  %v4654_v8 = vadd.f32 %v4652_v36, %v4641_v1  ;;  %v4679_v53 = vmul.f32 %v6429_v47, %v4674_v12  ;;  %v4678_v11 = vmul.f32 %v6429_v47, %v4671_v18 }
 0x465   : > { %v4758_v36 = vmul.f32 %v6435_v52, %v9666_v33  ;;  %v6436_v47 = vsel %vm4768_vm3, 1.0, %v10562_v31  ;;  %vm4965_vm3 = vcmp.eq.s32.totalorder %v9842_v10, 48 }
 0x466   : > { %v4655_v39 = vadd.f32 %v4653_v19, %v4642_v27  ;;  %v4667_v30 = vadd.f32 %v4665_v41, %v4654_v8  ;;  %v4759_v27 = vmul.f32 %v6435_v52, %v9680_v42  ;;  %v6437_v41 = vsel %vm4781_vm4, 1.0, %v10562_v31 }
 0x467   : > { %v4687_v3 = vpop.xlane.xlu1 %4686  ;;  %v4684_v22 = vpop.xlane.xlu0 %4683  ;;  %v4771_v33 = vmul.f32 %v6436_v47, %v9672_v21  ;;  %v6438_v42 = vsel %vm4794_vm11, 1.0, %v10562_v31  ;;  %vm4978_vm4 = vcmp.eq.s32.totalorder %v9842_v10, 49  ;;  %vm4991_vm11 = vcmp.eq.s32.totalorder %v9842_v10, 50 }
 0x468   : > { %v4668_v37 = vadd.f32 %v4666_v15, %v4655_v39  ;;  %v4692_v34 = vmul.f32 %v6430_v40, %v4687_v3  ;;  %v4691_v13 = vmul.f32 %v6430_v40, %v4684_v22  ;;  %v4680_v0 = vadd.f32 %v4678_v11, %v4667_v30 }
 0x469   : > { %v4784_v11 = vmul.f32 %v6437_v41, %v9682_v32  ;;  %v6439_v30 = vsel %vm4807_vm2, 1.0, %v10562_v31  ;;  %v4798_v21 = vmul.f32 %v6438_v42, %v9706_v60  ;;  %vm5004_vm2 = vcmp.eq.s32.totalorder %v9842_v10, 51 }
 0x46a   : > { %v4681_v48 = vadd.f32 %v4679_v53, %v4668_v37  ;;  %v4693_v38 = vadd.f32 %v4691_v13, %v4680_v0  ;;  %v4785_v53 = vmul.f32 %v6437_v41, %v9698_v59  ;;  %v4797_v13 = vmul.f32 %v6438_v42, %v9690_v50  ;;  %v10599_v41 = vld [vmem:[#allocation31_spill] sm:$0xff] }
 0x46b   : > { %v4700_v61 = vpop.xlane.xlu1 %4699  ;;  %v4697_v23 = vpop.xlane.xlu0 %4696  ;;  %v6440_v59 = vsel %vm4820_vm12, 1.0, %v10562_v31  ;;  %v4811_v32 = vmul.f32 %v6439_v30, %v9715_v14  ;;  %v6442_v14 = vsel %vm4846_vm9, 1.0, %v10562_v31  ;;  %vm5017_vm12 = vcmp.eq.s32.totalorder %v9842_v10, 52 }
 0x46c   : > { %v4705_v63 = vmul.f32 %v6431_v16, %v4700_v61  ;;  %v4704_v4 = vmul.f32 %v6431_v16, %v4697_v23  ;;  %v4694_v62 = vadd.f32 %v4692_v34, %v4681_v48  ;;  %v4772_v23 = vmul.f32 %v6436_v47, %v9688_v2 }
 0x46d   : > { %v4824_v50 = vmul.f32 %v6440_v59, %v9723_v29  ;;  %vm5043_vm9 = vcmp.eq.s32.totalorder %v9842_v10, 54 }
 0x46e   : > { %v4707_v25 = vadd.f32 %v4705_v63, %v4694_v62  ;;  %v4706_v17 = vadd.f32 %v4704_v4, %v4693_v38  ;;  %v6441_v63 = vsel %vm4833_vm1, 1.0, %v10562_v31  ;;  %vm5030_vm1 = vcmp.eq.s32.totalorder %v9842_v10, 53 }
 0x46f   : > { %v4713_v6 = vpop.xlane.xlu1 %4712  ;;  %v4710_v9 = vpop.xlane.xlu0 %4709 }
 0x470   : > { %v4718_v54 = vmul.f32 %v6432_v26, %v4713_v6  ;;  %v4717_v12 = vmul.f32 %v6432_v26, %v4710_v9  ;;  %v4810_v9 = vmul.f32 %v6439_v30, %v9700_v57  ;;  %v4837_v57 = vmul.f32 %v6441_v63, %v9731_v45 }
 0x471   : > { %v6444_v45 = vsel %vm4872_vm7, 1.0, %v10562_v31  ;;  %vm5069_vm7 = vcmp.eq.s32.totalorder %v9842_v10, 56 }
 0x472   : > { %v4720_v55 = vadd.f32 %v4718_v54, %v4707_v25  ;;  %v4719_v49 = vadd.f32 %v4717_v12, %v4706_v17  ;;  %v4836_v54 = vmul.f32 %v6441_v63, %v9717_v24  ;;  %v10594_v17 = vld [vmem:[#allocation30_spill] sm:$0xff] }
 0x473   : > { %v4726_v18 = vpop.xlane.xlu1 %4725  ;;  %v4723_v44 = vpop.xlane.xlu0 %4722  ;;  %v10595_v24 = vld [vmem:[#allocation26_spill] sm:$0xff] }
 0x474   : > { %v4731_v43 = vmul.f32 %v6433_v46, %v4726_v18  ;;  %v4730_v56 = vmul.f32 %v6433_v46, %v4723_v44  ;;  %v4823_v46 = vmul.f32 %v6440_v59, %v9708_v35  ;;  %v6443_v44 = vsel %vm4859_vm6, 1.0, %v10562_v31 }
 0x475   : > { %v4850_v35 = vmul.f32 %v6442_v14, %v9739_v51  ;;  %v4863_v52 = vmul.f32 %v6443_v44, %v10595_v24  ;;  %v6448_v59 = vsel %vm4924_vm10, 1.0, %v10562_v31  ;;  %vm5056_vm6 = vcmp.eq.s32.totalorder %v9842_v10, 55 }
 0x476   : > { %v4733_v22 = vadd.f32 %v4731_v43, %v4720_v55  ;;  %v4732_v28 = vadd.f32 %v4730_v56, %v4719_v49  ;;  %v4849_v43 = vmul.f32 %v6442_v14, %v10594_v17  ;;  %v10596_v55 = vld [vmem:[#allocation29_spill] sm:$0xff]  ;;  %v10605_v14 = vld [vmem:[#allocation36_spill] sm:$0xff]  ;;  %v10607_v17 = vld [vmem:[#allocation38_spill] sm:$0xff]  ;;  %vm5121_vm10 = vcmp.eq.s32.totalorder %v9842_v10, 60 }
 0x477   : > { %v4739_v7 = vpop.xlane.xlu1 %4738  ;;  %v4736_v3 = vpop.xlane.xlu0 %4735  ;;  %v4862_v49 = vmul.f32 %v6443_v44, %v10596_v55  ;;  %v6452_v55 = vsel %vm4978_vm4, 1.0, %v10562_v31  ;;  %vm5175_vm4 = vcmp.eq.s32.totalorder %v9842_v10, 64 }
 0x478   : > { %v4744_v58 = vmul.f32 %v6434_v5, %v4739_v7  ;;  %v4743_v19 = vmul.f32 %v6434_v5, %v4736_v3 }
 0x47a   : > { %v4746_v1 = vadd.f32 %v4744_v58, %v4733_v22  ;;  %v4745_v15 = vadd.f32 %v4743_v19, %v4732_v28  ;;  %v6445_v22 = vsel %vm4885_vm8, 1.0, %v10562_v31  ;;  %v10597_v58 = vld [vmem:[#allocation28_spill] sm:$0xff]  ;;  %vm5082_vm8 = vcmp.eq.s32.totalorder %v9842_v10, 57 }
 0x47b   : > { %v10129_v40 = vpop.xlane.xlu1 %5015  ;;  %v10131_v61 = vpop.xlane.xlu0 %5012  ;;  %v4876_v19 = vmul.f32 %v6444_v45, %v10597_v58  ;;  %v10610_v58 = vld [vmem:[#allocation41_spill] sm:$0xff] }
 0x47c   : > { %v4761_v39 = vadd.f32 %v4759_v27, %v4746_v1  ;;  %v4760_v8 = vadd.f32 %v4758_v36, %v4745_v15  ;;  %v10598_v36 = vld [vmem:[#allocation27_spill] sm:$0xff]  ;;  %v6446_v15 = vsel %vm4898_vm5, 1.0, %v10562_v31  ;;  %vm5095_vm5 = vcmp.eq.s32.totalorder %v9842_v10, 58 }
 0x47d   : > { %v4875_v47 = vmul.f32 %v6444_v45, %v10598_v36 }
 0x47e   : > { %v4774_v16 = vadd.f32 %v4772_v23, %v4761_v39  ;;  %v4773_v37 = vadd.f32 %v4771_v33, %v4760_v8  ;;  %v4889_v23 = vmul.f32 %v6445_v22, %v10599_v41  ;;  %v10600_v33 = vld [vmem:[#allocation25_spill] sm:$0xff]  ;;  %v10612_v41 = vld [vmem:[#allocation43_spill] sm:$0xff] }
 0x47f   : > { %v10141_v34 = vpop.xlane.xlu1 %5028  ;;  %v10143_v2 = vpop.xlane.xlu0 %5025  ;;  %v4888_v39 = vmul.f32 %v6445_v22, %v10600_v33 }
 0x480   : > { %v4787_v26 = vadd.f32 %v4785_v53, %v4774_v16  ;;  %v4786_v6 = vadd.f32 %v4784_v11, %v4773_v37  ;;  %v6447_v53 = vsel %vm4911_vm14, 1.0, %v10562_v31  ;;  %v10601_v37 = vld [vmem:[#allocation32_spill] sm:$0xff]  ;;  %vm5108_vm14 = vcmp.eq.s32.totalorder %v9842_v10, 59 }
 0x481   : > { %v4902_v30 = vmul.f32 %v6446_v15, %v10601_v37 }
 0x482   : > { %v4800_v48 = vadd.f32 %v4798_v21, %v4787_v26  ;;  %v4799_v0 = vadd.f32 %v4797_v13, %v4786_v6  ;;  %v10602_v21 = vld [vmem:[#allocation33_spill] sm:$0xff] }
 0x483   : > { %v10153_v4 = vpop.xlane.xlu1 %5041  ;;  %v10155_v60 = vpop.xlane.xlu0 %5038  ;;  %v4901_v13 = vmul.f32 %v6446_v15, %v10602_v21  ;;  %v10614_v21 = vld [vmem:[#allocation44_spill] sm:$0xff] }
 0x484   : > { %v4813_v62 = vadd.f32 %v4811_v32, %v4800_v48  ;;  %v4812_v38 = vadd.f32 %v4810_v9, %v4799_v0  ;;  %v10603_v32 = vld [vmem:[#allocation34_spill] sm:$0xff]  ;;  %v10604_v48 = vld [vmem:[#allocation35_spill] sm:$0xff] }
 0x485   : > { %v4915_v9 = vmul.f32 %v6447_v53, %v10603_v32  ;;  %v4914_v0 = vmul.f32 %v6447_v53, %v10604_v48  ;;  %v6454_v53 = vsel %vm5004_vm2, 1.0, %v10562_v31  ;;  %vm5201_vm2 = vcmp.eq.s32.totalorder %v9842_v10, 66 }
 0x486   : > { %v4826_v12 = vadd.f32 %v4824_v50, %v4813_v62  ;;  %v4825_v18 = vadd.f32 %v4823_v46, %v4812_v38  ;;  %v6449_v46 = vsel %vm4937_vm15, 1.0, %v10562_v31  ;;  %vm5134_vm15 = vcmp.eq.s32.totalorder %v9842_v10, 61 }
 0x487   : > { %v10165_v25 = vpop.xlane.xlu1 %5054  ;;  %v10167_v29 = vpop.xlane.xlu0 %5051 }
 0x488   : > { %v4839_v56 = vadd.f32 %v4837_v57, %v4826_v12  ;;  %v4838_v5 = vadd.f32 %v4836_v54, %v4825_v18  ;;  %v4928_v57 = vmul.f32 %v6448_v59, %v10605_v14  ;;  %v10606_v54 = vld [vmem:[#allocation37_spill] sm:$0xff]  ;;  %v6455_v14 = vsel %vm5017_vm12, 1.0, %v10562_v31 }
 0x489   : > { %v4927_v12 = vmul.f32 %v6448_v59, %v10606_v54  ;;  %v10615_v59 = vld [vmem:[#allocation47_spill] sm:$0xff]  ;;  %vm5214_vm12 = vcmp.eq.s32.totalorder %v9842_v10, 67 }
 0x48a   : > { %v4852_v7 = vadd.f32 %v4850_v35, %v4839_v56  ;;  %v4851_v3 = vadd.f32 %v4849_v43, %v4838_v5  ;;  %v6450_v35 = vsel %vm4950_vm13, 1.0, %v10562_v31  ;;  %v4941_v43 = vmul.f32 %v6449_v46, %v10607_v17  ;;  %v10608_v56 = vld [vmem:[#allocation39_spill] sm:$0xff] }
 0x48b   : > { %v10177_v28 = vpop.xlane.xlu1 %5067  ;;  %v10179_v51 = vpop.xlane.xlu0 %5064  ;;  %v4940_v5 = vmul.f32 %v6449_v46, %v10608_v56  ;;  %v6456_v17 = vsel %vm5030_vm1, 1.0, %v10562_v31  ;;  %v5021_v56 = vmul.f32 %v6455_v14, %v10129_v40  ;;  %vm5147_vm13 = vcmp.eq.s32.totalorder %v9842_v10, 62 }
 0x48c   : > { %v4865_v27 = vadd.f32 %v4863_v52, %v4852_v7  ;;  %v4864_v1 = vadd.f32 %v4862_v49, %v4851_v3  ;;  %v6451_v52 = vsel %vm4965_vm3, 1.0, %v10562_v31  ;;  %v10609_v3 = vld [vmem:[#allocation40_spill] sm:$0xff]  ;;  %vm5160_vm3 = vcmp.eq.s32.totalorder %v9842_v10, 63 }
 0x48d   : > { %v4954_v22 = vmul.f32 %v6450_v35, %v10609_v3  ;;  %vm5227_vm1 = vcmp.eq.s32.totalorder %v9842_v10, 68 }
 0x48e   : > { %v4878_v8 = vadd.f32 %v4876_v19, %v4865_v27  ;;  %v4877_v42 = vadd.f32 %v4875_v47, %v4864_v1  ;;  %v4953_v19 = vmul.f32 %v6450_v35, %v10610_v58  ;;  %v6453_v27 = vsel %vm4991_vm11, 1.0, %v10562_v31  ;;  %v10611_v1 = vld [vmem:[#allocation42_spill] sm:$0xff] }
 0x48f   : > { %v10189_v11 = vpop.xlane.xlu1 %5080  ;;  %v10191_v16 = vpop.xlane.xlu0 %5077  ;;  %v4969_v15 = vmul.f32 %v6451_v52, %v10611_v1  ;;  %v4994_v32 = vmul.f32 %v6453_v27, %v10615_v59  ;;  %v5034_v58 = vmul.f32 %v6456_v17, %v10141_v34  ;;  %v6459_v1 = vsel %vm5069_vm7, 1.0, %v10562_v31 }
 0x490   : > { %v4891_v26 = vadd.f32 %v4889_v23, %v4878_v8  ;;  %v4890_v6 = vadd.f32 %v4888_v39, %v4877_v42  ;;  %v4968_v23 = vmul.f32 %v6451_v52, %v10612_v41  ;;  %v10613_v8 = vld [vmem:[#allocation45_spill] sm:$0xff]  ;;  %v6462_v59 = vsel %vm5108_vm14, 1.0, %v10562_v31 }
 0x491   : > { %v4981_v42 = vmul.f32 %v6452_v55, %v10613_v8  ;;  %vm5188_vm11 = vcmp.eq.s32.totalorder %v9842_v10, 65  ;;  %vm5266_vm7 = vcmp.eq.s32.totalorder %v9842_v10, 71  ;;  %vm5739_vm14 = vcmask 130048  }
 0x492   : > { %v4904_v63 = vadd.f32 %v4902_v30, %v4891_v26  ;;  %v4903_v50 = vadd.f32 %v4901_v13, %v4890_v6  ;;  %v4982_v13 = vmul.f32 %v6452_v55, %v10614_v21 }
 0x493   : > { %v10202_v62 = vpop.xlane.xlu1 %5093  ;;  %v10204_v38 = vpop.xlane.xlu0 %5090 }
 0x494   : > { %v4917_v18 = vadd.f32 %v4915_v9, %v4904_v63  ;;  %v4916_v44 = vadd.f32 %v4914_v0, %v4903_v50  ;;  %v10616_v9 = vld [vmem:[#allocation46_spill] sm:$0xff]  ;;  %v10617_v50 = vld [vmem:[#allocation49_spill] sm:$0xff] }
 0x495   : > { %v4995_v48 = vmul.f32 %v6453_v27, %v10616_v9  ;;  %v5007_v46 = vmul.f32 %v6454_v53, %v10617_v50 }
 0x496   : > { %v4930_v45 = vadd.f32 %v4928_v57, %v4917_v18  ;;  %v4929_v24 = vadd.f32 %v4927_v12, %v4916_v44  ;;  %v10618_v12 = vld [vmem:[#allocation48_spill] sm:$0xff] }
 0x497   : > { %v10215_v49 = vpop.xlane.xlu1 %5106  ;;  %v10217_v7 = vpop.xlane.xlu0 %5103  ;;  %v5008_v18 = vmul.f32 %v6454_v53, %v10618_v12  ;;  %v6461_v53 = vsel %vm5095_vm5, 1.0, %v10562_v31  ;;  %vm5273_vm5 = vcmask 588800  }
 0x498   : > { %v4943_v36 = vadd.f32 %v4941_v43, %v4930_v45  ;;  %v4942_v47 = vadd.f32 %v4940_v5, %v4929_v24  ;;  %v5020_v45 = vmul.f32 %v6455_v14, %v10131_v61  ;;  %v6457_v24 = vsel %vm5043_vm9, 1.0, %v10562_v31 }
 0x499   : > { %v5046_v27 = vmul.f32 %v6457_v24, %v10155_v60  ;;  %v5073_v60 = vmul.f32 %v6459_v1, %v10177_v28  ;;  %v5098_v9 = vmul.f32 %v6461_v53, %v10204_v38  ;;  %v6464_v14 = vsel %vm5134_vm15, 1.0, %v10562_v31 }
 0x49a   : > { %v4956_v33 = vadd.f32 %v4954_v22, %v4943_v36  ;;  %v4955_v39 = vadd.f32 %v4953_v19, %v4942_v47  ;;  %v5033_v19 = vmul.f32 %v6456_v17, %v10143_v2  ;;  %v6458_v36 = vsel %vm5056_vm6, 1.0, %v10562_v31 }
 0x49b   : > { %v10226_v37 = vpop.xlane.xlu1 %5119  ;;  %v10228_v30 = vpop.xlane.xlu0 %5116  ;;  %v5047_v47 = vmul.f32 %v6457_v24, %v10153_v4  ;;  %v5060_v2 = vmul.f32 %v6458_v36, %v10165_v25  ;;  %vm5240_vm9 = vcmp.eq.s32.totalorder %v9842_v10, 69  ;;  %vm5253_vm6 = vcmp.eq.s32.totalorder %v9842_v10, 70 }
 0x49c   : > { %v4971_v26 = vadd.f32 %v4969_v15, %v4956_v33  ;;  %v4970_v6 = vadd.f32 %v4968_v23, %v4955_v39  ;;  %v5059_v33 = vmul.f32 %v6458_v36, %v10167_v29  ;;  %v6460_v39 = vsel %vm5082_vm8, 1.0, %v10562_v31 }
 0x49d   : > { %v5086_v29 = vmul.f32 %v6460_v39, %v10189_v11  ;;  %vm5275_vm8 = vcmask 584704   ;;  %vm10620_vm15 = vcmask 818176  }
 0x49e   : > { %v4984_v0 = vadd.f32 %v4982_v13, %v4971_v26  ;;  %v4983_v63 = vadd.f32 %v4981_v42, %v4970_v6  ;;  %v5072_v42 = vmul.f32 %v6459_v1, %v10179_v51  ;;  %v5085_v6 = vmul.f32 %v6460_v39, %v10191_v16 }
 0x49f   : > { %v10237_v57 = vpop.xlane.xlu1 %5132  ;;  %v10239_v54 = vpop.xlane.xlu0 %5129  ;;  %v5099_v51 = vmul.f32 %v6461_v53, %v10202_v62  ;;  %v5112_v16 = vmul.f32 %v6462_v59, %v10215_v49 }
 0x4a0   : > { %v4997_v44 = vadd.f32 %v4995_v48, %v4984_v0  ;;  %v4996_v35 = vadd.f32 %v4994_v32, %v4983_v63  ;;  %v6463_v48 = vsel %vm5121_vm10, 1.0, %v10562_v31  ;;  %vm10619_vm10 = vcmask 1043456  }
 0x4a1   : > { %v5125_v38 = vmul.f32 %v6463_v48, %v10226_v37 }
 0x4a2   : > { %v5010_v43 = vadd.f32 %v5008_v18, %v4997_v44  ;;  %v5009_v5 = vadd.f32 %v5007_v46, %v4996_v35  ;;  %v5111_v46 = vmul.f32 %v6462_v59, %v10217_v7  ;;  %v5124_v18 = vmul.f32 %v6463_v48, %v10228_v30 }
 0x4a3   : > { %v10249_v52 = vpop.xlane.xlu1 %5145  ;;  %v10251_v55 = vpop.xlane.xlu0 %5142  ;;  %v6465_v44 = vsel %vm5147_vm13, 1.0, %v10562_v31  ;;  %v5138_v7 = vmul.f32 %v6464_v14, %v10237_v57  ;;  %vm5945_vm13 = vcmask 1041408  }
 0x4a4   : > { %v5023_v3 = vadd.f32 %v5021_v56, %v5010_v43  ;;  %v5022_v22 = vadd.f32 %v5020_v45, %v5009_v5  ;;  %v5137_v56 = vmul.f32 %v6464_v14, %v10239_v54  ;;  %v6466_v5 = vsel %vm5160_vm3, 1.0, %v10562_v31 }
 0x4a5   : > { %v5151_v30 = vmul.f32 %v6465_v44, %v10249_v52  ;;  %v5150_v24 = vmul.f32 %v6465_v44, %v10251_v55  ;;  %v6469_v55 = vsel %vm5201_vm2, 1.0, %v10562_v31 }
 0x4a6   : > { %v5036_v40 = vadd.f32 %v5034_v58, %v5023_v3  ;;  %v5035_v61 = vadd.f32 %v5033_v19, %v5022_v22  ;;  %v6467_v3 = vsel %vm5175_vm4, 1.0, %v10562_v31 }
 0x4a7   : > { %v5159_v15 = vpop.xlane.xlu1 %5158  ;;  %v5156_v41 = vpop.xlane.xlu0 %5155 }
 0x4a8   : > { %v5049_v23 = vadd.f32 %v5047_v47, %v5036_v40  ;;  %v5048_v34 = vadd.f32 %v5046_v27, %v5035_v61  ;;  %v5164_v36 = vmul.f32 %v6466_v5, %v5159_v15  ;;  %v5163_v54 = vmul.f32 %v6466_v5, %v5156_v41  ;;  %v5279_v5 = vld [vmem:[#allocation10 + $0x8] sm:$0xff] }
 0x4a9   : > { %v6468_v40 = vsel %vm5188_vm11, 1.0, %v10562_v31  ;;  %v6470_v15 = vsel %vm5214_vm12, 1.0, %v10562_v31 }
 0x4aa   : > { %v5062_v8 = vadd.f32 %v5060_v2, %v5049_v23  ;;  %v5061_v4 = vadd.f32 %v5059_v33, %v5048_v34 }
 0x4ab   : > { %v5174_v21 = vpop.xlane.xlu1 %5173  ;;  %v5171_v13 = vpop.xlane.xlu0 %5170 }
 0x4ac   : > { %v5075_v26 = vadd.f32 %v5073_v60, %v5062_v8  ;;  %v5074_v25 = vadd.f32 %v5072_v42, %v5061_v4  ;;  %v5179_v27 = vmul.f32 %v6467_v3, %v5174_v21  ;;  %v5178_v52 = vmul.f32 %v6467_v3, %v5171_v13 }
 0x4ad   : > { %v6471_v42 = vsel %vm5227_vm1, 1.0, %v10562_v31 }
 0x4ae   : > { %v5088_v32 = vadd.f32 %v5086_v29, %v5075_v26  ;;  %v5087_v28 = vadd.f32 %v5085_v6, %v5074_v25  ;;  %v6472_v6 = vsel %vm5240_vm9, 1.0, %v10562_v31 }
 0x4af   : > { %v5187_v0 = vpop.xlane.xlu1 %5186  ;;  %v5184_v63 = vpop.xlane.xlu0 %5183 }
 0x4b0   : > { %v5101_v50 = vadd.f32 %v5099_v51, %v5088_v32  ;;  %v5100_v11 = vadd.f32 %v5098_v9, %v5087_v28  ;;  %v5192_v33 = vmul.f32 %v6468_v40, %v5187_v0  ;;  %v5191_v39 = vmul.f32 %v6468_v40, %v5184_v63  ;;  %v5446_v40 = vld [vmem:[#allocation10 + $0x90] sm:$0xff] }
 0x4b1   : > { %v6473_v9 = vsel %vm5253_vm6, 1.0, %v10562_v31 }
 0x4b2   : > { %v5114_v12 = vadd.f32 %v5112_v16, %v5101_v50  ;;  %v5113_v62 = vadd.f32 %v5111_v46, %v5100_v11  ;;  %v6474_v46 = vsel %vm5266_vm7, 1.0, %v10562_v31 }
 0x4b3   : > { %v5200_v35 = vpop.xlane.xlu1 %5199  ;;  %v5197_v17 = vpop.xlane.xlu0 %5196 }
 0x4b4   : > { %v5127_v43 = vadd.f32 %v5125_v38, %v5114_v12  ;;  %v5126_v49 = vadd.f32 %v5124_v18, %v5113_v62  ;;  %v5205_v4 = vmul.f32 %v6469_v55, %v5200_v35  ;;  %v5204_v60 = vmul.f32 %v6469_v55, %v5197_v17  ;;  %v5449_v55 = vld [vmem:[#allocation10 + $0xa8] sm:$0xff] }
 0x4b6   : > { %v5140_v45 = vadd.f32 %v5138_v7, %v5127_v43  ;;  %v5139_v37 = vadd.f32 %v5137_v56, %v5126_v49  ;;  %v5278_v56 = vld [vmem:[#allocation10] sm:$0xff] }
 0x4b7   : > { %v5213_v22 = vpop.xlane.xlu1 %5212  ;;  %v5210_v58 = vpop.xlane.xlu0 %5209 }
 0x4b8   : > { %v5153_v19 = vadd.f32 %v5151_v30, %v5140_v45  ;;  %v5152_v57 = vadd.f32 %v5150_v24, %v5139_v37  ;;  %v5218_v25 = vmul.f32 %v6470_v15, %v5213_v22  ;;  %v5217_v29 = vmul.f32 %v6470_v15, %v5210_v58  ;;  %v5280_v37 = vld [vmem:[#allocation10 + $0x10] sm:$0xff]  ;;  %v5281_v30 = vld [vmem:[#allocation10 + $0x18] sm:$0xff]  ;;  %v5282_v22 = vld [vmem:[#allocation10 + $0x20] sm:$0xff] }
 0x4b9   : > { %v7442_v45 = vpack.c.bf16 %v5279_v5, %v5278_v56  ;;  %v7445_v3 = vpack.c.bf16 %v5281_v30, %v5280_v37  ;;  %v5283_v58 = vld [vmem:[#allocation10 + $0x28] sm:$0xff] }
 0x4ba   : > { %v5166_v61 = vadd.f32 %v5164_v36, %v5153_v19  ;;  %v5165_v47 = vadd.f32 %v5163_v54, %v5152_v57  ;;  %v7448_v19 = vpack.c.bf16 %v5283_v58, %v5282_v22  ;;  %v5284_v57 = vld [vmem:[#allocation10 + $0x30] sm:$0xff]  ;;  %v5285_v36 = vld [vmem:[#allocation10 + $0x38] sm:$0xff]  ;;  %v5453_v15 = vld [vmem:[#allocation10 + $0xc8] sm:$0xff] }
 0x4bb   : > { %v5226_v1 = vpop.xlane.xlu1 %5225  ;;  %v5223_v23 = vpop.xlane.xlu0 %5222  ;;  %v7451_v54 = vpack.c.bf16 %v5285_v36, %v5284_v57  ;;  %v6480_v22 = vld [vmem:[#allocation11] ss:$0 sm:$0xff] }
 0x4bc   : > { %v5181_v34 = vadd.f32 %v5179_v27, %v5166_v61  ;;  %v5180_v2 = vadd.f32 %v5178_v52, %v5165_v47  ;;  %v5231_v28 = vmul.f32 %v6471_v42, %v5226_v1  ;;  %v5230_v51 = vmul.f32 %v6471_v42, %v5223_v23  ;;  %v5447_v61 = vld [vmem:[#allocation10 + $0x98] sm:$0xff]  ;;  %v5286_v47 = vld [vmem:[#allocation10 + $0x40] sm:$0xff] }
 0x4bd   : > { %v7454_v27 = vpack.c.bf16 %v5447_v61, %v5446_v40  ;;  %v5448_v52 = vld [vmem:[#allocation10 + $0xa0] sm:$0xff]  ;;  %v5748_v40 = vld [vmem:[#allocation13 + $0x8] sm:$0xff] }
 0x4be   : > { %v5194_v41 = vadd.f32 %v5192_v33, %v5181_v34  ;;  %v5193_v8 = vadd.f32 %v5191_v39, %v5180_v2  ;;  %v7457_v23 = vpack.c.bf16 %v5449_v55, %v5448_v52  ;;  %v5450_v34 = vld [vmem:[#allocation10 + $0xb0] sm:$0xff]  ;;  %v5451_v2 = vld [vmem:[#allocation10 + $0xb8] sm:$0xff]  ;;  %v5452_v39 = vld [vmem:[#allocation10 + $0xc0] sm:$0xff] }
 0x4bf   : > { %v5239_v53 = vpop.xlane.xlu1 %5238  ;;  %v5236_v21 = vpop.xlane.xlu0 %5235  ;;  %v7460_v33 = vpack.c.bf16 %v5451_v2, %v5450_v34 }
 0x4c0   : > { %v5207_v13 = vadd.f32 %v5205_v4, %v5194_v41  ;;  %v5206_v26 = vadd.f32 %v5204_v60, %v5193_v8  ;;  %v5244_v11 = vmul.f32 %v6472_v6, %v5239_v53  ;;  %v5243_v16 = vmul.f32 %v6472_v6, %v5236_v21  ;;  %v5531_v8 = vld [vmem:[#allocation10 + $0xd8] sm:$0xff]  ;;  %v5532_v4 = vld [vmem:[#allocation10 + $0xe0] sm:$0xff]  ;;  %v5454_v60 = vld [vmem:[#allocation10 + $0xd0] sm:$0xff] }
 0x4c1   : > { %v7463_v41 = vpack.c.bf16 %v5453_v15, %v5452_v39  ;;  %v7466_v42 = vpack.c.bf16 %v5532_v4, %v5531_v8  ;;  %v5533_v53 = vld [vmem:[#allocation10 + $0xe8] sm:$0xff]  ;;  %v5534_v21 = vld [vmem:[#allocation10 + $0xf0] sm:$0xff] }
 0x4c2   : > { %v5220_v59 = vadd.f32 %v5218_v25, %v5207_v13  ;;  %v5219_v32 = vadd.f32 %v5217_v29, %v5206_v26  ;;  %v7469_v26 = vpack.c.bf16 %v5534_v21, %v5533_v53  ;;  %v5535_v25 = vld [vmem:[#allocation10 + $0xf8] sm:$0xff]  ;;  %v5536_v29 = vld [vmem:[#allocation10 + $0x100] sm:$0xff] }
 0x4c3   : > { %v5252_v48 = vpop.xlane.xlu1 %5251  ;;  %v5249_v0 = vpop.xlane.xlu0 %5248  ;;  %v7472_v6 = vpack.c.bf16 %v5536_v29, %v5535_v25  ;;  %v5831_v25 = vld [vmem:[%s10411_s7 + $0x8] sm:$0xff] }
 0x4c4   : > { %v5233_v63 = vadd.f32 %v5231_v28, %v5220_v59  ;;  %v5232_v50 = vadd.f32 %v5230_v51, %v5219_v32  ;;  %v5257_v62 = vmul.f32 %v6473_v9, %v5252_v48  ;;  %v5256_v38 = vmul.f32 %v6473_v9, %v5249_v0  ;;  %v5537_v59 = vld [vmem:[#allocation10 + $0x108] sm:$0xff]  ;;  %v5538_v32 = vld [vmem:[#allocation10 + $0x110] sm:$0xff]  ;;  %v5616_v51 = vld [vmem:[#allocation10 + $0x120] sm:$0xff] }
 0x4c5   : > { %v7475_v28 = vpack.c.bf16 %v5538_v32, %v5537_v59  ;;  %v5617_v9 = vld [vmem:[#allocation10 + $0x128] sm:$0xff]  ;;  %v5539_v48 = vld [vmem:[#allocation10 + $0x118] sm:$0xff] }
 0x4c6   : > { %v5246_v14 = vadd.f32 %v5244_v11, %v5233_v63  ;;  %v5245_v12 = vadd.f32 %v5243_v16, %v5232_v50  ;;  %v7478_v0 = vpack.c.bf16 %v5617_v9, %v5616_v51  ;;  %v5618_v63 = vld [vmem:[#allocation10 + $0x130] sm:$0xff]  ;;  %v5619_v50 = vld [vmem:[#allocation10 + $0x138] sm:$0xff]  ;;  %v5832_v32 = vld [vmem:[%s10411_s7 + $0x10] sm:$0xff] }
 0x4c7   : > { %v5265_v18 = vpop.xlane.xlu1 %5264  ;;  %v5262_v10 = vpop.xlane.xlu0 %5261  ;;  %v7481_v16 = vpack.c.bf16 %v5619_v50, %v5618_v63  ;;  %v5834_v9 = vld [vmem:[%s10411_s7 + $0x20] sm:$0xff]  ;;  %v5836_v63 = vld [vmem:[%s10411_s7 + $0x30] sm:$0xff]  ;;  %v5837_v50 = vld [vmem:[%s10411_s7 + $0x38] sm:$0xff] }
 0x4c8   : > { %v5259_v44 = vadd.f32 %v5257_v62, %v5246_v14  ;;  %v5258_v35 = vadd.f32 %v5256_v38, %v5245_v12  ;;  %v5270_v17 = vmul.f32 %v6474_v46, %v5265_v18  ;;  %v5269_v43 = vmul.f32 %v6474_v46, %v5262_v10  ;;  %v5620_v46 = vld [vmem:[#allocation10 + $0x140] sm:$0xff]  ;;  %v5621_v14 = vld [vmem:[#allocation10 + $0x148] sm:$0xff]  ;;  %v5622_v62 = vld [vmem:[#allocation10 + $0x150] sm:$0xff] }
 0x4c9   : > { %v7484_v12 = vpack.c.bf16 %v5621_v14, %v5620_v46  ;;  %v5623_v38 = vld [vmem:[#allocation10 + $0x158] sm:$0xff]  ;;  %v5624_v10 = vld [vmem:[#allocation10 + $0x160] sm:$0xff] }
 0x4ca   : > { %v5272_v49 = vadd.f32 %v5270_v17, %v5259_v44  ;;  %v5271_v7 = vadd.f32 %v5269_v43, %v5258_v35  ;;  %v7487_v18 = vpack.c.bf16 %v5623_v38, %v5622_v62  ;;  %v5839_v46 = vld [vmem:[%s10411_s7 + $0x48] sm:$0xff]  ;;  %v5841_v62 = vld [vmem:[%s10411_s7 + $0x58] sm:$0xff] }
 0x4cc   : > { %5276 = vst.msk [vmem:[#allocation4 + $0x8] sm:$0xf] %vm5275_vm8, %v5272_v49 }
 0x4cd   : > { %5274 = vst.msk [vmem:[#allocation4] sm:$0xff] %vm5273_vm5, %v5271_v7 }
 0x4d4   : > { %v5287_v24 = vld [vmem:[#allocation4 + $0x1] sm:$0xff] }
 0x4d5   : > { %6930 = vmatmul.mubr.msk.f32.vlgmr.msra.gmra.mrb[24].mxu1 %vm5273_vm5, %v5287_v24  ;;  %v5277_v1 = vld [vmem:[#allocation4] sm:$0xff] }
 0x4d6   : > { %7443 = vmatpush3.bf16.msra.mxu1 %v7442_v45  ;;  %6950 = vmatprep.mubr.msk.f32.mxu1 %vm8170_vm0, %v10562_v31  ;;  %v5444_v13 = vld [vmem:[#allocation4 + $0x2] sm:$0xff] }
 0x4d7   : > { %7444 = vmatprep.subr.bf16.mxu1 %v10593_v20  ;;  %v5529_v11 = vld [vmem:[#allocation4 + $0x3] sm:$0xff] }
 0x4d8   : > { %v5614_v44 = vld [vmem:[#allocation4 + $0x4] sm:$0xff] }
 0x4da   : > { %7446 = vmatpush3.bf16.msra.mxu1 %v7445_v3 }
 0x4db   : > { %7447 = vmatprep.subr.bf16.mxu1 %v10593_v20 }
 0x4de   : > { %7449 = vmatpush3.bf16.msra.mxu1 %v7448_v19 }
 0x4df   : > { %7450 = vmatprep.subr.bf16.mxu1 %v10593_v20 }
 0x4e2   : > { %7452 = vmatpush3.bf16.msra.mxu1 %v7451_v54  ;;  %v5747_v54 = vld [vmem:[#allocation13] sm:$0xff] }
 0x4e3   : > { %6948 = vmatprep.subr.mxu1 %v10562_v31  ;;  %v7490_v61 = vpack.c.bf16 %v5748_v40, %v5747_v54  ;;  %v6486_v40 = vld [vmem:[#allocation19] ss:$0 sm:$0xff] }
 0x4e6   : > { %6949 = vmatpush3.msra.mxu1 %v5286_v47 }
 0x4e7   : > { %6951 = vmatmul.mubr.msk.f32.vlgmr.msra.gmra.mrb[26].mxu1 %vm5273_vm5, %v5277_v1  ;;  %7453 = vmatprep.subr.bf16.mxu1 %v10593_v20 }
 0x4e8   : > { %7455 = vmatpush3.bf16.msra.mxu1 %v7454_v27  ;;  %6971 = vmatprep.mubr.msk.f32.mxu1 %vm8170_vm0, %v10562_v31 }
 0x4e9   : > { %7456 = vmatprep.subr.bf16.mxu1 %v10593_v20 }
 0x4ec   : > { %7458 = vmatpush3.bf16.msra.mxu1 %v7457_v23 }
 0x4ed   : > { %7459 = vmatprep.subr.bf16.mxu1 %v10593_v20 }
 0x4f0   : > { %7461 = vmatpush3.bf16.msra.mxu1 %v7460_v33 }
 0x4f1   : > { %7462 = vmatprep.subr.bf16.mxu1 %v10593_v20 }
 0x4f4   : > { %7464 = vmatpush3.bf16.msra.mxu1 %v7463_v41 }
 0x4f5   : > { %6969 = vmatprep.subr.mxu1 %v10562_v31 }
 0x4f8   : > { %6970 = vmatpush3.msra.mxu1 %v5454_v60 }
 0x4f9   : > { %6972 = vmatmul.mubr.msk.f32.vlgmr.msra.gmra.mrb[28].mxu1 %vm5273_vm5, %v5444_v13  ;;  %7465 = vmatprep.subr.bf16.mxu1 %v10593_v20 }
 0x4fa   : > { %7467 = vmatpush3.bf16.msra.mxu1 %v7466_v42  ;;  %6992 = vmatprep.mubr.msk.f32.mxu1 %vm8170_vm0, %v10562_v31 }
 0x4fb   : > { %7468 = vmatprep.subr.bf16.mxu1 %v10593_v20 }
 0x4fe   : > { %7470 = vmatpush3.bf16.msra.mxu1 %v7469_v26  ;;  %v5830_v26 = vld [vmem:[%s10411_s7] sm:$0xff] }
 0x4ff   : > { %7471 = vmatprep.subr.bf16.mxu1 %v10593_v20 }
 0x502   : > { %7473 = vmatpush3.bf16.msra.mxu1 %v7472_v6  ;;  %v7493_v6 = vpack.c.bf16 %v5831_v25, %v5830_v26 }
 0x503   : > { %7474 = vmatprep.subr.bf16.mxu1 %v10593_v20 }
 0x506   : > { %7476 = vmatpush3.bf16.msra.mxu1 %v7475_v28  ;;  %v5833_v28 = vld [vmem:[%s10411_s7 + $0x18] sm:$0xff] }
 0x507   : > { %6990 = vmatprep.subr.mxu1 %v10562_v31  ;;  %v7496_v51 = vpack.c.bf16 %v5833_v28, %v5832_v32 }
 0x50a   : > { %6991 = vmatpush3.msra.mxu1 %v5539_v48  ;;  %v5835_v48 = vld [vmem:[%s10411_s7 + $0x28] sm:$0xff] }
 0x50b   : > { %6993 = vmatmul.mubr.msk.f32.vlgmr.msra.gmra.mrb[30].mxu1 %vm5273_vm5, %v5529_v11  ;;  %7477 = vmatprep.subr.bf16.mxu1 %v10593_v20  ;;  %v7502_v11 = vpack.c.bf16 %v5837_v50, %v5836_v63 }
 0x50c   : > { %7479 = vmatpush3.bf16.msra.mxu1 %v7478_v0  ;;  %7013 = vmatprep.mubr.msk.f32.mxu1 %vm8170_vm0, %v10562_v31  ;;  %v7499_v0 = vpack.c.bf16 %v5835_v48, %v5834_v9 }
 0x50d   : > { %7480 = vmatprep.subr.bf16.mxu1 %v10593_v20 }
 0x510   : > { %7482 = vmatpush3.bf16.msra.mxu1 %v7481_v16  ;;  %v5838_v16 = vld [vmem:[%s10411_s7 + $0x40] sm:$0xff] }
 0x511   : > { %7483 = vmatprep.subr.bf16.mxu1 %v10593_v20  ;;  %v7505_v14 = vpack.c.bf16 %v5839_v46, %v5838_v16 }
 0x514   : > { %7485 = vmatpush3.bf16.msra.mxu1 %v7484_v12  ;;  %v5840_v12 = vld [vmem:[%s10411_s7 + $0x50] sm:$0xff] }
 0x515   : > { %7486 = vmatprep.subr.bf16.mxu1 %v10593_v20  ;;  %v7508_v38 = vpack.c.bf16 %v5841_v62, %v5840_v12 }
 0x518   : > { %7488 = vmatpush3.bf16.msra.mxu1 %v7487_v18  ;;  %v5842_v18 = vld [vmem:[%s10411_s7 + $0x60] sm:$0xf] }
 0x519   : > { %7011 = vmatprep.subr.mxu1 %v10562_v31 }
 0x51c   : > { %7012 = vmatpush3.msra.mxu1 %v5624_v10  ;;  %v6481_v10 = vld [vmem:[#allocation14] ss:$0 sm:$0xff] }
 0x51d   : > { %7014 = vmatmul.mubr.msk.f32.vlgmr.msra.gmra.mrb[32].mxu1 %vm5273_vm5, %v5614_v44  ;;  %7489 = vmatprep.subr.bf16.mxu1 %v10593_v20  ;;  %v5927_v44 = vld [vmem:[#allocation17] sm:$0xff] }
 0x51e   : > { %7020 = vmatprep.mubr.msk.f32.mxu1 %vm8170_vm0, %v10562_v31  ;;  %7491 = vmatpush3.bf16.msra.mxu1 %v7490_v61 }
 0x51f   : > { %7492 = vmatprep.subr.bf16.mxu1 %v10593_v20 }
 0x5a8   : > { %v5367_v35 = vpop.f32.mrb[24].mxu1 }
 0x5a9   : > { %v6931_v17 = vpop.f32.mrb[25].mxu1 }
 0x5ba   : > { %v5440_v43 = vpop.f32.mrb[26].mxu1 }
 0x5bb   : > { %v5441_v49 = vadd.f32 %v5440_v43, %v5367_v35  ;;  %v6952_v7 = vpop.f32.mrb[27].mxu1  ;;  %v5928_v35 = vld [vmem:[#allocation17 + $0x8] sm:$0xff] }
 0x5bc   : > { %v7511_v7 = vpack.c.bf16 %v5928_v35, %v5927_v44 }
 0x5cc   : > { %v5524_v56 = vpop.f32.mrb[28].mxu1 }
 0x5cd   : > { %v5528_v5 = vadd.f32 %v5524_v56, %v5441_v49  ;;  %v6973_v45 = vpop.f32.mrb[29].mxu1 }
 0x5ce   : > { %v5930_v45 = vld [vmem:[#allocation17 + $0x18] sm:$0xff] }
 0x5de   : > { %v5609_v37 = vpop.f32.mrb[30].mxu1 }
 0x5df   : > { %v5613_v30 = vadd.f32 %v5609_v37, %v5528_v5  ;;  %v6994_v24 = vpop.f32.mrb[31].mxu1  ;;  %v5929_v5 = vld [vmem:[#allocation17 + $0x10] sm:$0xff] }
 0x5e0   : > { %v7514_v37 = vpack.c.bf16 %v5930_v45, %v5929_v5  ;;  %v5932_v24 = vld [vmem:[#allocation17 + $0x28] sm:$0xff] }
 0x5f0   : > { %v5694_v3 = vpop.f32.mrb[32].mxu1 }
 0x5f1   : > { %v5698_v58 = vadd.f32 %v5694_v3, %v5613_v30  ;;  %v7015_v19 = vpop.f32.mrb[33].mxu1  ;;  %v5931_v30 = vld [vmem:[#allocation17 + $0x20] sm:$0xff] }
 0x5f2   : > { %v7517_v3 = vpack.c.bf16 %v5932_v24, %v5931_v30 }
 0x5f3   : > { %v5706_v57 = vadd.f32 %v6480_v22, %v5698_v58  ;;  %v5933_v22 = vld [vmem:[#allocation17 + $0x30] sm:$0x3]  ;;  %v6483_v58 = vld [vmem:[#allocation16] ss:$0 sm:$0xff] }
 0x5f5   : > { %v5707_v36 = vmax.f32 %v5706_v57, 0.0 }
 0x5f7   : > { %5715 = vrot.lane.b32.xlu1 %v5707_v36, %s8171_s24  ;;  %5711 = vrot.lane.b32.xlu0 %v5707_v36, %s8172_s30 }
 0x5fb   : > { %5719 = vrot.lane.b32.xlu1 %v5707_v36, %s8173_s14  ;;  %5727 = vrot.lane.b32.xlu0 %v5707_v36, %s8174_s22  ;;  %s505_s14 = scalar_lea.vmem %s10415_s11, %s6185_s18 }
 0x5ff   : > { %5723 = vrot.lane.b32.xlu1 %v5707_v36, %s8175_s28  ;;  %5735 = vrot.lane.b32.xlu0 %v5707_v36, %s8176_s27 }
 0x603   : > { %5731 = vrot.lane.b32.xlu1 %v5707_v36, %s8177_s29 }
 0x669   : > { %v5716_v47 = vpop.permute.xlu1 %5715  ;;  %v5712_v27 = vpop.permute.xlu0 %5711 }
 0x66a   : > { %v5714_v52 = vmax.f32 %v5707_v36, %v5712_v27 }
 0x66c   : > { %v5718_v55 = vmax.f32 %v5714_v52, %v5716_v47 }
 0x66d   : > { %v5720_v1 = vpop.permute.xlu1 %5719  ;;  %v5728_v34 = vpop.permute.xlu0 %5727 }
 0x66e   : > { %v5722_v23 = vmax.f32 %v5718_v55, %v5720_v1 }
 0x671   : > { %v5724_v2 = vpop.permute.xlu1 %5723  ;;  %v5736_v8 = vpop.permute.xlu0 %5735 }
 0x672   : > { %v5726_v33 = vmax.f32 %v5722_v23, %v5724_v2 }
 0x674   : > { %v5730_v39 = vmax.f32 %v5726_v33, %v5728_v34 }
 0x675   : > { %v5732_v15 = vpop.permute.xlu1 %5731 }
 0x676   : > { %v5734_v41 = vmax.f32 %v5730_v39, %v5732_v15 }
 0x678   : > { %v5738_v4 = vmax.f32 %v5734_v41, %v5736_v8 }
 0x67a   : > { %v5740_v60 = vsel %vm5739_vm14, %v5738_v4, -inf }
 0x67b   : > { %v5741_v42 = vrot.slane %v5740_v60, 4 }
 0x67d   : > { %v5742_v53 = vmax.f32 %v5740_v60, %v5741_v42 }
 0x67f   : > { %v5743_v21 = vrot.slane %v5742_v53, 2 }
 0x681   : > { %v5744_v13 = vmax.f32 %v5742_v53, %v5743_v21 }
 0x683   : > { %v5745_v29 = vrot.slane %v5744_v13, 1 }
 0x685   : > { %v5746_v59 = vmax.f32 %v5744_v13, %v5745_v29 }
 0x687   : > { %7021 = vmatmul.mubr.msk.f32.vlgmr.msra.gmra.mrb[34].mxu1 %vm5739_vm14, %v5746_v59 }
 0x688   : > { %7494 = vmatpush3.bf16.msra.mxu1 %v7493_v6  ;;  %7049 = vmatprep.mubr.msk.f32.mxu1 %vm8170_vm0, %v10562_v31 }
 0x689   : > { %7495 = vmatprep.subr.bf16.mxu1 %v10593_v20 }
 0x68c   : > { %7497 = vmatpush3.bf16.msra.mxu1 %v7496_v51 }
 0x68d   : > { %7498 = vmatprep.subr.bf16.mxu1 %v10593_v20 }
 0x690   : > { %7500 = vmatpush3.bf16.msra.mxu1 %v7499_v0 }
 0x691   : > { %7501 = vmatprep.subr.bf16.mxu1 %v10593_v20 }
 0x694   : > { %7503 = vmatpush3.bf16.msra.mxu1 %v7502_v11 }
 0x695   : > { %7504 = vmatprep.subr.bf16.mxu1 %v10593_v20 }
 0x698   : > { %7506 = vmatpush3.bf16.msra.mxu1 %v7505_v14 }
 0x699   : > { %7507 = vmatprep.subr.bf16.mxu1 %v10593_v20 }
 0x69c   : > { %7509 = vmatpush3.bf16.msra.mxu1 %v7508_v38 }
 0x69d   : > { %7047 = vmatprep.subr.mxu1 %v10562_v31 }
 0x6a0   : > { %7048 = vmatpush3.msk.msra.mxu1 %vm10619_vm10, %v5842_v18 }
 0x6a1   : > { %7510 = vmatprep.subr.bf16.mxu1 %v10593_v20 }
 0x75a   : > { %v5825_v17 = vpop.f32.mrb[34].mxu1 }
 0x75b   : > { %v5826_v43 = vadd.f32 %v6481_v10, %v5825_v17  ;;  %v7022_v49 = vpop.f32.mrb[35].mxu1 }
 0x75d   : > { %v5829_v56 = vmax.f32 %v5826_v43, 0.0 }
 0x75f   : > { %7050 = vmatmul.mubr.msk.f32.vlgmr.msra.gmra.mrb[36].mxu1 %vm10620_vm15, %v5829_v56 }
 0x760   : > { %7512 = vmatpush3.bf16.msra.mxu1 %v7511_v7  ;;  %7066 = vmatprep.mubr.msk.f32.mxu1 %vm8170_vm0, %v10562_v31  ;;  %vm5941_vm0 = vcmask 408576  }
 0x761   : > { %7513 = vmatprep.subr.bf16.mxu1 %v10593_v20 }
 0x764   : > { %7515 = vmatpush3.bf16.msra.mxu1 %v7514_v37 }
 0x765   : > { %7516 = vmatprep.subr.bf16.mxu1 %v10593_v20 }
 0x768   : > { %7518 = vmatpush3.bf16.msra.mxu1 %v7517_v3 }
 0x769   : > { %7064 = vmatprep.subr.mxu1 %v10562_v31 }
 0x76c   : > { %7065 = vmatpush3.msk.msra.mxu1 %vm5945_vm13, %v5933_v22 }
 0x832   : > { %v5922_v19 = vpop.f32.mrb[36].mxu1 }
 0x833   : > { %v5923_v57 = vadd.f32 %v6483_v58, %v5922_v19  ;;  %v7051_v36 = vpop.f32.mrb[37].mxu1 }
 0x835   : > { %v5926_v54 = vmax.f32 %v5923_v57, 0.0 }
 0x837   : > { %7067 = vmatmul.mubr.msk.f32.vlgmr.msra.gmra.mrb[38].mxu1 %vm5941_vm0, %v5926_v54 }
 0x90a   : > { %v6015_v20 = vpop.f32.mrb[38].mxu1 }
 0x90b   : > { %v6016_v61 = vadd.f32 %v6486_v40, %v6015_v20  ;;  %v7068_v47 = vpop.f32.mrb[39].mxu1 }
 0x90d   : > { %6019 = vst [vmem:[%s505_s14] sm:$0xff] %v6016_v61 }
 0x90e PF: > { %s26_s17 = sadd.s32 1, %s8153_s17  }
 0x90f   : > { %p23_p11 = scmp.ge.s32.totalorder %s26_s17, 4  }
 0x911   :  { %25 = sbr.rel (!%p23_p11) target bundleno = 5 (0x5), region = 139 }
 0x918   :  { %6039 = vsyncpa [#allocation7], 1 }
 0x919   :  { %6041 = vsyncpa [#allocation7 + $0x1], 1 }
 0x91a   :  { %6042 = vsyncpa [#allocation9], 1 }
 0x91b   :  { %6043 = vsyncpa [#allocation12], 1 }
 0x91c   :  { %6044 = vsyncpa [#allocation15], 1 }
 0x91d   :  { %6045 = vsyncpa [#allocation18], 1 }

</bundles_post_ra>
